<compile_context>
chip_gen: v7x
topology: tpu7x:2x2x1
jax: 0.10.0
libtpu: 0.0.40
codegen_flags: <defaults>
</compile_context>

<pallas_src>
import functools

import jax
import jax.numpy as jnp
from jax.experimental import pallas as pl
from jax.experimental.pallas import tpu as pltpu

BN_EPS = 1e-5
_KB = 1536      # block width along the padded 3000-axis (3072 / 1536 -> 2 grid steps)
_LANE = 128


def _rup(n, m):
    return ((n + m - 1) // m) * m


def _bn_relu(z, g, be):
    # BatchNorm1d, training mode: biased batch stats, eps=1e-5, folded into one FMA.
    mu = jnp.mean(z, axis=0, keepdims=True)
    var = jnp.mean((z - mu) * (z - mu), axis=0, keepdims=True)
    scale = g * jax.lax.rsqrt(var + BN_EPS)
    shift = be - mu * scale
    return jnp.maximum(z * scale + shift, 0.0)


def _netiic_kernel(
    x_ref,
    w00_ref, b00_ref, g00_ref, be00_ref,
    w0_ref,  b0_ref,  g0_ref,  be0_ref,
    w05_ref, b05_ref, g05_ref, be05_ref,
    w1_ref,  b1_ref,  g1_ref,  be1_ref,
    wh_ref,  bh_ref,
    out_ref,
    acc_ref,
    *, oc_class_num,
):
    k = pl.program_id(0)

    @pl.when(k == 0)
    def _():
        acc_ref[...] = jnp.zeros_like(acc_ref)

    # ---- layer 1 on this 1536-wide column block of the padded 3000 axis ------------
    # (BN stats are per-feature over the batch, so blocking the feature axis is exact;
    #  padded columns have zero weight/bias/beta -> contribute exactly zero.)
    xb = x_ref[...].astype(jnp.bfloat16)
    z1 = jnp.dot(xb, w00_ref[...], preferred_element_type=jnp.float32) + b00_ref[...]
    h1 = _bn_relu(z1, g00_ref[...], be00_ref[...])                       # (B, _KB) f32

    # ---- layer 2: stream w0 row-blocks, accumulate pre-BN activations in VMEM ------
    acc_ref[...] += jnp.dot(h1.astype(jnp.bfloat16), w0_ref[...],
                            preferred_element_type=jnp.float32)

    # ---- last block: finish layer 2, run layers 3/4 and the fused softmax heads ----
    @pl.when(k == pl.num_programs(0) - 1)
    def _():
        h2 = _bn_relu(acc_ref[...] + b0_ref[...], g0_ref[...], be0_ref[...])   # (B,1024)
        z3 = jnp.dot(h2.astype(jnp.bfloat16), w05_ref[...],
                     preferred_element_type=jnp.float32) + b05_ref[...]
        h3 = _bn_relu(z3, g05_ref[...], be05_ref[...])                          # (B,512)
        z4 = jnp.dot(h3.astype(jnp.bfloat16), w1_ref[...],
                     preferred_element_type=jnp.float32) + b1_ref[...]
        hp = _bn_relu(z4, g1_ref[...], be1_ref[...])                            # (B,prefp)

        # fused heads: one (prefp, 128) matmul for [dense3 | dense3_oc | dense3_cl | pad]
        logits = jnp.dot(hp.astype(jnp.bfloat16), wh_ref[...],
                         preferred_element_type=jnp.float32) + bh_ref[...]      # (B,128)

        # segmented softmax over the lane-dense logits slab:
        #   cols [0,2) -> y, [2,2+oc) -> y_oc, [2+oc,4+oc) -> y_cl, rest = padding (zeros)
        oc = oc_class_num
        col = jax.lax.broadcasted_iota(jnp.int32, logits.shape, 1)
        m0 = col < 2
        m1 = (col >= 2) & (col < 2 + oc)
        m2 = (col >= 2 + oc) & (col < 4 + oc)
        valid = col < 4 + oc
        neg = jnp.float32(-1e30)

        def seg_max(m):
            return jnp.max(jnp.where(m, logits, neg), axis=1, keepdims=True)

        mx = jnp.where(m0, seg_max(m0), jnp.where(m1, seg_max(m1), seg_max(m2)))
        e = jnp.where(valid, jnp.exp(logits - mx), 0.0)

        def seg_sum(m):
            return jnp.sum(jnp.where(m, e, 0.0), axis=1, keepdims=True)

        den = jnp.where(m0, seg_sum(m0), jnp.where(m1, seg_sum(m1), seg_sum(m2)))
        out_ref[...] = e / den      # one unmasked, lane-dense (B,128) store


def prepare_params(params):
    """One-time device-side prep: zero-pad every feature axis to a lane-friendly size,
    cast weights to bf16, fuse the three head weight/bias matrices into one slab.

    NOTE: padding uses ZEROS for weight/bias/gamma/beta so padded features stay exactly 0
    through Linear -> BN(batch stats) -> ReLU and contribute exactly nothing downstream.
    """
    n1 = params["w00"].shape[1]      # 3000
    n2 = params["w0"].shape[1]       # 1000
    n3 = params["w05"].shape[1]      # 500
    pref = params["w1"].shape[1]
    oc = params["w3_oc"].shape[1]

    n1p = _rup(n1, _KB)              # 3072
    n2p = _rup(n2, _LANE)            # 1024
    n3p = _rup(n3, _LANE)            # 512
    prefp = _rup(pref, _LANE)
    hpad = _rup(4 + oc, _LANE)       # fused-head / output-slab width

    def pad2(a, rows, cols):
        return jnp.pad(a, ((0, rows - a.shape[0]), (0, cols - a.shape[1])))

    wh = jnp.concatenate([params["w3"], params["w3_oc"], params["w3_cl"]], axis=1)
    bh = jnp.concatenate([params["b3"], params["b3_oc"], params["b3_cl"]], axis=1)

    return {
        "w00": pad2(params["w00"], params["w00"].shape[0], n1p).astype(jnp.bfloat16),
        "b00": pad2(params["b00"], 1, n1p),
        "g00": pad2(params["g00"], 1, n1p),
        "be00": pad2(params["be00"], 1, n1p),
        "w0": pad2(params["w0"], n1p, n2p).astype(jnp.bfloat16),
        "b0": pad2(params["b0"], 1, n2p),
        "g0": pad2(params["g0"], 1, n2p),
        "be0": pad2(params["be0"], 1, n2p),
        "w05": pad2(params["w05"], n2p, n3p).astype(jnp.bfloat16),
        "b05": pad2(params["b05"], 1, n3p),
        "g05": pad2(params["g05"], 1, n3p),
        "be05": pad2(params["be05"], 1, n3p),
        "w1": pad2(params["w1"], n3p, prefp).astype(jnp.bfloat16),
        "b1": pad2(params["b1"], 1, prefp),
        "g1": pad2(params["g1"], 1, prefp),
        "be1": pad2(params["be1"], 1, prefp),
        "wh": pad2(wh, prefp, hpad).astype(jnp.bfloat16),
        "bh": pad2(bh, 1, hpad),
        "oc": oc,
    }


def netiic_forward(x, dev):
    """x: (B, input_num) f32.  dev: output of prepare_params().  Returns (y, y_oc, y_rev, y_cl)."""
    B, input_num = x.shape
    n1p = dev["w00"].shape[1]
    n2p = dev["w0"].shape[1]
    n3p = dev["w05"].shape[1]
    prefp = dev["w1"].shape[1]
    hpad = dev["wh"].shape[1]
    oc = dev["oc"]
    assert n1p % _KB == 0
    nk = n1p // _KB

    args = (
        x,
        dev["w00"], dev["b00"], dev["g00"], dev["be00"],
        dev["w0"],  dev["b0"],  dev["g0"],  dev["be0"],
        dev["w05"], dev["b05"], dev["g05"], dev["be05"],
        dev["w1"],  dev["b1"],  dev["g1"],  dev["be1"],
        dev["wh"],  dev["bh"],
    )

    def cst(shape):  # operand resident across the whole grid (fetched once)
        return pl.BlockSpec(shape, lambda k, _s=len(shape): (0,) * _s)

    in_specs = [
        cst((B, input_num)),                               # x
        pl.BlockSpec((input_num, _KB), lambda k: (0, k)),  # w00 column block (streamed)
        pl.BlockSpec((1, _KB), lambda k: (0, k)),          # b00
        pl.BlockSpec((1, _KB), lambda k: (0, k)),          # g00
        pl.BlockSpec((1, _KB), lambda k: (0, k)),          # be00
        pl.BlockSpec((_KB, n2p), lambda k: (k, 0)),        # w0 row block (streamed)
        cst((1, n2p)), cst((1, n2p)), cst((1, n2p)),       # b0, g0, be0
        cst((n2p, n3p)), cst((1, n3p)), cst((1, n3p)), cst((1, n3p)),
        cst((n3p, prefp)), cst((1, prefp)), cst((1, prefp)), cst((1, prefp)),
        cst((prefp, hpad)), cst((1, hpad)),
    ]
    out_specs = cst((B, hpad))
    out_shape = jax.ShapeDtypeStruct((B, hpad), jnp.float32)

    fn = pl.pallas_call(
        functools.partial(_netiic_kernel, oc_class_num=oc),
        out_shape=out_shape,
        grid_spec=pltpu.PrefetchScalarGridSpec(
            num_scalar_prefetch=0,
            grid=(nk,),
            in_specs=in_specs,
            out_specs=out_specs,
            scratch_shapes=[pltpu.VMEM((B, n2p), jnp.float32)],
        ),
        compiler_params=pltpu.CompilerParams(
            dimension_semantics=("arbitrary",),   # streamed axis is a reduction
            vmem_limit_bytes=32 * 1024 * 1024,    # safe on v7x (64 MiB physical)
        ),
    )
    slab = fn(*args)                              # (B, 128) lane-dense output slab
    y = slab[:, 0:2]
    y_oc = slab[:, 2:2 + oc]
    y_cl = slab[:, 2 + oc:4 + oc]
    y_rev = 1.0 - y
    return y, y_oc, y_rev, y_cl


def init_params(key, input_num, prefinal_num, oc_class_num):
    """Deterministic synthetic parameters (PyTorch-shaped, pre-transposed to (in,out))."""
    dims = [
        ("00", input_num, 3000),
        ("0",  3000,      1000),
        ("05", 1000,      500),
        ("1",  500,       prefinal_num),
    ]
    heads = [
        ("3",    prefinal_num, 2),
        ("3_oc", prefinal_num, oc_class_num),
        ("3_cl", prefinal_num, 2),
    ]
    params = {}
    keys = jax.random.split(key, 2 * (len(dims) + len(heads)))
    ki = 0
    for name, fan_in, fan_out in dims:
        bound = 1.0 / jnp.sqrt(fan_in)
        params[f"w{name}"] = jax.random.uniform(keys[ki], (fan_in, fan_out),
                                                jnp.float32, -bound, bound); ki += 1
        params[f"b{name}"] = jax.random.uniform(keys[ki], (1, fan_out),
                                                jnp.float32, -bound, bound); ki += 1
        params[f"g{name}"] = jnp.ones((1, fan_out), jnp.float32)
        params[f"be{name}"] = jnp.zeros((1, fan_out), jnp.float32)
    for name, fan_in, fan_out in heads:
        bound = 1.0 / jnp.sqrt(fan_in)
        params[f"w{name}"] = jax.random.uniform(keys[ki], (fan_in, fan_out),
                                                jnp.float32, -bound, bound); ki += 1
        params[f"b{name}"] = jax.random.uniform(keys[ki], (1, fan_out),
                                                jnp.float32, -bound, bound); ki += 1
    return params


def _reference_forward(x, params):
    """Pure-JAX reference mirroring the kernel's bf16 matmul inputs / f32 accumulation."""
    bf = jnp.bfloat16

    def dbr(h, w, b, g, be):
        z = jnp.dot(h.astype(bf), w.astype(bf),
                    preferred_element_type=jnp.float32) + b
        mu = jnp.mean(z, axis=0, keepdims=True)
        var = jnp.mean((z - mu) ** 2, axis=0, keepdims=True)
        scale = g * jax.lax.rsqrt(var + BN_EPS)
        shift = be - mu * scale
        return jnp.maximum(z * scale + shift, 0.0)

    def head(h, w, b):
        logits = jnp.dot(h.astype(bf), w.astype(bf),
                         preferred_element_type=jnp.float32) + b
        return jax.nn.softmax(logits, axis=1)

    h = dbr(x, params["w00"], params["b00"], params["g00"], params["be00"])
    h = dbr(h, params["w0"], params["b0"], params["g0"], params["be0"])
    h = dbr(h, params["w05"], params["b05"], params["g05"], params["be05"])
    hp = dbr(h, params["w1"], params["b1"], params["g1"], params["be1"])
    y = head(hp, params["w3"], params["b3"])
    y_oc = head(hp, params["w3_oc"], params["b3_oc"])
    y_cl = head(hp, params["w3_cl"], params["b3_cl"])
    return y, y_oc, 1.0 - y, y_cl


if __name__ == "__main__":
    input_num = 64
    prefinal_num = 128
    oc_class_num = 8
    batch = 8  # BatchNorm1d in training mode needs batch > 1

    key = jax.random.PRNGKey(0)
    kx, kp = jax.random.split(key)
    x = jax.random.normal(kx, (batch, input_num), jnp.float32)
    params = init_params(kp, input_num, prefinal_num, oc_class_num)
    dev = prepare_params(params)  # one-time bf16 cast / padding / head fusion

    outs = netiic_forward(x, dev)
    outs = jax.block_until_ready(outs)

    refs = _reference_forward(x, params)
    for o, r in zip(outs, refs):
        assert o.shape == r.shape and o.dtype == r.dtype
        assert jnp.max(jnp.abs(o - r)) < 5e-3, "mismatch vs reference"

    print("KERNEL_OK")
</pallas_src>

<mosaic_0001>
module attributes {stable_mosaic.version = 11 : i64} {
  func.func @_netiic_kernel(%arg0: i32, %arg1: memref<8x64xf32, #tpu.memory_space<vmem>>, %arg2: memref<64x1536xbf16, #tpu.memory_space<vmem>>, %arg3: memref<1x1536xf32, #tpu.memory_space<vmem>>, %arg4: memref<1x1536xf32, #tpu.memory_space<vmem>>, %arg5: memref<1x1536xf32, #tpu.memory_space<vmem>>, %arg6: memref<1536x1024xbf16, #tpu.memory_space<vmem>>, %arg7: memref<1x1024xf32, #tpu.memory_space<vmem>>, %arg8: memref<1x1024xf32, #tpu.memory_space<vmem>>, %arg9: memref<1x1024xf32, #tpu.memory_space<vmem>>, %arg10: memref<1024x512xbf16, #tpu.memory_space<vmem>>, %arg11: memref<1x512xf32, #tpu.memory_space<vmem>>, %arg12: memref<1x512xf32, #tpu.memory_space<vmem>>, %arg13: memref<1x512xf32, #tpu.memory_space<vmem>>, %arg14: memref<512x128xbf16, #tpu.memory_space<vmem>>, %arg15: memref<1x128xf32, #tpu.memory_space<vmem>>, %arg16: memref<1x128xf32, #tpu.memory_space<vmem>>, %arg17: memref<1x128xf32, #tpu.memory_space<vmem>>, %arg18: memref<128x128xbf16, #tpu.memory_space<vmem>>, %arg19: memref<1x128xf32, #tpu.memory_space<vmem>>, %arg20: memref<8x128xf32, #tpu.memory_space<vmem>>, %arg21: memref<8x1024xf32, #tpu.memory_space<vmem>>) attributes {dimension_semantics = [#tpu.dimension_semantics<arbitrary>], iteration_bounds = array<i64: 2>, scalar_prefetch = 0 : i64, scratch_operands = 1 : i64, tpu.core_type = #tpu.core_type<tc>, window_params = [{pipeline_mode = #tpu.pipeline_mode<synchronous>, transform_indices = @transform_0, window_bounds = array<i64: 8, 64>}, {transform_indices = @transform_1, window_bounds = array<i64: 64, 1536>}, {transform_indices = @transform_2, window_bounds = array<i64: 1, 1536>}, {transform_indices = @transform_3, window_bounds = array<i64: 1, 1536>}, {transform_indices = @transform_4, window_bounds = array<i64: 1, 1536>}, {transform_indices = @transform_5, window_bounds = array<i64: 1536, 1024>}, {pipeline_mode = #tpu.pipeline_mode<synchronous>, transform_indices = @transform_6, window_bounds = array<i64: 1, 1024>}, {pipeline_mode = #tpu.pipeline_mode<synchronous>, transform_indices = @transform_7, window_bounds = array<i64: 1, 1024>}, {pipeline_mode = #tpu.pipeline_mode<synchronous>, transform_indices = @transform_8, window_bounds = array<i64: 1, 1024>}, {pipeline_mode = #tpu.pipeline_mode<synchronous>, transform_indices = @transform_9, window_bounds = array<i64: 1024, 512>}, {pipeline_mode = #tpu.pipeline_mode<synchronous>, transform_indices = @transform_10, window_bounds = array<i64: 1, 512>}, {pipeline_mode = #tpu.pipeline_mode<synchronous>, transform_indices = @transform_11, window_bounds = array<i64: 1, 512>}, {pipeline_mode = #tpu.pipeline_mode<synchronous>, transform_indices = @transform_12, window_bounds = array<i64: 1, 512>}, {pipeline_mode = #tpu.pipeline_mode<synchronous>, transform_indices = @transform_13, window_bounds = array<i64: 512, 128>}, {pipeline_mode = #tpu.pipeline_mode<synchronous>, transform_indices = @transform_14, window_bounds = array<i64: 1, 128>}, {pipeline_mode = #tpu.pipeline_mode<synchronous>, transform_indices = @transform_15, window_bounds = array<i64: 1, 128>}, {pipeline_mode = #tpu.pipeline_mode<synchronous>, transform_indices = @transform_16, window_bounds = array<i64: 1, 128>}, {pipeline_mode = #tpu.pipeline_mode<synchronous>, transform_indices = @transform_17, window_bounds = array<i64: 128, 128>}, {pipeline_mode = #tpu.pipeline_mode<synchronous>, transform_indices = @transform_18, window_bounds = array<i64: 1, 128>}, {pipeline_mode = #tpu.pipeline_mode<synchronous>, transform_indices = @transform_19, window_bounds = array<i64: 8, 128>}]} {
    %c0_i32 = arith.constant 0 : i32
    %0 = arith.cmpi eq, %arg0, %c0_i32 : i32
    %1 = arith.extui %0 : i1 to i32
    %c0_i32_0 = arith.constant 0 : i32
    %2 = arith.cmpi ne, %1, %c0_i32_0 : i32
    scf.if %2 {
      %cst_24 = arith.constant 0.000000e+00 : f32
      %46 = vector.broadcast %cst_24 : f32 to vector<8x1024xf32>
      %c0_25 = arith.constant 0 : index
      %c0_26 = arith.constant 0 : index
      %47 = vector.load %arg21[%c0_25, %c0_26] : memref<8x1024xf32, #tpu.memory_space<vmem>>, vector<8x1024xf32>
      tpu.vector_store %arg21[%c0_25, %c0_26], %46 {strides = array<i32>} : memref<8x1024xf32, #tpu.memory_space<vmem>>, vector<8x1024xf32>,
    } else {
    }
    %c0 = arith.constant 0 : index
    %c0_1 = arith.constant 0 : index
    %3 = vector.load %arg1[%c0, %c0_1] : memref<8x64xf32, #tpu.memory_space<vmem>>, vector<8x64xf32>
    %4 = arith.truncf %3 : vector<8x64xf32> to vector<8x64xbf16>
    %c0_2 = arith.constant 0 : index
    %c0_3 = arith.constant 0 : index
    %5 = vector.load %arg2[%c0_2, %c0_3] : memref<64x1536xbf16, #tpu.memory_space<vmem>>, vector<64x1536xbf16>
    %cst = arith.constant dense<0.000000e+00> : vector<8x1536xf32>
    %6 = tpu.matmul %4, %5, %cst {dimension_numbers = #tpu.dot_dimension_numbers<[1], [0], [0], [1], [0, 0, 1, 1], [], []>} : vector<8x64xbf16>, vector<64x1536xbf16>, vector<8x1536xf32> -> vector<8x1536xf32>
    %c0_4 = arith.constant 0 : index
    %c0_5 = arith.constant 0 : index
    %7 = vector.load %arg3[%c0_4, %c0_5] : memref<1x1536xf32, #tpu.memory_space<vmem>>, vector<1x1536xf32>
    %8 = vector.broadcast %7 : vector<1x1536xf32> to vector<8x1536xf32>
    %9 = arith.addf %6, %8 : vector<8x1536xf32>
    %c0_6 = arith.constant 0 : index
    %c0_7 = arith.constant 0 : index
    %10 = vector.load %arg4[%c0_6, %c0_7] : memref<1x1536xf32, #tpu.memory_space<vmem>>, vector<1x1536xf32>
    %c0_8 = arith.constant 0 : index
    %c0_9 = arith.constant 0 : index
    %11 = vector.load %arg5[%c0_8, %c0_9] : memref<1x1536xf32, #tpu.memory_space<vmem>>, vector<1x1536xf32>
    %cst_10 = arith.constant dense<0.000000e+00> : vector<1536xf32>
    %12 = vector.multi_reduction <add>, %9, %cst_10 [0] : vector<8x1536xf32> to vector<1536xf32>
    %13 = vector.shape_cast %12 : vector<1536xf32> to vector<1x1536xf32>
    %cst_11 = arith.constant 8.000000e+00 : f32
    %14 = vector.broadcast %cst_11 : f32 to vector<1x1536xf32>
    %15 = arith.divf %13, %14 : vector<1x1536xf32>
    %16 = vector.broadcast %15 : vector<1x1536xf32> to vector<8x1536xf32>
    %17 = arith.subf %9, %16 : vector<8x1536xf32>
    %18 = vector.broadcast %15 : vector<1x1536xf32> to vector<8x1536xf32>
    %19 = arith.subf %9, %18 : vector<8x1536xf32>
    %20 = arith.mulf %17, %19 : vector<8x1536xf32>
    %cst_12 = arith.constant dense<0.000000e+00> : vector<1536xf32>
    %21 = vector.multi_reduction <add>, %20, %cst_12 [0] : vector<8x1536xf32> to vector<1536xf32>
    %22 = vector.shape_cast %21 : vector<1536xf32> to vector<1x1536xf32>
    %cst_13 = arith.constant 8.000000e+00 : f32
    %23 = vector.broadcast %cst_13 : f32 to vector<1x1536xf32>
    %24 = arith.divf %22, %23 : vector<1x1536xf32>
    %cst_14 = arith.constant 9.99999974E-6 : f32
    %25 = vector.broadcast %cst_14 : f32 to vector<1x1536xf32>
    %26 = arith.addf %24, %25 : vector<1x1536xf32>
    %27 = math.rsqrt %26 : vector<1x1536xf32>
    %28 = arith.mulf %10, %27 : vector<1x1536xf32>
    %29 = arith.mulf %15, %28 : vector<1x1536xf32>
    %30 = arith.subf %11, %29 : vector<1x1536xf32>
    %31 = vector.broadcast %28 : vector<1x1536xf32> to vector<8x1536xf32>
    %32 = arith.mulf %9, %31 : vector<8x1536xf32>
    %33 = vector.broadcast %30 : vector<1x1536xf32> to vector<8x1536xf32>
    %34 = arith.addf %32, %33 : vector<8x1536xf32>
    %cst_15 = arith.constant 0.000000e+00 : f32
    %35 = vector.broadcast %cst_15 : f32 to vector<8x1536xf32>
    %36 = arith.maximumf %34, %35 : vector<8x1536xf32>
    %c0_16 = arith.constant 0 : index
    %c0_17 = arith.constant 0 : index
    %37 = vector.load %arg21[%c0_16, %c0_17] : memref<8x1024xf32, #tpu.memory_space<vmem>>, vector<8x1024xf32>
    %38 = arith.truncf %36 : vector<8x1536xf32> to vector<8x1536xbf16>
    %c0_18 = arith.constant 0 : index
    %c0_19 = arith.constant 0 : index
    %39 = vector.load %arg6[%c0_18, %c0_19] : memref<1536x1024xbf16, #tpu.memory_space<vmem>>, vector<1536x1024xbf16>
    %cst_20 = arith.constant dense<0.000000e+00> : vector<8x1024xf32>
    %40 = tpu.matmul %38, %39, %cst_20 {dimension_numbers = #tpu.dot_dimension_numbers<[1], [0], [0], [1], [0, 0, 1, 1], [], []>} : vector<8x1536xbf16>, vector<1536x1024xbf16>, vector<8x1024xf32> -> vector<8x1024xf32>
    %41 = arith.addf %37, %40 : vector<8x1024xf32>
    %c0_21 = arith.constant 0 : index
    %c0_22 = arith.constant 0 : index
    %42 = vector.load %arg21[%c0_21, %c0_22] : memref<8x1024xf32, #tpu.memory_space<vmem>>, vector<8x1024xf32>
    tpu.vector_store %arg21[%c0_21, %c0_22], %41 {strides = array<i32>} : memref<8x1024xf32, #tpu.memory_space<vmem>>, vector<8x1024xf32>,
    %c1_i32 = arith.constant 1 : i32
    %43 = arith.cmpi eq, %arg0, %c1_i32 : i32
    %44 = arith.extui %43 : i1 to i32
    %c0_i32_23 = arith.constant 0 : i32
    %45 = arith.cmpi ne, %44, %c0_i32_23 : i32
    scf.if %45 {
      %c0_24 = arith.constant 0 : index
      %c0_25 = arith.constant 0 : index
      %46 = vector.load %arg21[%c0_24, %c0_25] : memref<8x1024xf32, #tpu.memory_space<vmem>>, vector<8x1024xf32>
      %c0_26 = arith.constant 0 : index
      %c0_27 = arith.constant 0 : index
      %47 = vector.load %arg7[%c0_26, %c0_27] : memref<1x1024xf32, #tpu.memory_space<vmem>>, vector<1x1024xf32>
      %48 = vector.broadcast %47 : vector<1x1024xf32> to vector<8x1024xf32>
      %49 = arith.addf %46, %48 : vector<8x1024xf32>
      %c0_28 = arith.constant 0 : index
      %c0_29 = arith.constant 0 : index
      %50 = vector.load %arg8[%c0_28, %c0_29] : memref<1x1024xf32, #tpu.memory_space<vmem>>, vector<1x1024xf32>
      %c0_30 = arith.constant 0 : index
      %c0_31 = arith.constant 0 : index
      %51 = vector.load %arg9[%c0_30, %c0_31] : memref<1x1024xf32, #tpu.memory_space<vmem>>, vector<1x1024xf32>
      %cst_32 = arith.constant dense<0.000000e+00> : vector<1024xf32>
      %52 = vector.multi_reduction <add>, %49, %cst_32 [0] : vector<8x1024xf32> to vector<1024xf32>
      %53 = vector.shape_cast %52 : vector<1024xf32> to vector<1x1024xf32>
      %cst_33 = arith.constant 8.000000e+00 : f32
      %54 = vector.broadcast %cst_33 : f32 to vector<1x1024xf32>
      %55 = arith.divf %53, %54 : vector<1x1024xf32>
      %56 = vector.broadcast %55 : vector<1x1024xf32> to vector<8x1024xf32>
      %57 = arith.subf %49, %56 : vector<8x1024xf32>
      %58 = vector.broadcast %55 : vector<1x1024xf32> to vector<8x1024xf32>
      %59 = arith.subf %49, %58 : vector<8x1024xf32>
      %60 = arith.mulf %57, %59 : vector<8x1024xf32>
      %cst_34 = arith.constant dense<0.000000e+00> : vector<1024xf32>
      %61 = vector.multi_reduction <add>, %60, %cst_34 [0] : vector<8x1024xf32> to vector<1024xf32>
      %62 = vector.shape_cast %61 : vector<1024xf32> to vector<1x1024xf32>
      %cst_35 = arith.constant 8.000000e+00 : f32
      %63 = vector.broadcast %cst_35 : f32 to vector<1x1024xf32>
      %64 = arith.divf %62, %63 : vector<1x1024xf32>
      %cst_36 = arith.constant 9.99999974E-6 : f32
      %65 = vector.broadcast %cst_36 : f32 to vector<1x1024xf32>
      %66 = arith.addf %64, %65 : vector<1x1024xf32>
      %67 = math.rsqrt %66 : vector<1x1024xf32>
      %68 = arith.mulf %50, %67 : vector<1x1024xf32>
      %69 = arith.mulf %55, %68 : vector<1x1024xf32>
      %70 = arith.subf %51, %69 : vector<1x1024xf32>
      %71 = vector.broadcast %68 : vector<1x1024xf32> to vector<8x1024xf32>
      %72 = arith.mulf %49, %71 : vector<8x1024xf32>
      %73 = vector.broadcast %70 : vector<1x1024xf32> to vector<8x1024xf32>
      %74 = arith.addf %72, %73 : vector<8x1024xf32>
      %cst_37 = arith.constant 0.000000e+00 : f32
      %75 = vector.broadcast %cst_37 : f32 to vector<8x1024xf32>
      %76 = arith.maximumf %74, %75 : vector<8x1024xf32>
      %77 = arith.truncf %76 : vector<8x1024xf32> to vector<8x1024xbf16>
      %c0_38 = arith.constant 0 : index
      %c0_39 = arith.constant 0 : index
      %78 = vector.load %arg10[%c0_38, %c0_39] : memref<1024x512xbf16, #tpu.memory_space<vmem>>, vector<1024x512xbf16>
      %cst_40 = arith.constant dense<0.000000e+00> : vector<8x512xf32>
      %79 = tpu.matmul %77, %78, %cst_40 {dimension_numbers = #tpu.dot_dimension_numbers<[1], [0], [0], [1], [0, 0, 1, 1], [], []>} : vector<8x1024xbf16>, vector<1024x512xbf16>, vector<8x512xf32> -> vector<8x512xf32>
      %c0_41 = arith.constant 0 : index
      %c0_42 = arith.constant 0 : index
      %80 = vector.load %arg11[%c0_41, %c0_42] : memref<1x512xf32, #tpu.memory_space<vmem>>, vector<1x512xf32>
      %81 = vector.broadcast %80 : vector<1x512xf32> to vector<8x512xf32>
      %82 = arith.addf %79, %81 : vector<8x512xf32>
      %c0_43 = arith.constant 0 : index
      %c0_44 = arith.constant 0 : index
      %83 = vector.load %arg12[%c0_43, %c0_44] : memref<1x512xf32, #tpu.memory_space<vmem>>, vector<1x512xf32>
      %c0_45 = arith.constant 0 : index
      %c0_46 = arith.constant 0 : index
      %84 = vector.load %arg13[%c0_45, %c0_46] : memref<1x512xf32, #tpu.memory_space<vmem>>, vector<1x512xf32>
      %cst_47 = arith.constant dense<0.000000e+00> : vector<512xf32>
      %85 = vector.multi_reduction <add>, %82, %cst_47 [0] : vector<8x512xf32> to vector<512xf32>
      %86 = vector.shape_cast %85 : vector<512xf32> to vector<1x512xf32>
      %cst_48 = arith.constant 8.000000e+00 : f32
      %87 = vector.broadcast %cst_48 : f32 to vector<1x512xf32>
      %88 = arith.divf %86, %87 : vector<1x512xf32>
      %89 = vector.broadcast %88 : vector<1x512xf32> to vector<8x512xf32>
      %90 = arith.subf %82, %89 : vector<8x512xf32>
      %91 = vector.broadcast %88 : vector<1x512xf32> to vector<8x512xf32>
      %92 = arith.subf %82, %91 : vector<8x512xf32>
      %93 = arith.mulf %90, %92 : vector<8x512xf32>
      %cst_49 = arith.constant dense<0.000000e+00> : vector<512xf32>
      %94 = vector.multi_reduction <add>, %93, %cst_49 [0] : vector<8x512xf32> to vector<512xf32>
      %95 = vector.shape_cast %94 : vector<512xf32> to vector<1x512xf32>
      %cst_50 = arith.constant 8.000000e+00 : f32
      %96 = vector.broadcast %cst_50 : f32 to vector<1x512xf32>
      %97 = arith.divf %95, %96 : vector<1x512xf32>
      %cst_51 = arith.constant 9.99999974E-6 : f32
      %98 = vector.broadcast %cst_51 : f32 to vector<1x512xf32>
      %99 = arith.addf %97, %98 : vector<1x512xf32>
      %100 = math.rsqrt %99 : vector<1x512xf32>
      %101 = arith.mulf %83, %100 : vector<1x512xf32>
      %102 = arith.mulf %88, %101 : vector<1x512xf32>
      %103 = arith.subf %84, %102 : vector<1x512xf32>
      %104 = vector.broadcast %101 : vector<1x512xf32> to vector<8x512xf32>
      %105 = arith.mulf %82, %104 : vector<8x512xf32>
      %106 = vector.broadcast %103 : vector<1x512xf32> to vector<8x512xf32>
      %107 = arith.addf %105, %106 : vector<8x512xf32>
      %cst_52 = arith.constant 0.000000e+00 : f32
      %108 = vector.broadcast %cst_52 : f32 to vector<8x512xf32>
      %109 = arith.maximumf %107, %108 : vector<8x512xf32>
      %110 = arith.truncf %109 : vector<8x512xf32> to vector<8x512xbf16>
      %c0_53 = arith.constant 0 : index
      %c0_54 = arith.constant 0 : index
      %111 = vector.load %arg14[%c0_53, %c0_54] : memref<512x128xbf16, #tpu.memory_space<vmem>>, vector<512x128xbf16>
      %cst_55 = arith.constant dense<0.000000e+00> : vector<8x128xf32>
      %112 = tpu.matmul %110, %111, %cst_55 {dimension_numbers = #tpu.dot_dimension_numbers<[1], [0], [0], [1], [0, 0, 1, 1], [], []>} : vector<8x512xbf16>, vector<512x128xbf16>, vector<8x128xf32> -> vector<8x128xf32>
      %c0_56 = arith.constant 0 : index
      %c0_57 = arith.constant 0 : index
      %113 = vector.load %arg15[%c0_56, %c0_57] : memref<1x128xf32, #tpu.memory_space<vmem>>, vector<1x128xf32>
      %114 = vector.broadcast %113 : vector<1x128xf32> to vector<8x128xf32>
      %115 = arith.addf %112, %114 : vector<8x128xf32>
      %c0_58 = arith.constant 0 : index
      %c0_59 = arith.constant 0 : index
      %116 = vector.load %arg16[%c0_58, %c0_59] : memref<1x128xf32, #tpu.memory_space<vmem>>, vector<1x128xf32>
      %c0_60 = arith.constant 0 : index
      %c0_61 = arith.constant 0 : index
      %117 = vector.load %arg17[%c0_60, %c0_61] : memref<1x128xf32, #tpu.memory_space<vmem>>, vector<1x128xf32>
      %cst_62 = arith.constant dense<0.000000e+00> : vector<128xf32>
      %118 = vector.multi_reduction <add>, %115, %cst_62 [0] : vector<8x128xf32> to vector<128xf32>
      %119 = vector.shape_cast %118 : vector<128xf32> to vector<1x128xf32>
      %cst_63 = arith.constant 8.000000e+00 : f32
      %120 = vector.broadcast %cst_63 : f32 to vector<1x128xf32>
      %121 = arith.divf %119, %120 : vector<1x128xf32>
      %122 = vector.broadcast %121 : vector<1x128xf32> to vector<8x128xf32>
      %123 = arith.subf %115, %122 : vector<8x128xf32>
      %124 = vector.broadcast %121 : vector<1x128xf32> to vector<8x128xf32>
      %125 = arith.subf %115, %124 : vector<8x128xf32>
      %126 = arith.mulf %123, %125 : vector<8x128xf32>
      %cst_64 = arith.constant dense<0.000000e+00> : vector<128xf32>
      %127 = vector.multi_reduction <add>, %126, %cst_64 [0] : vector<8x128xf32> to vector<128xf32>
      %128 = vector.shape_cast %127 : vector<128xf32> to vector<1x128xf32>
      %cst_65 = arith.constant 8.000000e+00 : f32
      %129 = vector.broadcast %cst_65 : f32 to vector<1x128xf32>
      %130 = arith.divf %128, %129 : vector<1x128xf32>
      %cst_66 = arith.constant 9.99999974E-6 : f32
      %131 = vector.broadcast %cst_66 : f32 to vector<1x128xf32>
      %132 = arith.addf %130, %131 : vector<1x128xf32>
      %133 = math.rsqrt %132 : vector<1x128xf32>
      %134 = arith.mulf %116, %133 : vector<1x128xf32>
      %135 = arith.mulf %121, %134 : vector<1x128xf32>
      %136 = arith.subf %117, %135 : vector<1x128xf32>
      %137 = vector.broadcast %134 : vector<1x128xf32> to vector<8x128xf32>
      %138 = arith.mulf %115, %137 : vector<8x128xf32>
      %139 = vector.broadcast %136 : vector<1x128xf32> to vector<8x128xf32>
      %140 = arith.addf %138, %139 : vector<8x128xf32>
      %cst_67 = arith.constant 0.000000e+00 : f32
      %141 = vector.broadcast %cst_67 : f32 to vector<8x128xf32>
      %142 = arith.maximumf %140, %141 : vector<8x128xf32>
      %143 = arith.truncf %142 : vector<8x128xf32> to vector<8x128xbf16>
      %c0_68 = arith.constant 0 : index
      %c0_69 = arith.constant 0 : index
      %144 = vector.load %arg18[%c0_68, %c0_69] : memref<128x128xbf16, #tpu.memory_space<vmem>>, vector<128x128xbf16>
      %cst_70 = arith.constant dense<0.000000e+00> : vector<8x128xf32>
      %145 = tpu.matmul %143, %144, %cst_70 {dimension_numbers = #tpu.dot_dimension_numbers<[1], [0], [0], [1], [0, 0, 1, 1], [], []>} : vector<8x128xbf16>, vector<128x128xbf16>, vector<8x128xf32> -> vector<8x128xf32>
      %c0_71 = arith.constant 0 : index
      %c0_72 = arith.constant 0 : index
      %146 = vector.load %arg19[%c0_71, %c0_72] : memref<1x128xf32, #tpu.memory_space<vmem>>, vector<1x128xf32>
      %147 = vector.broadcast %146 : vector<1x128xf32> to vector<8x128xf32>
      %148 = arith.addf %145, %147 : vector<8x128xf32>
      %149 = tpu.iota {dimensions = array<i32: 1>} : vector<8x128xi32>
      %c2_i32 = arith.constant 2 : i32
      %150 = vector.broadcast %c2_i32 : i32 to vector<8x128xi32>
      %151 = arith.cmpi slt, %149, %150 : vector<8x128xi32>
      %c2_i32_73 = arith.constant 2 : i32
      %152 = vector.broadcast %c2_i32_73 : i32 to vector<8x128xi32>
      %153 = arith.cmpi sge, %149, %152 : vector<8x128xi32>
      %c10_i32 = arith.constant 10 : i32
      %154 = vector.broadcast %c10_i32 : i32 to vector<8x128xi32>
      %155 = arith.cmpi slt, %149, %154 : vector<8x128xi32>
      %156 = arith.andi %153, %155 : vector<8x128xi1>
      %c10_i32_74 = arith.constant 10 : i32
      %157 = vector.broadcast %c10_i32_74 : i32 to vector<8x128xi32>
      %158 = arith.cmpi sge, %149, %157 : vector<8x128xi32>
      %c12_i32 = arith.constant 12 : i32
      %159 = vector.broadcast %c12_i32 : i32 to vector<8x128xi32>
      %160 = arith.cmpi slt, %149, %159 : vector<8x128xi32>
      %161 = arith.andi %158, %160 : vector<8x128xi1>
      %c12_i32_75 = arith.constant 12 : i32
      %162 = vector.broadcast %c12_i32_75 : i32 to vector<8x128xi32>
      %163 = arith.cmpi slt, %149, %162 : vector<8x128xi32>
      %cst_76 = arith.constant -1.000000e+30 : f32
      %164 = vector.broadcast %cst_76 : f32 to vector<8x128xf32>
      %165 = arith.select %151, %148, %164 : vector<8x128xi1>, vector<8x128xf32>
      %cst_77 = arith.constant dense<0xFF800000> : vector<8xf32>
      %166 = vector.multi_reduction <maximumf>, %165, %cst_77 [1] : vector<8x128xf32> to vector<8xf32>
      %167 = vector.shape_cast %166 : vector<8xf32> to vector<8x1xf32>
      %cst_78 = arith.constant -1.000000e+30 : f32
      %168 = vector.broadcast %cst_78 : f32 to vector<8x128xf32>
      %169 = arith.select %156, %148, %168 : vector<8x128xi1>, vector<8x128xf32>
      %cst_79 = arith.constant dense<0xFF800000> : vector<8xf32>
      %170 = vector.multi_reduction <maximumf>, %169, %cst_79 [1] : vector<8x128xf32> to vector<8xf32>
      %171 = vector.shape_cast %170 : vector<8xf32> to vector<8x1xf32>
      %cst_80 = arith.constant -1.000000e+30 : f32
      %172 = vector.broadcast %cst_80 : f32 to vector<8x128xf32>
      %173 = arith.select %161, %148, %172 : vector<8x128xi1>, vector<8x128xf32>
      %cst_81 = arith.constant dense<0xFF800000> : vector<8xf32>
      %174 = vector.multi_reduction <maximumf>, %173, %cst_81 [1] : vector<8x128xf32> to vector<8xf32>
      %175 = vector.shape_cast %174 : vector<8xf32> to vector<8x1xf32>
      %176 = vector.shape_cast %171 : vector<8x1xf32> to vector<8x1xf32>
      %177 = vector.broadcast %176 : vector<8x1xf32> to vector<8x128xf32>
      %178 = vector.shape_cast %175 : vector<8x1xf32> to vector<8x1xf32>
      %179 = vector.broadcast %178 : vector<8x1xf32> to vector<8x128xf32>
      %180 = arith.select %156, %177, %179 : vector<8x128xi1>, vector<8x128xf32>
      %181 = vector.shape_cast %167 : vector<8x1xf32> to vector<8x1xf32>
      %182 = vector.broadcast %181 : vector<8x1xf32> to vector<8x128xf32>
      %183 = arith.select %151, %182, %180 : vector<8x128xi1>, vector<8x128xf32>
      %184 = arith.subf %148, %183 : vector<8x128xf32>
      %185 = math.exp %184 : vector<8x128xf32>
      %cst_82 = arith.constant 0.000000e+00 : f32
      %186 = vector.broadcast %cst_82 : f32 to vector<8x128xf32>
      %187 = arith.select %163, %185, %186 : vector<8x128xi1>, vector<8x128xf32>
      %cst_83 = arith.constant 0.000000e+00 : f32
      %188 = vector.broadcast %cst_83 : f32 to vector<8x128xf32>
      %189 = arith.select %151, %187, %188 : vector<8x128xi1>, vector<8x128xf32>
      %cst_84 = arith.constant dense<0.000000e+00> : vector<8xf32>
      %190 = vector.multi_reduction <add>, %189, %cst_84 [1] : vector<8x128xf32> to vector<8xf32>
      %191 = vector.shape_cast %190 : vector<8xf32> to vector<8x1xf32>
      %cst_85 = arith.constant 0.000000e+00 : f32
      %192 = vector.broadcast %cst_85 : f32 to vector<8x128xf32>
      %193 = arith.select %156, %187, %192 : vector<8x128xi1>, vector<8x128xf32>
      %cst_86 = arith.constant dense<0.000000e+00> : vector<8xf32>
      %194 = vector.multi_reduction <add>, %193, %cst_86 [1] : vector<8x128xf32> to vector<8xf32>
      %195 = vector.shape_cast %194 : vector<8xf32> to vector<8x1xf32>
      %cst_87 = arith.constant 0.000000e+00 : f32
      %196 = vector.broadcast %cst_87 : f32 to vector<8x128xf32>
      %197 = arith.select %161, %187, %196 : vector<8x128xi1>, vector<8x128xf32>
      %cst_88 = arith.constant dense<0.000000e+00> : vector<8xf32>
      %198 = vector.multi_reduction <add>, %197, %cst_88 [1] : vector<8x128xf32> to vector<8xf32>
      %199 = vector.shape_cast %198 : vector<8xf32> to vector<8x1xf32>
      %200 = vector.shape_cast %195 : vector<8x1xf32> to vector<8x1xf32>
      %201 = vector.broadcast %200 : vector<8x1xf32> to vector<8x128xf32>
      %202 = vector.shape_cast %199 : vector<8x1xf32> to vector<8x1xf32>
      %203 = vector.broadcast %202 : vector<8x1xf32> to vector<8x128xf32>
      %204 = arith.select %156, %201, %203 : vector<8x128xi1>, vector<8x128xf32>
      %205 = vector.shape_cast %191 : vector<8x1xf32> to vector<8x1xf32>
      %206 = vector.broadcast %205 : vector<8x1xf32> to vector<8x128xf32>
      %207 = arith.select %151, %206, %204 : vector<8x128xi1>, vector<8x128xf32>
      %208 = arith.divf %187, %207 : vector<8x128xf32>
      %c0_89 = arith.constant 0 : index
      %c0_90 = arith.constant 0 : index
      %209 = vector.load %arg20[%c0_89, %c0_90] : memref<8x128xf32, #tpu.memory_space<vmem>>, vector<8x128xf32>
      tpu.vector_store %arg20[%c0_89, %c0_90], %208 {strides = array<i32>} : memref<8x128xf32, #tpu.memory_space<vmem>>, vector<8x128xf32>,
    } else {
    }
    return
  }
  func.func @transform_0(%arg0: i32) -> (i32, i32) {
    %c0_i32 = arith.constant 0 : i32
    %c0_i32_0 = arith.constant 0 : i32
    %c0_i32_1 = arith.constant 0 : i32
    return %c0_i32, %c0_i32_0 : i32, i32
  }
  func.func @transform_1(%arg0: i32) -> (i32, i32) {
    %c0_i32 = arith.constant 0 : i32
    %c0_i32_0 = arith.constant 0 : i32
    return %c0_i32, %arg0 : i32, i32
  }
  func.func @transform_2(%arg0: i32) -> (i32, i32) {
    %c0_i32 = arith.constant 0 : i32
    %c0_i32_0 = arith.constant 0 : i32
    return %c0_i32, %arg0 : i32, i32
  }
  func.func @transform_3(%arg0: i32) -> (i32, i32) {
    %c0_i32 = arith.constant 0 : i32
    %c0_i32_0 = arith.constant 0 : i32
    return %c0_i32, %arg0 : i32, i32
  }
  func.func @transform_4(%arg0: i32) -> (i32, i32) {
    %c0_i32 = arith.constant 0 : i32
    %c0_i32_0 = arith.constant 0 : i32
    return %c0_i32, %arg0 : i32, i32
  }
  func.func @transform_5(%arg0: i32) -> (i32, i32) {
    %c0_i32 = arith.constant 0 : i32
    %c0_i32_0 = arith.constant 0 : i32
    return %arg0, %c0_i32 : i32, i32
  }
  func.func @transform_6(%arg0: i32) -> (i32, i32) {
    %c0_i32 = arith.constant 0 : i32
    %c0_i32_0 = arith.constant 0 : i32
    %c0_i32_1 = arith.constant 0 : i32
    return %c0_i32, %c0_i32_0 : i32, i32
  }
  func.func @transform_7(%arg0: i32) -> (i32, i32) {
    %c0_i32 = arith.constant 0 : i32
    %c0_i32_0 = arith.constant 0 : i32
    %c0_i32_1 = arith.constant 0 : i32
    return %c0_i32, %c0_i32_0 : i32, i32
  }
  func.func @transform_8(%arg0: i32) -> (i32, i32) {
    %c0_i32 = arith.constant 0 : i32
    %c0_i32_0 = arith.constant 0 : i32
    %c0_i32_1 = arith.constant 0 : i32
    return %c0_i32, %c0_i32_0 : i32, i32
  }
  func.func @transform_9(%arg0: i32) -> (i32, i32) {
    %c0_i32 = arith.constant 0 : i32
    %c0_i32_0 = arith.constant 0 : i32
    %c0_i32_1 = arith.constant 0 : i32
    return %c0_i32, %c0_i32_0 : i32, i32
  }
  func.func @transform_10(%arg0: i32) -> (i32, i32) {
    %c0_i32 = arith.constant 0 : i32
    %c0_i32_0 = arith.constant 0 : i32
    %c0_i32_1 = arith.constant 0 : i32
    return %c0_i32, %c0_i32_0 : i32, i32
  }
  func.func @transform_11(%arg0: i32) -> (i32, i32) {
    %c0_i32 = arith.constant 0 : i32
    %c0_i32_0 = arith.constant 0 : i32
    %c0_i32_1 = arith.constant 0 : i32
    return %c0_i32, %c0_i32_0 : i32, i32
  }
  func.func @transform_12(%arg0: i32) -> (i32, i32) {
    %c0_i32 = arith.constant 0 : i32
    %c0_i32_0 = arith.constant 0 : i32
    %c0_i32_1 = arith.constant 0 : i32
    return %c0_i32, %c0_i32_0 : i32, i32
  }
  func.func @transform_13(%arg0: i32) -> (i32, i32) {
    %c0_i32 = arith.constant 0 : i32
    %c0_i32_0 = arith.constant 0 : i32
    %c0_i32_1 = arith.constant 0 : i32
    return %c0_i32, %c0_i32_0 : i32, i32
  }
  func.func @transform_14(%arg0: i32) -> (i32, i32) {
    %c0_i32 = arith.constant 0 : i32
    %c0_i32_0 = arith.constant 0 : i32
    %c0_i32_1 = arith.constant 0 : i32
    return %c0_i32, %c0_i32_0 : i32, i32
  }
  func.func @transform_15(%arg0: i32) -> (i32, i32) {
    %c0_i32 = arith.constant 0 : i32
    %c0_i32_0 = arith.constant 0 : i32
    %c0_i32_1 = arith.constant 0 : i32
    return %c0_i32, %c0_i32_0 : i32, i32
  }
  func.func @transform_16(%arg0: i32) -> (i32, i32) {
    %c0_i32 = arith.constant 0 : i32
    %c0_i32_0 = arith.constant 0 : i32
    %c0_i32_1 = arith.constant 0 : i32
    return %c0_i32, %c0_i32_0 : i32, i32
  }
  func.func @transform_17(%arg0: i32) -> (i32, i32) {
    %c0_i32 = arith.constant 0 : i32
    %c0_i32_0 = arith.constant 0 : i32
    %c0_i32_1 = arith.constant 0 : i32
    return %c0_i32, %c0_i32_0 : i32, i32
  }
  func.func @transform_18(%arg0: i32) -> (i32, i32) {
    %c0_i32 = arith.constant 0 : i32
    %c0_i32_0 = arith.constant 0 : i32
    %c0_i32_1 = arith.constant 0 : i32
    return %c0_i32, %c0_i32_0 : i32, i32
  }
  func.func @transform_19(%arg0: i32) -> (i32, i32) {
    %c0_i32 = arith.constant 0 : i32
    %c0_i32_0 = arith.constant 0 : i32
    %c0_i32_1 = arith.constant 0 : i32
    return %c0_i32, %c0_i32_0 : i32, i32
  }
}

</mosaic_0001>

<bundles_post_ra>
// kernel: tpu_custom_call.1
= control target key start
LH: loop header
LB: loop body
LE: loop exit
PB: predicated region body
PF: predicated region fallthrough
CT: control target
= control target key end

     0   :  { %s16031_s0 = inlined_call_operand.hbm [shape: f32[8,64], index: 0, kind: input, shape index: {}]   ;;  %s16032_s1 = inlined_call_operand.hbm [shape: bf16[64,3072], index: 1, kind: input, shape index: {}]   ;;  %s16033_s2 = inlined_call_operand.hbm [shape: f32[1,3072], index: 2, kind: input, shape index: {}]   ;;  %s16034_s3 = inlined_call_operand.hbm [shape: f32[1,3072], index: 3, kind: input, shape index: {}]   ;;  %s16035_s4 = inlined_call_operand.hbm [shape: f32[1,3072], index: 4, kind: input, shape index: {}]   ;;  %s16036_s5 = inlined_call_operand.hbm [shape: bf16[3072,1024], index: 5, kind: input, shape index: {}]   ;;  %s16037_s6 = inlined_call_operand.hbm [shape: f32[1,1024], index: 6, kind: input, shape index: {}]   ;;  %s16038_s7 = inlined_call_operand.hbm [shape: f32[1,1024], index: 7, kind: input, shape index: {}]   ;;  %s16039_s8 = inlined_call_operand.hbm [shape: f32[1,1024], index: 8, kind: input, shape index: {}]   ;;  %s16040_s9 = inlined_call_operand.hbm [shape: bf16[1024,512], index: 9, kind: input, shape index: {}]   ;;  %s16041_s10 = inlined_call_operand.hbm [shape: f32[1,512], index: 10, kind: input, shape index: {}]   ;;  %s16042_s11 = inlined_call_operand.hbm [shape: f32[1,512], index: 11, kind: input, shape index: {}]   ;;  %s16043_s12 = inlined_call_operand.hbm [shape: f32[1,512], index: 12, kind: input, shape index: {}]   ;;  %s16044_s13 = inlined_call_operand.hbm [shape: bf16[512,128], index: 13, kind: input, shape index: {}]   ;;  %s16045_s14 = inlined_call_operand.hbm [shape: f32[1,128], index: 14, kind: input, shape index: {}]   ;;  %s16046_s15 = inlined_call_operand.hbm [shape: f32[1,128], index: 15, kind: input, shape index: {}]   ;;  %s16047_s16 = inlined_call_operand.hbm [shape: f32[1,128], index: 16, kind: input, shape index: {}]   ;;  %s16048_s17 = inlined_call_operand.hbm [shape: bf16[128,128], index: 17, kind: input, shape index: {}]   ;;  %s16049_s18 = inlined_call_operand.hbm [shape: f32[1,128], index: 18, kind: input, shape index: {}]   ;;  %s16050_s19 = inlined_call_operand.hbm [shape: f32[8,128], index: 19, kind: output, shape index: {}]  }
   0x1   :  { %16078 = sst [smem:[#allocation49_spill]] %s16031_s0 }
   0x2   :  { %16079 = sst [smem:[#allocation50_spill]] %s16032_s1 }
   0x3   :  { %16080 = sst [smem:[#allocation51_spill]] %s16033_s2 }
   0x4   :  { %16081 = sst [smem:[#allocation52_spill]] %s16034_s3 }
   0x5   :  { %16082 = sst [smem:[#allocation53_spill]] %s16035_s4 }
   0x6   :  { %16083 = sst [smem:[#allocation54_spill]] %s16036_s5 }
   0x7   :  { %16084 = sst [smem:[#allocation55_spill]] %s16037_s6 }
   0x8   :  { %16085 = sst [smem:[#allocation56_spill]] %s16038_s7 }
   0x9   :  { %16086 = sst [smem:[#allocation57_spill]] %s16039_s8 }
   0xa   :  { %16087 = sst [smem:[#allocation58_spill]] %s16040_s9 }
   0xb   :  { %16088 = sst [smem:[#allocation59_spill]] %s16041_s10 }
   0xc   :  { %16089 = sst [smem:[#allocation60_spill]] %s16042_s11 }
   0xd   :  { %16090 = sst [smem:[#allocation61_spill]] %s16044_s13 }
   0xe   :  { %16091 = sst [smem:[#allocation62_spill]] %s16045_s14 }
   0xf   :  { %16092 = sst [smem:[#allocation63_spill]] %s16046_s15 }
  0x10   :  { %16093 = sst [smem:[#allocation64_spill]] %s16047_s16 }
  0x11   :  { %16094 = sst [smem:[#allocation65_spill]] %s16048_s17 }
  0x12   :  { %16095 = sst [smem:[#allocation66_spill]] %s16049_s18 }
  0x13   :  { %16096 = sst [smem:[#allocation67_spill]] %s16050_s19 }
  0x14   :  { %24 = vsyncpa [#allocation4], 0 }
  0x15   :  { %25 = vsyncpa [#allocation7], 0 }
  0x16   :  { %27 = vsyncpa [#allocation7 + $0x1], 0 }
  0x17   :  { %28 = vsyncpa [#allocation10], 0 }
  0x18   :  { %30 = vsyncpa [#allocation10 + $0x1], 0 }
  0x19   :  { %31 = vsyncpa [#allocation13], 0 }
  0x1a   :  { %33 = vsyncpa [#allocation13 + $0x1], 0 }
  0x1b   :  { %34 = vsyncpa [#allocation16], 0 }
  0x1c   :  { %35 = vsyncpa [#allocation19], 0 }
  0x1d   :  { %36 = vsyncpa [#allocation22], 0 }
  0x1e   :  { %37 = vsyncpa [#allocation25], 0 }
  0x1f   :  { %38 = vsyncpa [#allocation28], 0 }
  0x20   :  { %39 = vsyncpa [#allocation31], 0 }
  0x21   :  { %40 = vsyncpa [#allocation5], 0  ;;  %s13932_s0 = smov 0   ;;  %s13934_s30 = smov 0  }
  0x22   :  { %s13936_s20 = smov 0   ;;  %s13938_s21 = smov 0  }
  0x23 LB: > { %s13798_s1 = smov [#allocation14]   ;;  %s13953_s2 = sadd.s32 4294967295, %s13796_s21   ;;  %s13796_s21 = sphi %s13938_s21, %s16164_s21   ;;  %s13792_s20 = sphi %s13936_s20, %s16163_s20   ;;  %s13788_s30 = sphi %s13934_s30, %s16162_s30   ;;  %s13784_s0 = sphi %s13932_s0, %s16161_s0  }
  0x24   : > { %s520_s22 = sshll.u32 %s13798_s1, 4  ;;  %p11100_p0 = scmp.ge.s32.totalorder %s13796_s21, 1  ;;  %s521_s22 = int_to_ptr.vmem [resolvable:$true] %s520_s22 }
  0x25   : > { %p16058_p1 = scmp.eq.s32.totalorder %s13953_s2, 0  ;;  %p496_p2 = scmp.lt.s32.totalorder %s13796_s21, 3 }
  0x26   : > { %s13799_s24 = smov [#allocation15]   ;;  %s13800_s3 = smov [#allocation18]  }
  0x27   : > { %p13959_p4 = pnand %p11100_p0, %p496_p2  ;;  %s531_s25 = sshll.u32 %s13799_s24, 4  ;;  %s13965_s25 = int_to_ptr.vmem [resolvable:$true] %s531_s25 }
  0x28   : > { %s552_s26 = sshll.u32 %s13800_s3, 4  ;;  %s16100_s6 = sld [smem:[#allocation55_spill]]  ;;  %s13973_s26 = int_to_ptr.vmem [resolvable:$true] %s552_s26 }
  0x29   : > { %s16097_s23 = scalar_select %p13959_p4, 1, 0 }
  0x2a   : > { %p12449_p5 = pneg %p13959_p4 }
  0x2b   : > { %16098 = sst [smem:[#allocation46_spill]] %s16097_s23 }
  0x2c   : > { %p13969_p6 = pnand %p12449_p5, %p16058_p1 }
  0x2e   : > { %s16099_s27 = scalar_select %p13969_p6, 1, 0 }
  0x2f   : > { %s13150_s1 = scalar_lea.hbm %s16100_s6, 128  ;;  %p13983_p8 = pneg %p13969_p6 }
  0x30   : > { %p13151_p7 = scmp.ne.s32.totalorder %s16100_s6, %s13150_s1  ;;  %p13157_p11 = scmp.lt.u32.totalorder %s13150_s1, %s16100_s6 }
  0x31   : > { %s16101_s24 = scalar_select %p13983_p8, 1, 0 }
  0x32   : > { %p13153_p9 = pnand %p13983_p8, %p13151_p7 }
  0x34   : > { %p13154_p10 = pneg %p13153_p9 }
  0x36   : > { %p13159_p12 = pnand %p13157_p11, %p13154_p10 }
  0x38   : > { %13162 = shalt.err (!%p13159_p12)
}
  0x39   : > { %s13163_s28 = scalar_lea.vmem %s521_s22, 128  ;;  %p13171_p5 = scmp.lt.s32.totalorder %s521_s22, %s521_s22 }
  0x3a   : > { %p13164_p13 = scmp.ne.s32.totalorder %s521_s22, %s13163_s28  ;;  %p13172_p3 = scmp.lt.s32.totalorder %s13163_s28, %s13163_s28 }
  0x3c   : > { %p13166_p0 = pnand %p13164_p13, %p13983_p8  ;;  %p13173_p1 = por %p13172_p3, %p13171_p5 }
  0x3e   : > { %p13167_p2 = pneg %p13166_p0 }
  0x40   : > { %p13174_p4 = pnand %p13173_p1, %p13167_p2 }
  0x42   : > { %13177 = shalt.err (!%p13174_p4)
}
  0x43   : > { %12455 = dma.hbm_to_vmem [thread:$0]  (!%p13969_p6), %s16100_s6, 128, %s521_s22, [#allocation13]  }
  0x44   : > { %s16102_s7 = sld [smem:[#allocation56_spill]] }
  0x4a   : > { %s13178_s1 = scalar_lea.hbm %s16102_s7, 128 }
  0x4b   : > { %p13179_p7 = scmp.ne.s32.totalorder %s16102_s7, %s13178_s1  ;;  %p13185_p1 = scmp.lt.u32.totalorder %s13178_s1, %s16102_s7 }
  0x4d   : > { %p13181_p9 = pnand %p13179_p7, %p13983_p8 }
  0x4f   : > { %p13182_p3 = pneg %p13181_p9 }
  0x51   : > { %p13187_p4 = pnand %p13185_p1, %p13182_p3 }
  0x53   : > { %13190 = shalt.err (!%p13187_p4)
}
  0x54   : > { %s13191_s22 = scalar_lea.vmem %s13965_s25, 128  ;;  %p13199_p13 = scmp.lt.s32.totalorder %s13965_s25, %s13965_s25 }
  0x55   : > { %p13192_p10 = scmp.ne.s32.totalorder %s13965_s25, %s13191_s22  ;;  %p13200_p0 = scmp.lt.s32.totalorder %s13191_s22, %s13191_s22 }
  0x57   : > { %p13194_p11 = pnand %p13192_p10, %p13983_p8  ;;  %p13201_p2 = por %p13200_p0, %p13199_p13 }
  0x59   : > { %p13195_p12 = pneg %p13194_p11 }
  0x5b   : > { %p13202_p5 = pnand %p13201_p2, %p13195_p12 }
  0x5d   : > { %13205 = shalt.err (!%p13202_p5)
}
  0x5e   : > { %12458 = dma.hbm_to_vmem [thread:$0]  (!%p13969_p6), %s16102_s7, 128, %s13965_s25, [#allocation16]  }
  0x5f   : > { %s16103_s9 = sld [smem:[#allocation58_spill]] }
  0x65   : > { %s13206_s5 = scalar_lea.hbm %s16103_s9, 32768 }
  0x66   : > { %p13207_p7 = scmp.ne.s32.totalorder %s16103_s9, %s13206_s5  ;;  %p13213_p1 = scmp.lt.u32.totalorder %s13206_s5, %s16103_s9 }
  0x68   : > { %p13209_p9 = pnand %p13207_p7, %p13983_p8 }
  0x6a   : > { %p13210_p3 = pneg %p13209_p9 }
  0x6c   : > { %p13215_p4 = pnand %p13213_p1, %p13210_p3 }
  0x6e   : > { %13218 = shalt.err (!%p13215_p4)
}
  0x6f   : > { %s13219_s25 = scalar_lea.vmem %s13973_s26, 32768  ;;  %p13227_p13 = scmp.lt.s32.totalorder %s13973_s26, %s13973_s26 }
  0x70   : > { %p13220_p10 = scmp.ne.s32.totalorder %s13973_s26, %s13219_s25  ;;  %p13228_p0 = scmp.lt.s32.totalorder %s13219_s25, %s13219_s25 }
  0x72   : > { %p13222_p11 = pnand %p13220_p10, %p13983_p8  ;;  %p13229_p2 = por %p13228_p0, %p13227_p13 }
  0x74   : > { %p13223_p12 = pneg %p13222_p11 }
  0x76   : > { %p13230_p5 = pnand %p13229_p2, %p13223_p12 }
  0x78   : > { %13233 = shalt.err (!%p13230_p5)
}
  0x79   : > { %s13801_s22 = smov 256   ;;  %s13802_s4 = smov 16  }
  0x7a   : > { %12464 = dma.hbm_to_vmem [thread:$0]  (!%p13969_p6), %s16103_s9, 32768, %s13973_s26, [#allocation19], %s13801_s22, %s13801_s22, %s13802_s4  }
  0x7b   : > { %s13803_s23 = smov [#allocation21]   ;;  %s13804_s29 = smov [#allocation24]  }
  0x7c   : > { %s577_s5 = sshll.u32 %s13803_s23, 4  ;;  %s598_s1 = sshll.u32 %s13804_s29, 4  ;;  %s578_s5 = int_to_ptr.vmem [resolvable:$true] %s577_s5  ;;  %s599_s1 = int_to_ptr.vmem [resolvable:$true] %s598_s1 }
  0x7d   : > { %s16104_s11 = sld [smem:[#allocation60_spill]] }
  0x83   : > { %s13234_s25 = scalar_lea.hbm %s16104_s11, 64 }
  0x84   : > { %p13235_p7 = scmp.ne.s32.totalorder %s16104_s11, %s13234_s25  ;;  %p13241_p1 = scmp.lt.u32.totalorder %s13234_s25, %s16104_s11 }
  0x86   : > { %p13237_p9 = pnand %p13235_p7, %p13983_p8 }
  0x88   : > { %p13238_p3 = pneg %p13237_p9 }
  0x8a   : > { %p13243_p4 = pnand %p13241_p1, %p13238_p3 }
  0x8c   : > { %13246 = shalt.err (!%p13243_p4)
}
  0x8d   : > { %s13247_s26 = scalar_lea.vmem %s578_s5, 64  ;;  %p13255_p13 = scmp.lt.s32.totalorder %s578_s5, %s578_s5 }
  0x8e   : > { %p13248_p10 = scmp.ne.s32.totalorder %s578_s5, %s13247_s26  ;;  %p13256_p0 = scmp.lt.s32.totalorder %s13247_s26, %s13247_s26 }
  0x90   : > { %p13250_p11 = pnand %p13248_p10, %p13983_p8  ;;  %p13257_p2 = por %p13256_p0, %p13255_p13 }
  0x92   : > { %p13251_p12 = pneg %p13250_p11 }
  0x94   : > { %p13258_p5 = pnand %p13257_p2, %p13251_p12 }
  0x96   : > { %13261 = shalt.err (!%p13258_p5)
}
  0x97   : > { %12470 = dma.hbm_to_vmem [thread:$0]  (!%p13969_p6), %s16104_s11, 64, %s578_s5, [#allocation22]  }
  0x98   : > { %s16105_s13 = sld [smem:[#allocation61_spill]] }
  0x9e   : > { %s13262_s22 = scalar_lea.hbm %s16105_s13, 4096 }
  0x9f   : > { %p13263_p7 = scmp.ne.s32.totalorder %s16105_s13, %s13262_s22  ;;  %p13269_p1 = scmp.lt.u32.totalorder %s13262_s22, %s16105_s13 }
  0xa1   : > { %p13265_p9 = pnand %p13263_p7, %p13983_p8 }
  0xa3   : > { %p13266_p3 = pneg %p13265_p9 }
  0xa5   : > { %p13271_p4 = pnand %p13269_p1, %p13266_p3 }
  0xa7   : > { %13274 = shalt.err (!%p13271_p4)
}
  0xa8   : > { %s13275_s29 = scalar_lea.vmem %s599_s1, 4096  ;;  %p13283_p13 = scmp.lt.s32.totalorder %s599_s1, %s599_s1 }
  0xa9   : > { %p13276_p10 = scmp.ne.s32.totalorder %s599_s1, %s13275_s29  ;;  %p13284_p0 = scmp.lt.s32.totalorder %s13275_s29, %s13275_s29 }
  0xab   : > { %p13278_p11 = pnand %p13276_p10, %p13983_p8  ;;  %p13285_p2 = por %p13284_p0, %p13283_p13 }
  0xad   : > { %p13279_p12 = pneg %p13278_p11 }
  0xaf   : > { %p13286_p5 = pnand %p13285_p2, %p13279_p12 }
  0xb1   : > { %13289 = shalt.err (!%p13286_p5)
}
  0xb2   : > { %s13805_s5 = smov 64   ;;  %s13806_s3 = smov 4  }
  0xb3   : > { %12476 = dma.hbm_to_vmem [thread:$0]  (!%p13969_p6), %s16105_s13, 4096, %s599_s1, [#allocation25], %s13805_s5, %s13805_s5, %s13806_s3  }
  0xb4   : > { %s13807_s26 = smov [#allocation27]   ;;  %s13808_s7 = smov [#allocation30]  }
  0xb5   : > { %s623_s6 = sshll.u32 %s13807_s26, 4  ;;  %s644_s14 = sshll.u32 %s13808_s7, 4  ;;  %s624_s6 = int_to_ptr.vmem [resolvable:$true] %s623_s6  ;;  %s645_s14 = int_to_ptr.vmem [resolvable:$true] %s644_s14 }
  0xb6   : > { %s16106_s15 = sld [smem:[#allocation63_spill]] }
  0xbc   : > { %s13290_s4 = scalar_lea.hbm %s16106_s15, 16 }
  0xbd   : > { %p13291_p7 = scmp.ne.s32.totalorder %s16106_s15, %s13290_s4  ;;  %p13297_p1 = scmp.lt.u32.totalorder %s13290_s4, %s16106_s15 }
  0xbf   : > { %p13293_p9 = pnand %p13291_p7, %p13983_p8 }
  0xc1   : > { %p13294_p3 = pneg %p13293_p9 }
  0xc3   : > { %p13299_p4 = pnand %p13297_p1, %p13294_p3 }
  0xc5   : > { %13302 = shalt.err (!%p13299_p4)
}
  0xc6   : > { %s13303_s1 = scalar_lea.vmem %s624_s6, 16  ;;  %s13310_s28 = scalar_lea.vmem %s624_s6, 32 }
  0xc7   : > { %p13304_p10 = scmp.ne.s32.totalorder %s624_s6, %s13303_s1  ;;  %p13311_p13 = scmp.lt.s32.totalorder %s624_s6, %s624_s6 }
  0xc8   : > { %p13312_p0 = scmp.lt.s32.totalorder %s13310_s28, %s13303_s1 }
  0xc9   : > { %p13306_p11 = pnand %p13304_p10, %p13983_p8 }
  0xca   : > { %p13313_p2 = por %p13312_p0, %p13311_p13 }
  0xcb   : > { %p13307_p12 = pneg %p13306_p11 }
  0xcd   : > { %p13314_p5 = pnand %p13313_p2, %p13307_p12 }
  0xcf   : > { %13317 = shalt.err (!%p13314_p5)
}
  0xd0   : > { %12482 = dma.hbm_to_vmem [thread:$0]  (!%p13969_p6), %s16106_s15, 16, %s624_s6, [#allocation28]  }
  0xd1   : > { %s16107_s17 = sld [smem:[#allocation65_spill]] }
  0xd7   : > { %s13318_s22 = scalar_lea.hbm %s16107_s17, 1024 }
  0xd8   : > { %p13319_p7 = scmp.ne.s32.totalorder %s16107_s17, %s13318_s22  ;;  %p13325_p1 = scmp.lt.u32.totalorder %s13318_s22, %s16107_s17 }
  0xda   : > { %p13321_p9 = pnand %p13319_p7, %p13983_p8 }
  0xdc   : > { %p13322_p3 = pneg %p13321_p9 }
  0xde   : > { %p13327_p4 = pnand %p13325_p1, %p13322_p3 }
  0xe0   : > { %13330 = shalt.err (!%p13327_p4)
}
  0xe1   : > { %s13331_s29 = scalar_lea.vmem %s645_s14, 1024  ;;  %p13339_p13 = scmp.lt.s32.totalorder %s645_s14, %s645_s14 }
  0xe2   : > { %p13332_p10 = scmp.ne.s32.totalorder %s645_s14, %s13331_s29  ;;  %p13340_p0 = scmp.lt.s32.totalorder %s13331_s29, %s13331_s29 }
  0xe4   : > { %p13334_p11 = pnand %p13332_p10, %p13983_p8  ;;  %p13341_p2 = por %p13340_p0, %p13339_p13 }
  0xe6   : > { %p13335_p12 = pneg %p13334_p11 }
  0xe8   : > { %p13342_p5 = pnand %p13341_p2, %p13335_p12 }
  0xea   : > { %13345 = shalt.err (!%p13342_p5)
}
  0xeb   : > { %12488 = dma.hbm_to_vmem [thread:$0]  (!%p13969_p6), %s16107_s17, 1024, %s645_s14, [#allocation31], %s13805_s5, %s13805_s5, %s13806_s3  }
  0xec   : > { %s14124_s28 = sadd.s32 1, %s13796_s21   ;;  %s74_s26 = sadd.s32 1, %s13792_s20 }
  0xed   : > { %s71_s25 = ssub.s32 %s13796_s21, %s14124_s28  ;;  %p81_p9 = scmp.ne.s32.totalorder %s13792_s20, %s13788_s30 }
  0xee   : > { %p72_p7 = scmp.eq.s32.totalorder %s71_s25, 0  ;;  %p82_p3 = scmp.eq.s32.totalorder %s13796_s21, 0 }
  0xef   : > { %p87_p1 = scmp.ne.s32.totalorder %s13788_s30, %s13784_s0  ;;  %p16109_p10 = scmp.eq.s32.totalorder %s13953_s2, 0 }
  0xf0   : > { %s14135_s7 = scalar_select %p72_p7, %s13792_s20, %s74_s26  }
  0xf1   : > { %p83_p4 = por %p82_p3, %p81_p9  ;;  %p14139_p11 = por %p16109_p10, %p87_p1 }
  0xf2   : > { %16108 = sst [smem:[#allocation47_spill]] %s14135_s7  ;;  %p12522_p12 = scmp.lt.s32.totalorder %s13796_s21, 2 }
  0xf3   : > { %s16110_s16 = scalar_select %p14139_p11, 1, 0 }
  0xf4   : > { %s14145_s5 = sand.u32 1, %s13796_s21   ;;  %s14148_s3 = sand.u32 1, %s13792_s20  }
  0xf5   : > { %s12371_s14 = smul.u32 384, %s14148_s3  ;;  %p14151_p13 = pnand %p12522_p12, %p83_p4 }
  0xf6   : > { %s12263_s0 = smul.u32 768, %s13796_s21  ;;  %s16112_s19 = sld [smem:[#allocation50_spill]] }
  0xf7   : > { %s16111_s22 = scalar_select %p14151_p13, 1, 0 }
  0xf8   : > { %s673_s29 = scalar_lea.vmem [#allocation6], %s12371_s14  ;;  %s14164_s1 = smul.u32 12, %s14148_s3 }
  0xf9   : > { %s680_s6 = sshll.u32 %s673_s29, 4  ;;  %p14171_p2 = pneg %p14151_p13  ;;  %s14161_s6 = int_to_ptr.vmem [resolvable:$true] %s680_s6 }
  0xfb   : > { %s16113_s9 = scalar_select %p14171_p2, 1, 0 }
  0xfc   : > { %s14159_s23 = scalar_lea.hbm %s16112_s19, %s12263_s0  ;;  %s13351_s14 = scalar_lea.hbm %s16112_s19, 12288 }
  0xfd   : > { %s13346_s26 = scalar_lea.hbm %s14159_s23, 6144  ;;  %p13352_p9 = scmp.lt.u32.totalorder %s14159_s23, %s16112_s19 }
  0xfe   : > { %p13347_p0 = scmp.ne.s32.totalorder %s14159_s23, %s13346_s26  ;;  %p13353_p3 = scmp.lt.u32.totalorder %s13351_s14, %s13346_s26 }
  0xff   : > { %p13355_p4 = scmp.lt.u32.totalorder %s13346_s26, %s14159_s23 }
 0x100   : > { %p13349_p5 = pnand %p14171_p2, %p13347_p0  ;;  %p13354_p1 = por %p13353_p3, %p13352_p9 }
 0x102   : > { %p13350_p7 = pneg %p13349_p5  ;;  %p13356_p10 = por %p13355_p4, %p13354_p1 }
 0x104   : > { %p13357_p12 = pnand %p13356_p10, %p13350_p7 }
 0x106   : > { %13360 = shalt.err (!%p13357_p12)
}
 0x107   : > { %s13361_s25 = scalar_lea.vmem %s14161_s6, 6144  ;;  %s13809_s0 = smov [#allocation6]  }
 0x108   : > { %p13362_p0 = scmp.ne.s32.totalorder %s14161_s6, %s13361_s25  ;;  %s13366_s4 = sshll.u32 %s13809_s0, 4  ;;  %s13367_s4 = int_to_ptr.vmem [resolvable:$false] %s13366_s4 }
 0x109   : > { %s13368_s18 = scalar_lea.vmem %s13367_s4, 12288  ;;  %p13369_p6 = scmp.lt.s32.totalorder %s14161_s6, %s13367_s4 }
 0x10a   : > { %p13364_p5 = pnand %p13362_p0, %p14171_p2  ;;  %p13370_p8 = scmp.lt.s32.totalorder %s13368_s18, %s13361_s25 }
 0x10c   : > { %p13365_p11 = pneg %p13364_p5  ;;  %p13371_p9 = por %p13370_p8, %p13369_p6 }
 0x10e   : > { %p13372_p3 = pnand %p13371_p9, %p13365_p11 }
 0x110   : > { %13375 = shalt.err (!%p13372_p3)
}
 0x111   : > { %s13810_s26 = smov 1536   ;;  %s13811_s14 = smov 768  }
 0x112   : > { %s13812_s29 = smov 48   ;;  %s16114_s0 = scalar_lea.sflag [#allocation7], %s14145_s5 }
 0x113   : > { %12495 = dma.hbm_to_vmem [thread:$0]  (!%p14151_p13), %s14159_s23, 6144, %s14161_s6, %s16114_s0, %s13810_s26, %s13811_s14, %s13812_s29  }
 0x114   : > { %s14197_s11 = smul.u32 192, %s13796_s21  ;;  %s16115_s18 = sld [smem:[#allocation52_spill]] }
 0x115   : > { %s713_s15 = scalar_lea.vmem [#allocation9], %s14164_s1  ;;  %s13813_s19 = smov [#allocation3]  }
 0x116   : > { %s721_s17 = sshll.u32 %s713_s15, 4  ;;  %s14208_s7 = sshll.u32 %s13813_s19, 4  ;;  %s14206_s17 = int_to_ptr.vmem [resolvable:$true] %s721_s17  ;;  %s510_s7 = int_to_ptr.vmem [resolvable:$true] %s14208_s7 }
 0x117   : > { %s16072_s23 = scalar_lea.sflag [#allocation10], %s14145_s5 }
 0x11a   : > { %s14203_s13 = scalar_lea.hbm %s16115_s18, %s14197_s11  ;;  %s13381_s29 = scalar_lea.hbm %s16115_s18, 384 }
 0x11b   : > { %s13376_s6 = scalar_lea.hbm %s14203_s13, 192  ;;  %p13382_p7 = scmp.lt.u32.totalorder %s14203_s13, %s16115_s18 }
 0x11c   : > { %p13377_p6 = scmp.ne.s32.totalorder %s14203_s13, %s13376_s6  ;;  %p13383_p1 = scmp.lt.u32.totalorder %s13381_s29, %s13376_s6 }
 0x11d   : > { %p13385_p10 = scmp.lt.u32.totalorder %s13376_s6, %s14203_s13 }
 0x11e   : > { %p13379_p8 = pnand %p13377_p6, %p14171_p2  ;;  %p13384_p4 = por %p13383_p1, %p13382_p7 }
 0x120   : > { %p13380_p11 = pneg %p13379_p8  ;;  %p13386_p12 = por %p13385_p10, %p13384_p4 }
 0x122   : > { %p13387_p0 = pnand %p13386_p12, %p13380_p11 }
 0x124   : > { %13390 = shalt.err (!%p13387_p0)
}
 0x125   : > { %s13391_s15 = scalar_lea.vmem %s14206_s17, 192  ;;  %s13814_s19 = smov [#allocation9]  }
 0x126   : > { %p13392_p5 = scmp.ne.s32.totalorder %s14206_s17, %s13391_s15  ;;  %s13396_s4 = sshll.u32 %s13814_s19, 4  ;;  %s13397_s4 = int_to_ptr.vmem [resolvable:$false] %s13396_s4 }
 0x127   : > { %s13398_s26 = scalar_lea.vmem %s13397_s4, 384  ;;  %p13399_p6 = scmp.lt.s32.totalorder %s14206_s17, %s13397_s4 }
 0x128   : > { %p13394_p9 = pnand %p13392_p5, %p14171_p2  ;;  %p13400_p8 = scmp.lt.s32.totalorder %s13398_s26, %s13391_s15 }
 0x12a   : > { %p13395_p3 = pneg %p13394_p9  ;;  %p13401_p7 = por %p13400_p8, %p13399_p6 }
 0x12c   : > { %p13402_p1 = pnand %p13401_p7, %p13395_p3 }
 0x12e   : > { %13405 = shalt.err (!%p13402_p1)
}
 0x12f   : > { %12501 = dma.hbm_to_vmem [thread:$0]  (!%p14151_p13), %s14203_s13, 192, %s14206_s17, %s16072_s23  }
 0x130   : > { %s16116_s29 = sld [smem:[#allocation49_spill]]  ;;  %p16117_p4 = scmp.ne.s32.totalorder %s16101_s24, 0 }
 0x136   : > { %s13406_s0 = scalar_lea.hbm %s16116_s29, 128 }
 0x137   : > { %p13407_p11 = scmp.ne.s32.totalorder %s16116_s29, %s13406_s0  ;;  %p13413_p0 = scmp.lt.u32.totalorder %s13406_s0, %s16116_s29 }
 0x139   : > { %p13409_p10 = pnand %p13407_p11, %p16117_p4 }
 0x13b   : > { %p13410_p12 = pneg %p13409_p10 }
 0x13d   : > { %p13415_p5 = pnand %p13413_p0, %p13410_p12 }
 0x13f   : > { %13418 = shalt.err (!%p13415_p5)
}
 0x140   : > { %s13419_s26 = scalar_lea.vmem %s510_s7, 128  ;;  %p13427_p8 = scmp.lt.s32.totalorder %s510_s7, %s510_s7 }
 0x141   : > { %p13420_p9 = scmp.ne.s32.totalorder %s510_s7, %s13419_s26  ;;  %p13428_p7 = scmp.lt.s32.totalorder %s13419_s26, %s13419_s26 }
 0x143   : > { %p13422_p3 = pnand %p13420_p9, %p16117_p4  ;;  %p13429_p1 = por %p13428_p7, %p13427_p8 }
 0x145   : > { %p13423_p6 = pneg %p13422_p3 }
 0x147   : > { %p13430_p13 = pnand %p13429_p1, %p13423_p6 }
 0x149   : > { %13433 = shalt.err (!%p13430_p13)
}
 0x14a   : > { %p16118_p11 = scmp.ne.s32.totalorder %s16099_s27, 0  ;;  %s13815_s6 = smov [#allocation17]  }
 0x14b   : > { %s542_s14 = sshll.u32 %s13815_s6, 4  ;;  %s13816_s0 = smov [#allocation20]   ;;  %s543_s14 = int_to_ptr.vmem [resolvable:$true] %s542_s14 }
 0x14c   : > { %12452 = dma.hbm_to_vmem [thread:$0]  (!%p16118_p11), %s16116_s29, 128, %s510_s7, [#allocation4]  }
 0x14d   : > { %s566_s25 = sshll.u32 %s13816_s0, 4  ;;  %s16119_s8 = sld [smem:[#allocation57_spill]]  ;;  %s567_s25 = int_to_ptr.vmem [resolvable:$true] %s566_s25 }
 0x153   : > { %s13434_s4 = scalar_lea.hbm %s16119_s8, 128 }
 0x154   : > { %p13435_p13 = scmp.ne.s32.totalorder %s16119_s8, %s13434_s4  ;;  %p13441_p0 = scmp.lt.u32.totalorder %s13434_s4, %s16119_s8 }
 0x156   : > { %p13437_p10 = pnand %p13435_p13, %p16117_p4 }
 0x158   : > { %p13438_p12 = pneg %p13437_p10 }
 0x15a   : > { %p13443_p5 = pnand %p13441_p0, %p13438_p12 }
 0x15c   : > { %13446 = shalt.err (!%p13443_p5)
}
 0x15d   : > { %s13447_s7 = scalar_lea.vmem %s543_s14, 128  ;;  %p13455_p8 = scmp.lt.s32.totalorder %s543_s14, %s543_s14 }
 0x15e   : > { %p13448_p9 = scmp.ne.s32.totalorder %s543_s14, %s13447_s7  ;;  %p13456_p7 = scmp.lt.s32.totalorder %s13447_s7, %s13447_s7 }
 0x160   : > { %p13450_p3 = pnand %p13448_p9, %p16117_p4  ;;  %p13457_p1 = por %p13456_p7, %p13455_p8 }
 0x162   : > { %p13451_p6 = pneg %p13450_p3 }
 0x164   : > { %p13458_p2 = pnand %p13457_p1, %p13451_p6 }
 0x166   : > { %13461 = shalt.err (!%p13458_p2)
}
 0x167   : > { %12461 = dma.hbm_to_vmem [thread:$0]  (!%p16118_p11), %s16119_s8, 128, %s543_s14, [#allocation16]  }
 0x168   : > { %s16120_s10 = sld [smem:[#allocation59_spill]] }
 0x16e   : > { %s13462_s0 = scalar_lea.hbm %s16120_s10, 64 }
 0x16f   : > { %p13463_p13 = scmp.ne.s32.totalorder %s16120_s10, %s13462_s0  ;;  %p13469_p2 = scmp.lt.u32.totalorder %s13462_s0, %s16120_s10 }
 0x171   : > { %p13465_p10 = pnand %p13463_p13, %p16117_p4 }
 0x173   : > { %p13466_p12 = pneg %p13465_p10 }
 0x175   : > { %p13471_p0 = pnand %p13469_p2, %p13466_p12 }
 0x177   : > { %13474 = shalt.err (!%p13471_p0)
}
 0x178   : > { %s13475_s13 = scalar_lea.vmem %s567_s25, 64  ;;  %p13483_p6 = scmp.lt.s32.totalorder %s567_s25, %s567_s25 }
 0x179   : > { %p13476_p5 = scmp.ne.s32.totalorder %s567_s25, %s13475_s13  ;;  %p13484_p8 = scmp.lt.s32.totalorder %s13475_s13, %s13475_s13 }
 0x17b   : > { %p13478_p9 = pnand %p13476_p5, %p16117_p4  ;;  %p13485_p7 = por %p13484_p8, %p13483_p6 }
 0x17d   : > { %p13479_p3 = pneg %p13478_p9 }
 0x17f   : > { %p13486_p1 = pnand %p13485_p7, %p13479_p3 }
 0x181   : > { %13489 = shalt.err (!%p13486_p1)
}
 0x182   : > { %12467 = dma.hbm_to_vmem [thread:$0]  (!%p16118_p11), %s16120_s10, 64, %s567_s25, [#allocation19]  }
 0x183   : > { %s13817_s23 = smov [#allocation23]   ;;  %s13818_s18 = smov [#allocation26]  }
 0x184   : > { %s588_s17 = sshll.u32 %s13817_s23, 4  ;;  %s612_s6 = sshll.u32 %s13818_s18, 4  ;;  %s589_s17 = int_to_ptr.vmem [resolvable:$true] %s588_s17  ;;  %s613_s6 = int_to_ptr.vmem [resolvable:$true] %s612_s6 }
 0x185   : > { %s13490_s15 = scalar_lea.hbm %s16043_s12, 64 }
 0x186   : > { %p13491_p13 = scmp.ne.s32.totalorder %s16043_s12, %s13490_s15  ;;  %p13497_p2 = scmp.lt.u32.totalorder %s13490_s15, %s16043_s12 }
 0x188   : > { %p13493_p10 = pnand %p13491_p13, %p16117_p4 }
 0x18a   : > { %p13494_p12 = pneg %p13493_p10 }
 0x18c   : > { %p13499_p0 = pnand %p13497_p2, %p13494_p12 }
 0x18e   : > { %13502 = shalt.err (!%p13499_p0)
}
 0x18f   : > { %s13503_s25 = scalar_lea.vmem %s589_s17, 64  ;;  %p13511_p6 = scmp.lt.s32.totalorder %s589_s17, %s589_s17 }
 0x190   : > { %p13504_p5 = scmp.ne.s32.totalorder %s589_s17, %s13503_s25  ;;  %p13512_p8 = scmp.lt.s32.totalorder %s13503_s25, %s13503_s25 }
 0x192   : > { %p13506_p9 = pnand %p13504_p5, %p16117_p4  ;;  %p13513_p7 = por %p13512_p8, %p13511_p6 }
 0x194   : > { %p13507_p3 = pneg %p13506_p9 }
 0x196   : > { %p13514_p1 = pnand %p13513_p7, %p13507_p3 }
 0x198   : > { %13517 = shalt.err (!%p13514_p1)
}
 0x199   : > { %12473 = dma.hbm_to_vmem [thread:$0]  (!%p16118_p11), %s16043_s12, 64, %s589_s17, [#allocation22]  }
 0x19a   : > { %s16121_s19 = sld [smem:[#allocation62_spill]] }
 0x1a0   : > { %s13518_s15 = scalar_lea.hbm %s16121_s19, 16 }
 0x1a1   : > { %p13519_p13 = scmp.ne.s32.totalorder %s16121_s19, %s13518_s15  ;;  %p13525_p2 = scmp.lt.u32.totalorder %s13518_s15, %s16121_s19 }
 0x1a3   : > { %p13521_p10 = pnand %p13519_p13, %p16117_p4 }
 0x1a5   : > { %p13522_p12 = pneg %p13521_p10 }
 0x1a7   : > { %p13527_p0 = pnand %p13525_p2, %p13522_p12 }
 0x1a9   : > { %13530 = shalt.err (!%p13527_p0)
}
 0x1aa   : > { %s13531_s25 = scalar_lea.vmem %s613_s6, 16  ;;  %s13538_s17 = scalar_lea.vmem %s613_s6, 32 }
 0x1ab   : > { %p13532_p5 = scmp.ne.s32.totalorder %s613_s6, %s13531_s25  ;;  %p13539_p6 = scmp.lt.s32.totalorder %s613_s6, %s613_s6 }
 0x1ac   : > { %p13540_p8 = scmp.lt.s32.totalorder %s13538_s17, %s13531_s25 }
 0x1ad   : > { %p13534_p9 = pnand %p13532_p5, %p16117_p4 }
 0x1ae   : > { %p13541_p7 = por %p13540_p8, %p13539_p6 }
 0x1af   : > { %p13535_p3 = pneg %p13534_p9 }
 0x1b1   : > { %p13542_p1 = pnand %p13541_p7, %p13535_p3 }
 0x1b3   : > { %13545 = shalt.err (!%p13542_p1)
}
 0x1b4   : > { %12479 = dma.hbm_to_vmem [thread:$0]  (!%p16118_p11), %s16121_s19, 16, %s613_s6, [#allocation25]  }
 0x1b5   : > { %s13819_s18 = smov [#allocation29]   ;;  %s13820_s15 = smov [#allocation32]  }
 0x1b6   : > { %s634_s0 = sshll.u32 %s13819_s18, 4  ;;  %s658_s4 = sshll.u32 %s13820_s15, 4  ;;  %s635_s0 = int_to_ptr.vmem [resolvable:$true] %s634_s0  ;;  %s659_s4 = int_to_ptr.vmem [resolvable:$true] %s658_s4 }
 0x1b7   : > { %s16122_s14 = sld [smem:[#allocation64_spill]] }
 0x1bd   : > { %s13546_s8 = scalar_lea.hbm %s16122_s14, 16 }
 0x1be   : > { %p13547_p13 = scmp.ne.s32.totalorder %s16122_s14, %s13546_s8  ;;  %p13553_p2 = scmp.lt.u32.totalorder %s13546_s8, %s16122_s14 }
 0x1c0   : > { %p13549_p10 = pnand %p13547_p13, %p16117_p4 }
 0x1c2   : > { %p13550_p12 = pneg %p13549_p10 }
 0x1c4   : > { %p13555_p0 = pnand %p13553_p2, %p13550_p12 }
 0x1c6   : > { %13558 = shalt.err (!%p13555_p0)
}
 0x1c7   : > { %s13559_s6 = scalar_lea.vmem %s635_s0, 16  ;;  %s13566_s23 = scalar_lea.vmem %s635_s0, 32 }
 0x1c8   : > { %p13560_p5 = scmp.ne.s32.totalorder %s635_s0, %s13559_s6  ;;  %p13567_p6 = scmp.lt.s32.totalorder %s635_s0, %s635_s0 }
 0x1c9   : > { %p13568_p8 = scmp.lt.s32.totalorder %s13566_s23, %s13559_s6 }
 0x1ca   : > { %p13562_p9 = pnand %p13560_p5, %p16117_p4 }
 0x1cb   : > { %p13569_p7 = por %p13568_p8, %p13567_p6 }
 0x1cc   : > { %p13563_p3 = pneg %p13562_p9 }
 0x1ce   : > { %p13570_p1 = pnand %p13569_p7, %p13563_p3 }
 0x1d0   : > { %13573 = shalt.err (!%p13570_p1)
}
 0x1d1   : > { %12485 = dma.hbm_to_vmem [thread:$0]  (!%p16118_p11), %s16122_s14, 16, %s635_s0, [#allocation28]  }
 0x1d2   : > { %s16123_s26 = sld [smem:[#allocation66_spill]] }
 0x1d8   : > { %s13574_s13 = scalar_lea.hbm %s16123_s26, 16 }
 0x1d9   : > { %p13575_p13 = scmp.ne.s32.totalorder %s16123_s26, %s13574_s13  ;;  %p13581_p2 = scmp.lt.u32.totalorder %s13574_s13, %s16123_s26 }
 0x1db   : > { %p13577_p10 = pnand %p13575_p13, %p16117_p4 }
 0x1dd   : > { %p13578_p12 = pneg %p13577_p10 }
 0x1df   : > { %p13583_p0 = pnand %p13581_p2, %p13578_p12 }
 0x1e1   : > { %13586 = shalt.err (!%p13583_p0)
}
 0x1e2   : > { %s13587_s23 = scalar_lea.vmem %s659_s4, 16  ;;  %s13594_s0 = scalar_lea.vmem %s659_s4, 32 }
 0x1e3   : > { %p13588_p5 = scmp.ne.s32.totalorder %s659_s4, %s13587_s23  ;;  %p13595_p6 = scmp.lt.s32.totalorder %s659_s4, %s659_s4 }
 0x1e4   : > { %p13596_p8 = scmp.lt.s32.totalorder %s13594_s0, %s13587_s23 }
 0x1e5   : > { %p13590_p9 = pnand %p13588_p5, %p16117_p4 }
 0x1e6   : > { %p13597_p7 = por %p13596_p8, %p13595_p6 }
 0x1e7   : > { %p13591_p3 = pneg %p13590_p9 }
 0x1e9   : > { %p13598_p1 = pnand %p13597_p7, %p13591_p3 }
 0x1eb   : > { %13601 = shalt.err (!%p13598_p1)
}
 0x1ec   : > { %12491 = dma.hbm_to_vmem [thread:$0]  (!%p16118_p11), %s16123_s26, 16, %s659_s4, [#allocation31]  }
 0x1ed   : > { %s16124_s24 = sld [smem:[#allocation51_spill]]  ;;  %s694_s25 = scalar_lea.vmem [#allocation8], %s14164_s1 }
 0x1ee   : > { %s702_s17 = sshll.u32 %s694_s25, 4  ;;  %p16125_p13 = scmp.ne.s32.totalorder %s16113_s9, 0  ;;  %s703_s17 = int_to_ptr.vmem [resolvable:$true] %s702_s17 }
 0x1f3   : > { %s14365_s13 = scalar_lea.hbm %s16124_s24, %s14197_s11  ;;  %s13607_s4 = scalar_lea.hbm %s16124_s24, 384 }
 0x1f4   : > { %s13602_s27 = scalar_lea.hbm %s14365_s13, 192  ;;  %p13608_p11 = scmp.lt.u32.totalorder %s14365_s13, %s16124_s24 }
 0x1f5   : > { %p13603_p4 = scmp.ne.s32.totalorder %s14365_s13, %s13602_s27  ;;  %p13609_p2 = scmp.lt.u32.totalorder %s13607_s4, %s13602_s27 }
 0x1f6   : > { %p13611_p5 = scmp.lt.u32.totalorder %s13602_s27, %s14365_s13 }
 0x1f7   : > { %p13605_p10 = pnand %p13603_p4, %p16125_p13  ;;  %p13610_p0 = por %p13609_p2, %p13608_p11 }
 0x1f9   : > { %p13606_p12 = pneg %p13605_p10  ;;  %p13612_p9 = por %p13611_p5, %p13610_p0 }
 0x1fb   : > { %p13613_p3 = pnand %p13612_p9, %p13606_p12 }
 0x1fd   : > { %13616 = shalt.err (!%p13613_p3)
}
 0x1fe   : > { %s13617_s18 = scalar_lea.vmem %s703_s17, 192  ;;  %s13821_s15 = smov [#allocation8]  }
 0x1ff   : > { %p13618_p6 = scmp.ne.s32.totalorder %s703_s17, %s13617_s18  ;;  %s13622_s8 = sshll.u32 %s13821_s15, 4  ;;  %s13623_s8 = int_to_ptr.vmem [resolvable:$false] %s13622_s8 }
 0x200   : > { %s13624_s10 = scalar_lea.vmem %s13623_s8, 384  ;;  %p13625_p1 = scmp.lt.s32.totalorder %s703_s17, %s13623_s8 }
 0x201   : > { %p13620_p8 = pnand %p13618_p6, %p16125_p13  ;;  %p13626_p4 = scmp.lt.s32.totalorder %s13624_s10, %s13617_s18 }
 0x203   : > { %p13621_p7 = pneg %p13620_p8  ;;  %p13627_p10 = por %p13626_p4, %p13625_p1 }
 0x205   : > { %p13628_p2 = pnand %p13627_p10, %p13621_p7 }
 0x207   : > { %13631 = shalt.err (!%p13628_p2)
}
 0x208   : > { %p16126_p11 = scmp.ne.s32.totalorder %s16111_s22, 0  ;;  %s16127_s25 = scalar_lea.sflag [#allocation7], %s14145_s5 }
 0x209   : > { %s16128_s6 = sld [smem:[#allocation53_spill]]  ;;  %s732_s23 = scalar_lea.vmem [#allocation11], %s14164_s1 }
 0x20a   : > { %12498 = dma.hbm_to_vmem [thread:$0]  (!%p16126_p11), %s14365_s13, 192, %s703_s17, %s16127_s25  }
 0x20b   : > { %s740_s0 = sshll.u32 %s732_s23, 4  ;;  %s741_s0 = int_to_ptr.vmem [resolvable:$true] %s740_s0 }
 0x20f   : > { %s14391_s4 = scalar_lea.hbm %s16128_s6, %s14197_s11  ;;  %s13637_s13 = scalar_lea.hbm %s16128_s6, 384 }
 0x210   : > { %s13632_s18 = scalar_lea.hbm %s14391_s4, 192  ;;  %p13638_p9 = scmp.lt.u32.totalorder %s14391_s4, %s16128_s6 }
 0x211   : > { %p13633_p12 = scmp.ne.s32.totalorder %s14391_s4, %s13632_s18  ;;  %p13639_p3 = scmp.lt.u32.totalorder %s13637_s13, %s13632_s18 }
 0x212   : > { %p13641_p8 = scmp.lt.u32.totalorder %s13632_s18, %s14391_s4 }
 0x213   : > { %p13635_p0 = pnand %p13633_p12, %p16125_p13  ;;  %p13640_p6 = por %p13639_p3, %p13638_p9 }
 0x215   : > { %p13636_p5 = pneg %p13635_p0  ;;  %p13642_p7 = por %p13641_p8, %p13640_p6 }
 0x217   : > { %p13643_p1 = pnand %p13642_p7, %p13636_p5 }
 0x219   : > { %13646 = shalt.err (!%p13643_p1)
}
 0x21a   : > { %s13647_s11 = scalar_lea.vmem %s741_s0, 192  ;;  %s13822_s1 = smov [#allocation11]  }
 0x21b   : > { %p13648_p4 = scmp.ne.s32.totalorder %s741_s0, %s13647_s11  ;;  %s13652_s25 = sshll.u32 %s13822_s1, 4  ;;  %s13653_s25 = int_to_ptr.vmem [resolvable:$false] %s13652_s25 }
 0x21c   : > { %s13654_s27 = scalar_lea.vmem %s13653_s25, 384  ;;  %p13655_p12 = scmp.lt.s32.totalorder %s741_s0, %s13653_s25 }
 0x21d   : > { %p13650_p10 = pnand %p13648_p4, %p16125_p13  ;;  %p13656_p0 = scmp.lt.s32.totalorder %s13654_s27, %s13647_s11 }
 0x21f   : > { %p13651_p2 = pneg %p13650_p10  ;;  %p13657_p11 = por %p13656_p0, %p13655_p12 }
 0x221   : > { %p13658_p3 = pnand %p13657_p11, %p13651_p2 }
 0x223   : > { %13661 = shalt.err (!%p13658_p3)
}
 0x224   : > { %p16129_p9 = scmp.ne.s32.totalorder %s16111_s22, 0  ;;  %s16130_s7 = scalar_lea.sflag [#allocation10], %s14145_s5 }
 0x225   : > { %s12375_s23 = smul.u32 6144, %s14148_s3  ;;  %s16131_s13 = sld [smem:[#allocation54_spill]] }
 0x226   : > { %12504 = dma.hbm_to_vmem [thread:$0]  (!%p16129_p9), %s14391_s4, 192, %s741_s0, %s16130_s7  }
 0x227   : > { %s12269_s18 = smul.u32 98304, %s13796_s21  ;;  %s751_s10 = scalar_lea.vmem [#allocation12], %s12375_s23 }
 0x228   : > { %s759_s11 = sshll.u32 %s751_s10, 4  ;;  %s748_s1 = scalar_lea.sflag [#allocation13], %s14145_s5  ;;  %s14420_s11 = int_to_ptr.vmem [resolvable:$true] %s759_s11 }
 0x22b   : > { %s14418_s17 = scalar_lea.hbm %s16131_s13, %s12269_s18  ;;  %s13667_s4 = scalar_lea.hbm %s16131_s13, 196608 }
 0x22c   : > { %s13662_s25 = scalar_lea.hbm %s14418_s17, 98304  ;;  %p13668_p8 = scmp.lt.u32.totalorder %s14418_s17, %s16131_s13 }
 0x22d   : > { %p13663_p11 = scmp.ne.s32.totalorder %s14418_s17, %s13662_s25  ;;  %p13669_p7 = scmp.lt.u32.totalorder %s13667_s4, %s13662_s25 }
 0x22e   : > { %p13671_p4 = scmp.lt.u32.totalorder %s13662_s25, %s14418_s17 }
 0x22f   : > { %p13665_p5 = pnand %p13663_p11, %p16125_p13  ;;  %p13670_p1 = por %p13669_p7, %p13668_p8 }
 0x231   : > { %p13666_p6 = pneg %p13665_p5  ;;  %p13672_p10 = por %p13671_p4, %p13670_p1 }
 0x233   : > { %p13673_p2 = pnand %p13672_p10, %p13666_p6 }
 0x235   : > { %13676 = shalt.err (!%p13673_p2)
}
 0x236   : > { %s13677_s7 = scalar_lea.vmem %s14420_s11, 98304  ;;  %s13823_s23 = smov [#allocation12]  }
 0x237   : > { %p13678_p12 = scmp.ne.s32.totalorder %s14420_s11, %s13677_s7  ;;  %s13682_s18 = sshll.u32 %s13823_s23, 4  ;;  %s13683_s18 = int_to_ptr.vmem [resolvable:$false] %s13682_s18 }
 0x238   : > { %s13684_s15 = scalar_lea.vmem %s13683_s18, 196608  ;;  %p13685_p11 = scmp.lt.s32.totalorder %s14420_s11, %s13683_s18 }
 0x239   : > { %p13680_p0 = pnand %p13678_p12, %p16125_p13  ;;  %p13686_p5 = scmp.lt.s32.totalorder %s13684_s15, %s13677_s7 }
 0x23b   : > { %p13681_p3 = pneg %p13680_p0  ;;  %p13687_p8 = por %p13686_p5, %p13685_p11 }
 0x23d   : > { %p13688_p7 = pnand %p13687_p8, %p13681_p3 }
 0x23f   : > { %13691 = shalt.err (!%p13688_p7)
}
 0x240   : > { %s13824_s8 = smov 512   ;;  %s13825_s10 = smov 32  }
 0x241   : > { %12507 = dma.hbm_to_vmem [thread:$0]  (!%p16129_p9), %s14418_s17, 98304, %s14420_s11, %s748_s1, %s13824_s8, %s13824_s8, %s13825_s10  }
 0x242   : > { %s16132_s9 = sld [smem:[#allocation46_spill]] }
 0x248   : > { %p16133_p13 = scmp.ne.s32.totalorder %s16132_s9, 0 }
 0x24a   : > { %771 = sbr.rel (%p16133_p13) target bundleno = 3329 (0xd01), region = 96 }
 0x251   : > { %p16134_p6 = scmp.eq.s32.totalorder %s13953_s2, 0 }
 0x253   : > { %13735 = dma.done.wait (%p16134_p6), [#allocation4], 128   ;;  %p16135_p1 = pmov %p16134_p6 }
 0x254   : > { %s777_s25 = sand.u32 1, %s13953_s2   ;;  %s779_s21 = sand.u32 1, %s13788_s30  }
 0x255   : > { %13737 = vsyncadd (%p16135_p1), [#allocation4], 4294967168  ;;  %s12376_s3 = smul.u32 384, %s779_s21  ;;  %s778_s4 = scalar_lea.sflag [#allocation7], %s777_s25 }
 0x256   : > { %p16136_p4 = scmp.ne.s32.totalorder %s16110_s16, 0 }
 0x257   : > { %s14454_s0 = scalar_lea.vmem [#allocation6], %s12376_s3 }
 0x258   : > { %13739 = dma.done.wait (%p16136_p4), %s778_s4, 6336  }
 0x259   : > { %13741 = vsyncadd (%p16136_p4), %s778_s4, 4294960960  ;;  %s14460_s5 = smul.u32 12, %s779_s21  ;;  %s796_s17 = scalar_lea.sflag [#allocation10], %s777_s25 }
 0x25b   : > { %s790_s22 = scalar_lea.vmem [#allocation8], %s14460_s5  ;;  %s799_s11 = scalar_lea.vmem [#allocation9], %s14460_s5 }
 0x25c   : > { %13743 = dma.done.wait (%p16136_p4), %s796_s17, 384  }
 0x25d   : > { %13745 = vsyncadd (%p16136_p4), %s796_s17, 4294966912  ;;  %s12378_s1 = smul.u32 6144, %s779_s21  ;;  %s808_s27 = scalar_lea.vmem [#allocation11], %s14460_s5 }
 0x25e   : > { %s814_s7 = scalar_lea.sflag [#allocation13], %s777_s25 }
 0x25f   : > { %s14469_s23 = scalar_lea.vmem [#allocation12], %s12378_s1 }
 0x260   : > { %13747 = dma.done.wait (%p16136_p4), %s814_s7, 98304  }
 0x261   : > { %13749 = vsyncadd (%p16136_p4), %s814_s7, 4294868992  ;;  %p16137_p9 = pmov %p16135_p1 }
 0x262   : > { %p16138_p10 = pmov %p16135_p1 }
 0x263   : > { %13751 = dma.done.wait (%p16137_p9), [#allocation13], 128  }
 0x264   : > { %13753 = vsyncadd (%p16138_p10), [#allocation13], 4294967168  ;;  %p16139_p2 = pmov %p16135_p1 }
 0x265   : > { %p16140_p12 = pmov %p16135_p1 }
 0x266   : > { %13755 = dma.done.wait (%p16139_p2), [#allocation16], 256  }
 0x267   : > { %13757 = vsyncadd (%p16140_p12), [#allocation16], 4294967040  ;;  %p16141_p0 = pmov %p16135_p1 }
 0x269   : > { %13759 = dma.done.wait (%p16141_p0), [#allocation19], 32832   ;;  %p16142_p3 = pmov %p16141_p0 }
 0x26a   : > { %p16143_p11 = pmov %p16141_p0 }
 0x26b   : > { %13761 = vsyncadd (%p16142_p3), [#allocation19], 4294934464 }
 0x26c   : > { %13763 = dma.done.wait (%p16143_p11), [#allocation22], 128   ;;  %p16144_p5 = pmov %p16141_p0 }
 0x26d   : > { %p16145_p8 = pmov %p16141_p0 }
 0x26e   : > { %13765 = vsyncadd (%p16144_p5), [#allocation22], 4294967168 }
 0x26f   : > { %13767 = dma.done.wait (%p16145_p8), [#allocation25], 4112   ;;  %p16146_p7 = pmov %p16141_p0 }
 0x270   : > { %p16147_p13 = pmov %p16141_p0 }
 0x271   : > { %13769 = vsyncadd (%p16146_p7), [#allocation25], 4294963184 }
 0x272   : > { %13771 = dma.done.wait (%p16147_p13), [#allocation28], 32   ;;  %p16148_p6 = pmov %p16141_p0 }
 0x273   : > { %p16149_p1 = pmov %p16141_p0 }
 0x274   : > { %13773 = vsyncadd (%p16148_p6), [#allocation28], 4294967264 }
 0x275   : > { %13775 = dma.done.wait (%p16149_p1), [#allocation31], 1040   ;;  %p16150_p4 = pmov %p16141_p0 }
 0x276   : > { %p16151_p9 = scmp.ne.s32.totalorder %s13953_s2, 0 }
 0x277   : > { %13777 = vsyncadd (%p16150_p4), [#allocation31], 4294966256  ;;  %v13826_v0 = vmov (!%p16151_p9), 0.0  }
 0x278   : > { %948 = sbr.rel (%p16151_p9) target bundleno = 639 (0x27f), region = 176  ;;  %949 = vst [vmem:[#allocation2] sm:$0xff] (!%p16151_p9), %v13826_v0  ;;  %950 = vst [vmem:[#allocation2 + $0x8] sm:$0xff] (!%p16151_p9), %v13826_v0 }
 0x279   : > { %951 = vst [vmem:[#allocation2 + $0x10] sm:$0xff] (!%p16151_p9), %v13826_v0  ;;  %952 = vst [vmem:[#allocation2 + $0x18] sm:$0xff] (!%p16151_p9), %v13826_v0 }
 0x27a   : > { %953 = vst [vmem:[#allocation2 + $0x20] sm:$0xff] (!%p16151_p9), %v13826_v0  ;;  %954 = vst [vmem:[#allocation2 + $0x28] sm:$0xff] (!%p16151_p9), %v13826_v0 }
 0x27b   : > { %955 = vst [vmem:[#allocation2 + $0x30] sm:$0xff] (!%p16151_p9), %v13826_v0  ;;  %956 = vst [vmem:[#allocation2 + $0x38] sm:$0xff] (!%p16151_p9), %v13826_v0 }
 0x27f PF: > { %v12600_v1 = vld [vmem:[%s14454_s0 + $0x4] ss:$48 sps:$4 sm:$0xff]   ;;  %v12602_v2 = vld [vmem:[%s14454_s0 + $0xc] ss:$48 sps:$4 sm:$0xff]   ;;  %v13827_v3 = vmov 0   ;;  %vm1311_vm0 = vcmask 523264  }
 0x280   : > { %1347 = vmatprep.mubr.bf16.mxu0 %v13827_v3  ;;  %1388 = vmatprep.mubr.bf16.mxu1 %v13827_v3  ;;  %v12604_v4 = vld [vmem:[%s14454_s0] ss:$48 sps:$4 sm:$0xff]   ;;  %v12605_v5 = vld [vmem:[%s14454_s0 + $0x8] ss:$48 sps:$4 sm:$0xff]   ;;  %v12606_v6 = vld [vmem:[%s14454_s0 + $0x64] ss:$48 sps:$4 sm:$0xff]  }
 0x281   : > { %1315 = vmatprep.subr.bf16.mxu0 %v12600_v1  ;;  %1356 = vmatprep.subr.bf16.mxu1 %v12602_v2  ;;  %v12608_v7 = vld [vmem:[%s14454_s0 + $0x6c] ss:$48 sps:$4 sm:$0xff]   ;;  %v12610_v8 = vld [vmem:[%s14454_s0 + $0x60] ss:$48 sps:$4 sm:$0xff]   ;;  %v12611_v9 = vld [vmem:[%s14454_s0 + $0x68] ss:$48 sps:$4 sm:$0xff]  }
 0x282   : > { %1316 = vmatpush1.bf16.msra.mxu0 %v12604_v4  ;;  %1357 = vmatpush1.bf16.msra.mxu1 %v12605_v5  ;;  %v12612_v10 = vld [vmem:[%s14454_s0 + $0xc4] ss:$48 sps:$4 sm:$0xff]   ;;  %v12614_v11 = vld [vmem:[%s14454_s0 + $0xcc] ss:$48 sps:$4 sm:$0xff]   ;;  %v12616_v12 = vld [vmem:[%s14454_s0 + $0xc0] ss:$48 sps:$4 sm:$0xff]  }
 0x283   : > { %1317 = vmatprep.subr.bf16.mxu0 %v12606_v6  ;;  %1358 = vmatprep.subr.bf16.mxu1 %v12608_v7  ;;  %v12617_v13 = vld [vmem:[%s14454_s0 + $0xc8] ss:$48 sps:$4 sm:$0xff]   ;;  %v12618_v14 = vld [vmem:[%s14454_s0 + $0x124] ss:$48 sps:$4 sm:$0xff]   ;;  %v12620_v15 = vld [vmem:[%s14454_s0 + $0x12c] ss:$48 sps:$4 sm:$0xff]  }
 0x284   : > { %v12622_v16 = vld [vmem:[%s14454_s0 + $0x120] ss:$48 sps:$4 sm:$0xff]   ;;  %v12623_v17 = vld [vmem:[%s14454_s0 + $0x128] ss:$48 sps:$4 sm:$0xff]   ;;  %v12626_v19 = vld [vmem:[%s14454_s0 + $0x14] ss:$48 sps:$4 sm:$0xff]  }
 0x285   : > { %v957_v18 = vld [vmem:[#allocation3] sm:$0xff]  ;;  %v12624_v22 = vld [vmem:[%s14454_s0 + $0x10] ss:$48 sps:$4 sm:$0xff]   ;;  %v12632_v24 = vld [vmem:[%s14454_s0 + $0x74] ss:$48 sps:$4 sm:$0xff]   ;;  %p11960_p10 = scmp.ne.s32.totalorder %s13953_s2, 1 }
 0x286   : > { %1318 = vmatpush1.bf16.msra.mxu0 %v12610_v8  ;;  %1359 = vmatpush1.bf16.msra.mxu1 %v12611_v9  ;;  %v12629_v20 = vld [vmem:[%s14454_s0 + $0x1c] ss:$48 sps:$4 sm:$0xff]   ;;  %v14525_v21 = vpack.c.bf16 %v957_v18, %v957_v18  ;;  %v12627_v23 = vld [vmem:[%s14454_s0 + $0x18] ss:$48 sps:$4 sm:$0xff]   ;;  %v12630_v26 = vld [vmem:[%s14454_s0 + $0x70] ss:$48 sps:$4 sm:$0xff]  }
 0x287   : > { %1319 = vmatprep.subr.bf16.mxu0 %v12612_v10  ;;  %1360 = vmatprep.subr.bf16.mxu1 %v12614_v11  ;;  %v12635_v25 = vld [vmem:[%s14454_s0 + $0x7c] ss:$48 sps:$4 sm:$0xff]   ;;  %v12633_v27 = vld [vmem:[%s14454_s0 + $0x78] ss:$48 sps:$4 sm:$0xff]   ;;  %v12638_v28 = vld [vmem:[%s14454_s0 + $0xd4] ss:$48 sps:$4 sm:$0xff]  }
 0x288   : > { %v12641_v29 = vld [vmem:[%s14454_s0 + $0xdc] ss:$48 sps:$4 sm:$0xff]   ;;  %v12636_v30 = vld [vmem:[%s14454_s0 + $0xd0] ss:$48 sps:$4 sm:$0xff]   ;;  %v12639_v31 = vld [vmem:[%s14454_s0 + $0xd8] ss:$48 sps:$4 sm:$0xff]  }
 0x289   : > { %v12644_v32 = vld [vmem:[%s14454_s0 + $0x134] ss:$48 sps:$4 sm:$0xff]   ;;  %v12647_v33 = vld [vmem:[%s14454_s0 + $0x13c] ss:$48 sps:$4 sm:$0xff]   ;;  %v12642_v34 = vld [vmem:[%s14454_s0 + $0x130] ss:$48 sps:$4 sm:$0xff]  }
 0x28a   : > { %1320 = vmatpush1.bf16.msra.mxu0 %v12616_v12  ;;  %1361 = vmatpush1.bf16.msra.mxu1 %v12617_v13  ;;  %v12645_v35 = vld [vmem:[%s14454_s0 + $0x138] ss:$48 sps:$4 sm:$0xff]   ;;  %v12650_v36 = vld [vmem:[%s14454_s0 + $0x24] ss:$48 sps:$4 sm:$0xff]   ;;  %v12653_v37 = vld [vmem:[%s14454_s0 + $0x2c] ss:$48 sps:$4 sm:$0xff]  }
 0x28b   : > { %1321 = vmatprep.subr.bf16.mxu0 %v12618_v14  ;;  %1362 = vmatprep.subr.bf16.mxu1 %v12620_v15  ;;  %v12648_v38 = vld [vmem:[%s14454_s0 + $0x20] ss:$48 sps:$4 sm:$0xff]   ;;  %v12651_v39 = vld [vmem:[%s14454_s0 + $0x28] ss:$48 sps:$4 sm:$0xff]   ;;  %v12656_v40 = vld [vmem:[%s14454_s0 + $0x84] ss:$48 sps:$4 sm:$0xff]  }
 0x28c   : > { %v12659_v41 = vld [vmem:[%s14454_s0 + $0x8c] ss:$48 sps:$4 sm:$0xff]   ;;  %v12654_v42 = vld [vmem:[%s14454_s0 + $0x80] ss:$48 sps:$4 sm:$0xff]   ;;  %v12657_v43 = vld [vmem:[%s14454_s0 + $0x88] ss:$48 sps:$4 sm:$0xff]  }
 0x28d   : > { %v12662_v44 = vld [vmem:[%s14454_s0 + $0xe4] ss:$48 sps:$4 sm:$0xff]   ;;  %v12665_v45 = vld [vmem:[%s14454_s0 + $0xec] ss:$48 sps:$4 sm:$0xff]   ;;  %v12660_v46 = vld [vmem:[%s14454_s0 + $0xe0] ss:$48 sps:$4 sm:$0xff]  }
 0x28e   : > { %1322 = vmatpush1.bf16.msra.mxu0 %v12622_v16  ;;  %1363 = vmatpush1.bf16.msra.mxu1 %v12623_v17  ;;  %v12663_v47 = vld [vmem:[%s14454_s0 + $0xe8] ss:$48 sps:$4 sm:$0xff]   ;;  %v12668_v48 = vld [vmem:[%s14454_s0 + $0x144] ss:$48 sps:$4 sm:$0xff]   ;;  %v12671_v49 = vld [vmem:[%s14454_s0 + $0x14c] ss:$48 sps:$4 sm:$0xff]  }
 0x28f   : > { %1397 = vmatprep.subr.bf16.mxu0 %v12626_v19  ;;  %1438 = vmatprep.subr.bf16.mxu1 %v12629_v20  ;;  %v12666_v50 = vld [vmem:[%s14454_s0 + $0x140] ss:$48 sps:$4 sm:$0xff]   ;;  %v12669_v51 = vld [vmem:[%s14454_s0 + $0x148] ss:$48 sps:$4 sm:$0xff]   ;;  %vm13830_vm1 = vmmov (!%p11960_p10), 0  }
 0x290   : > { %v2152_v52 = vld [vmem:[%s14469_s23] sm:$0xff] }
 0x291   : > { %11186 = vmatmul.mubr.msk.bf16.vlgmr.msra.gmra.mrb[0].mxu0 %vm1311_vm0, %v14525_v21  ;;  %11187 = vmatmul.mubr.msk.bf16.vlgmr.msra.gmra.mrb[0].mxu1 %vm1311_vm0, %v14525_v21  ;;  %v2156_v53 = vld [vmem:[%s14469_s23 + $0x20] sm:$0xff] }
 0x292   : > { %1398 = vmatpush1.bf16.msra.mxu0 %v12624_v22  ;;  %1439 = vmatpush1.bf16.msra.mxu1 %v12627_v23  ;;  %v2280_v54 = vld [vmem:[%s14469_s23 + $0x400] sm:$0xff]  ;;  %v11193_v55 = vcombine.high %v2152_v52, %v2156_v53  ;;  %v11192_v57 = vcombine.low %v2152_v52, %v2156_v53 }
 0x293   : > { %1399 = vmatprep.subr.bf16.mxu0 %v12632_v24  ;;  %1440 = vmatprep.subr.bf16.mxu1 %v12635_v25  ;;  %v2284_v56 = vld [vmem:[%s14469_s23 + $0x420] sm:$0xff] }
 0x294   : > { %1429 = vmatprep.mubr.bf16.mxu0 %v13827_v3  ;;  %1470 = vmatprep.mubr.bf16.mxu1 %v13827_v3  ;;  %v11320_v58 = vcombine.low %v2280_v54, %v2284_v56  ;;  %v11321_v59 = vcombine.high %v2280_v54, %v2284_v56  ;;  %v2160_v60 = vld [vmem:[%s14469_s23 + $0x40] sm:$0xff] }
 0x295   : > { %v2164_v61 = vld [vmem:[%s14469_s23 + $0x60] sm:$0xff] }
 0x296   : > { %1400 = vmatpush1.bf16.msra.mxu0 %v12630_v26  ;;  %1441 = vmatpush1.bf16.msra.mxu1 %v12633_v27  ;;  %v2288_v62 = vld [vmem:[%s14469_s23 + $0x440] sm:$0xff]  ;;  %v11201_v63 = vcombine.high %v2160_v60, %v2164_v61  ;;  %v11200_v1 = vcombine.low %v2160_v60, %v2164_v61 }
 0x297   : > { %1401 = vmatprep.subr.bf16.mxu0 %v12638_v28  ;;  %1442 = vmatprep.subr.bf16.mxu1 %v12641_v29  ;;  %v2292_v0 = vld [vmem:[%s14469_s23 + $0x460] sm:$0xff] }
 0x298   : > { %v11328_v2 = vcombine.low %v2288_v62, %v2292_v0  ;;  %v2168_v4 = vld [vmem:[%s14469_s23 + $0x80] sm:$0xff] }
 0x299   : > { %v2172_v5 = vld [vmem:[%s14469_s23 + $0xa0] sm:$0xff] }
 0x29a   : > { %1402 = vmatpush1.bf16.msra.mxu0 %v12636_v30  ;;  %1443 = vmatpush1.bf16.msra.mxu1 %v12639_v31  ;;  %v2296_v6 = vld [vmem:[%s14469_s23 + $0x480] sm:$0xff]  ;;  %v11209_v7 = vcombine.high %v2168_v4, %v2172_v5  ;;  %v11208_v9 = vcombine.low %v2168_v4, %v2172_v5 }
 0x29b   : > { %1403 = vmatprep.subr.bf16.mxu0 %v12644_v32  ;;  %1444 = vmatprep.subr.bf16.mxu1 %v12647_v33  ;;  %v2300_v8 = vld [vmem:[%s14469_s23 + $0x4a0] sm:$0xff] }
 0x29c   : > { %v11336_v10 = vcombine.low %v2296_v6, %v2300_v8  ;;  %v11337_v11 = vcombine.high %v2296_v6, %v2300_v8  ;;  %v2176_v12 = vld [vmem:[%s14469_s23 + $0xc0] sm:$0xff] }
 0x29d   : > { %v2180_v13 = vld [vmem:[%s14469_s23 + $0xe0] sm:$0xff] }
 0x29e   : > { %1404 = vmatpush1.bf16.msra.mxu0 %v12642_v34  ;;  %1445 = vmatpush1.bf16.msra.mxu1 %v12645_v35  ;;  %v2304_v14 = vld [vmem:[%s14469_s23 + $0x4c0] sm:$0xff]  ;;  %v11217_v15 = vcombine.high %v2176_v12, %v2180_v13  ;;  %v11216_v17 = vcombine.low %v2176_v12, %v2180_v13 }
 0x29f   : > { %1479 = vmatprep.subr.bf16.mxu0 %v12650_v36  ;;  %1520 = vmatprep.subr.bf16.mxu1 %v12653_v37  ;;  %v2308_v16 = vld [vmem:[%s14469_s23 + $0x4e0] sm:$0xff] }
 0x2a0   : > { %v11344_v18 = vcombine.low %v2304_v14, %v2308_v16  ;;  %v11345_v19 = vcombine.high %v2304_v14, %v2308_v16  ;;  %v2184_v20 = vld [vmem:[%s14469_s23 + $0x100] sm:$0xff] }
 0x2a1   : > { %11188 = vmatmul.mubr.msk.bf16.vlgmr.msra.gmra.mrb[4].mxu0 %vm1311_vm0, %v14525_v21  ;;  %11189 = vmatmul.mubr.msk.bf16.vlgmr.msra.gmra.mrb[4].mxu1 %vm1311_vm0, %v14525_v21  ;;  %v2312_v22 = vld [vmem:[%s14469_s23 + $0x500] sm:$0xff] }
 0x2a2   : > { %1480 = vmatpush1.bf16.msra.mxu0 %v12648_v38  ;;  %1521 = vmatpush1.bf16.msra.mxu1 %v12651_v39  ;;  %v2316_v24 = vld [vmem:[%s14469_s23 + $0x520] sm:$0xff] }
 0x2a3   : > { %1481 = vmatprep.subr.bf16.mxu0 %v12656_v40  ;;  %1522 = vmatprep.subr.bf16.mxu1 %v12659_v41  ;;  %v11352_v26 = vcombine.low %v2312_v22, %v2316_v24  ;;  %v11353_v27 = vcombine.high %v2312_v22, %v2316_v24  ;;  %v2192_v28 = vld [vmem:[%s14469_s23 + $0x140] sm:$0xff] }
 0x2a4   : > { %1511 = vmatprep.mubr.bf16.mxu0 %v13827_v3  ;;  %1552 = vmatprep.mubr.bf16.mxu1 %v13827_v3  ;;  %v11329_v3 = vcombine.high %v2288_v62, %v2292_v0  ;;  %v2196_v29 = vld [vmem:[%s14469_s23 + $0x160] sm:$0xff] }
 0x2a5   : > { %v2320_v30 = vld [vmem:[%s14469_s23 + $0x540] sm:$0xff]  ;;  %v11233_v31 = vcombine.high %v2192_v28, %v2196_v29  ;;  %v11232_v33 = vcombine.low %v2192_v28, %v2196_v29 }
 0x2a6   : > { %1482 = vmatpush1.bf16.msra.mxu0 %v12654_v42  ;;  %1523 = vmatpush1.bf16.msra.mxu1 %v12657_v43  ;;  %v2324_v32 = vld [vmem:[%s14469_s23 + $0x560] sm:$0xff] }
 0x2a7   : > { %1483 = vmatprep.subr.bf16.mxu0 %v12662_v44  ;;  %1524 = vmatprep.subr.bf16.mxu1 %v12665_v45  ;;  %v11360_v34 = vcombine.low %v2320_v30, %v2324_v32  ;;  %v11361_v35 = vcombine.high %v2320_v30, %v2324_v32  ;;  %v2200_v36 = vld [vmem:[%s14469_s23 + $0x180] sm:$0xff] }
 0x2a8   : > { %v2204_v37 = vld [vmem:[%s14469_s23 + $0x1a0] sm:$0xff] }
 0x2a9   : > { %v2328_v38 = vld [vmem:[%s14469_s23 + $0x580] sm:$0xff]  ;;  %v11241_v39 = vcombine.high %v2200_v36, %v2204_v37  ;;  %v11240_v41 = vcombine.low %v2200_v36, %v2204_v37 }
 0x2aa   : > { %1484 = vmatpush1.bf16.msra.mxu0 %v12660_v46  ;;  %1525 = vmatpush1.bf16.msra.mxu1 %v12663_v47  ;;  %v2332_v40 = vld [vmem:[%s14469_s23 + $0x5a0] sm:$0xff] }
 0x2ab   : > { %1485 = vmatprep.subr.bf16.mxu0 %v12668_v48  ;;  %1526 = vmatprep.subr.bf16.mxu1 %v12671_v49  ;;  %v11368_v42 = vcombine.low %v2328_v38, %v2332_v40  ;;  %v11369_v43 = vcombine.high %v2328_v38, %v2332_v40  ;;  %v2208_v44 = vld [vmem:[%s14469_s23 + $0x1c0] sm:$0xff] }
 0x2ac   : > { %v2212_v45 = vld [vmem:[%s14469_s23 + $0x1e0] sm:$0xff] }
 0x2ad   : > { %v2336_v46 = vld [vmem:[%s14469_s23 + $0x5c0] sm:$0xff]  ;;  %v11249_v47 = vcombine.high %v2208_v44, %v2212_v45  ;;  %v11248_v49 = vcombine.low %v2208_v44, %v2212_v45 }
 0x2ae   : > { %1486 = vmatpush1.bf16.msra.mxu0 %v12666_v50  ;;  %1527 = vmatpush1.bf16.msra.mxu1 %v12669_v51  ;;  %v2340_v48 = vld [vmem:[%s14469_s23 + $0x5e0] sm:$0xff] }
 0x2af   : > { %6760 = vmatprep.subr.bf16.mxu0 %v11193_v55  ;;  %6801 = vmatprep.subr.bf16.mxu1 %v11321_v59  ;;  %v11376_v50 = vcombine.low %v2336_v46, %v2340_v48  ;;  %v11377_v51 = vcombine.high %v2336_v46, %v2340_v48  ;;  %v2216_v52 = vld [vmem:[%s14469_s23 + $0x200] sm:$0xff] }
 0x2b0   : > { %v2220_v53 = vld [vmem:[%s14469_s23 + $0x220] sm:$0xff] }
 0x2b1   : > { %11190 = vmatmul.mubr.msk.bf16.vlgmr.msra.gmra.mrb[8].mxu0 %vm1311_vm0, %v14525_v21  ;;  %11191 = vmatmul.mubr.msk.bf16.vlgmr.msra.gmra.mrb[8].mxu1 %vm1311_vm0, %v14525_v21  ;;  %v2188_v21 = vld [vmem:[%s14469_s23 + $0x120] sm:$0xff]  ;;  %v11257_v55 = vcombine.high %v2216_v52, %v2220_v53 }
 0x2b2   : > { %6761 = vmatpush1.bf16.msra.mxu0 %v11192_v57  ;;  %6802 = vmatpush1.bf16.msra.mxu1 %v11320_v58  ;;  %v11225_v23 = vcombine.high %v2184_v20, %v2188_v21  ;;  %v11224_v25 = vcombine.low %v2184_v20, %v2188_v21  ;;  %v2344_v54 = vld [vmem:[%s14469_s23 + $0x600] sm:$0xff]  ;;  %v11256_v57 = vcombine.low %v2216_v52, %v2220_v53 }
 0x2b3   : > { %6762 = vmatprep.subr.bf16.mxu0 %v11201_v63  ;;  %6803 = vmatprep.subr.bf16.mxu1 %v11329_v3  ;;  %v2348_v56 = vld [vmem:[%s14469_s23 + $0x620] sm:$0xff] }
 0x2b4   : > { %v11384_v58 = vcombine.low %v2344_v54, %v2348_v56  ;;  %v11385_v59 = vcombine.high %v2344_v54, %v2348_v56  ;;  %v2224_v60 = vld [vmem:[%s14469_s23 + $0x240] sm:$0xff] }
 0x2b5   : > { %v2228_v61 = vld [vmem:[%s14469_s23 + $0x260] sm:$0xff] }
 0x2b6   : > { %6763 = vmatpush1.bf16.msra.mxu0 %v11200_v1  ;;  %6804 = vmatpush1.bf16.msra.mxu1 %v11328_v2  ;;  %v2352_v62 = vld [vmem:[%s14469_s23 + $0x640] sm:$0xff]  ;;  %v11265_v63 = vcombine.high %v2224_v60, %v2228_v61  ;;  %v11264_v1 = vcombine.low %v2224_v60, %v2228_v61  ;;  %v16076_v60 = vlaneseq }
 0x2b7   : > { %6764 = vmatprep.subr.bf16.mxu0 %v11209_v7  ;;  %6805 = vmatprep.subr.bf16.mxu1 %v11337_v11  ;;  %v2356_v0 = vld [vmem:[%s14469_s23 + $0x660] sm:$0xff] }
 0x2b8   : > { %v11392_v2 = vcombine.low %v2352_v62, %v2356_v0  ;;  %v11393_v3 = vcombine.high %v2352_v62, %v2356_v0  ;;  %v2232_v4 = vld [vmem:[%s14469_s23 + $0x280] sm:$0xff]  ;;  %v14658_v61 = vshrl.u32 %v16076_v60, 7 }
 0x2b9   : > { %v2236_v5 = vld [vmem:[%s14469_s23 + $0x2a0] sm:$0xff] }
 0x2ba   : > { %6765 = vmatpush1.bf16.msra.mxu0 %v11208_v9  ;;  %6806 = vmatpush1.bf16.msra.mxu1 %v11336_v10  ;;  %v2360_v6 = vld [vmem:[%s14469_s23 + $0x680] sm:$0xff]  ;;  %v11273_v7 = vcombine.high %v2232_v4, %v2236_v5  ;;  %v11272_v9 = vcombine.low %v2232_v4, %v2236_v5  ;;  %v14661_v62 = vsub.s32 0, %v14658_v61 }
 0x2bb   : > { %6766 = vmatprep.subr.bf16.mxu0 %v11217_v15  ;;  %6807 = vmatprep.subr.bf16.mxu1 %v11345_v19  ;;  %v2364_v8 = vld [vmem:[%s14469_s23 + $0x6a0] sm:$0xff] }
 0x2bc   : > { %v11400_v10 = vcombine.low %v2360_v6, %v2364_v8  ;;  %v11401_v11 = vcombine.high %v2360_v6, %v2364_v8  ;;  %v2240_v12 = vld [vmem:[%s14469_s23 + $0x2c0] sm:$0xff] }
 0x2bd   : > { %v2244_v13 = vld [vmem:[%s14469_s23 + $0x2e0] sm:$0xff] }
 0x2be   : > { %6767 = vmatpush1.bf16.msra.mxu0 %v11216_v17  ;;  %6808 = vmatpush1.bf16.msra.mxu1 %v11344_v18  ;;  %v2368_v14 = vld [vmem:[%s14469_s23 + $0x6c0] sm:$0xff]  ;;  %v11281_v15 = vcombine.high %v2240_v12, %v2244_v13  ;;  %v11280_v17 = vcombine.low %v2240_v12, %v2244_v13 }
 0x2bf   : > { %6768 = vmatprep.subr.bf16.mxu0 %v11225_v23  ;;  %6809 = vmatprep.subr.bf16.mxu1 %v11353_v27  ;;  %v2372_v16 = vld [vmem:[%s14469_s23 + $0x6e0] sm:$0xff] }
 0x2c0   : > { %v11408_v18 = vcombine.low %v2368_v14, %v2372_v16  ;;  %v11409_v19 = vcombine.high %v2368_v14, %v2372_v16  ;;  %v2248_v20 = vld [vmem:[%s14469_s23 + $0x300] sm:$0xff] }
 0x2c1   : > { %v2252_v21 = vld [vmem:[%s14469_s23 + $0x320] sm:$0xff] }
 0x2c2   : > { %6769 = vmatpush1.bf16.msra.mxu0 %v11224_v25  ;;  %6810 = vmatpush1.bf16.msra.mxu1 %v11352_v26  ;;  %v2376_v22 = vld [vmem:[%s14469_s23 + $0x700] sm:$0xff]  ;;  %v11289_v23 = vcombine.high %v2248_v20, %v2252_v21  ;;  %v11288_v25 = vcombine.low %v2248_v20, %v2252_v21 }
 0x2c3   : > { %6770 = vmatprep.subr.bf16.mxu0 %v11233_v31  ;;  %6811 = vmatprep.subr.bf16.mxu1 %v11361_v35  ;;  %v2380_v24 = vld [vmem:[%s14469_s23 + $0x720] sm:$0xff] }
 0x2c4   : > { %v11416_v26 = vcombine.low %v2376_v22, %v2380_v24  ;;  %v11417_v27 = vcombine.high %v2376_v22, %v2380_v24  ;;  %v2256_v28 = vld [vmem:[%s14469_s23 + $0x340] sm:$0xff] }
 0x2c5   : > { %v2260_v29 = vld [vmem:[%s14469_s23 + $0x360] sm:$0xff] }
 0x2c6   : > { %6771 = vmatpush1.bf16.msra.mxu0 %v11232_v33  ;;  %6812 = vmatpush1.bf16.msra.mxu1 %v11360_v34  ;;  %v11297_v30 = vcombine.high %v2256_v28, %v2260_v29  ;;  %v2384_v31 = vld [vmem:[%s14469_s23 + $0x740] sm:$0xff]  ;;  %v11296_v33 = vcombine.low %v2256_v28, %v2260_v29 }
 0x2c7   : > { %6772 = vmatprep.subr.bf16.mxu0 %v11241_v39  ;;  %6813 = vmatprep.subr.bf16.mxu1 %v11369_v43  ;;  %v2388_v32 = vld [vmem:[%s14469_s23 + $0x760] sm:$0xff] }
 0x2c8   : > { %v11424_v34 = vcombine.low %v2384_v31, %v2388_v32  ;;  %v11425_v35 = vcombine.high %v2384_v31, %v2388_v32  ;;  %v2264_v36 = vld [vmem:[%s14469_s23 + $0x380] sm:$0xff] }
 0x2c9   : > { %v2268_v37 = vld [vmem:[%s14469_s23 + $0x3a0] sm:$0xff] }
 0x2ca   : > { %6773 = vmatpush1.bf16.msra.mxu0 %v11240_v41  ;;  %6814 = vmatpush1.bf16.msra.mxu1 %v11368_v42  ;;  %v2392_v38 = vld [vmem:[%s14469_s23 + $0x780] sm:$0xff]  ;;  %v11305_v39 = vcombine.high %v2264_v36, %v2268_v37  ;;  %v11304_v41 = vcombine.low %v2264_v36, %v2268_v37  ;;  %v14707_v37 = vsub.s32 5, %v14658_v61 }
 0x2cb   : > { %6774 = vmatprep.subr.bf16.mxu0 %v11249_v47  ;;  %6815 = vmatprep.subr.bf16.mxu1 %v11377_v51  ;;  %v2396_v40 = vld [vmem:[%s14469_s23 + $0x7a0] sm:$0xff] }
 0x2cc   : > { %v11432_v42 = vcombine.low %v2392_v38, %v2396_v40  ;;  %v11433_v43 = vcombine.high %v2392_v38, %v2396_v40  ;;  %v2272_v44 = vld [vmem:[%s14469_s23 + $0x3c0] sm:$0xff]  ;;  %v14710_v38 = vsub.s32 7, %v14658_v61 }
 0x2cd   : > { %v2276_v45 = vld [vmem:[%s14469_s23 + $0x3e0] sm:$0xff] }
 0x2ce   : > { %6775 = vmatpush1.bf16.msra.mxu0 %v11248_v49  ;;  %6816 = vmatpush1.bf16.msra.mxu1 %v11376_v50  ;;  %v2400_v46 = vld [vmem:[%s14469_s23 + $0x7c0] sm:$0xff]  ;;  %v11313_v47 = vcombine.high %v2272_v44, %v2276_v45  ;;  %v11312_v49 = vcombine.low %v2272_v44, %v2276_v45 }
 0x2cf   : > { %6776 = vmatprep.subr.bf16.mxu0 %v11257_v55  ;;  %6817 = vmatprep.subr.bf16.mxu1 %v11385_v59  ;;  %v2404_v48 = vld [vmem:[%s14469_s23 + $0x7e0] sm:$0xff] }
 0x2d0   : > { %v11440_v50 = vcombine.low %v2400_v46, %v2404_v48  ;;  %v11441_v51 = vcombine.high %v2400_v46, %v2404_v48  ;;  %v14638_v52 = vld [vmem:[%s14469_s23 + $0x800] sm:$0xff] }
 0x2d1   : > { %v14641_v53 = vld [vmem:[%s14469_s23 + $0x820] sm:$0xff] }
 0x2d2   : > { %6777 = vmatpush1.bf16.msra.mxu0 %v11256_v57  ;;  %6818 = vmatpush1.bf16.msra.mxu1 %v11384_v58  ;;  %v14644_v54 = vld [vmem:[%s14469_s23 + $0xc00] sm:$0xff]  ;;  %v11449_v55 = vcombine.high %v14638_v52, %v14641_v53 }
 0x2d3   : > { %6778 = vmatprep.subr.bf16.mxu0 %v11265_v63  ;;  %6819 = vmatprep.subr.bf16.mxu1 %v11393_v3  ;;  %v14649_v56 = vld [vmem:[%s14469_s23 + $0xc20] sm:$0xff]  ;;  %v14664_v63 = vsub.s32 2, %v14658_v61 }
 0x2d4   : > { %16152 = vst [vmem:[#allocation48_spill] sm:$0xff] %v14649_v56  ;;  %v11577_v59 = vcombine.high %v14644_v54, %v14649_v56  ;;  %v14668_v0 = vld [vmem:[%s790_s22] sm:$0xff] }
 0x2d5   : > { %v1014_v3 = vrot.slane %v14668_v0, %v14661_v62  ;;  %v1022_v4 = vrot.slane %v14668_v0, %v14664_v63 }
 0x2d6   : > { %6779 = vmatpush1.bf16.msra.mxu0 %v11264_v1  ;;  %6820 = vmatpush1.bf16.msra.mxu1 %v11392_v2  ;;  %v14671_v1 = vsub.s32 1, %v14658_v61  ;;  %v14674_v2 = vsub.s32 3, %v14658_v61 }
 0x2d7   : > { %6780 = vmatprep.subr.bf16.mxu0 %v11273_v7  ;;  %6821 = vmatprep.subr.bf16.mxu1 %v11401_v11 }
 0x2d8   : > { %v1018_v5 = vrot.slane %v14668_v0, %v14671_v1  ;;  %v1026_v6 = vrot.slane %v14668_v0, %v14674_v2 }
 0x2da   : > { %6781 = vmatpush1.bf16.msra.mxu0 %v11272_v9  ;;  %6822 = vmatpush1.bf16.msra.mxu1 %v11400_v10 }
 0x2db   : > { %6782 = vmatprep.subr.bf16.mxu0 %v11281_v15  ;;  %6823 = vmatprep.subr.bf16.mxu1 %v11409_v19 }
 0x2de   : > { %6783 = vmatpush1.bf16.msra.mxu0 %v11280_v17  ;;  %6824 = vmatpush1.bf16.msra.mxu1 %v11408_v18 }
 0x2df   : > { %6784 = vmatprep.subr.bf16.mxu0 %v11289_v23  ;;  %6825 = vmatprep.subr.bf16.mxu1 %v11417_v27 }
 0x2e2   : > { %6785 = vmatpush1.bf16.msra.mxu0 %v11288_v25  ;;  %6826 = vmatpush1.bf16.msra.mxu1 %v11416_v26 }
 0x2e3   : > { %6786 = vmatprep.subr.bf16.mxu0 %v11297_v30  ;;  %6827 = vmatprep.subr.bf16.mxu1 %v11425_v35 }
 0x2e6   : > { %6787 = vmatpush1.bf16.msra.mxu0 %v11296_v33  ;;  %6828 = vmatpush1.bf16.msra.mxu1 %v11424_v34  ;;  %v14701_v33 = vsub.s32 4, %v14658_v61  ;;  %v14704_v34 = vsub.s32 6, %v14658_v61 }
 0x2e7   : > { %6788 = vmatprep.subr.bf16.mxu0 %v11305_v39  ;;  %6829 = vmatprep.subr.bf16.mxu1 %v11433_v43  ;;  %v14714_v43 = vld [vmem:[%s790_s22 + $0x8] sm:$0xf] }
 0x2e8   : > { %v1030_v46 = vrot.slane %v14668_v0, %v14701_v33 }
 0x2ea   : > { %6789 = vmatpush1.bf16.msra.mxu0 %v11304_v41  ;;  %6830 = vmatpush1.bf16.msra.mxu1 %v11432_v42 }
 0x2eb   : > { %6790 = vmatprep.subr.bf16.mxu0 %v11313_v47  ;;  %6831 = vmatprep.subr.bf16.mxu1 %v11441_v51  ;;  %v1038_v47 = vrot.slane %v14668_v0, %v14704_v34  ;;  %v1042_v51 = vrot.slane %v14668_v0, %v14710_v38 }
 0x2ee   : > { %6791 = vmatpush1.bf16.msra.mxu0 %v11312_v49  ;;  %6832 = vmatpush1.bf16.msra.mxu1 %v11440_v50  ;;  %v1034_v50 = vrot.slane %v14668_v0, %v14707_v37 }
 0x2ef   : > { %6842 = vmatprep.subr.bf16.mxu0 %v11449_v55  ;;  %6883 = vmatprep.subr.bf16.mxu1 %v11577_v59 }
 0x364   : > { %v1349_v7 = vpop.f32.mrb[0].mxu0  ;;  %v1390_v8 = vpop.f32.mrb[0].mxu1 }
 0x365   : > { %v14684_v9 = vadd.f32 %v1349_v7, %v1014_v3  ;;  %v14686_v10 = vadd.f32 %v1390_v8, %v1022_v4  ;;  %v1351_v11 = vpop.f32.mrb[1].mxu0  ;;  %v1392_v12 = vpop.f32.mrb[1].mxu1  ;;  %v1046_v3 = vrot.slane %v14714_v43, %v14661_v62  ;;  %v1054_v8 = vrot.slane %v14714_v43, %v14664_v63 }
 0x366   : > { %v14688_v13 = vadd.f32 %v1351_v11, %v1018_v5  ;;  %v14690_v14 = vadd.f32 %v1392_v12, %v1026_v6  ;;  %v1353_v15 = vpop.f32.mrb[2].mxu0  ;;  %v1394_v16 = vpop.f32.mrb[2].mxu1  ;;  %v1050_v11 = vrot.slane %v14714_v43, %v14671_v1 }
 0x367   : > { %v1565_v17 = vrot.slane %v14684_v9, 4  ;;  %v1577_v18 = vrot.slane %v14686_v10, 4  ;;  %v1354_v19 = vpop.f32.mrb[3].mxu0  ;;  %v1395_v20 = vpop.f32.mrb[3].mxu1 }
 0x368   : > { %v1571_v21 = vrot.slane %v14688_v13, 4  ;;  %v1583_v22 = vrot.slane %v14690_v14, 4 }
 0x369   : > { %v1566_v23 = vadd.f32 %v1565_v17, %v14684_v9  ;;  %v1578_v24 = vadd.f32 %v1577_v18, %v14686_v10 }
 0x36a   : > { %v1572_v25 = vadd.f32 %v1571_v21, %v14688_v13  ;;  %v1584_v26 = vadd.f32 %v1583_v22, %v14690_v14 }
 0x36b   : > { %v1567_v27 = vrot.slane %v1566_v23, 2  ;;  %v1579_v28 = vrot.slane %v1578_v24, 2 }
 0x36c   : > { %v1573_v29 = vrot.slane %v1572_v25, 2  ;;  %v1585_v30 = vrot.slane %v1584_v26, 2 }
 0x36d   : > { %v1568_v31 = vadd.f32 %v1567_v27, %v1566_v23  ;;  %v1580_v32 = vadd.f32 %v1579_v28, %v1578_v24 }
 0x36e   : > { %v1574_v35 = vadd.f32 %v1573_v29, %v1572_v25  ;;  %v1586_v36 = vadd.f32 %v1585_v30, %v1584_v26 }
 0x36f   : > { %v1569_v39 = vrot.slane %v1568_v31, 1  ;;  %v1581_v40 = vrot.slane %v1580_v32, 1 }
 0x370   : > { %v1575_v41 = vrot.slane %v1574_v35, 1  ;;  %v1587_v42 = vrot.slane %v1586_v36, 1 }
 0x371   : > { %v1570_v44 = vadd.f32 %v1569_v39, %v1568_v31  ;;  %v1582_v45 = vadd.f32 %v1581_v40, %v1580_v32 }
 0x372   : > { %v1576_v48 = vadd.f32 %v1575_v41, %v1574_v35  ;;  %v1588_v49 = vadd.f32 %v1587_v42, %v1586_v36 }
 0x373   : > { %v14724_v55 = vmul.f32 0.125, %v1570_v44  ;;  %v14726_v59 = vmul.f32 0.125, %v1582_v45 }
 0x374   : > { %v14730_v4 = vmul.f32 0.125, %v1576_v48  ;;  %v14732_v5 = vmul.f32 0.125, %v1588_v49  ;;  %v1431_v6 = vpop.f32.mrb[4].mxu0  ;;  %v1472_v7 = vpop.f32.mrb[4].mxu1 }
 0x375   : > { %v1650_v0 = vsub.f32 %v14684_v9, %v14724_v55  ;;  %v1652_v12 = vsub.f32 %v14686_v10, %v14726_v59  ;;  %v14742_v15 = vadd.f32 %v1431_v6, %v1030_v46  ;;  %v14744_v16 = vadd.f32 %v1472_v7, %v1038_v47  ;;  %v1433_v17 = vpop.f32.mrb[5].mxu0  ;;  %v1474_v18 = vpop.f32.mrb[5].mxu1 }
 0x376   : > { %v1651_v19 = vsub.f32 %v14688_v13, %v14730_v4  ;;  %v1653_v20 = vsub.f32 %v14690_v14, %v14732_v5  ;;  %v14750_v21 = vadd.f32 %v1433_v17, %v1034_v50  ;;  %v14752_v22 = vadd.f32 %v1474_v18, %v1042_v51  ;;  %v1435_v23 = vpop.f32.mrb[6].mxu0  ;;  %v1476_v24 = vpop.f32.mrb[6].mxu1 }
 0x377   : > { %v1662_v25 = vmul.f32 %v1650_v0, %v1650_v0  ;;  %v1664_v26 = vmul.f32 %v1652_v12, %v1652_v12  ;;  %v1589_v27 = vrot.slane %v14742_v15, 4  ;;  %v1601_v28 = vrot.slane %v14744_v16, 4  ;;  %v1436_v29 = vpop.f32.mrb[7].mxu0  ;;  %v1477_v30 = vpop.f32.mrb[7].mxu1 }
 0x378   : > { %v1663_v31 = vmul.f32 %v1651_v19, %v1651_v19  ;;  %v1665_v32 = vmul.f32 %v1653_v20, %v1653_v20  ;;  %v1595_v35 = vrot.slane %v14750_v21, 4  ;;  %v1607_v36 = vrot.slane %v14752_v22, 4 }
 0x379   : > { %v1674_v39 = vrot.slane %v1662_v25, 4  ;;  %v1686_v40 = vrot.slane %v1664_v26, 4  ;;  %v1590_v41 = vadd.f32 %v1589_v27, %v14742_v15  ;;  %v1602_v42 = vadd.f32 %v1601_v28, %v14744_v16 }
 0x37a   : > { %v1680_v44 = vrot.slane %v1663_v31, 4  ;;  %v1692_v45 = vrot.slane %v1665_v32, 4  ;;  %v1596_v46 = vadd.f32 %v1595_v35, %v14750_v21  ;;  %v1608_v47 = vadd.f32 %v1607_v36, %v14752_v22 }
 0x37b   : > { %v1675_v48 = vadd.f32 %v1674_v39, %v1662_v25  ;;  %v1687_v49 = vadd.f32 %v1686_v40, %v1664_v26  ;;  %v1591_v50 = vrot.slane %v1590_v41, 2  ;;  %v1603_v51 = vrot.slane %v1602_v42, 2 }
 0x37c   : > { %v1681_v6 = vadd.f32 %v1680_v44, %v1663_v31  ;;  %v1693_v7 = vadd.f32 %v1692_v45, %v1665_v32  ;;  %v1597_v0 = vrot.slane %v1596_v46, 2  ;;  %v1609_v12 = vrot.slane %v1608_v47, 2 }
 0x37d   : > { %v1676_v17 = vrot.slane %v1675_v48, 2  ;;  %v1688_v18 = vrot.slane %v1687_v49, 2  ;;  %v1592_v19 = vadd.f32 %v1591_v50, %v1590_v41  ;;  %v1604_v20 = vadd.f32 %v1603_v51, %v1602_v42 }
 0x37e   : > { %v1682_v23 = vrot.slane %v1681_v6, 2  ;;  %v1694_v24 = vrot.slane %v1693_v7, 2  ;;  %v1598_v27 = vadd.f32 %v1597_v0, %v1596_v46  ;;  %v1610_v28 = vadd.f32 %v1609_v12, %v1608_v47 }
 0x37f   : > { %v1677_v29 = vadd.f32 %v1676_v17, %v1675_v48  ;;  %v1689_v30 = vadd.f32 %v1688_v18, %v1687_v49  ;;  %v1593_v35 = vrot.slane %v1592_v19, 1  ;;  %v1605_v36 = vrot.slane %v1604_v20, 1 }
 0x380   : > { %v1683_v25 = vadd.f32 %v1682_v23, %v1681_v6  ;;  %v1695_v26 = vadd.f32 %v1694_v24, %v1693_v7  ;;  %v1599_v39 = vrot.slane %v1598_v27, 1  ;;  %v1611_v40 = vrot.slane %v1610_v28, 1 }
 0x381   : > { %v1678_v31 = vrot.slane %v1677_v29, 1  ;;  %v1690_v32 = vrot.slane %v1689_v30, 1  ;;  %v1594_v44 = vadd.f32 %v1593_v35, %v1592_v19  ;;  %v1606_v45 = vadd.f32 %v1605_v36, %v1604_v20 }
 0x382   : > { %v1684_v60 = vrot.slane %v1683_v25, 1  ;;  %v1696_v58 = vrot.slane %v1695_v26, 1  ;;  %v1600_v41 = vadd.f32 %v1599_v39, %v1598_v27  ;;  %v1612_v42 = vadd.f32 %v1611_v40, %v1610_v28 }
 0x383   : > { %v1679_v50 = vadd.f32 %v1678_v31, %v1677_v29  ;;  %v1691_v51 = vadd.f32 %v1690_v32, %v1689_v30  ;;  %v14762_v46 = vmul.f32 0.125, %v1594_v44  ;;  %v14764_v47 = vmul.f32 0.125, %v1606_v45 }
 0x384   : > { %v1685_v48 = vadd.f32 %v1684_v60, %v1683_v25  ;;  %v1697_v49 = vadd.f32 %v1696_v58, %v1695_v26  ;;  %v14766_v6 = vmul.f32 0.125, %v1600_v41  ;;  %v14768_v7 = vmul.f32 0.125, %v1612_v42  ;;  %v1513_v0 = vpop.f32.mrb[8].mxu0  ;;  %v1554_v12 = vpop.f32.mrb[8].mxu1 }
 0x385   : > { %v1746_v17 = vmul.f32 0.125, %v1679_v50  ;;  %v1748_v18 = vmul.f32 0.125, %v1691_v51  ;;  %v1654_v19 = vsub.f32 %v14742_v15, %v14762_v46  ;;  %v1656_v20 = vsub.f32 %v14744_v16, %v14764_v47  ;;  %v1515_v23 = vpop.f32.mrb[9].mxu0  ;;  %v1556_v24 = vpop.f32.mrb[9].mxu1 }
 0x386   : > { %v1747_v27 = vmul.f32 0.125, %v1685_v48  ;;  %v1749_v28 = vmul.f32 0.125, %v1697_v49  ;;  %v1655_v58 = vsub.f32 %v14750_v21, %v14766_v6  ;;  %v1657_v60 = vsub.f32 %v14752_v22, %v14768_v7  ;;  %v1517_v29 = vpop.f32.mrb[10].mxu0  ;;  %v1558_v30 = vpop.f32.mrb[10].mxu1 }
 0x387   : > { %v1758_v35 = vadd.f32 1e-05, %v1746_v17  ;;  %v1760_v36 = vadd.f32 1e-05, %v1748_v18  ;;  %v1666_v25 = vmul.f32 %v1654_v19, %v1654_v19  ;;  %v1668_v26 = vmul.f32 %v1656_v20, %v1656_v20  ;;  %v1518_v39 = vpop.f32.mrb[11].mxu0  ;;  %v1559_v40 = vpop.f32.mrb[11].mxu1 }
 0x388   : > { %v1759_v31 = vadd.f32 1e-05, %v1747_v27  ;;  %v1667_v32 = vmul.f32 %v1655_v58, %v1655_v58  ;;  %v1669_v44 = vmul.f32 %v1657_v60, %v1657_v60  ;;  %v1058_v45 = vrot.slane %v14714_v43, %v14674_v2 }
 0x389   : > { %v1761_v41 = vadd.f32 1e-05, %v1749_v28  ;;  %v1698_v42 = vrot.slane %v1666_v25, 4  ;;  %v1710_v50 = vrot.slane %v1668_v26, 4  ;;  %v14783_v51 = vadd.f32 %v1513_v0, %v1046_v3 }
 0x38a   : > { %12672 = vrsqrt.f32 %v1758_v35  ;;  %v1704_v48 = vrot.slane %v1667_v32, 4  ;;  %v1716_v49 = vrot.slane %v1669_v44, 4  ;;  %v14788_v17 = vadd.f32 %v1554_v12, %v1054_v8 }
 0x38b   : > { %12674 = vrsqrt.f32 %v1760_v36  ;;  %v1699_v18 = vadd.f32 %v1698_v42, %v1666_v25  ;;  %v1711_v19 = vadd.f32 %v1710_v50, %v1668_v26  ;;  %v1613_v20 = vrot.slane %v14783_v51, 4 }
 0x38c   : > { %12676 = vrsqrt.f32 %v1759_v31  ;;  %v1705_v27 = vadd.f32 %v1704_v48, %v1667_v32  ;;  %v1717_v28 = vadd.f32 %v1716_v49, %v1669_v44  ;;  %v1625_v58 = vrot.slane %v14788_v17, 4 }
 0x38d   : > { %v1700_v3 = vrot.slane %v1699_v18, 2  ;;  %v1712_v0 = vrot.slane %v1711_v19, 2  ;;  %v1614_v60 = vadd.f32 %v1613_v20, %v14783_v51  ;;  %v14796_v29 = vadd.f32 %v1515_v23, %v1050_v11 }
 0x38e   : > { %v1706_v8 = vrot.slane %v1705_v27, 2  ;;  %v1718_v12 = vrot.slane %v1717_v28, 2  ;;  %v1626_v30 = vadd.f32 %v1625_v58, %v14788_v17  ;;  %v14799_v35 = vadd.f32 %v1556_v24, %v1058_v45 }
 0x38f   : > { %v1701_v36 = vadd.f32 %v1700_v3, %v1699_v18  ;;  %v1713_v25 = vadd.f32 %v1712_v0, %v1711_v19  ;;  %v1615_v26 = vrot.slane %v1614_v60, 2  ;;  %v1619_v39 = vrot.slane %v14796_v29, 4 }
 0x390   : > { %v1707_v40 = vadd.f32 %v1706_v8, %v1705_v27  ;;  %v1719_v31 = vadd.f32 %v1718_v12, %v1717_v28  ;;  %v1627_v32 = vrot.slane %v1626_v30, 2  ;;  %v1631_v44 = vrot.slane %v14799_v35, 4 }
 0x391   : > { %v1702_v42 = vrot.slane %v1701_v36, 1  ;;  %v1714_v43 = vrot.slane %v1713_v25, 1  ;;  %v1616_v11 = vadd.f32 %v1615_v26, %v1614_v60  ;;  %v1620_v23 = vadd.f32 %v1619_v39, %v14796_v29 }
 0x392   : > { %v1708_v50 = vrot.slane %v1707_v40, 1  ;;  %v1720_v48 = vrot.slane %v1719_v31, 1  ;;  %v1628_v49 = vadd.f32 %v1627_v32, %v1626_v30  ;;  %v1632_v24 = vadd.f32 %v1631_v44, %v14799_v35 }
 0x393   : > { %v1703_v45 = vadd.f32 %v1702_v42, %v1701_v36  ;;  %v1715_v18 = vadd.f32 %v1714_v43, %v1713_v25  ;;  %v1617_v19 = vrot.slane %v1616_v11, 1  ;;  %v1621_v20 = vrot.slane %v1620_v23, 2 }
 0x394   : > { %v12673_v58 = vpop.eup %12672  ;;  %12678 = vrsqrt.f32 %v1761_v41  ;;  %v1709_v27 = vadd.f32 %v1708_v50, %v1707_v40  ;;  %v1721_v28 = vadd.f32 %v1720_v48, %v1719_v31  ;;  %v1629_v3 = vrot.slane %v1628_v49, 1 }
 0x395   : > { %v12675_v0 = vpop.eup %12674  ;;  %v1750_v8 = vmul.f32 0.125, %v1703_v45  ;;  %v1752_v12 = vmul.f32 0.125, %v1715_v18  ;;  %v1618_v60 = vadd.f32 %v1617_v19, %v1616_v11  ;;  %v1622_v26 = vadd.f32 %v1621_v20, %v1620_v23 }
 0x396   : > { %v12677_v39 = vpop.eup %12676  ;;  %v1751_v57 = vmul.f32 0.125, %v1709_v27  ;;  %v1753_v56 = vmul.f32 0.125, %v1721_v28  ;;  %v1630_v30 = vadd.f32 %v1629_v3, %v1628_v49  ;;  %v1633_v32 = vrot.slane %v1632_v24, 2 }
 0x397   : > { %v1762_v44 = vadd.f32 1e-05, %v1750_v8  ;;  %v1764_v36 = vadd.f32 1e-05, %v1752_v12  ;;  %v14805_v25 = vmul.f32 0.125, %v1618_v60  ;;  %v1623_v23 = vrot.slane %v1622_v26, 1 }
 0x398   : > { %v13828_v42 = vmov 1966171168   ;;  %v1763_v41 = vadd.f32 1e-05, %v1751_v57  ;;  %v1765_v40 = vadd.f32 1e-05, %v1753_v56  ;;  %v1634_v48 = vadd.f32 %v1633_v32, %v1632_v24 }
 0x399   : > { %v1799_v43 = vunpack.c.l.s4 %v13828_v42  ;;  %v14807_v31 = vmul.f32 0.125, %v1630_v30  ;;  %12680 = vrsqrt.f32 %v1762_v44  ;;  %v1658_v11 = vsub.f32 %v14783_v51, %v14805_v25 }
 0x39a   : > { %12682 = vrsqrt.f32 %v1764_v36  ;;  %v1624_v45 = vadd.f32 %v1623_v23, %v1622_v26  ;;  %v1635_v57 = vrot.slane %v1634_v48, 1  ;;  %v1794_v26 = vcombine.low %v12673_v58, %v12677_v39 }
 0x39b   : > { %v1660_v50 = vsub.f32 %v14788_v17, %v14807_v31  ;;  %12684 = vrsqrt.f32 %v1763_v41  ;;  %v1670_v49 = vmul.f32 %v1658_v11, %v1658_v11  ;;  %v1800_v18 = vunpack.c.0.s8 %v1799_v43 }
 0x39c   : > { %12686 = vrsqrt.f32 %v1765_v40  ;;  %v14813_v20 = vmul.f32 0.125, %v1624_v45  ;;  %v1636_v3 = vadd.f32 %v1635_v57, %v1634_v48 }
 0x39d   : > { %v1672_v19 = vmul.f32 %v1660_v50, %v1660_v50  ;;  %v1722_v56 = vrot.slane %v1670_v49, 4  ;;  %v14818_v60 = vsub.s32 %v1800_v18, %v14658_v61 }
 0x39e   : > { %v12679_v27 = vpop.eup %12678  ;;  %v1659_v12 = vsub.f32 %v14796_v29, %v14813_v20  ;;  %v14820_v30 = vmul.f32 0.125, %v1636_v3 }
 0x39f   : > { %v1734_v28 = vrot.slane %v1672_v19, 4  ;;  %v1723_v8 = vadd.f32 %v1722_v56, %v1670_v49  ;;  %v1795_v32 = vcombine.low %v12675_v0, %v12679_v27  ;;  %v1804_v61 = vrot.slane %v1794_v26, %v14818_v60 }
 0x3a0   : > { %v1671_v36 = vmul.f32 %v1659_v12, %v1659_v12  ;;  %v1661_v43 = vsub.f32 %v14799_v35, %v14820_v30 }
 0x3a1   : > { %v1735_v24 = vadd.f32 %v1734_v28, %v1672_v19  ;;  %v1724_v44 = vrot.slane %v1723_v8, 2  ;;  %v1811_v45 = vrot.slane %v1795_v32, %v14818_v60 }
 0x3a2   : > { %v1728_v11 = vrot.slane %v1671_v36, 4  ;;  %v1673_v48 = vmul.f32 %v1661_v43, %v1661_v43 }
 0x3a3   : > { %v1736_v42 = vrot.slane %v1735_v24, 2  ;;  %v12681_v41 = vpop.eup %12680  ;;  %v1725_v40 = vadd.f32 %v1724_v44, %v1723_v8 }
 0x3a4   : > { %v12683_v23 = vpop.eup %12682  ;;  %v1729_v58 = vadd.f32 %v1728_v11, %v1671_v36  ;;  %v1740_v57 = vrot.slane %v1673_v48, 4 }
 0x3a5   : > { %v1737_v50 = vadd.f32 %v1736_v42, %v1735_v24  ;;  %v12685_v49 = vpop.eup %12684  ;;  %v1726_v18 = vrot.slane %v1725_v40, 1  ;;  %v1826_v24 = vcombine.low %v1804_v61, %v1811_v45 }
 0x3a6   : > { %v12687_v0 = vpop.eup %12686  ;;  %v1796_v39 = vcombine.low %v12681_v41, %v12685_v49  ;;  %v1730_v28 = vrot.slane %v1729_v58, 2  ;;  %v1741_v12 = vadd.f32 %v1740_v57, %v1673_v48 }
 0x3a7   : > { %v1738_v19 = vrot.slane %v1737_v50, 1  ;;  %v1797_v56 = vcombine.low %v12683_v23, %v12687_v0  ;;  %v1727_v27 = vadd.f32 %v1726_v18, %v1725_v40  ;;  %v1834_v49 = vrot.slane %v1826_v24, %v14818_v60  ;;  %v1561_v0 = vld [vmem:[%s799_s11] sm:$0xff] }
 0x3a8   : > { %v1818_v3 = vrot.slane %v1796_v39, %v14818_v60  ;;  %v1731_v42 = vadd.f32 %v1730_v28, %v1729_v58  ;;  %v1742_v43 = vrot.slane %v1741_v12, 2 }
 0x3a9   : > { %v1739_v8 = vadd.f32 %v1738_v19, %v1737_v50  ;;  %v1825_v44 = vrot.slane %v1797_v56, %v14818_v60  ;;  %v1754_v26 = vmul.f32 0.125, %v1727_v27 }
 0x3aa   : > { %v1732_v11 = vrot.slane %v1731_v42, 1  ;;  %v1743_v41 = vadd.f32 %v1742_v43, %v1741_v12 }
 0x3ab   : > { %v1756_v32 = vmul.f32 0.125, %v1739_v8  ;;  %v1827_v36 = vcombine.low %v1818_v3, %v1825_v44  ;;  %v1766_v23 = vadd.f32 1e-05, %v1754_v26 }
 0x3ac   : > { %v1733_v18 = vadd.f32 %v1732_v11, %v1731_v42  ;;  %v1744_v48 = vrot.slane %v1743_v41, 1 }
 0x3ad   : > { %v1841_v40 = vrot.slane %v1827_v36, %v14818_v60  ;;  %v1768_v50 = vadd.f32 1e-05, %v1756_v32  ;;  %12688 = vrsqrt.f32 %v1766_v23 }
 0x3ae   : > { %v1755_v45 = vmul.f32 0.125, %v1733_v18  ;;  %v1745_v39 = vadd.f32 %v1744_v48, %v1743_v41 }
 0x3af   : > { %v1842_v61 = vcombine.low %v1834_v49, %v1841_v40  ;;  %12690 = vrsqrt.f32 %v1768_v50 }
 0x3b0   : > { %v1767_v58 = vadd.f32 1e-05, %v1755_v45  ;;  %v1757_v57 = vmul.f32 0.125, %v1745_v39  ;;  %v14858_v39 = vld [vmem:[%s14469_s23 + $0x840] sm:$0xff] }
 0x3b1   : > { %v1869_v19 = vmul.f32 %v1842_v61, %v1561_v0 }
 0x3b2   : > { %12692 = vrsqrt.f32 %v1767_v58  ;;  %v1769_v8 = vadd.f32 1e-05, %v1757_v57  ;;  %v14862_v57 = vld [vmem:[%s14469_s23 + $0x860] sm:$0xff] }
 0x3b3   : > { %v1892_v56 = vrot.slane %v1869_v19, %v14701_v33  ;;  %v1896_v27 = vrot.slane %v1869_v19, %v14707_v37  ;;  %v14835_v28 = vrot.slane %v1869_v19, %v14704_v34  ;;  %v1904_v3 = vrot.slane %v1869_v19, %v14710_v38 }
 0x3b4   : > { %v1876_v12 = vrot.slane %v1869_v19, %v14661_v62  ;;  %v1880_v24 = vrot.slane %v1869_v19, %v14671_v1  ;;  %12694 = vrsqrt.f32 %v1769_v8  ;;  %v1884_v36 = vrot.slane %v1869_v19, %v14664_v63  ;;  %v14868_v8 = vld [vmem:[%s14469_s23 + $0xc60] sm:$0xff] }
 0x3b5   : > { %v1937_v44 = vmul.f32 %v1892_v56, %v14762_v46  ;;  %v1938_v26 = vmul.f32 %v1896_v27, %v14766_v6  ;;  %v1939_v42 = vmul.f32 %v14835_v28, %v14764_v47  ;;  %v1940_v32 = vmul.f32 %v1904_v3, %v14768_v7 }
 0x3b6   : > { %v2041_v43 = vmul.f32 %v1904_v3, %v14752_v22  ;;  %v1888_v11 = vrot.slane %v1869_v19, %v14674_v2  ;;  %v1933_v40 = vmul.f32 %v1876_v12, %v14724_v55  ;;  %v1934_v46 = vmul.f32 %v1880_v24, %v14730_v4  ;;  %v14865_v3 = vld [vmem:[%s14469_s23 + $0xc40] sm:$0xff] }
 0x3b7   : > { %v1959_v41 = vcombine.low %v1937_v44, %v1938_v26  ;;  %v1960_v49 = vcombine.low %v1939_v42, %v1940_v32  ;;  %v1935_v6 = vmul.f32 %v1884_v36, %v14726_v59  ;;  %v12689_v0 = vpop.eup %12688  ;;  %v1563_v42 = vld [vmem:[%s808_s27] sm:$0xff] }
 0x3b8   : > { %v1936_v47 = vmul.f32 %v1888_v11, %v14732_v5  ;;  %v1957_v23 = vcombine.low %v1933_v40, %v1934_v46  ;;  %v11457_v40 = vcombine.high %v14858_v39, %v14862_v57  ;;  %v11585_v46 = vcombine.high %v14865_v3, %v14868_v8 }
 0x3b9   : > { %v1981_v7 = vrot.slane %v1959_v41, %v14818_v60  ;;  %v1988_v22 = vrot.slane %v1960_v49, %v14818_v60  ;;  %v12691_v4 = vpop.eup %12690  ;;  %v11456_v49 = vcombine.low %v14858_v39, %v14862_v57 }
 0x3ba   : > { %v1958_v18 = vcombine.low %v1935_v6, %v1936_v47  ;;  %v1967_v55 = vrot.slane %v1957_v23, %v14818_v60  ;;  %v2035_v47 = vmul.f32 %v1880_v24, %v14688_v13 }
 0x3bb   : > { %v1990_v50 = vcombine.low %v1981_v7, %v1988_v22  ;;  %v2037_v7 = vmul.f32 %v1888_v11, %v14690_v14  ;;  %v2034_v22 = vmul.f32 %v1876_v12, %v14684_v9 }
 0x3bc   : > { %v1974_v48 = vrot.slane %v1958_v18, %v14818_v60  ;;  %v12693_v59 = vpop.eup %12692  ;;  %v2036_v18 = vmul.f32 %v1884_v36, %v14686_v10 }
 0x3bd   : > { %v2004_v5 = vrot.slane %v1990_v50, %v14818_v60  ;;  %v1843_v45 = vcombine.low %v12689_v0, %v12693_v59  ;;  %v2039_v0 = vmul.f32 %v1896_v27, %v14750_v21  ;;  %v2038_v50 = vmul.f32 %v1892_v56, %v14742_v15 }
 0x3be   : > { %v1989_v61 = vcombine.low %v1967_v55, %v1974_v48  ;;  %v12695_v19 = vpop.eup %12694  ;;  %v1562_v55 = vld [vmem:[%s799_s11 + $0x8] sm:$0xf] }
 0x3bf   : > { %v1844_v44 = vcombine.low %v12691_v4, %v12695_v19  ;;  %v1851_v26 = vrot.slane %v1843_v45, %v14818_v60 }
 0x3c0   : > { %v1997_v58 = vrot.slane %v1989_v61, %v14818_v60 }
 0x3c1   : > { %v1858_v41 = vrot.slane %v1844_v44, %v14818_v60 }
 0x3c2   : > { %v2005_v32 = vcombine.low %v1997_v58, %v2004_v5 }
 0x3c3   : > { %v1859_v23 = vcombine.low %v1851_v26, %v1858_v41 }
 0x3c4   : > { %v2032_v6 = vsub.f32 %v1563_v42, %v2005_v32 }
 0x3c5   : > { %v1866_v14 = vrot.slane %v1859_v23, %v14818_v60 }
 0x3c6   : > { %v2055_v4 = vrot.slane %v2032_v6, %v14671_v1  ;;  %v2063_v48 = vrot.slane %v2032_v6, %v14674_v2  ;;  %v2051_v59 = vrot.slane %v2032_v6, %v14661_v62  ;;  %v2059_v13 = vrot.slane %v2032_v6, %v14664_v63 }
 0x3c7   : > { %v2071_v9 = vrot.slane %v2032_v6, %v14707_v37  ;;  %v2079_v10 = vrot.slane %v2032_v6, %v14710_v38  ;;  %v2067_v21 = vrot.slane %v2032_v6, %v14701_v33  ;;  %v1870_v24 = vmul.f32 %v1866_v14, %v1562_v55 }
 0x3c8   : > { %v2109_v27 = vadd.f32 %v2055_v4, %v2035_v47  ;;  %v2111_v15 = vadd.f32 %v2063_v48, %v2037_v7  ;;  %v2108_v56 = vadd.f32 %v2051_v59, %v2034_v22  ;;  %v2110_v12 = vadd.f32 %v2059_v13, %v2036_v18  ;;  %v2428_v4 = vld [vmem:[%s14469_s23 + $0x8a0] sm:$0xff] }
 0x3c9   : > { %v2113_v36 = vadd.f32 %v2071_v9, %v2039_v0  ;;  %v2115_v11 = vadd.f32 %v2079_v10, %v2041_v43  ;;  %v14896_v5 = vadd.f32 %v2067_v21, %v2038_v50  ;;  %v14899_v44 = vrot.slane %v1870_v24, %v14664_v63  ;;  %v2424_v0 = vld [vmem:[%s14469_s23 + $0x880] sm:$0xff] }
 0x3ca   : > { %v2121_v61 = vmax.f32 %v2109_v27, 0.0  ;;  %v2123_v45 = vmax.f32 %v2111_v15, 0.0  ;;  %v2120_v19 = vmax.f32 %v2108_v56, 0.0  ;;  %v2122_v58 = vmax.f32 %v2110_v12, 0.0  ;;  %v2552_v48 = vld [vmem:[%s14469_s23 + $0xc80] sm:$0xff] }
 0x3cb   : > { %v1920_v26 = vrot.slane %v1870_v24, %v14674_v2  ;;  %v2125_v42 = vmax.f32 %v2113_v36, 0.0  ;;  %v2127_v32 = vmax.f32 %v2115_v11, 0.0  ;;  %v1943_v22 = vmul.f32 %v14899_v44, %v14807_v31  ;;  %v2556_v59 = vld [vmem:[%s14469_s23 + $0xca0] sm:$0xff] }
 0x3cc   : > { %v14902_v41 = vpack.c.bf16 %v2121_v61, %v2121_v61  ;;  %v14904_v43 = vpack.c.bf16 %v2123_v45, %v2123_v45  ;;  %v14906_v47 = vpack.c.bf16 %v2120_v19, %v2120_v19  ;;  %v14908_v7 = vpack.c.bf16 %v2122_v58, %v2122_v58  ;;  %v2564_v56 = vld [vmem:[%s14469_s23 + $0xce0] sm:$0xff]  ;;  %v1564_v19 = vld [vmem:[%s808_s27 + $0x8] sm:$0xf] }
 0x3cd   : > { %v1944_v23 = vmul.f32 %v1920_v26, %v14820_v30  ;;  %v14914_v18 = vmul.f32 %v1920_v26, %v14799_v35  ;;  %v2040_v50 = vmul.f32 %v14835_v28, %v14744_v16  ;;  %v14921_v55 = vpack.c.bf16 %v2125_v42, %v2125_v42  ;;  %v2444_v11 = vld [vmem:[%s14469_s23 + $0x920] sm:$0xff] }
 0x3ce   : > { %6792 = vmatprep.mubr.bf16.mxu0 %v14902_v41  ;;  %6833 = vmatprep.mubr.bf16.mxu1 %v14904_v43  ;;  %v2075_v31 = vrot.slane %v2032_v6, %v14704_v34  ;;  %v1908_v30 = vrot.slane %v1870_v24, %v14661_v62  ;;  %v14930_v16 = vpack.c.bf16 %v2127_v32, %v2127_v32  ;;  %v16154_v6 = vld [vmem:[#allocation48_spill] sm:$0xff]  ;;  %v2568_v61 = vld [vmem:[%s14469_s23 + $0xd00] sm:$0xff] }
 0x3cf   : > { %v2007_v35 = vcombine.low %v1943_v22, %v1944_v23  ;;  %6793 = vmatmul.mubr.bf16.vlgmr.msra.gmra.mrb[12].mxu0 %v14906_v47  ;;  %6834 = vmatmul.mubr.bf16.vlgmr.msra.gmra.mrb[12].mxu1 %v14908_v7  ;;  %v14933_v28 = vrot.slane %v1870_v24, %v14671_v1  ;;  %v16153_v13 = vcombine.low %v14638_v52, %v14641_v53  ;;  %v2432_v52 = vld [vmem:[%s14469_s23 + $0x8c0] sm:$0xff] }
 0x3d0   : > { %v16155_v14 = vcombine.low %v14644_v54, %v16154_v6  ;;  %v11584_v9 = vcombine.low %v14865_v3, %v14868_v8  ;;  %v14943_v10 = vadd.f32 %v2075_v31, %v2040_v50  ;;  %v1941_v21 = vmul.f32 %v1908_v30, %v14805_v25  ;;  %6874 = vmatprep.mubr.bf16.mxu0 %v14921_v55  ;;  %v2436_v54 = vld [vmem:[%s14469_s23 + $0x8e0] sm:$0xff] }
 0x3d1   : > { %6843 = vmatpush1.bf16.msra.mxu0 %v16153_v13  ;;  %6915 = vmatprep.mubr.bf16.mxu1 %v14930_v16  ;;  %v11465_v27 = vcombine.high %v2424_v0, %v2428_v4  ;;  %v11593_v15 = vcombine.high %v2552_v48, %v2556_v59  ;;  %v1942_v53 = vmul.f32 %v14933_v28, %v14813_v20  ;;  %v2560_v25 = vld [vmem:[%s14469_s23 + $0xcc0] sm:$0xff] }
 0x3d2   : > { %6884 = vmatpush1.bf16.msra.mxu1 %v16155_v14  ;;  %6844 = vmatprep.subr.bf16.mxu0 %v11457_v40  ;;  %v2021_v12 = vrot.slane %v2007_v35, %v14818_v60  ;;  %v11464_v20 = vcombine.low %v2424_v0, %v2428_v4  ;;  %v11592_v40 = vcombine.low %v2552_v48, %v2556_v59  ;;  %v2572_v45 = vld [vmem:[%s14469_s23 + $0xd20] sm:$0xff] }
 0x3d3   : > { %6885 = vmatprep.subr.bf16.mxu1 %v11585_v46  ;;  %v2006_v24 = vcombine.low %v1941_v21, %v1942_v53  ;;  %v11473_v3 = vcombine.high %v2432_v52, %v2436_v54  ;;  %v11601_v8 = vcombine.high %v2560_v25, %v2564_v56  ;;  %v2440_v46 = vld [vmem:[%s14469_s23 + $0x900] sm:$0xff]  ;;  %v11472_v57 = vcombine.low %v2432_v52, %v2436_v54 }
 0x3d4   : > { %v11481_v58 = vcombine.high %v2440_v46, %v2444_v11  ;;  %v11609_v26 = vcombine.high %v2568_v61, %v2572_v45  ;;  %v2448_v42 = vld [vmem:[%s14469_s23 + $0x940] sm:$0xff]  ;;  %v11480_v50 = vcombine.low %v2440_v46, %v2444_v11  ;;  %v2042_v48 = vmul.f32 %v1908_v30, %v14783_v51 }
 0x3d5   : > { %6845 = vmatpush1.bf16.msra.mxu0 %v11456_v49  ;;  %v2014_v36 = vrot.slane %v2006_v24, %v14818_v60  ;;  %v11600_v49 = vcombine.low %v2560_v25, %v2564_v56  ;;  %v2452_v32 = vld [vmem:[%s14469_s23 + $0x960] sm:$0xff]  ;;  %v11608_v59 = vcombine.low %v2568_v61, %v2572_v45  ;;  %v2044_v35 = vmul.f32 %v14899_v44, %v14788_v17 }
 0x3d6   : > { %6886 = vmatpush1.bf16.msra.mxu1 %v11584_v9  ;;  %6846 = vmatprep.subr.bf16.mxu0 %v11465_v27  ;;  %v2576_v23 = vld [vmem:[%s14469_s23 + $0xd40] sm:$0xff]  ;;  %v11489_v31 = vcombine.high %v2448_v42, %v2452_v32 }
 0x3d7   : > { %6887 = vmatprep.subr.bf16.mxu1 %v11593_v15  ;;  %v2022_v39 = vcombine.low %v2014_v36, %v2021_v12  ;;  %v2580_v0 = vld [vmem:[%s14469_s23 + $0xd60] sm:$0xff]  ;;  %v11488_v15 = vcombine.low %v2448_v42, %v2452_v32 }
 0x3d8   : > { %v11617_v13 = vcombine.high %v2576_v23, %v2580_v0  ;;  %v2456_v6 = vld [vmem:[%s14469_s23 + $0x980] sm:$0xff]  ;;  %v11616_v52 = vcombine.low %v2576_v23, %v2580_v0 }
 0x3d9   : > { %6847 = vmatpush1.bf16.msra.mxu0 %v11464_v20  ;;  %v2029_v22 = vrot.slane %v2022_v39, %v14818_v60  ;;  %v2460_v21 = vld [vmem:[%s14469_s23 + $0x9a0] sm:$0xff] }
 0x3da   : > { %6888 = vmatpush1.bf16.msra.mxu1 %v11592_v40  ;;  %6848 = vmatprep.subr.bf16.mxu0 %v11473_v3  ;;  %v2584_v51 = vld [vmem:[%s14469_s23 + $0xd80] sm:$0xff]  ;;  %v11497_v54 = vcombine.high %v2456_v6, %v2460_v21  ;;  %v11496_v20 = vcombine.low %v2456_v6, %v2460_v21 }
 0x3db   : > { %6889 = vmatprep.subr.bf16.mxu1 %v11601_v8  ;;  %v14976_v4 = vsub.f32 %v1564_v19, %v2029_v22  ;;  %v2588_v30 = vld [vmem:[%s14469_s23 + $0xda0] sm:$0xff] }
 0x3dc   : > { %v11625_v25 = vcombine.high %v2584_v51, %v2588_v30  ;;  %v2464_v56 = vld [vmem:[%s14469_s23 + $0x9c0] sm:$0xff]  ;;  %v11624_v40 = vcombine.low %v2584_v51, %v2588_v30 }
 0x3dd   : > { %6849 = vmatpush1.bf16.msra.mxu0 %v11472_v57  ;;  %v2095_v14 = vrot.slane %v14976_v4, %v14674_v2  ;;  %v2083_v9 = vrot.slane %v14976_v4, %v14661_v62  ;;  %v2091_v17 = vrot.slane %v14976_v4, %v14664_v63  ;;  %v2468_v12 = vld [vmem:[%s14469_s23 + $0x9e0] sm:$0xff] }
 0x3de   : > { %6890 = vmatpush1.bf16.msra.mxu1 %v11600_v49  ;;  %6850 = vmatprep.subr.bf16.mxu0 %v11481_v58  ;;  %v2596_v24 = vld [vmem:[%s14469_s23 + $0xde0] sm:$0xff]  ;;  %v11505_v3 = vcombine.high %v2464_v56, %v2468_v12  ;;  %v11504_v45 = vcombine.low %v2464_v56, %v2468_v12 }
 0x3df   : > { %6891 = vmatprep.subr.bf16.mxu1 %v11609_v26  ;;  %v14992_v44 = vadd.f32 %v2095_v14, %v14914_v18  ;;  %v14994_v27 = vadd.f32 %v2083_v9, %v2042_v48  ;;  %v14996_v53 = vadd.f32 %v2091_v17, %v2044_v35  ;;  %v2592_v18 = vld [vmem:[%s14469_s23 + $0xdc0] sm:$0xff] }
 0x3e0   : > { %v11633_v8 = vcombine.high %v2592_v18, %v2596_v24  ;;  %v2472_v46 = vld [vmem:[%s14469_s23 + $0xa00] sm:$0xff]  ;;  %v11632_v39 = vcombine.low %v2592_v18, %v2596_v24 }
 0x3e1   : > { %6851 = vmatpush1.bf16.msra.mxu0 %v11480_v50  ;;  %v2476_v36 = vld [vmem:[%s14469_s23 + $0xa20] sm:$0xff] }
 0x3e2   : > { %6892 = vmatpush1.bf16.msra.mxu1 %v11608_v59  ;;  %6852 = vmatprep.subr.bf16.mxu0 %v11489_v31  ;;  %v2600_v11 = vld [vmem:[%s14469_s23 + $0xe00] sm:$0xff]  ;;  %v11513_v57 = vcombine.high %v2472_v46, %v2476_v36  ;;  %v11512_v32 = vcombine.low %v2472_v46, %v2476_v36 }
 0x3e3   : > { %6893 = vmatprep.subr.bf16.mxu1 %v11617_v13  ;;  %v2604_v61 = vld [vmem:[%s14469_s23 + $0xe20] sm:$0xff] }
 0x3e4   : > { %v11641_v49 = vcombine.high %v2600_v11, %v2604_v61  ;;  %v2480_v19 = vld [vmem:[%s14469_s23 + $0xa40] sm:$0xff]  ;;  %v11640_v22 = vcombine.low %v2600_v11, %v2604_v61 }
 0x3e5   : > { %6853 = vmatpush1.bf16.msra.mxu0 %v11488_v15  ;;  %v2484_v58 = vld [vmem:[%s14469_s23 + $0xa60] sm:$0xff] }
 0x3e6   : > { %6894 = vmatpush1.bf16.msra.mxu1 %v11616_v52  ;;  %6854 = vmatprep.subr.bf16.mxu0 %v11497_v54  ;;  %v2608_v26 = vld [vmem:[%s14469_s23 + $0xe40] sm:$0xff]  ;;  %v11521_v23 = vcombine.high %v2480_v19, %v2484_v58  ;;  %v11520_v35 = vcombine.low %v2480_v19, %v2484_v58 }
 0x3e7   : > { %6895 = vmatprep.subr.bf16.mxu1 %v11625_v25  ;;  %v2612_v42 = vld [vmem:[%s14469_s23 + $0xe60] sm:$0xff] }
 0x3e8   : > { %v11649_v0 = vcombine.high %v2608_v26, %v2612_v42  ;;  %v2488_v50 = vld [vmem:[%s14469_s23 + $0xa80] sm:$0xff]  ;;  %v11648_v13 = vcombine.low %v2608_v26, %v2612_v42 }
 0x3e9   : > { %6855 = vmatpush1.bf16.msra.mxu0 %v11496_v20  ;;  %v2492_v48 = vld [vmem:[%s14469_s23 + $0xaa0] sm:$0xff] }
 0x3ea   : > { %6896 = vmatpush1.bf16.msra.mxu1 %v11624_v40  ;;  %6856 = vmatprep.subr.bf16.mxu0 %v11505_v3  ;;  %v2616_v59 = vld [vmem:[%s14469_s23 + $0xe80] sm:$0xff]  ;;  %v11529_v6 = vcombine.high %v2488_v50, %v2492_v48  ;;  %v11528_v17 = vcombine.low %v2488_v50, %v2492_v48 }
 0x3eb   : > { %6897 = vmatprep.subr.bf16.mxu1 %v11633_v8  ;;  %v2620_v31 = vld [vmem:[%s14469_s23 + $0xea0] sm:$0xff] }
 0x3ec   : > { %v11657_v14 = vcombine.high %v2616_v59, %v2620_v31  ;;  %v2496_v9 = vld [vmem:[%s14469_s23 + $0xac0] sm:$0xff]  ;;  %v11656_v15 = vcombine.low %v2616_v59, %v2620_v31  ;;  %v2043_v31 = vmul.f32 %v14933_v28, %v14796_v29 }
 0x3ed   : > { %6857 = vmatpush1.bf16.msra.mxu0 %v11504_v45  ;;  %v2500_v21 = vld [vmem:[%s14469_s23 + $0xae0] sm:$0xff] }
 0x3ee   : > { %6898 = vmatpush1.bf16.msra.mxu1 %v11632_v39  ;;  %6858 = vmatprep.subr.bf16.mxu0 %v11513_v57  ;;  %v2624_v51 = vld [vmem:[%s14469_s23 + $0xec0] sm:$0xff]  ;;  %v11537_v52 = vcombine.high %v2496_v9, %v2500_v21  ;;  %v11536_v24 = vcombine.low %v2496_v9, %v2500_v21 }
 0x3ef   : > { %6899 = vmatprep.subr.bf16.mxu1 %v11641_v49  ;;  %v2628_v30 = vld [vmem:[%s14469_s23 + $0xee0] sm:$0xff] }
 0x3f0   : > { %v11665_v54 = vcombine.high %v2624_v51, %v2628_v30  ;;  %v2504_v25 = vld [vmem:[%s14469_s23 + $0xb00] sm:$0xff]  ;;  %v11664_v20 = vcombine.low %v2624_v51, %v2628_v30 }
 0x3f1   : > { %6859 = vmatpush1.bf16.msra.mxu0 %v11512_v32  ;;  %v2508_v56 = vld [vmem:[%s14469_s23 + $0xb20] sm:$0xff] }
 0x3f2   : > { %6900 = vmatpush1.bf16.msra.mxu1 %v11640_v22  ;;  %6860 = vmatprep.subr.bf16.mxu0 %v11521_v23  ;;  %v2632_v12 = vld [vmem:[%s14469_s23 + $0xf00] sm:$0xff]  ;;  %v11545_v40 = vcombine.high %v2504_v25, %v2508_v56  ;;  %v11544_v61 = vcombine.low %v2504_v25, %v2508_v56 }
 0x3f3   : > { %6901 = vmatprep.subr.bf16.mxu1 %v11649_v0  ;;  %v2636_v18 = vld [vmem:[%s14469_s23 + $0xf20] sm:$0xff] }
 0x3f4   : > { %v11673_v3 = vcombine.high %v2632_v12, %v2636_v18  ;;  %v2512_v8 = vld [vmem:[%s14469_s23 + $0xb40] sm:$0xff]  ;;  %v11672_v45 = vcombine.low %v2632_v12, %v2636_v18  ;;  %v2131_v18 = vmax.f32 %v14992_v44, 0.0 }
 0x3f5   : > { %6861 = vmatpush1.bf16.msra.mxu0 %v11520_v35  ;;  %v2516_v46 = vld [vmem:[%s14469_s23 + $0xb60] sm:$0xff]  ;;  %v2087_v35 = vrot.slane %v14976_v4, %v14671_v1  ;;  %v2124_v4 = vmax.f32 %v14896_v5, 0.0 }
 0x3f6   : > { %6902 = vmatpush1.bf16.msra.mxu1 %v11648_v13  ;;  %6862 = vmatprep.subr.bf16.mxu0 %v11529_v6  ;;  %v2640_v36 = vld [vmem:[%s14469_s23 + $0xf40] sm:$0xff]  ;;  %v11553_v39 = vcombine.high %v2512_v8, %v2516_v46  ;;  %v11552_v42 = vcombine.low %v2512_v8, %v2516_v46 }
 0x3f7   : > { %6903 = vmatprep.subr.bf16.mxu1 %v11657_v14  ;;  %v2644_v11 = vld [vmem:[%s14469_s23 + $0xf60] sm:$0xff]  ;;  %v15049_v8 = vpack.c.bf16 %v2124_v4, %v2124_v4 }
 0x3f8   : > { %v11681_v57 = vcombine.high %v2640_v36, %v2644_v11  ;;  %v2520_v49 = vld [vmem:[%s14469_s23 + $0xb80] sm:$0xff]  ;;  %v11680_v32 = vcombine.low %v2640_v36, %v2644_v11 }
 0x3f9   : > { %6863 = vmatpush1.bf16.msra.mxu0 %v11528_v17  ;;  %v2524_v19 = vld [vmem:[%s14469_s23 + $0xba0] sm:$0xff] }
 0x3fa   : > { %6904 = vmatpush1.bf16.msra.mxu1 %v11656_v15  ;;  %6864 = vmatprep.subr.bf16.mxu0 %v11537_v52  ;;  %v2648_v58 = vld [vmem:[%s14469_s23 + $0xf80] sm:$0xff]  ;;  %v11561_v22 = vcombine.high %v2520_v49, %v2524_v19  ;;  %v11560_v13 = vcombine.low %v2520_v49, %v2524_v19  ;;  %v2117_v15 = vadd.f32 %v2087_v35, %v2043_v31  ;;  %v2126_v52 = vmax.f32 %v14943_v10, 0.0 }
 0x3fb   : > { %6905 = vmatprep.subr.bf16.mxu1 %v11665_v54  ;;  %v2652_v26 = vld [vmem:[%s14469_s23 + $0xfa0] sm:$0xff] }
 0x3fc   : > { %v11689_v23 = vcombine.high %v2648_v58, %v2652_v26  ;;  %v2528_v0 = vld [vmem:[%s14469_s23 + $0xbc0] sm:$0xff]  ;;  %v11688_v6 = vcombine.low %v2648_v58, %v2652_v26  ;;  %v2129_v56 = vmax.f32 %v2117_v15, 0.0  ;;  %v15051_v5 = vpack.c.bf16 %v2126_v52, %v2126_v52 }
 0x3fd   : > { %6865 = vmatpush1.bf16.msra.mxu0 %v11536_v24  ;;  %v2532_v50 = vld [vmem:[%s14469_s23 + $0xbe0] sm:$0xff] }
 0x3fe   : > { %6906 = vmatpush1.bf16.msra.mxu1 %v11664_v20  ;;  %6866 = vmatprep.subr.bf16.mxu0 %v11545_v40  ;;  %v2656_v48 = vld [vmem:[%s14469_s23 + $0xfc0] sm:$0xff]  ;;  %v11569_v14 = vcombine.high %v2528_v0, %v2532_v50  ;;  %v11568_v29 = vcombine.low %v2528_v0, %v2532_v50  ;;  %v15053_v46 = vpack.c.bf16 %v2129_v56, %v2129_v56 }
 0x3ff   : > { %6907 = vmatprep.subr.bf16.mxu1 %v11673_v3  ;;  %v2660_v59 = vld [vmem:[%s14469_s23 + $0xfe0] sm:$0xff] }
 0x400   : > { %v11697_v9 = vcombine.high %v2656_v48, %v2660_v59  ;;  %v2664_v21 = vld [vmem:[%s14469_s23 + $0x1000] sm:$0xff]  ;;  %v11696_v28 = vcombine.low %v2656_v48, %v2660_v59 }
 0x401   : > { %6867 = vmatpush1.bf16.msra.mxu0 %v11544_v61  ;;  %v2668_v51 = vld [vmem:[%s14469_s23 + $0x1020] sm:$0xff] }
 0x402   : > { %6908 = vmatpush1.bf16.msra.mxu1 %v11672_v45  ;;  %6868 = vmatprep.subr.bf16.mxu0 %v11553_v39  ;;  %v2792_v30 = vld [vmem:[%s14469_s23 + $0x1400] sm:$0xff]  ;;  %v11705_v54 = vcombine.high %v2664_v21, %v2668_v51  ;;  %v11704_v3 = vcombine.low %v2664_v21, %v2668_v51  ;;  %v15059_v45 = vpack.c.bf16 %v2131_v18, %v2131_v18 }
 0x403   : > { %6909 = vmatprep.subr.bf16.mxu1 %v11681_v57  ;;  %v2796_v17 = vld [vmem:[%s14469_s23 + $0x1420] sm:$0xff] }
 0x404   : > { %v11833_v25 = vcombine.high %v2792_v30, %v2796_v17  ;;  %v2672_v12 = vld [vmem:[%s14469_s23 + $0x1040] sm:$0xff]  ;;  %v11832_v10 = vcombine.low %v2792_v30, %v2796_v17 }
 0x405   : > { %6869 = vmatpush1.bf16.msra.mxu0 %v11552_v42  ;;  %v2676_v24 = vld [vmem:[%s14469_s23 + $0x1060] sm:$0xff] }
 0x406   : > { %6910 = vmatpush1.bf16.msra.mxu1 %v11680_v32  ;;  %6870 = vmatprep.subr.bf16.mxu0 %v11561_v22  ;;  %v2800_v20 = vld [vmem:[%s14469_s23 + $0x1440] sm:$0xff]  ;;  %v11713_v36 = vcombine.high %v2672_v12, %v2676_v24  ;;  %v11712_v49 = vcombine.low %v2672_v12, %v2676_v24 }
 0x407   : > { %6911 = vmatprep.subr.bf16.mxu1 %v11689_v23  ;;  %v2804_v40 = vld [vmem:[%s14469_s23 + $0x1460] sm:$0xff] }
 0x408   : > { %v11841_v44 = vcombine.high %v2800_v20, %v2804_v40  ;;  %v2680_v11 = vld [vmem:[%s14469_s23 + $0x1080] sm:$0xff]  ;;  %v11840_v19 = vcombine.low %v2800_v20, %v2804_v40 }
 0x409   : > { %6871 = vmatpush1.bf16.msra.mxu0 %v11560_v13  ;;  %v2684_v61 = vld [vmem:[%s14469_s23 + $0x10a0] sm:$0xff] }
 0x40a   : > { %6912 = vmatpush1.bf16.msra.mxu1 %v11688_v6  ;;  %6872 = vmatprep.subr.bf16.mxu0 %v11569_v14  ;;  %v2808_v39 = vld [vmem:[%s14469_s23 + $0x1480] sm:$0xff]  ;;  %v11721_v58 = vcombine.high %v2680_v11, %v2684_v61  ;;  %v11720_v0 = vcombine.low %v2680_v11, %v2684_v61 }
 0x40b   : > { %6913 = vmatprep.subr.bf16.mxu1 %v11697_v9  ;;  %v2812_v57 = vld [vmem:[%s14469_s23 + $0x14a0] sm:$0xff] }
 0x40c   : > { %v11849_v26 = vcombine.high %v2808_v39, %v2812_v57  ;;  %v2688_v42 = vld [vmem:[%s14469_s23 + $0x10c0] sm:$0xff]  ;;  %v11848_v50 = vcombine.low %v2808_v39, %v2812_v57 }
 0x40d   : > { %6873 = vmatpush1.bf16.msra.mxu0 %v11568_v29  ;;  %v2692_v32 = vld [vmem:[%s14469_s23 + $0x10e0] sm:$0xff] }
 0x40e   : > { %6914 = vmatpush1.bf16.msra.mxu1 %v11696_v28  ;;  %6924 = vmatprep.subr.bf16.mxu0 %v11705_v54  ;;  %v2816_v22 = vld [vmem:[%s14469_s23 + $0x14c0] sm:$0xff]  ;;  %v11729_v48 = vcombine.high %v2688_v42, %v2692_v32  ;;  %v11728_v14 = vcombine.low %v2688_v42, %v2692_v32 }
 0x40f   : > { %6965 = vmatprep.subr.bf16.mxu1 %v11833_v25  ;;  %v2820_v23 = vld [vmem:[%s14469_s23 + $0x14e0] sm:$0xff] }
 0x410   : > { %6875 = vmatmul.mubr.bf16.vlgmr.msra.gmra.mrb[16].mxu0 %v15049_v8  ;;  %v11857_v59 = vcombine.high %v2816_v22, %v2820_v23  ;;  %v2696_v31 = vld [vmem:[%s14469_s23 + $0x1100] sm:$0xff]  ;;  %v11856_v9 = vcombine.low %v2816_v22, %v2820_v23 }
 0x411   : > { %6916 = vmatmul.mubr.bf16.vlgmr.msra.gmra.mrb[16].mxu1 %v15051_v5  ;;  %6925 = vmatpush1.bf16.msra.mxu0 %v11704_v3  ;;  %v2700_v35 = vld [vmem:[%s14469_s23 + $0x1120] sm:$0xff] }
 0x412   : > { %6956 = vmatprep.mubr.bf16.mxu0 %v15053_v46  ;;  %6966 = vmatpush1.bf16.msra.mxu1 %v11832_v10  ;;  %v2824_v13 = vld [vmem:[%s14469_s23 + $0x1500] sm:$0xff]  ;;  %v11737_v21 = vcombine.high %v2696_v31, %v2700_v35  ;;  %v11736_v28 = vcombine.low %v2696_v31, %v2700_v35 }
 0x413   : > { %6997 = vmatprep.mubr.bf16.mxu1 %v15059_v45  ;;  %6926 = vmatprep.subr.bf16.mxu0 %v11713_v36  ;;  %v2828_v6 = vld [vmem:[%s14469_s23 + $0x1520] sm:$0xff] }
 0x414   : > { %6967 = vmatprep.subr.bf16.mxu1 %v11841_v44  ;;  %v11865_v51 = vcombine.high %v2824_v13, %v2828_v6  ;;  %v2704_v30 = vld [vmem:[%s14469_s23 + $0x1140] sm:$0xff]  ;;  %v11864_v4 = vcombine.low %v2824_v13, %v2828_v6 }
 0x415   : > { %6927 = vmatpush1.bf16.msra.mxu0 %v11712_v49  ;;  %v2708_v17 = vld [vmem:[%s14469_s23 + $0x1160] sm:$0xff] }
 0x416   : > { %6968 = vmatpush1.bf16.msra.mxu1 %v11840_v19  ;;  %6928 = vmatprep.subr.bf16.mxu0 %v11721_v58  ;;  %v2832_v15 = vld [vmem:[%s14469_s23 + $0x1540] sm:$0xff]  ;;  %v11745_v52 = vcombine.high %v2704_v30, %v2708_v17  ;;  %v11744_v24 = vcombine.low %v2704_v30, %v2708_v17 }
 0x417   : > { %6969 = vmatprep.subr.bf16.mxu1 %v11849_v26  ;;  %v2836_v29 = vld [vmem:[%s14469_s23 + $0x1560] sm:$0xff] }
 0x418   : > { %v11873_v54 = vcombine.high %v2832_v15, %v2836_v29  ;;  %v2712_v25 = vld [vmem:[%s14469_s23 + $0x1180] sm:$0xff]  ;;  %v11872_v20 = vcombine.low %v2832_v15, %v2836_v29 }
 0x419   : > { %6929 = vmatpush1.bf16.msra.mxu0 %v11720_v0  ;;  %v2716_v56 = vld [vmem:[%s14469_s23 + $0x11a0] sm:$0xff] }
 0x41a   : > { %6970 = vmatpush1.bf16.msra.mxu1 %v11848_v50  ;;  %6930 = vmatprep.subr.bf16.mxu0 %v11729_v48  ;;  %v2840_v12 = vld [vmem:[%s14469_s23 + $0x1580] sm:$0xff]  ;;  %v11753_v40 = vcombine.high %v2712_v25, %v2716_v56  ;;  %v11752_v61 = vcombine.low %v2712_v25, %v2716_v56 }
 0x41b   : > { %6971 = vmatprep.subr.bf16.mxu1 %v11857_v59  ;;  %v2844_v18 = vld [vmem:[%s14469_s23 + $0x15a0] sm:$0xff] }
 0x41c   : > { %v11881_v3 = vcombine.high %v2840_v12, %v2844_v18  ;;  %v2720_v10 = vld [vmem:[%s14469_s23 + $0x11c0] sm:$0xff]  ;;  %v11880_v39 = vcombine.low %v2840_v12, %v2844_v18 }
 0x41d   : > { %6931 = vmatpush1.bf16.msra.mxu0 %v11728_v14  ;;  %v2724_v36 = vld [vmem:[%s14469_s23 + $0x11e0] sm:$0xff] }
 0x41e   : > { %6972 = vmatpush1.bf16.msra.mxu1 %v11856_v9  ;;  %6932 = vmatprep.subr.bf16.mxu0 %v11737_v21  ;;  %v2848_v44 = vld [vmem:[%s14469_s23 + $0x15c0] sm:$0xff]  ;;  %v11761_v57 = vcombine.high %v2720_v10, %v2724_v36  ;;  %v11760_v32 = vcombine.low %v2720_v10, %v2724_v36 }
 0x41f   : > { %6973 = vmatprep.subr.bf16.mxu1 %v11865_v51  ;;  %v2852_v11 = vld [vmem:[%s14469_s23 + $0x15e0] sm:$0xff] }
 0x420   : > { %v11889_v49 = vcombine.high %v2848_v44, %v2852_v11  ;;  %v2728_v19 = vld [vmem:[%s14469_s23 + $0x1200] sm:$0xff]  ;;  %v11888_v22 = vcombine.low %v2848_v44, %v2852_v11 }
 0x421   : > { %6933 = vmatpush1.bf16.msra.mxu0 %v11736_v28  ;;  %v2732_v58 = vld [vmem:[%s14469_s23 + $0x1220] sm:$0xff] }
 0x422   : > { %6974 = vmatpush1.bf16.msra.mxu1 %v11864_v4  ;;  %6934 = vmatprep.subr.bf16.mxu0 %v11745_v52  ;;  %v2856_v26 = vld [vmem:[%s14469_s23 + $0x1600] sm:$0xff]  ;;  %v11769_v23 = vcombine.high %v2728_v19, %v2732_v58  ;;  %v11768_v35 = vcombine.low %v2728_v19, %v2732_v58 }
 0x423   : > { %6975 = vmatprep.subr.bf16.mxu1 %v11873_v54  ;;  %v2860_v42 = vld [vmem:[%s14469_s23 + $0x1620] sm:$0xff] }
 0x424   : > { %v11897_v0 = vcombine.high %v2856_v26, %v2860_v42  ;;  %v2736_v50 = vld [vmem:[%s14469_s23 + $0x1240] sm:$0xff]  ;;  %v11896_v13 = vcombine.low %v2856_v26, %v2860_v42 }
 0x425   : > { %6935 = vmatpush1.bf16.msra.mxu0 %v11744_v24  ;;  %v2740_v48 = vld [vmem:[%s14469_s23 + $0x1260] sm:$0xff] }
 0x426   : > { %6976 = vmatpush1.bf16.msra.mxu1 %v11872_v20  ;;  %6936 = vmatprep.subr.bf16.mxu0 %v11753_v40  ;;  %v2864_v59 = vld [vmem:[%s14469_s23 + $0x1640] sm:$0xff]  ;;  %v11777_v6 = vcombine.high %v2736_v50, %v2740_v48  ;;  %v11776_v17 = vcombine.low %v2736_v50, %v2740_v48 }
 0x427   : > { %6977 = vmatprep.subr.bf16.mxu1 %v11881_v3  ;;  %v2868_v31 = vld [vmem:[%s14469_s23 + $0x1660] sm:$0xff] }
 0x428   : > { %v11905_v14 = vcombine.high %v2864_v59, %v2868_v31  ;;  %v2744_v9 = vld [vmem:[%s14469_s23 + $0x1280] sm:$0xff]  ;;  %v11904_v15 = vcombine.low %v2864_v59, %v2868_v31 }
 0x429   : > { %6937 = vmatpush1.bf16.msra.mxu0 %v11752_v61  ;;  %v2748_v21 = vld [vmem:[%s14469_s23 + $0x12a0] sm:$0xff] }
 0x42a   : > { %6978 = vmatpush1.bf16.msra.mxu1 %v11880_v39  ;;  %6938 = vmatprep.subr.bf16.mxu0 %v11761_v57  ;;  %v2872_v51 = vld [vmem:[%s14469_s23 + $0x1680] sm:$0xff]  ;;  %v11785_v29 = vcombine.high %v2744_v9, %v2748_v21  ;;  %v11784_v56 = vcombine.low %v2744_v9, %v2748_v21 }
 0x42b   : > { %6979 = vmatprep.subr.bf16.mxu1 %v11889_v49  ;;  %v2876_v30 = vld [vmem:[%s14469_s23 + $0x16a0] sm:$0xff] }
 0x42c   : > { %v11913_v28 = vcombine.high %v2872_v51, %v2876_v30  ;;  %v2752_v4 = vld [vmem:[%s14469_s23 + $0x12c0] sm:$0xff]  ;;  %v11912_v12 = vcombine.low %v2872_v51, %v2876_v30 }
 0x42d   : > { %6939 = vmatpush1.bf16.msra.mxu0 %v11760_v32  ;;  %v2756_v52 = vld [vmem:[%s14469_s23 + $0x12e0] sm:$0xff] }
 0x42e   : > { %6980 = vmatpush1.bf16.msra.mxu1 %v11888_v22  ;;  %6940 = vmatprep.subr.bf16.mxu0 %v11769_v23  ;;  %v2880_v54 = vld [vmem:[%s14469_s23 + $0x16c0] sm:$0xff]  ;;  %v11793_v18 = vcombine.high %v2752_v4, %v2756_v52  ;;  %v11792_v36 = vcombine.low %v2752_v4, %v2756_v52  ;;  %v2285_v4 = vld [vmem:[%s14469_s23 + $0x428] sm:$0xff] }
 0x42f   : > { %6981 = vmatprep.subr.bf16.mxu1 %v11897_v0  ;;  %v2884_v25 = vld [vmem:[%s14469_s23 + $0x16e0] sm:$0xff] }
 0x430   : > { %v11921_v24 = vcombine.high %v2880_v54, %v2884_v25  ;;  %v2760_v20 = vld [vmem:[%s14469_s23 + $0x1300] sm:$0xff]  ;;  %v11920_v44 = vcombine.low %v2880_v54, %v2884_v25  ;;  %v2128_v25 = vmax.f32 %v14994_v27, 0.0 }
 0x431   : > { %6941 = vmatpush1.bf16.msra.mxu0 %v11768_v35  ;;  %v2764_v40 = vld [vmem:[%s14469_s23 + $0x1320] sm:$0xff] }
 0x432   : > { %6982 = vmatpush1.bf16.msra.mxu1 %v11896_v13  ;;  %6942 = vmatprep.subr.bf16.mxu0 %v11777_v6  ;;  %v2888_v3 = vld [vmem:[%s14469_s23 + $0x1700] sm:$0xff]  ;;  %v11801_v11 = vcombine.high %v2760_v20, %v2764_v40  ;;  %v11800_v58 = vcombine.low %v2760_v20, %v2764_v40  ;;  %v2165_v20 = vld [vmem:[%s14469_s23 + $0x68] sm:$0xff] }
 0x433   : > { %6983 = vmatprep.subr.bf16.mxu1 %v11905_v14  ;;  %v2892_v10 = vld [vmem:[%s14469_s23 + $0x1720] sm:$0xff] }
 0x434   : > { %v11929_v61 = vcombine.high %v2888_v3, %v2892_v10  ;;  %v2768_v39 = vld [vmem:[%s14469_s23 + $0x1340] sm:$0xff]  ;;  %v11928_v26 = vcombine.low %v2888_v3, %v2892_v10  ;;  %v2289_v3 = vld [vmem:[%s14469_s23 + $0x448] sm:$0xff] }
 0x435   : > { %6943 = vmatpush1.bf16.msra.mxu0 %v11776_v17  ;;  %v2772_v57 = vld [vmem:[%s14469_s23 + $0x1360] sm:$0xff]  ;;  %v2293_v10 = vld [vmem:[%s14469_s23 + $0x468] sm:$0xff] }
 0x436   : > { %6984 = vmatpush1.bf16.msra.mxu1 %v11904_v15  ;;  %6944 = vmatprep.subr.bf16.mxu0 %v11785_v29  ;;  %v2896_v49 = vld [vmem:[%s14469_s23 + $0x1740] sm:$0xff]  ;;  %v11809_v42 = vcombine.high %v2768_v39, %v2772_v57  ;;  %v11808_v48 = vcombine.low %v2768_v39, %v2772_v57  ;;  %v2153_v15 = vld [vmem:[%s14469_s23 + $0x8] sm:$0xff]  ;;  %v11331_v39 = vcombine.high %v2289_v3, %v2293_v10 }
 0x437   : > { %6985 = vmatprep.subr.bf16.mxu1 %v11913_v28  ;;  %v2900_v19 = vld [vmem:[%s14469_s23 + $0x1760] sm:$0xff]  ;;  %v2157_v29 = vld [vmem:[%s14469_s23 + $0x28] sm:$0xff] }
 0x438   : > { %v11937_v32 = vcombine.high %v2896_v49, %v2900_v19  ;;  %v2776_v22 = vld [vmem:[%s14469_s23 + $0x1380] sm:$0xff]  ;;  %v11936_v59 = vcombine.low %v2896_v49, %v2900_v19  ;;  %v2281_v28 = vld [vmem:[%s14469_s23 + $0x408] sm:$0xff]  ;;  %v11194_v40 = vcombine.low %v2153_v15, %v2157_v29 }
 0x439   : > { %6945 = vmatpush1.bf16.msra.mxu0 %v11784_v56  ;;  %v2780_v23 = vld [vmem:[%s14469_s23 + $0x13a0] sm:$0xff]  ;;  %v11195_v56 = vcombine.high %v2153_v15, %v2157_v29  ;;  %v11322_v27 = vcombine.low %v2281_v28, %v2285_v4  ;;  %v2297_v57 = vld [vmem:[%s14469_s23 + $0x488] sm:$0xff] }
 0x43a   : > { %6986 = vmatpush1.bf16.msra.mxu1 %v11912_v12  ;;  %6946 = vmatprep.subr.bf16.mxu0 %v11793_v18  ;;  %v2904_v0 = vld [vmem:[%s14469_s23 + $0x1780] sm:$0xff]  ;;  %v11817_v31 = vcombine.high %v2776_v22, %v2780_v23  ;;  %v11816_v21 = vcombine.low %v2776_v22, %v2780_v23  ;;  %v2130_v12 = vmax.f32 %v14996_v53, 0.0  ;;  %v11323_v18 = vcombine.high %v2281_v28, %v2285_v4  ;;  %v2169_v53 = vld [vmem:[%s14469_s23 + $0x88] sm:$0xff] }
 0x43b   : > { %6987 = vmatprep.subr.bf16.mxu1 %v11921_v24  ;;  %v2908_v50 = vld [vmem:[%s14469_s23 + $0x17a0] sm:$0xff]  ;;  %v2161_v24 = vld [vmem:[%s14469_s23 + $0x48] sm:$0xff] }
 0x43c   : > { %v11945_v35 = vcombine.high %v2904_v0, %v2908_v50  ;;  %v2784_v13 = vld [vmem:[%s14469_s23 + $0x13c0] sm:$0xff]  ;;  %v11944_v51 = vcombine.low %v2904_v0, %v2908_v50  ;;  %v2301_v49 = vld [vmem:[%s14469_s23 + $0x4a8] sm:$0xff]  ;;  %v11202_v19 = vcombine.low %v2161_v24, %v2165_v20 }
 0x43d   : > { %6947 = vmatpush1.bf16.msra.mxu0 %v11792_v36  ;;  %v2788_v6 = vld [vmem:[%s14469_s23 + $0x13e0] sm:$0xff]  ;;  %v15127_v36 = vpack.c.bf16 %v2128_v25, %v2128_v25  ;;  %v2181_v22 = vld [vmem:[%s14469_s23 + $0xe8] sm:$0xff] }
 0x43e   : > { %6988 = vmatpush1.bf16.msra.mxu1 %v11920_v44  ;;  %6948 = vmatprep.subr.bf16.mxu0 %v11801_v11  ;;  %v2912_v14 = vld [vmem:[%s14469_s23 + $0x17c0] sm:$0xff]  ;;  %v11825_v30 = vcombine.high %v2784_v13, %v2788_v6  ;;  %v11824_v52 = vcombine.low %v2784_v13, %v2788_v6  ;;  %v15129_v44 = vpack.c.bf16 %v2130_v12, %v2130_v12  ;;  %v2305_v23 = vld [vmem:[%s14469_s23 + $0x4c8] sm:$0xff] }
 0x43f   : > { %6989 = vmatprep.subr.bf16.mxu1 %v11929_v61  ;;  %v2916_v9 = vld [vmem:[%s14469_s23 + $0x17e0] sm:$0xff]  ;;  %v11203_v11 = vcombine.high %v2161_v24, %v2165_v20  ;;  %v2173_v61 = vld [vmem:[%s14469_s23 + $0xa8] sm:$0xff] }
 0x440   : > { %v11953_v17 = vcombine.high %v2912_v14, %v2916_v9  ;;  %v11952_v54 = vcombine.low %v2912_v14, %v2916_v9  ;;  %v2309_v0 = vld [vmem:[%s14469_s23 + $0x4e8] sm:$0xff]  ;;  %v11210_v50 = vcombine.low %v2169_v53, %v2173_v61 }
 0x441   : > { %6949 = vmatpush1.bf16.msra.mxu0 %v11800_v58  ;;  %v11330_v58 = vcombine.low %v2289_v3, %v2293_v10  ;;  %v2189_v13 = vld [vmem:[%s14469_s23 + $0x128] sm:$0xff] }
 0x442   : > { %6990 = vmatpush1.bf16.msra.mxu1 %v11928_v26  ;;  %6950 = vmatprep.subr.bf16.mxu0 %v11809_v42  ;;  %v11211_v26 = vcombine.high %v2169_v53, %v2173_v61  ;;  %v11339_v42 = vcombine.high %v2297_v57, %v2301_v49  ;;  %v2313_v6 = vld [vmem:[%s14469_s23 + $0x508] sm:$0xff] }
 0x443   : > { %6991 = vmatprep.subr.bf16.mxu1 %v11937_v32  ;;  %v2177_v32 = vld [vmem:[%s14469_s23 + $0xc8] sm:$0xff] }
 0x444   : > { %v2317_v14 = vld [vmem:[%s14469_s23 + $0x528] sm:$0xff]  ;;  %v11218_v9 = vcombine.low %v2177_v32, %v2181_v22 }
 0x445   : > { %6951 = vmatpush1.bf16.msra.mxu0 %v11808_v48  ;;  %v11338_v48 = vcombine.low %v2297_v57, %v2301_v49  ;;  %v2197_v15 = vld [vmem:[%s14469_s23 + $0x168] sm:$0xff] }
 0x446   : > { %6992 = vmatpush1.bf16.msra.mxu1 %v11936_v59  ;;  %6952 = vmatprep.subr.bf16.mxu0 %v11817_v31  ;;  %v11219_v59 = vcombine.high %v2177_v32, %v2181_v22  ;;  %v11347_v31 = vcombine.high %v2305_v23, %v2309_v0  ;;  %v2321_v29 = vld [vmem:[%s14469_s23 + $0x548] sm:$0xff] }
 0x447   : > { %6993 = vmatprep.subr.bf16.mxu1 %v11945_v35  ;;  %v2185_v35 = vld [vmem:[%s14469_s23 + $0x108] sm:$0xff] }
 0x448   : > { %v2325_v28 = vld [vmem:[%s14469_s23 + $0x568] sm:$0xff]  ;;  %v11226_v4 = vcombine.low %v2185_v35, %v2189_v13 }
 0x449   : > { %6953 = vmatpush1.bf16.msra.mxu0 %v11816_v21  ;;  %v11346_v21 = vcombine.low %v2305_v23, %v2309_v0  ;;  %v11363_v25 = vcombine.high %v2321_v29, %v2325_v28  ;;  %v2205_v12 = vld [vmem:[%s14469_s23 + $0x1a8] sm:$0xff] }
 0x44a   : > { %6994 = vmatpush1.bf16.msra.mxu1 %v11944_v51  ;;  %6954 = vmatprep.subr.bf16.mxu0 %v11825_v30  ;;  %v11227_v51 = vcombine.high %v2185_v35, %v2189_v13  ;;  %v11355_v30 = vcombine.high %v2313_v6, %v2317_v14  ;;  %v2333_v24 = vld [vmem:[%s14469_s23 + $0x5a8] sm:$0xff] }
 0x44b   : > { %6995 = vmatprep.subr.bf16.mxu1 %v11953_v17  ;;  %v2193_v17 = vld [vmem:[%s14469_s23 + $0x148] sm:$0xff] }
 0x44c   : > { %v11234_v20 = vcombine.low %v2193_v17, %v2197_v15  ;;  %v2337_v53 = vld [vmem:[%s14469_s23 + $0x5c8] sm:$0xff] }
 0x44d   : > { %6955 = vmatpush1.bf16.msra.mxu0 %v11824_v52  ;;  %v11354_v52 = vcombine.low %v2313_v6, %v2317_v14  ;;  %v2341_v61 = vld [vmem:[%s14469_s23 + $0x5e8] sm:$0xff] }
 0x44e   : > { %6996 = vmatpush1.bf16.msra.mxu1 %v11952_v54  ;;  %7006 = vmatprep.subr.bf16.mxu0 %v11195_v56  ;;  %v11235_v54 = vcombine.high %v2193_v17, %v2197_v15  ;;  %v2201_v56 = vld [vmem:[%s14469_s23 + $0x188] sm:$0xff]  ;;  %v11378_v23 = vcombine.low %v2337_v53, %v2341_v61 }
 0x44f   : > { %7047 = vmatprep.subr.bf16.mxu1 %v11323_v18  ;;  %v2329_v18 = vld [vmem:[%s14469_s23 + $0x588] sm:$0xff]  ;;  %v11243_v3 = vcombine.high %v2201_v56, %v2205_v12 }
 0x450   : > { %6957 = vmatmul.mubr.bf16.vlgmr.msra.gmra.mrb[20].mxu0 %v15127_v36  ;;  %v11371_v10 = vcombine.high %v2329_v18, %v2333_v24  ;;  %v11370_v57 = vcombine.low %v2329_v18, %v2333_v24  ;;  %v2349_v32 = vld [vmem:[%s14469_s23 + $0x628] sm:$0xff] }
 0x451   : > { %6998 = vmatmul.mubr.bf16.vlgmr.msra.gmra.mrb[20].mxu1 %v15129_v44  ;;  %7007 = vmatpush1.bf16.msra.mxu0 %v11194_v40  ;;  %v11362_v40 = vcombine.low %v2321_v29, %v2325_v28  ;;  %v2357_v35 = vld [vmem:[%s14469_s23 + $0x668] sm:$0xff] }
 0x452   : > { %7038 = vmatprep.mubr.bf16.mxu0 %v14902_v41  ;;  %7048 = vmatpush1.bf16.msra.mxu1 %v11322_v27  ;;  %v2209_v27 = vld [vmem:[%s14469_s23 + $0x1c8] sm:$0xff] }
 0x453   : > { %7079 = vmatprep.mubr.bf16.mxu1 %v14904_v43  ;;  %7008 = vmatprep.subr.bf16.mxu0 %v11203_v11  ;;  %v2213_v11 = vld [vmem:[%s14469_s23 + $0x1e8] sm:$0xff] }
 0x454   : > { %7049 = vmatprep.subr.bf16.mxu1 %v11331_v39  ;;  %v11242_v39 = vcombine.low %v2201_v56, %v2205_v12  ;;  %v11251_v49 = vcombine.high %v2209_v27, %v2213_v11  ;;  %v11250_v22 = vcombine.low %v2209_v27, %v2213_v11  ;;  %v2365_v17 = vld [vmem:[%s14469_s23 + $0x6a8] sm:$0xff] }
 0x455   : > { %7009 = vmatpush1.bf16.msra.mxu0 %v11202_v19  ;;  %v11379_v19 = vcombine.high %v2337_v53, %v2341_v61  ;;  %v2373_v56 = vld [vmem:[%s14469_s23 + $0x6e8] sm:$0xff] }
 0x456   : > { %7050 = vmatpush1.bf16.msra.mxu1 %v11330_v58  ;;  %7010 = vmatprep.subr.bf16.mxu0 %v11211_v26  ;;  %v2217_v58 = vld [vmem:[%s14469_s23 + $0x208] sm:$0xff] }
 0x457   : > { %7051 = vmatprep.subr.bf16.mxu1 %v11339_v42  ;;  %v2221_v26 = vld [vmem:[%s14469_s23 + $0x228] sm:$0xff] }
 0x458   : > { %v2345_v42 = vld [vmem:[%s14469_s23 + $0x608] sm:$0xff]  ;;  %v11259_v0 = vcombine.high %v2217_v58, %v2221_v26  ;;  %v11258_v13 = vcombine.low %v2217_v58, %v2221_v26 }
 0x459   : > { %7011 = vmatpush1.bf16.msra.mxu0 %v11210_v50  ;;  %v11387_v50 = vcombine.high %v2345_v42, %v2349_v32  ;;  %v11386_v6 = vcombine.low %v2345_v42, %v2349_v32  ;;  %v2381_v27 = vld [vmem:[%s14469_s23 + $0x728] sm:$0xff] }
 0x45a   : > { %7052 = vmatpush1.bf16.msra.mxu1 %v11338_v48  ;;  %7012 = vmatprep.subr.bf16.mxu0 %v11219_v59  ;;  %v2225_v48 = vld [vmem:[%s14469_s23 + $0x248] sm:$0xff] }
 0x45b   : > { %7053 = vmatprep.subr.bf16.mxu1 %v11347_v31  ;;  %v2229_v59 = vld [vmem:[%s14469_s23 + $0x268] sm:$0xff] }
 0x45c   : > { %v2353_v31 = vld [vmem:[%s14469_s23 + $0x648] sm:$0xff]  ;;  %v11267_v14 = vcombine.high %v2225_v48, %v2229_v59  ;;  %v11266_v15 = vcombine.low %v2225_v48, %v2229_v59 }
 0x45d   : > { %7013 = vmatpush1.bf16.msra.mxu0 %v11218_v9  ;;  %v11395_v9 = vcombine.high %v2353_v31, %v2357_v35  ;;  %v11394_v29 = vcombine.low %v2353_v31, %v2357_v35  ;;  %v2389_v58 = vld [vmem:[%s14469_s23 + $0x768] sm:$0xff] }
 0x45e   : > { %7054 = vmatpush1.bf16.msra.mxu1 %v11346_v21  ;;  %7014 = vmatprep.subr.bf16.mxu0 %v11227_v51  ;;  %v2233_v21 = vld [vmem:[%s14469_s23 + $0x288] sm:$0xff] }
 0x45f   : > { %7055 = vmatprep.subr.bf16.mxu1 %v11355_v30  ;;  %v2237_v51 = vld [vmem:[%s14469_s23 + $0x2a8] sm:$0xff] }
 0x460   : > { %v2361_v30 = vld [vmem:[%s14469_s23 + $0x688] sm:$0xff]  ;;  %v11275_v28 = vcombine.high %v2233_v21, %v2237_v51  ;;  %v11274_v12 = vcombine.low %v2233_v21, %v2237_v51 }
 0x461   : > { %7015 = vmatpush1.bf16.msra.mxu0 %v11226_v4  ;;  %v11403_v4 = vcombine.high %v2361_v30, %v2365_v17  ;;  %v11402_v18 = vcombine.low %v2361_v30, %v2365_v17  ;;  %v2397_v48 = vld [vmem:[%s14469_s23 + $0x7a8] sm:$0xff] }
 0x462   : > { %7056 = vmatpush1.bf16.msra.mxu1 %v11354_v52  ;;  %7016 = vmatprep.subr.bf16.mxu0 %v11235_v54  ;;  %v2241_v52 = vld [vmem:[%s14469_s23 + $0x2c8] sm:$0xff] }
 0x463   : > { %7057 = vmatprep.subr.bf16.mxu1 %v11363_v25  ;;  %v2245_v54 = vld [vmem:[%s14469_s23 + $0x2e8] sm:$0xff] }
 0x464   : > { %v2369_v25 = vld [vmem:[%s14469_s23 + $0x6c8] sm:$0xff]  ;;  %v11283_v24 = vcombine.high %v2241_v52, %v2245_v54  ;;  %v11282_v11 = vcombine.low %v2241_v52, %v2245_v54 }
 0x465   : > { %7017 = vmatpush1.bf16.msra.mxu0 %v11234_v20  ;;  %v11411_v20 = vcombine.high %v2369_v25, %v2373_v56  ;;  %v11410_v53 = vcombine.low %v2369_v25, %v2373_v56  ;;  %v2405_v21 = vld [vmem:[%s14469_s23 + $0x7e8] sm:$0xff] }
 0x466   : > { %7058 = vmatpush1.bf16.msra.mxu1 %v11362_v40  ;;  %7018 = vmatprep.subr.bf16.mxu0 %v11243_v3  ;;  %v2249_v40 = vld [vmem:[%s14469_s23 + $0x308] sm:$0xff] }
 0x467   : > { %7059 = vmatprep.subr.bf16.mxu1 %v11371_v10  ;;  %v2253_v3 = vld [vmem:[%s14469_s23 + $0x328] sm:$0xff] }
 0x468   : > { %v2377_v10 = vld [vmem:[%s14469_s23 + $0x708] sm:$0xff]  ;;  %v11291_v61 = vcombine.high %v2249_v40, %v2253_v3  ;;  %v11290_v26 = vcombine.low %v2249_v40, %v2253_v3 }
 0x469   : > { %7019 = vmatpush1.bf16.msra.mxu0 %v11242_v39  ;;  %v11419_v39 = vcombine.high %v2377_v10, %v2381_v27  ;;  %v11418_v42 = vcombine.low %v2377_v10, %v2381_v27  ;;  %v2541_v52 = vld [vmem:[%s14469_s23 + $0xc28] sm:$0xff] }
 0x46a   : > { %7060 = vmatpush1.bf16.msra.mxu1 %v11370_v57  ;;  %7020 = vmatprep.subr.bf16.mxu0 %v11251_v49  ;;  %v2257_v57 = vld [vmem:[%s14469_s23 + $0x348] sm:$0xff] }
 0x46b   : > { %7061 = vmatprep.subr.bf16.mxu1 %v11379_v19  ;;  %v2261_v49 = vld [vmem:[%s14469_s23 + $0x368] sm:$0xff] }
 0x46c   : > { %v2385_v19 = vld [vmem:[%s14469_s23 + $0x748] sm:$0xff]  ;;  %v11299_v32 = vcombine.high %v2257_v57, %v2261_v49  ;;  %v11298_v59 = vcombine.low %v2257_v57, %v2261_v49 }
 0x46d   : > { %7021 = vmatpush1.bf16.msra.mxu0 %v11250_v22  ;;  %v11427_v22 = vcombine.high %v2385_v19, %v2389_v58  ;;  %v11426_v31 = vcombine.low %v2385_v19, %v2389_v58  ;;  %v2545_v40 = vld [vmem:[%s14469_s23 + $0xc48] sm:$0xff] }
 0x46e   : > { %7062 = vmatpush1.bf16.msra.mxu1 %v11378_v23  ;;  %7022 = vmatprep.subr.bf16.mxu0 %v11259_v0  ;;  %v2265_v23 = vld [vmem:[%s14469_s23 + $0x388] sm:$0xff] }
 0x46f   : > { %7063 = vmatprep.subr.bf16.mxu1 %v11387_v50  ;;  %v2269_v0 = vld [vmem:[%s14469_s23 + $0x3a8] sm:$0xff] }
 0x470   : > { %v2393_v50 = vld [vmem:[%s14469_s23 + $0x788] sm:$0xff]  ;;  %v11307_v35 = vcombine.high %v2265_v23, %v2269_v0  ;;  %v11306_v51 = vcombine.low %v2265_v23, %v2269_v0 }
 0x471   : > { %7023 = vmatpush1.bf16.msra.mxu0 %v11258_v13  ;;  %v11435_v13 = vcombine.high %v2393_v50, %v2397_v48  ;;  %v11434_v30 = vcombine.low %v2393_v50, %v2397_v48  ;;  %v2549_v3 = vld [vmem:[%s14469_s23 + $0xc68] sm:$0xff] }
 0x472   : > { %7064 = vmatpush1.bf16.msra.mxu1 %v11386_v6  ;;  %7024 = vmatprep.subr.bf16.mxu0 %v11267_v14  ;;  %v2273_v6 = vld [vmem:[%s14469_s23 + $0x3c8] sm:$0xff]  ;;  %v11586_v19 = vcombine.low %v2545_v40, %v2549_v3 }
 0x473   : > { %7065 = vmatprep.subr.bf16.mxu1 %v11395_v9  ;;  %v2277_v14 = vld [vmem:[%s14469_s23 + $0x3e8] sm:$0xff] }
 0x474   : > { %v2401_v9 = vld [vmem:[%s14469_s23 + $0x7c8] sm:$0xff]  ;;  %v11315_v17 = vcombine.high %v2273_v6, %v2277_v14  ;;  %v11314_v54 = vcombine.low %v2273_v6, %v2277_v14 }
 0x475   : > { %7025 = vmatpush1.bf16.msra.mxu0 %v11266_v15  ;;  %v11443_v15 = vcombine.high %v2401_v9, %v2405_v21  ;;  %v11442_v25 = vcombine.low %v2401_v9, %v2405_v21  ;;  %v2557_v57 = vld [vmem:[%s14469_s23 + $0xca8] sm:$0xff] }
 0x476   : > { %7066 = vmatpush1.bf16.msra.mxu1 %v11394_v29  ;;  %7026 = vmatprep.subr.bf16.mxu0 %v11275_v28  ;;  %v2409_v29 = vld [vmem:[%s14469_s23 + $0x808] sm:$0xff] }
 0x477   : > { %7067 = vmatprep.subr.bf16.mxu1 %v11403_v4  ;;  %v2413_v28 = vld [vmem:[%s14469_s23 + $0x828] sm:$0xff] }
 0x478   : > { %v2537_v4 = vld [vmem:[%s14469_s23 + $0xc08] sm:$0xff]  ;;  %v11451_v56 = vcombine.high %v2409_v29, %v2413_v28 }
 0x479   : > { %7027 = vmatpush1.bf16.msra.mxu0 %v11274_v12  ;;  %v11579_v12 = vcombine.high %v2537_v4, %v2541_v52  ;;  %v11578_v10 = vcombine.low %v2537_v4, %v2541_v52  ;;  %v2565_v23 = vld [vmem:[%s14469_s23 + $0xce8] sm:$0xff] }
 0x47a   : > { %7068 = vmatpush1.bf16.msra.mxu1 %v11402_v18  ;;  %7028 = vmatprep.subr.bf16.mxu0 %v11283_v24  ;;  %v2417_v18 = vld [vmem:[%s14469_s23 + $0x848] sm:$0xff] }
 0x47b   : > { %7069 = vmatprep.subr.bf16.mxu1 %v11411_v20  ;;  %v2421_v24 = vld [vmem:[%s14469_s23 + $0x868] sm:$0xff]  ;;  %v11450_v20 = vcombine.low %v2409_v29, %v2413_v28 }
 0x47c   : > { %v11459_v27 = vcombine.high %v2417_v18, %v2421_v24  ;;  %v11458_v49 = vcombine.low %v2417_v18, %v2421_v24  ;;  %v2573_v6 = vld [vmem:[%s14469_s23 + $0xd28] sm:$0xff] }
 0x47d   : > { %7029 = vmatpush1.bf16.msra.mxu0 %v11282_v11  ;;  %v2425_v11 = vld [vmem:[%s14469_s23 + $0x888] sm:$0xff] }
 0x47e   : > { %7070 = vmatpush1.bf16.msra.mxu1 %v11410_v53  ;;  %7030 = vmatprep.subr.bf16.mxu0 %v11291_v61  ;;  %v2429_v53 = vld [vmem:[%s14469_s23 + $0x8a8] sm:$0xff]  ;;  %v11587_v61 = vcombine.high %v2545_v40, %v2549_v3 }
 0x47f   : > { %7071 = vmatprep.subr.bf16.mxu1 %v11419_v39  ;;  %v2553_v39 = vld [vmem:[%s14469_s23 + $0xc88] sm:$0xff]  ;;  %v11467_v58 = vcombine.high %v2425_v11, %v2429_v53  ;;  %v11466_v0 = vcombine.low %v2425_v11, %v2429_v53 }
 0x480   : > { %v11594_v50 = vcombine.low %v2553_v39, %v2557_v57  ;;  %v2581_v29 = vld [vmem:[%s14469_s23 + $0xd68] sm:$0xff] }
 0x481   : > { %7031 = vmatpush1.bf16.msra.mxu0 %v11290_v26  ;;  %v11595_v26 = vcombine.high %v2553_v39, %v2557_v57  ;;  %v2589_v18 = vld [vmem:[%s14469_s23 + $0xda8] sm:$0xff] }
 0x482   : > { %7072 = vmatpush1.bf16.msra.mxu1 %v11418_v42  ;;  %7032 = vmatprep.subr.bf16.mxu0 %v11299_v32  ;;  %v2433_v42 = vld [vmem:[%s14469_s23 + $0x8c8] sm:$0xff] }
 0x483   : > { %7073 = vmatprep.subr.bf16.mxu1 %v11427_v22  ;;  %v2437_v32 = vld [vmem:[%s14469_s23 + $0x8e8] sm:$0xff] }
 0x484   : > { %v2561_v22 = vld [vmem:[%s14469_s23 + $0xcc8] sm:$0xff]  ;;  %v11475_v48 = vcombine.high %v2433_v42, %v2437_v32  ;;  %v11474_v14 = vcombine.low %v2433_v42, %v2437_v32 }
 0x485   : > { %7033 = vmatpush1.bf16.msra.mxu0 %v11298_v59  ;;  %v11603_v59 = vcombine.high %v2561_v22, %v2565_v23  ;;  %v11602_v9 = vcombine.low %v2561_v22, %v2565_v23  ;;  %v2465_v11 = vld [vmem:[%s14469_s23 + $0x9c8] sm:$0xff] }
 0x486   : > { %7074 = vmatpush1.bf16.msra.mxu1 %v11426_v31  ;;  %7034 = vmatprep.subr.bf16.mxu0 %v11307_v35  ;;  %v2441_v31 = vld [vmem:[%s14469_s23 + $0x908] sm:$0xff] }
 0x487   : > { %7075 = vmatprep.subr.bf16.mxu1 %v11435_v13  ;;  %v2445_v35 = vld [vmem:[%s14469_s23 + $0x928] sm:$0xff] }
 0x488   : > { %v2569_v13 = vld [vmem:[%s14469_s23 + $0xd08] sm:$0xff]  ;;  %v11483_v21 = vcombine.high %v2441_v31, %v2445_v35  ;;  %v11482_v28 = vcombine.low %v2441_v31, %v2445_v35 }
 0x489   : > { %7035 = vmatpush1.bf16.msra.mxu0 %v11306_v51  ;;  %v11611_v51 = vcombine.high %v2569_v13, %v2573_v6  ;;  %v11610_v4 = vcombine.low %v2569_v13, %v2573_v6  ;;  %v2469_v53 = vld [vmem:[%s14469_s23 + $0x9e8] sm:$0xff] }
 0x48a   : > { %7076 = vmatpush1.bf16.msra.mxu1 %v11434_v30  ;;  %7036 = vmatprep.subr.bf16.mxu0 %v11315_v17  ;;  %v2449_v30 = vld [vmem:[%s14469_s23 + $0x948] sm:$0xff]  ;;  %v11506_v6 = vcombine.low %v2465_v11, %v2469_v53 }
 0x48b   : > { %7077 = vmatprep.subr.bf16.mxu1 %v11443_v15  ;;  %v2453_v17 = vld [vmem:[%s14469_s23 + $0x968] sm:$0xff] }
 0x48c   : > { %v2577_v15 = vld [vmem:[%s14469_s23 + $0xd48] sm:$0xff]  ;;  %v11491_v52 = vcombine.high %v2449_v30, %v2453_v17  ;;  %v11490_v24 = vcombine.low %v2449_v30, %v2453_v17 }
 0x48d   : > { %7037 = vmatpush1.bf16.msra.mxu0 %v11314_v54  ;;  %v11619_v54 = vcombine.high %v2577_v15, %v2581_v29  ;;  %v2477_v31 = vld [vmem:[%s14469_s23 + $0xa28] sm:$0xff] }
 0x48e   : > { %7078 = vmatpush1.bf16.msra.mxu1 %v11442_v25  ;;  %7088 = vmatprep.subr.bf16.mxu0 %v11451_v56  ;;  %v2457_v25 = vld [vmem:[%s14469_s23 + $0x988] sm:$0xff] }
 0x48f   : > { %7129 = vmatprep.subr.bf16.mxu1 %v11579_v12  ;;  %v2461_v56 = vld [vmem:[%s14469_s23 + $0x9a8] sm:$0xff] }
 0x490   : > { %7039 = vmatmul.mubr.bf16.vlgmr.msra.gmra.mrb[24].mxu0 %v14906_v47  ;;  %v2585_v12 = vld [vmem:[%s14469_s23 + $0xd88] sm:$0xff]  ;;  %v11499_v40 = vcombine.high %v2457_v25, %v2461_v56  ;;  %v11498_v32 = vcombine.low %v2457_v25, %v2461_v56 }
 0x491   : > { %7080 = vmatmul.mubr.bf16.vlgmr.msra.gmra.mrb[24].mxu1 %v14908_v7  ;;  %7089 = vmatpush1.bf16.msra.mxu0 %v11450_v20  ;;  %v11618_v20 = vcombine.low %v2577_v15, %v2581_v29  ;;  %v2601_v35 = vld [vmem:[%s14469_s23 + $0xe08] sm:$0xff] }
 0x492   : > { %7120 = vmatprep.mubr.bf16.mxu0 %v14921_v55  ;;  %7130 = vmatpush1.bf16.msra.mxu1 %v11578_v10  ;;  %v2605_v13 = vld [vmem:[%s14469_s23 + $0xe28] sm:$0xff] }
 0x493   : > { %7161 = vmatprep.mubr.bf16.mxu1 %v14930_v16  ;;  %7090 = vmatprep.subr.bf16.mxu0 %v11459_v27  ;;  %v11627_v27 = vcombine.high %v2585_v12, %v2589_v18  ;;  %v2485_v30 = vld [vmem:[%s14469_s23 + $0xa68] sm:$0xff] }
 0x494   : > { %7131 = vmatprep.subr.bf16.mxu1 %v11587_v61  ;;  %v2609_v17 = vld [vmem:[%s14469_s23 + $0xe48] sm:$0xff] }
 0x495   : > { %7091 = vmatpush1.bf16.msra.mxu0 %v11458_v49  ;;  %v2593_v49 = vld [vmem:[%s14469_s23 + $0xdc8] sm:$0xff] }
 0x496   : > { %7132 = vmatpush1.bf16.msra.mxu1 %v11586_v19  ;;  %7092 = vmatprep.subr.bf16.mxu0 %v11467_v58  ;;  %v2597_v19 = vld [vmem:[%s14469_s23 + $0xde8] sm:$0xff] }
 0x497   : > { %7133 = vmatprep.subr.bf16.mxu1 %v11595_v26  ;;  %v2613_v15 = vld [vmem:[%s14469_s23 + $0xe68] sm:$0xff] }
 0x498   : > { %v2493_v25 = vld [vmem:[%s14469_s23 + $0xaa8] sm:$0xff] }
 0x499   : > { %7093 = vmatpush1.bf16.msra.mxu0 %v11466_v0  ;;  %v11626_v0 = vcombine.low %v2585_v12, %v2589_v18  ;;  %v2617_v56 = vld [vmem:[%s14469_s23 + $0xe88] sm:$0xff] }
 0x49a   : > { %7134 = vmatpush1.bf16.msra.mxu1 %v11594_v50  ;;  %7094 = vmatprep.subr.bf16.mxu0 %v11475_v48  ;;  %v11507_v50 = vcombine.high %v2465_v11, %v2469_v53  ;;  %v11635_v48 = vcombine.high %v2593_v49, %v2597_v19  ;;  %v2621_v12 = vld [vmem:[%s14469_s23 + $0xea8] sm:$0xff] }
 0x49b   : > { %7135 = vmatprep.subr.bf16.mxu1 %v11603_v59  ;;  %v2473_v59 = vld [vmem:[%s14469_s23 + $0xa08] sm:$0xff] }
 0x49c   : > { %v11514_v29 = vcombine.low %v2473_v59, %v2477_v31  ;;  %v2629_v11 = vld [vmem:[%s14469_s23 + $0xee8] sm:$0xff] }
 0x49d   : > { %7095 = vmatpush1.bf16.msra.mxu0 %v11474_v14  ;;  %v11634_v14 = vcombine.low %v2593_v49, %v2597_v19  ;;  %v2505_v19 = vld [vmem:[%s14469_s23 + $0xb08] sm:$0xff] }
 0x49e   : > { %7136 = vmatpush1.bf16.msra.mxu1 %v11602_v9  ;;  %7096 = vmatprep.subr.bf16.mxu0 %v11483_v21  ;;  %v11515_v9 = vcombine.high %v2473_v59, %v2477_v31  ;;  %v11643_v21 = vcombine.high %v2601_v35, %v2605_v13  ;;  %v2517_v59 = vld [vmem:[%s14469_s23 + $0xb68] sm:$0xff] }
 0x49f   : > { %7137 = vmatprep.subr.bf16.mxu1 %v11611_v51  ;;  %v2481_v51 = vld [vmem:[%s14469_s23 + $0xa48] sm:$0xff] }
 0x4a0   : > { %v11522_v18 = vcombine.low %v2481_v51, %v2485_v30  ;;  %v2641_v31 = vld [vmem:[%s14469_s23 + $0xf48] sm:$0xff] }
 0x4a1   : > { %7097 = vmatpush1.bf16.msra.mxu0 %v11482_v28  ;;  %v11642_v28 = vcombine.low %v2601_v35, %v2605_v13  ;;  %v2645_v35 = vld [vmem:[%s14469_s23 + $0xf68] sm:$0xff] }
 0x4a2   : > { %7138 = vmatpush1.bf16.msra.mxu1 %v11610_v4  ;;  %7098 = vmatprep.subr.bf16.mxu0 %v11491_v52  ;;  %v6794_v3 = vpop.f32.mrb[12].mxu0  ;;  %v6835_v10 = vpop.f32.mrb[12].mxu1  ;;  %v11523_v4 = vcombine.high %v2481_v51, %v2485_v30  ;;  %v11651_v52 = vcombine.high %v2609_v17, %v2613_v15  ;;  %v2525_v51 = vld [vmem:[%s14469_s23 + $0xba8] sm:$0xff] }
 0x4a3   : > { %7139 = vmatprep.subr.bf16.mxu1 %v11619_v54  ;;  %v15225_v61 = vadd.f32 %v6835_v10, %v6794_v3  ;;  %v6796_v39 = vpop.f32.mrb[13].mxu0  ;;  %v6837_v57 = vpop.f32.mrb[13].mxu1  ;;  %v2489_v54 = vld [vmem:[%s14469_s23 + $0xa88] sm:$0xff] }
 0x4a4   : > { %v15229_v58 = vadd.f32 %v6837_v57, %v6796_v39  ;;  %v6798_v26 = vpop.f32.mrb[14].mxu0  ;;  %v6839_v42 = vpop.f32.mrb[14].mxu1  ;;  %v2497_v3 = vld [vmem:[%s14469_s23 + $0xac8] sm:$0xff]  ;;  %v11530_v53 = vcombine.low %v2489_v54, %v2493_v25  ;;  %v11658_v39 = vcombine.low %v2617_v56, %v2621_v12 }
 0x4a5   : > { %7099 = vmatpush1.bf16.msra.mxu0 %v11490_v24  ;;  %v6799_v22 = vpop.f32.mrb[15].mxu0  ;;  %v6840_v23 = vpop.f32.mrb[15].mxu1  ;;  %v11650_v24 = vcombine.low %v2609_v17, %v2613_v15  ;;  %v2501_v10 = vld [vmem:[%s14469_s23 + $0xae8] sm:$0xff] }
 0x4a6   : > { %7140 = vmatpush1.bf16.msra.mxu1 %v11618_v20  ;;  %7100 = vmatprep.subr.bf16.mxu0 %v11499_v40  ;;  %v11531_v20 = vcombine.high %v2489_v54, %v2493_v25  ;;  %v11659_v40 = vcombine.high %v2617_v56, %v2621_v12  ;;  %v11539_v57 = vcombine.high %v2497_v3, %v2501_v10  ;;  %v2509_v26 = vld [vmem:[%s14469_s23 + $0xb28] sm:$0xff] }
 0x4a7   : > { %7141 = vmatprep.subr.bf16.mxu1 %v11627_v27  ;;  %v2625_v27 = vld [vmem:[%s14469_s23 + $0xec8] sm:$0xff]  ;;  %v11538_v22 = vcombine.low %v2497_v3, %v2501_v10  ;;  %v11546_v13 = vcombine.low %v2505_v19, %v2509_v26 }
 0x4a8   : > { %v11667_v49 = vcombine.high %v2625_v27, %v2629_v11  ;;  %v2633_v42 = vld [vmem:[%s14469_s23 + $0xf08] sm:$0xff]  ;;  %v11666_v23 = vcombine.low %v2625_v27, %v2629_v11 }
 0x4a9   : > { %7101 = vmatpush1.bf16.msra.mxu0 %v11498_v32  ;;  %v2637_v32 = vld [vmem:[%s14469_s23 + $0xf28] sm:$0xff] }
 0x4aa   : > { %7142 = vmatpush1.bf16.msra.mxu1 %v11626_v0  ;;  %7102 = vmatprep.subr.bf16.mxu0 %v11507_v50  ;;  %v11547_v0 = vcombine.high %v2505_v19, %v2509_v26  ;;  %v11675_v50 = vcombine.high %v2633_v42, %v2637_v32  ;;  %v2649_v30 = vld [vmem:[%s14469_s23 + $0xf88] sm:$0xff] }
 0x4ab   : > { %7143 = vmatprep.subr.bf16.mxu1 %v11635_v48  ;;  %v2513_v48 = vld [vmem:[%s14469_s23 + $0xb48] sm:$0xff] }
 0x4ac   : > { %v2653_v17 = vld [vmem:[%s14469_s23 + $0xfa8] sm:$0xff]  ;;  %v11554_v15 = vcombine.low %v2513_v48, %v2517_v59 }
 0x4ad   : > { %7103 = vmatpush1.bf16.msra.mxu0 %v11506_v6  ;;  %v11674_v6 = vcombine.low %v2633_v42, %v2637_v32  ;;  %v2533_v54 = vld [vmem:[%s14469_s23 + $0xbe8] sm:$0xff] }
 0x4ae   : > { %7144 = vmatpush1.bf16.msra.mxu1 %v11634_v14  ;;  %7104 = vmatprep.subr.bf16.mxu0 %v11515_v9  ;;  %v11555_v14 = vcombine.high %v2513_v48, %v2517_v59  ;;  %v11683_v9 = vcombine.high %v2641_v31, %v2645_v35  ;;  %v2657_v25 = vld [vmem:[%s14469_s23 + $0xfc8] sm:$0xff] }
 0x4af   : > { %7145 = vmatprep.subr.bf16.mxu1 %v11643_v21  ;;  %v2521_v21 = vld [vmem:[%s14469_s23 + $0xb88] sm:$0xff] }
 0x4b0   : > { %v2661_v56 = vld [vmem:[%s14469_s23 + $0xfe8] sm:$0xff]  ;;  %v11562_v12 = vcombine.low %v2521_v21, %v2525_v51 }
 0x4b1   : > { %7105 = vmatpush1.bf16.msra.mxu0 %v11514_v29  ;;  %v11682_v29 = vcombine.low %v2641_v31, %v2645_v35  ;;  %v2669_v3 = vld [vmem:[%s14469_s23 + $0x1028] sm:$0xff] }
 0x4b2   : > { %7146 = vmatpush1.bf16.msra.mxu1 %v11642_v28  ;;  %7106 = vmatprep.subr.bf16.mxu0 %v11523_v4  ;;  %v11563_v28 = vcombine.high %v2521_v21, %v2525_v51  ;;  %v11691_v4 = vcombine.high %v2649_v30, %v2653_v17  ;;  %v2793_v10 = vld [vmem:[%s14469_s23 + $0x1408] sm:$0xff] }
 0x4b3   : > { %7147 = vmatprep.subr.bf16.mxu1 %v11651_v52  ;;  %v2529_v52 = vld [vmem:[%s14469_s23 + $0xbc8] sm:$0xff] }
 0x4b4   : > { %v2797_v27 = vld [vmem:[%s14469_s23 + $0x1428] sm:$0xff]  ;;  %v11570_v11 = vcombine.low %v2529_v52, %v2533_v54 }
 0x4b5   : > { %7107 = vmatpush1.bf16.msra.mxu0 %v11522_v18  ;;  %v11690_v18 = vcombine.low %v2649_v30, %v2653_v17  ;;  %v2677_v19 = vld [vmem:[%s14469_s23 + $0x1068] sm:$0xff] }
 0x4b6   : > { %7148 = vmatpush1.bf16.msra.mxu1 %v11650_v24  ;;  %7108 = vmatprep.subr.bf16.mxu0 %v11531_v20  ;;  %v11571_v24 = vcombine.high %v2529_v52, %v2533_v54  ;;  %v11699_v20 = vcombine.high %v2657_v25, %v2661_v56  ;;  %v2801_v42 = vld [vmem:[%s14469_s23 + $0x1448] sm:$0xff] }
 0x4b7   : > { %7149 = vmatprep.subr.bf16.mxu1 %v11659_v40  ;;  %v2665_v40 = vld [vmem:[%s14469_s23 + $0x1008] sm:$0xff] }
 0x4b8   : > { %v11706_v26 = vcombine.low %v2665_v40, %v2669_v3  ;;  %v2805_v32 = vld [vmem:[%s14469_s23 + $0x1468] sm:$0xff] }
 0x4b9   : > { %7109 = vmatpush1.bf16.msra.mxu0 %v11530_v53  ;;  %v11698_v53 = vcombine.low %v2657_v25, %v2661_v56  ;;  %v11843_v48 = vcombine.high %v2801_v42, %v2805_v32  ;;  %v2809_v59 = vld [vmem:[%s14469_s23 + $0x1488] sm:$0xff] }
 0x4ba   : > { %7150 = vmatpush1.bf16.msra.mxu1 %v11658_v39  ;;  %7110 = vmatprep.subr.bf16.mxu0 %v11539_v57  ;;  %v11707_v39 = vcombine.high %v2665_v40, %v2669_v3  ;;  %v11835_v57 = vcombine.high %v2793_v10, %v2797_v27  ;;  %v2813_v31 = vld [vmem:[%s14469_s23 + $0x14a8] sm:$0xff] }
 0x4bb   : > { %7151 = vmatprep.subr.bf16.mxu1 %v11667_v49  ;;  %v2673_v49 = vld [vmem:[%s14469_s23 + $0x1048] sm:$0xff] }
 0x4bc   : > { %v11714_v35 = vcombine.low %v2673_v49, %v2677_v19  ;;  %v2693_v21 = vld [vmem:[%s14469_s23 + $0x10e8] sm:$0xff] }
 0x4bd   : > { %7111 = vmatpush1.bf16.msra.mxu0 %v11538_v22  ;;  %v11834_v22 = vcombine.low %v2793_v10, %v2797_v27  ;;  %v2817_v51 = vld [vmem:[%s14469_s23 + $0x14c8] sm:$0xff] }
 0x4be   : > { %7152 = vmatpush1.bf16.msra.mxu1 %v11666_v23  ;;  %7112 = vmatprep.subr.bf16.mxu0 %v11547_v0  ;;  %v11715_v23 = vcombine.high %v2673_v49, %v2677_v19  ;;  %v2681_v0 = vld [vmem:[%s14469_s23 + $0x1088] sm:$0xff] }
 0x4bf   : > { %7153 = vmatprep.subr.bf16.mxu1 %v11675_v50  ;;  %v2685_v50 = vld [vmem:[%s14469_s23 + $0x10a8] sm:$0xff] }
 0x4c0   : > { %v2821_v30 = vld [vmem:[%s14469_s23 + $0x14e8] sm:$0xff]  ;;  %v11722_v17 = vcombine.low %v2681_v0, %v2685_v50 }
 0x4c1   : > { %7113 = vmatpush1.bf16.msra.mxu0 %v11546_v13  ;;  %v11842_v13 = vcombine.low %v2801_v42, %v2805_v32  ;;  %v2701_v52 = vld [vmem:[%s14469_s23 + $0x1128] sm:$0xff] }
 0x4c2   : > { %7154 = vmatpush1.bf16.msra.mxu1 %v11674_v6  ;;  %7114 = vmatprep.subr.bf16.mxu0 %v11555_v14  ;;  %v11723_v6 = vcombine.high %v2681_v0, %v2685_v50  ;;  %v11851_v14 = vcombine.high %v2809_v59, %v2813_v31  ;;  %v2825_v54 = vld [vmem:[%s14469_s23 + $0x1508] sm:$0xff] }
 0x4c3   : > { %7155 = vmatprep.subr.bf16.mxu1 %v11683_v9  ;;  %v2689_v9 = vld [vmem:[%s14469_s23 + $0x10c8] sm:$0xff] }
 0x4c4   : > { %v2829_v25 = vld [vmem:[%s14469_s23 + $0x1528] sm:$0xff]  ;;  %v11730_v56 = vcombine.low %v2689_v9, %v2693_v21 }
 0x4c5   : > { %7115 = vmatpush1.bf16.msra.mxu0 %v11554_v15  ;;  %v11850_v15 = vcombine.low %v2809_v59, %v2813_v31  ;;  %v2709_v40 = vld [vmem:[%s14469_s23 + $0x1168] sm:$0xff] }
 0x4c6   : > { %7156 = vmatpush1.bf16.msra.mxu1 %v11682_v29  ;;  %7116 = vmatprep.subr.bf16.mxu0 %v11563_v28  ;;  %v11731_v29 = vcombine.high %v2689_v9, %v2693_v21  ;;  %v11859_v28 = vcombine.high %v2817_v51, %v2821_v30  ;;  %v2833_v3 = vld [vmem:[%s14469_s23 + $0x1548] sm:$0xff] }
 0x4c7   : > { %7157 = vmatprep.subr.bf16.mxu1 %v11691_v4  ;;  %v2697_v4 = vld [vmem:[%s14469_s23 + $0x1108] sm:$0xff] }
 0x4c8   : > { %v2837_v10 = vld [vmem:[%s14469_s23 + $0x1568] sm:$0xff]  ;;  %v11738_v27 = vcombine.low %v2697_v4, %v2701_v52 }
 0x4c9   : > { %7117 = vmatpush1.bf16.msra.mxu0 %v11562_v12  ;;  %v11858_v12 = vcombine.low %v2817_v51, %v2821_v30  ;;  %v2717_v49 = vld [vmem:[%s14469_s23 + $0x11a8] sm:$0xff]  ;;  %v11874_v32 = vcombine.low %v2833_v3, %v2837_v10 }
 0x4ca   : > { %7158 = vmatpush1.bf16.msra.mxu1 %v11690_v18  ;;  %7118 = vmatprep.subr.bf16.mxu0 %v11571_v24  ;;  %v11739_v18 = vcombine.high %v2697_v4, %v2701_v52  ;;  %v11867_v24 = vcombine.high %v2825_v54, %v2829_v25  ;;  %v2841_v19 = vld [vmem:[%s14469_s23 + $0x1588] sm:$0xff] }
 0x4cb   : > { %7159 = vmatprep.subr.bf16.mxu1 %v11699_v20  ;;  %v2705_v20 = vld [vmem:[%s14469_s23 + $0x1148] sm:$0xff] }
 0x4cc   : > { %v11746_v42 = vcombine.low %v2705_v20, %v2709_v40  ;;  %v2725_v59 = vld [vmem:[%s14469_s23 + $0x11e8] sm:$0xff] }
 0x4cd   : > { %7119 = vmatpush1.bf16.msra.mxu0 %v11570_v11  ;;  %v11866_v11 = vcombine.low %v2825_v54, %v2829_v25  ;;  %v2729_v52 = vld [vmem:[%s14469_s23 + $0x1208] sm:$0xff] }
 0x4ce   : > { %7160 = vmatpush1.bf16.msra.mxu1 %v11698_v53  ;;  %7170 = vmatprep.subr.bf16.mxu0 %v11707_v39  ;;  %v11747_v53 = vcombine.high %v2705_v20, %v2709_v40  ;;  %v11875_v39 = vcombine.high %v2833_v3, %v2837_v10  ;;  %v2733_v54 = vld [vmem:[%s14469_s23 + $0x1228] sm:$0xff] }
 0x4cf   : > { %7211 = vmatprep.subr.bf16.mxu1 %v11835_v57  ;;  %v2713_v57 = vld [vmem:[%s14469_s23 + $0x1188] sm:$0xff] }
 0x4d0   : > { %7121 = vmatmul.mubr.bf16.vlgmr.msra.gmra.mrb[28].mxu0 %v15049_v8  ;;  %v11754_v30 = vcombine.low %v2713_v57, %v2717_v49  ;;  %v2857_v25 = vld [vmem:[%s14469_s23 + $0x1608] sm:$0xff] }
 0x4d1   : > { %7162 = vmatmul.mubr.bf16.vlgmr.msra.gmra.mrb[28].mxu1 %v15051_v5  ;;  %7171 = vmatpush1.bf16.msra.mxu0 %v11706_v26  ;;  %v2845_v26 = vld [vmem:[%s14469_s23 + $0x15a8] sm:$0xff] }
 0x4d2   : > { %7202 = vmatprep.mubr.bf16.mxu0 %v15053_v46  ;;  %7212 = vmatpush1.bf16.msra.mxu1 %v11834_v22  ;;  %v11755_v22 = vcombine.high %v2713_v57, %v2717_v49  ;;  %v11883_v50 = vcombine.high %v2841_v19, %v2845_v26  ;;  %v2737_v40 = vld [vmem:[%s14469_s23 + $0x1248] sm:$0xff] }
 0x4d3   : > { %7243 = vmatprep.mubr.bf16.mxu1 %v15059_v45  ;;  %7172 = vmatprep.subr.bf16.mxu0 %v11715_v23  ;;  %v2741_v3 = vld [vmem:[%s14469_s23 + $0x1268] sm:$0xff] }
 0x4d4   : > { %7213 = vmatprep.subr.bf16.mxu1 %v11843_v48  ;;  %v2721_v48 = vld [vmem:[%s14469_s23 + $0x11c8] sm:$0xff] }
 0x4d5   : > { %7173 = vmatpush1.bf16.msra.mxu0 %v11714_v35  ;;  %v2865_v10 = vld [vmem:[%s14469_s23 + $0x1648] sm:$0xff] }
 0x4d6   : > { %7214 = vmatpush1.bf16.msra.mxu1 %v11842_v13  ;;  %7174 = vmatprep.subr.bf16.mxu0 %v11723_v6  ;;  %v2849_v6 = vld [vmem:[%s14469_s23 + $0x15c8] sm:$0xff] }
 0x4d7   : > { %7215 = vmatprep.subr.bf16.mxu1 %v11851_v14  ;;  %v2853_v14 = vld [vmem:[%s14469_s23 + $0x15e8] sm:$0xff] }
 0x4d8   : > { %v2745_v49 = vld [vmem:[%s14469_s23 + $0x1288] sm:$0xff] }
 0x4d9   : > { %7175 = vmatpush1.bf16.msra.mxu0 %v11722_v17 }
 0x4da   : > { %7216 = vmatpush1.bf16.msra.mxu1 %v11850_v15  ;;  %7176 = vmatprep.subr.bf16.mxu0 %v11731_v29 }
 0x4db   : > { %7217 = vmatprep.subr.bf16.mxu1 %v11859_v28  ;;  %v11763_v28 = vcombine.high %v2721_v48, %v2725_v59 }
 0x4dd   : > { %7177 = vmatpush1.bf16.msra.mxu0 %v11730_v56  ;;  %v2861_v56 = vld [vmem:[%s14469_s23 + $0x1628] sm:$0xff] }
 0x4de   : > { %7218 = vmatpush1.bf16.msra.mxu1 %v11858_v12  ;;  %7178 = vmatprep.subr.bf16.mxu0 %v11739_v18  ;;  %v11762_v12 = vcombine.low %v2721_v48, %v2725_v59  ;;  %v11890_v18 = vcombine.low %v2849_v6, %v2853_v14  ;;  %v11899_v20 = vcombine.high %v2857_v25, %v2861_v56  ;;  %v2757_v48 = vld [vmem:[%s14469_s23 + $0x12e8] sm:$0xff] }
 0x4df   : > { %7219 = vmatprep.subr.bf16.mxu1 %v11867_v24  ;;  %v11771_v24 = vcombine.high %v2729_v52, %v2733_v54  ;;  %v2881_v59 = vld [vmem:[%s14469_s23 + $0x16c8] sm:$0xff] }
 0x4e1   : > { %7179 = vmatpush1.bf16.msra.mxu0 %v11738_v27  ;;  %v2869_v27 = vld [vmem:[%s14469_s23 + $0x1668] sm:$0xff] }
 0x4e2   : > { %7220 = vmatpush1.bf16.msra.mxu1 %v11866_v11  ;;  %7180 = vmatprep.subr.bf16.mxu0 %v11747_v53  ;;  %v11770_v11 = vcombine.low %v2729_v52, %v2733_v54  ;;  %v11898_v53 = vcombine.low %v2857_v25, %v2861_v56  ;;  %v11907_v57 = vcombine.high %v2865_v10, %v2869_v27  ;;  %v2773_v52 = vld [vmem:[%s14469_s23 + $0x1368] sm:$0xff] }
 0x4e3   : > { %v6876_v23 = vpop.f32.mrb[16].mxu0  ;;  %7221 = vmatprep.subr.bf16.mxu1 %v11875_v39  ;;  %v11779_v39 = vcombine.high %v2737_v40, %v2741_v3  ;;  %v2897_v54 = vld [vmem:[%s14469_s23 + $0x1748] sm:$0xff] }
 0x4e4   : > { %v6917_v0 = vpop.f32.mrb[16].mxu1  ;;  %v6877_v31 = vadd.f32 %v6876_v23, %v15225_v61  ;;  %v6878_v35 = vpop.f32.mrb[17].mxu0  ;;  %v11882_v61 = vcombine.low %v2841_v19, %v2845_v26  ;;  %v2749_v19 = vld [vmem:[%s14469_s23 + $0x12a8] sm:$0xff] }
 0x4e5   : > { %v6919_v13 = vpop.f32.mrb[17].mxu1  ;;  %v6879_v9 = vadd.f32 %v6878_v35, %v15229_v58  ;;  %v6880_v21 = vpop.f32.mrb[18].mxu0  ;;  %7181 = vmatpush1.bf16.msra.mxu0 %v11746_v42  ;;  %v11891_v58 = vcombine.high %v2849_v6, %v2853_v14  ;;  %v2873_v26 = vld [vmem:[%s14469_s23 + $0x1688] sm:$0xff]  ;;  %v11787_v23 = vcombine.high %v2745_v49, %v2749_v19  ;;  %v11786_v35 = vcombine.low %v2745_v49, %v2749_v19 }
 0x4e6   : > { %v6921_v51 = vpop.f32.mrb[18].mxu1  ;;  %v15301_v17 = vadd.f32 %v6917_v0, %v6877_v31  ;;  %7222 = vmatpush1.bf16.msra.mxu1 %v11874_v32  ;;  %v6881_v15 = vpop.f32.mrb[19].mxu0  ;;  %7182 = vmatprep.subr.bf16.mxu0 %v11755_v22  ;;  %v2877_v42 = vld [vmem:[%s14469_s23 + $0x16a8] sm:$0xff]  ;;  %v11778_v32 = vcombine.low %v2737_v40, %v2741_v3  ;;  %v11906_v22 = vcombine.low %v2865_v10, %v2869_v27 }
 0x4e7   : > { %v6922_v29 = vpop.f32.mrb[19].mxu1  ;;  %v15303_v4 = vadd.f32 %v6919_v13, %v6879_v9  ;;  %7223 = vmatprep.subr.bf16.mxu1 %v11883_v50  ;;  %v11915_v0 = vcombine.high %v2873_v26, %v2877_v42  ;;  %v2753_v50 = vld [vmem:[%s14469_s23 + $0x12c8] sm:$0xff]  ;;  %v11914_v13 = vcombine.low %v2873_v26, %v2877_v42 }
 0x4e8   : > { %v2885_v31 = vld [vmem:[%s14469_s23 + $0x16e8] sm:$0xff]  ;;  %v11795_v6 = vcombine.high %v2753_v50, %v2757_v48  ;;  %v11794_v15 = vcombine.low %v2753_v50, %v2757_v48  ;;  %v2158_v50 = vld [vmem:[%s14469_s23 + $0x30] sm:$0xff] }
 0x4e9   : > { %7183 = vmatpush1.bf16.msra.mxu0 %v11754_v30  ;;  %v11923_v14 = vcombine.high %v2881_v59, %v2885_v31  ;;  %v2761_v9 = vld [vmem:[%s14469_s23 + $0x1308] sm:$0xff]  ;;  %v11922_v29 = vcombine.low %v2881_v59, %v2885_v31  ;;  %v2282_v48 = vld [vmem:[%s14469_s23 + $0x410] sm:$0xff] }
 0x4ea   : > { %7224 = vmatpush1.bf16.msra.mxu1 %v11882_v61  ;;  %7184 = vmatprep.subr.bf16.mxu0 %v11763_v28  ;;  %v2765_v21 = vld [vmem:[%s14469_s23 + $0x1328] sm:$0xff]  ;;  %v2286_v59 = vld [vmem:[%s14469_s23 + $0x430] sm:$0xff] }
 0x4eb   : > { %7225 = vmatprep.subr.bf16.mxu1 %v11891_v58  ;;  %v2889_v51 = vld [vmem:[%s14469_s23 + $0x1708] sm:$0xff]  ;;  %v11803_v61 = vcombine.high %v2761_v9, %v2765_v21  ;;  %v11802_v56 = vcombine.low %v2761_v9, %v2765_v21  ;;  %v2166_v9 = vld [vmem:[%s14469_s23 + $0x70] sm:$0xff] }
 0x4ec   : > { %v2893_v30 = vld [vmem:[%s14469_s23 + $0x1728] sm:$0xff] }
 0x4ed   : > { %7185 = vmatpush1.bf16.msra.mxu0 %v11762_v12  ;;  %v11931_v28 = vcombine.high %v2889_v51, %v2893_v30  ;;  %v2769_v58 = vld [vmem:[%s14469_s23 + $0x1348] sm:$0xff]  ;;  %v11930_v12 = vcombine.low %v2889_v51, %v2893_v30  ;;  %v2290_v51 = vld [vmem:[%s14469_s23 + $0x450] sm:$0xff] }
 0x4ee   : > { %7226 = vmatpush1.bf16.msra.mxu1 %v11890_v18  ;;  %7186 = vmatprep.subr.bf16.mxu0 %v11771_v24  ;;  %v2901_v25 = vld [vmem:[%s14469_s23 + $0x1768] sm:$0xff]  ;;  %v11811_v18 = vcombine.high %v2769_v58, %v2773_v52  ;;  %v11810_v27 = vcombine.low %v2769_v58, %v2773_v52  ;;  %v2294_v30 = vld [vmem:[%s14469_s23 + $0x470] sm:$0xff] }
 0x4ef   : > { %7227 = vmatprep.subr.bf16.mxu1 %v11899_v20  ;;  %v11939_v24 = vcombine.high %v2897_v54, %v2901_v25  ;;  %v2777_v20 = vld [vmem:[%s14469_s23 + $0x1388] sm:$0xff]  ;;  %v11333_v58 = vcombine.high %v2290_v51, %v2294_v30  ;;  %v2298_v52 = vld [vmem:[%s14469_s23 + $0x490] sm:$0xff] }
 0x4f0   : > { %v2781_v40 = vld [vmem:[%s14469_s23 + $0x13a8] sm:$0xff] }
 0x4f1   : > { %7187 = vmatpush1.bf16.msra.mxu0 %v11770_v11  ;;  %v2905_v3 = vld [vmem:[%s14469_s23 + $0x1788] sm:$0xff]  ;;  %v11938_v11 = vcombine.low %v2897_v54, %v2901_v25  ;;  %v11818_v42 = vcombine.low %v2777_v20, %v2781_v40  ;;  %v2302_v54 = vld [vmem:[%s14469_s23 + $0x4b0] sm:$0xff] }
 0x4f2   : > { %7228 = vmatpush1.bf16.msra.mxu1 %v11898_v53  ;;  %7188 = vmatprep.subr.bf16.mxu0 %v11779_v39  ;;  %v2909_v10 = vld [vmem:[%s14469_s23 + $0x17a8] sm:$0xff]  ;;  %v11819_v53 = vcombine.high %v2777_v20, %v2781_v40  ;;  %v2182_v20 = vld [vmem:[%s14469_s23 + $0xf0] sm:$0xff] }
 0x4f3   : > { %7229 = vmatprep.subr.bf16.mxu1 %v11907_v57  ;;  %v11947_v39 = vcombine.high %v2905_v3, %v2909_v10  ;;  %v2785_v57 = vld [vmem:[%s14469_s23 + $0x13c8] sm:$0xff]  ;;  %v2306_v40 = vld [vmem:[%s14469_s23 + $0x4d0] sm:$0xff] }
 0x4f4   : > { %v2789_v49 = vld [vmem:[%s14469_s23 + $0x13e8] sm:$0xff] }
 0x4f5   : > { %7189 = vmatpush1.bf16.msra.mxu0 %v11778_v32  ;;  %v2913_v19 = vld [vmem:[%s14469_s23 + $0x17c8] sm:$0xff]  ;;  %v11946_v32 = vcombine.low %v2905_v3, %v2909_v10  ;;  %v11826_v31 = vcombine.low %v2785_v57, %v2789_v49  ;;  %v2310_v3 = vld [vmem:[%s14469_s23 + $0x4f0] sm:$0xff] }
 0x4f6   : > { %7230 = vmatpush1.bf16.msra.mxu1 %v11906_v22  ;;  %7190 = vmatprep.subr.bf16.mxu0 %v11787_v23  ;;  %v2917_v26 = vld [vmem:[%s14469_s23 + $0x17e8] sm:$0xff]  ;;  %v11827_v22 = vcombine.high %v2785_v57, %v2789_v49  ;;  %v2190_v57 = vld [vmem:[%s14469_s23 + $0x130] sm:$0xff] }
 0x4f7   : > { %7231 = vmatprep.subr.bf16.mxu1 %v11915_v0  ;;  %v11955_v23 = vcombine.high %v2913_v19, %v2917_v26  ;;  %v2154_v0 = vld [vmem:[%s14469_s23 + $0x10] sm:$0xff] }
 0x4f8   : > { %v11196_v21 = vcombine.low %v2154_v0, %v2158_v50  ;;  %v2314_v49 = vld [vmem:[%s14469_s23 + $0x510] sm:$0xff] }
 0x4f9   : > { %7191 = vmatpush1.bf16.msra.mxu0 %v11786_v35  ;;  %v11954_v35 = vcombine.low %v2913_v19, %v2917_v26  ;;  %v2318_v19 = vld [vmem:[%s14469_s23 + $0x530] sm:$0xff] }
 0x4fa   : > { %7232 = vmatpush1.bf16.msra.mxu1 %v11914_v13  ;;  %7192 = vmatprep.subr.bf16.mxu0 %v11795_v6  ;;  %v11197_v13 = vcombine.high %v2154_v0, %v2158_v50  ;;  %v11325_v6 = vcombine.high %v2282_v48, %v2286_v59  ;;  %v2198_v0 = vld [vmem:[%s14469_s23 + $0x170] sm:$0xff] }
 0x4fb   : > { %7233 = vmatprep.subr.bf16.mxu1 %v11923_v14  ;;  %v2162_v14 = vld [vmem:[%s14469_s23 + $0x50] sm:$0xff] }
 0x4fc   : > { %v11204_v25 = vcombine.low %v2162_v14, %v2166_v9  ;;  %v2322_v50 = vld [vmem:[%s14469_s23 + $0x550] sm:$0xff] }
 0x4fd   : > { %7193 = vmatpush1.bf16.msra.mxu0 %v11794_v15  ;;  %v11324_v15 = vcombine.low %v2282_v48, %v2286_v59  ;;  %v2326_v48 = vld [vmem:[%s14469_s23 + $0x570] sm:$0xff] }
 0x4fe   : > { %7234 = vmatpush1.bf16.msra.mxu1 %v11922_v29  ;;  %7194 = vmatprep.subr.bf16.mxu0 %v11803_v61  ;;  %v11205_v29 = vcombine.high %v2162_v14, %v2166_v9  ;;  %v2170_v61 = vld [vmem:[%s14469_s23 + $0x90] sm:$0xff] }
 0x4ff   : > { %7235 = vmatprep.subr.bf16.mxu1 %v11931_v28  ;;  %v2174_v28 = vld [vmem:[%s14469_s23 + $0xb0] sm:$0xff] }
 0x500   : > { %v11212_v10 = vcombine.low %v2170_v61, %v2174_v28  ;;  %v2206_v14 = vld [vmem:[%s14469_s23 + $0x1b0] sm:$0xff] }
 0x501   : > { %7195 = vmatpush1.bf16.msra.mxu0 %v11802_v56  ;;  %v11332_v56 = vcombine.low %v2290_v51, %v2294_v30  ;;  %v2330_v9 = vld [vmem:[%s14469_s23 + $0x590] sm:$0xff]  ;;  %v11364_v30 = vcombine.low %v2322_v50, %v2326_v48 }
 0x502   : > { %7236 = vmatpush1.bf16.msra.mxu1 %v11930_v12  ;;  %7196 = vmatprep.subr.bf16.mxu0 %v11811_v18  ;;  %v11213_v12 = vcombine.high %v2170_v61, %v2174_v28  ;;  %v11341_v18 = vcombine.high %v2298_v52, %v2302_v54  ;;  %v2210_v28 = vld [vmem:[%s14469_s23 + $0x1d0] sm:$0xff] }
 0x503   : > { %7237 = vmatprep.subr.bf16.mxu1 %v11939_v24  ;;  %v2178_v24 = vld [vmem:[%s14469_s23 + $0xd0] sm:$0xff] }
 0x504   : > { %v11220_v26 = vcombine.low %v2178_v24, %v2182_v20 }
 0x505   : > { %7197 = vmatpush1.bf16.msra.mxu0 %v11810_v27  ;;  %v11340_v27 = vcombine.low %v2298_v52, %v2302_v54 }
 0x506   : > { %7238 = vmatpush1.bf16.msra.mxu1 %v11938_v11  ;;  %7198 = vmatprep.subr.bf16.mxu0 %v11819_v53  ;;  %v11221_v11 = vcombine.high %v2178_v24, %v2182_v20  ;;  %v11349_v53 = vcombine.high %v2306_v40, %v2310_v3 }
 0x507   : > { %7239 = vmatprep.subr.bf16.mxu1 %v11947_v39  ;;  %v2186_v39 = vld [vmem:[%s14469_s23 + $0x110] sm:$0xff] }
 0x508   : > { %v11228_v59 = vcombine.low %v2186_v39, %v2190_v57 }
 0x509   : > { %7199 = vmatpush1.bf16.msra.mxu0 %v11818_v42  ;;  %v11348_v42 = vcombine.low %v2306_v40, %v2310_v3 }
 0x50a   : > { %7240 = vmatpush1.bf16.msra.mxu1 %v11946_v32  ;;  %7200 = vmatprep.subr.bf16.mxu0 %v11827_v22  ;;  %v11229_v32 = vcombine.high %v2186_v39, %v2190_v57  ;;  %v11357_v22 = vcombine.high %v2314_v49, %v2318_v19 }
 0x50b   : > { %7241 = vmatprep.subr.bf16.mxu1 %v11955_v23  ;;  %v2194_v23 = vld [vmem:[%s14469_s23 + $0x150] sm:$0xff] }
 0x50c   : > { %v11236_v51 = vcombine.low %v2194_v23, %v2198_v0 }
 0x50d   : > { %7201 = vmatpush1.bf16.msra.mxu0 %v11826_v31  ;;  %v11356_v31 = vcombine.low %v2314_v49, %v2318_v19  ;;  %v2218_v19 = vld [vmem:[%s14469_s23 + $0x210] sm:$0xff] }
 0x50e   : > { %7242 = vmatpush1.bf16.msra.mxu1 %v11954_v35  ;;  %7252 = vmatprep.subr.bf16.mxu0 %v11197_v13  ;;  %v11237_v35 = vcombine.high %v2194_v23, %v2198_v0  ;;  %v11365_v13 = vcombine.high %v2322_v50, %v2326_v48 }
 0x50f   : > { %7293 = vmatprep.subr.bf16.mxu1 %v11325_v6  ;;  %v2202_v6 = vld [vmem:[%s14469_s23 + $0x190] sm:$0xff] }
 0x510   : > { %7203 = vmatmul.mubr.bf16.vlgmr.msra.gmra.mrb[32].mxu0 %v15127_v36  ;;  %v11244_v3 = vcombine.low %v2202_v6, %v2206_v14 }
 0x511   : > { %7244 = vmatmul.mubr.bf16.vlgmr.msra.gmra.mrb[32].mxu1 %v15129_v44  ;;  %7253 = vmatpush1.bf16.msra.mxu0 %v11196_v21  ;;  %v2334_v21 = vld [vmem:[%s14469_s23 + $0x5b0] sm:$0xff] }
 0x512   : > { %7284 = vmatprep.mubr.bf16.mxu0 %v14902_v41  ;;  %7294 = vmatpush1.bf16.msra.mxu1 %v11324_v15  ;;  %v11245_v15 = vcombine.high %v2202_v6, %v2206_v14  ;;  %v11373_v61 = vcombine.high %v2330_v9, %v2334_v21  ;;  %v2358_v6 = vld [vmem:[%s14469_s23 + $0x670] sm:$0xff] }
 0x513   : > { %7325 = vmatprep.mubr.bf16.mxu1 %v14904_v43  ;;  %7254 = vmatprep.subr.bf16.mxu0 %v11205_v29 }
 0x514   : > { %7295 = vmatprep.subr.bf16.mxu1 %v11333_v58  ;;  %v2214_v58 = vld [vmem:[%s14469_s23 + $0x1f0] sm:$0xff] }
 0x515   : > { %7255 = vmatpush1.bf16.msra.mxu0 %v11204_v25  ;;  %v11253_v39 = vcombine.high %v2210_v28, %v2214_v58  ;;  %v11252_v0 = vcombine.low %v2210_v28, %v2214_v58 }
 0x516   : > { %7296 = vmatpush1.bf16.msra.mxu1 %v11332_v56  ;;  %7256 = vmatprep.subr.bf16.mxu0 %v11213_v12  ;;  %v2338_v56 = vld [vmem:[%s14469_s23 + $0x5d0] sm:$0xff] }
 0x517   : > { %7297 = vmatprep.subr.bf16.mxu1 %v11341_v18  ;;  %v2342_v12 = vld [vmem:[%s14469_s23 + $0x5f0] sm:$0xff] }
 0x518   : > { %v2132_v18 = vld [vmem:[#allocation2] sm:$0xff]  ;;  %v11380_v50 = vcombine.low %v2338_v56, %v2342_v12 }
 0x519   : > { %7257 = vmatpush1.bf16.msra.mxu0 %v11212_v10 }
 0x51a   : > { %7298 = vmatpush1.bf16.msra.mxu1 %v11340_v27  ;;  %7258 = vmatprep.subr.bf16.mxu0 %v11221_v11  ;;  %v2133_v27 = vld [vmem:[#allocation2 + $0x8] sm:$0xff] }
 0x51b   : > { %7299 = vmatprep.subr.bf16.mxu1 %v11349_v53  ;;  %v11372_v53 = vcombine.low %v2330_v9, %v2334_v21 }
 0x51d   : > { %7259 = vmatpush1.bf16.msra.mxu0 %v11220_v26  ;;  %v2222_v26 = vld [vmem:[%s14469_s23 + $0x230] sm:$0xff] }
 0x51e   : > { %7300 = vmatpush1.bf16.msra.mxu1 %v11348_v42  ;;  %7260 = vmatprep.subr.bf16.mxu0 %v11229_v32  ;;  %v2346_v32 = vld [vmem:[%s14469_s23 + $0x610] sm:$0xff]  ;;  %v11261_v48 = vcombine.high %v2218_v19, %v2222_v26  ;;  %v11260_v14 = vcombine.low %v2218_v19, %v2222_v26 }
 0x51f   : > { %7301 = vmatprep.subr.bf16.mxu1 %v11357_v22  ;;  %v2350_v22 = vld [vmem:[%s14469_s23 + $0x630] sm:$0xff] }
 0x520   : > { %v11388_v9 = vcombine.low %v2346_v32, %v2350_v22  ;;  %v2262_v19 = vld [vmem:[%s14469_s23 + $0x370] sm:$0xff] }
 0x521   : > { %7261 = vmatpush1.bf16.msra.mxu0 %v11228_v59  ;;  %v11389_v59 = vcombine.high %v2346_v32, %v2350_v22  ;;  %v2386_v26 = vld [vmem:[%s14469_s23 + $0x750] sm:$0xff] }
 0x522   : > { %7302 = vmatpush1.bf16.msra.mxu1 %v11356_v31  ;;  %7262 = vmatprep.subr.bf16.mxu0 %v11237_v35  ;;  %v2226_v31 = vld [vmem:[%s14469_s23 + $0x250] sm:$0xff] }
 0x523   : > { %v6958_v29 = vpop.f32.mrb[20].mxu0  ;;  %7303 = vmatprep.subr.bf16.mxu1 %v11365_v13  ;;  %v2230_v35 = vld [vmem:[%s14469_s23 + $0x270] sm:$0xff] }
 0x524   : > { %v6959_v52 = vadd.f32 %v6958_v29, %v15301_v17  ;;  %v6999_v54 = vpop.f32.mrb[20].mxu1  ;;  %v6960_v25 = vpop.f32.mrb[21].mxu0  ;;  %v2354_v13 = vld [vmem:[%s14469_s23 + $0x650] sm:$0xff]  ;;  %v11269_v21 = vcombine.high %v2226_v31, %v2230_v35  ;;  %v11268_v28 = vcombine.low %v2226_v31, %v2230_v35 }
 0x525   : > { %v6961_v24 = vadd.f32 %v6960_v25, %v15303_v4  ;;  %v7001_v20 = vpop.f32.mrb[21].mxu1  ;;  %v6962_v40 = vpop.f32.mrb[22].mxu0  ;;  %7263 = vmatpush1.bf16.msra.mxu0 %v11236_v51  ;;  %v11381_v4 = vcombine.high %v2338_v56, %v2342_v12  ;;  %v11397_v51 = vcombine.high %v2354_v13, %v2358_v6  ;;  %v2362_v29 = vld [vmem:[%s14469_s23 + $0x690] sm:$0xff]  ;;  %v11396_v58 = vcombine.low %v2354_v13, %v2358_v6 }
 0x526   : > { %v7000_v10 = vadd.f32 %v6999_v54, %v6959_v52  ;;  %v7003_v11 = vpop.f32.mrb[22].mxu1  ;;  %7304 = vmatpush1.bf16.msra.mxu1 %v11364_v30  ;;  %v6963_v17 = vpop.f32.mrb[23].mxu0  ;;  %7264 = vmatprep.subr.bf16.mxu0 %v11245_v15  ;;  %v2234_v30 = vld [vmem:[%s14469_s23 + $0x290] sm:$0xff] }
 0x527   : > { %v7002_v57 = vadd.f32 %v7001_v20, %v6961_v24  ;;  %v7004_v49 = vpop.f32.mrb[23].mxu1  ;;  %7305 = vmatprep.subr.bf16.mxu1 %v11373_v61  ;;  %v2238_v15 = vld [vmem:[%s14469_s23 + $0x2b0] sm:$0xff] }
 0x528   : > { %v7744_v42 = vadd.f32 %v7000_v10, %v2132_v18  ;;  %v2366_v61 = vld [vmem:[%s14469_s23 + $0x6b0] sm:$0xff]  ;;  %v11277_v52 = vcombine.high %v2234_v30, %v2238_v15  ;;  %v11276_v24 = vcombine.low %v2234_v30, %v2238_v15 }
 0x529   : > { %v7745_v23 = vadd.f32 %v7002_v57, %v2133_v27  ;;  %7265 = vmatpush1.bf16.msra.mxu0 %v11244_v3  ;;  %v11405_v54 = vcombine.high %v2362_v29, %v2366_v61  ;;  %v2242_v25 = vld [vmem:[%s14469_s23 + $0x2d0] sm:$0xff]  ;;  %v11404_v20 = vcombine.low %v2362_v29, %v2366_v61 }
 0x52a   : > { %7752 = vst [vmem:[#allocation2] sm:$0xff] %v7744_v42  ;;  %7306 = vmatpush1.bf16.msra.mxu1 %v11372_v53  ;;  %7266 = vmatprep.subr.bf16.mxu0 %v11253_v39  ;;  %v2246_v56 = vld [vmem:[%s14469_s23 + $0x2f0] sm:$0xff] }
 0x52b   : > { %7753 = vst [vmem:[#allocation2 + $0x8] sm:$0xff] %v7745_v23  ;;  %7307 = vmatprep.subr.bf16.mxu1 %v11381_v4  ;;  %v2370_v12 = vld [vmem:[%s14469_s23 + $0x6d0] sm:$0xff]  ;;  %v11285_v40 = vcombine.high %v2242_v25, %v2246_v56  ;;  %v11284_v53 = vcombine.low %v2242_v25, %v2246_v56 }
 0x52c   : > { %v2374_v18 = vld [vmem:[%s14469_s23 + $0x6f0] sm:$0xff] }
 0x52d   : > { %7267 = vmatpush1.bf16.msra.mxu0 %v11252_v0  ;;  %v11413_v3 = vcombine.high %v2370_v12, %v2374_v18  ;;  %v2250_v10 = vld [vmem:[%s14469_s23 + $0x310] sm:$0xff]  ;;  %v11412_v39 = vcombine.low %v2370_v12, %v2374_v18 }
 0x52e   : > { %7308 = vmatpush1.bf16.msra.mxu1 %v11380_v50  ;;  %7268 = vmatprep.subr.bf16.mxu0 %v11261_v48  ;;  %v2254_v27 = vld [vmem:[%s14469_s23 + $0x330] sm:$0xff] }
 0x52f   : > { %7309 = vmatprep.subr.bf16.mxu1 %v11389_v59  ;;  %v2378_v11 = vld [vmem:[%s14469_s23 + $0x710] sm:$0xff]  ;;  %v11293_v57 = vcombine.high %v2250_v10, %v2254_v27  ;;  %v11292_v32 = vcombine.low %v2250_v10, %v2254_v27 }
 0x530   : > { %v2382_v17 = vld [vmem:[%s14469_s23 + $0x730] sm:$0xff] }
 0x531   : > { %7269 = vmatpush1.bf16.msra.mxu0 %v11260_v14  ;;  %v11421_v49 = vcombine.high %v2378_v11, %v2382_v17  ;;  %v2258_v4 = vld [vmem:[%s14469_s23 + $0x350] sm:$0xff]  ;;  %v11420_v22 = vcombine.low %v2378_v11, %v2382_v17 }
 0x532   : > { %7310 = vmatpush1.bf16.msra.mxu1 %v11388_v9  ;;  %7270 = vmatprep.subr.bf16.mxu0 %v11269_v21  ;;  %v2390_v42 = vld [vmem:[%s14469_s23 + $0x770] sm:$0xff]  ;;  %v11301_v23 = vcombine.high %v2258_v4, %v2262_v19  ;;  %v11300_v35 = vcombine.low %v2258_v4, %v2262_v19 }
 0x533   : > { %7311 = vmatprep.subr.bf16.mxu1 %v11397_v51  ;;  %v11429_v0 = vcombine.high %v2386_v26, %v2390_v42  ;;  %v2266_v50 = vld [vmem:[%s14469_s23 + $0x390] sm:$0xff]  ;;  %v11428_v13 = vcombine.low %v2386_v26, %v2390_v42 }
 0x534   : > { %v2270_v48 = vld [vmem:[%s14469_s23 + $0x3b0] sm:$0xff] }
 0x535   : > { %7271 = vmatpush1.bf16.msra.mxu0 %v11268_v28  ;;  %v2394_v59 = vld [vmem:[%s14469_s23 + $0x790] sm:$0xff]  ;;  %v11309_v6 = vcombine.high %v2266_v50, %v2270_v48  ;;  %v11308_v15 = vcombine.low %v2266_v50, %v2270_v48 }
 0x536   : > { %7312 = vmatpush1.bf16.msra.mxu1 %v11396_v58  ;;  %7272 = vmatprep.subr.bf16.mxu0 %v11277_v52  ;;  %v2398_v31 = vld [vmem:[%s14469_s23 + $0x7b0] sm:$0xff] }
 0x537   : > { %7313 = vmatprep.subr.bf16.mxu1 %v11405_v54  ;;  %v11437_v14 = vcombine.high %v2394_v59, %v2398_v31  ;;  %v2274_v9 = vld [vmem:[%s14469_s23 + $0x3d0] sm:$0xff]  ;;  %v11436_v29 = vcombine.low %v2394_v59, %v2398_v31 }
 0x538   : > { %v2278_v21 = vld [vmem:[%s14469_s23 + $0x3f0] sm:$0xff] }
 0x539   : > { %7273 = vmatpush1.bf16.msra.mxu0 %v11276_v24  ;;  %v2402_v51 = vld [vmem:[%s14469_s23 + $0x7d0] sm:$0xff]  ;;  %v11317_v61 = vcombine.high %v2274_v9, %v2278_v21  ;;  %v11316_v56 = vcombine.low %v2274_v9, %v2278_v21 }
 0x53a   : > { %7314 = vmatpush1.bf16.msra.mxu1 %v11404_v20  ;;  %7274 = vmatprep.subr.bf16.mxu0 %v11285_v40  ;;  %v2406_v30 = vld [vmem:[%s14469_s23 + $0x7f0] sm:$0xff] }
 0x53b   : > { %7315 = vmatprep.subr.bf16.mxu1 %v11413_v3  ;;  %v11445_v28 = vcombine.high %v2402_v51, %v2406_v30  ;;  %v2410_v58 = vld [vmem:[%s14469_s23 + $0x810] sm:$0xff]  ;;  %v11444_v12 = vcombine.low %v2402_v51, %v2406_v30 }
 0x53c   : > { %v2414_v52 = vld [vmem:[%s14469_s23 + $0x830] sm:$0xff] }
 0x53d   : > { %7275 = vmatpush1.bf16.msra.mxu0 %v11284_v53  ;;  %v2538_v54 = vld [vmem:[%s14469_s23 + $0xc10] sm:$0xff]  ;;  %v11453_v18 = vcombine.high %v2410_v58, %v2414_v52  ;;  %v11452_v3 = vcombine.low %v2410_v58, %v2414_v52 }
 0x53e   : > { %7316 = vmatpush1.bf16.msra.mxu1 %v11412_v39  ;;  %7276 = vmatprep.subr.bf16.mxu0 %v11293_v57  ;;  %v2542_v25 = vld [vmem:[%s14469_s23 + $0xc30] sm:$0xff] }
 0x53f   : > { %7317 = vmatprep.subr.bf16.mxu1 %v11421_v49  ;;  %v11581_v24 = vcombine.high %v2538_v54, %v2542_v25  ;;  %v2418_v20 = vld [vmem:[%s14469_s23 + $0x850] sm:$0xff]  ;;  %v11580_v11 = vcombine.low %v2538_v54, %v2542_v25 }
 0x540   : > { %v2422_v40 = vld [vmem:[%s14469_s23 + $0x870] sm:$0xff] }
 0x541   : > { %7277 = vmatpush1.bf16.msra.mxu0 %v11292_v32  ;;  %v2546_v10 = vld [vmem:[%s14469_s23 + $0xc50] sm:$0xff]  ;;  %v11461_v17 = vcombine.high %v2418_v20, %v2422_v40  ;;  %v11460_v19 = vcombine.low %v2418_v20, %v2422_v40 }
 0x542   : > { %7318 = vmatpush1.bf16.msra.mxu1 %v11420_v22  ;;  %7278 = vmatprep.subr.bf16.mxu0 %v11301_v23  ;;  %v2550_v27 = vld [vmem:[%s14469_s23 + $0xc70] sm:$0xff] }
 0x543   : > { %7319 = vmatprep.subr.bf16.mxu1 %v11429_v0  ;;  %v2426_v53 = vld [vmem:[%s14469_s23 + $0x890] sm:$0xff]  ;;  %v11589_v57 = vcombine.high %v2546_v10, %v2550_v27  ;;  %v11588_v26 = vcombine.low %v2546_v10, %v2550_v27 }
 0x544   : > { %v2430_v39 = vld [vmem:[%s14469_s23 + $0x8b0] sm:$0xff] }
 0x545   : > { %7279 = vmatpush1.bf16.msra.mxu0 %v11300_v35  ;;  %v2554_v49 = vld [vmem:[%s14469_s23 + $0xc90] sm:$0xff]  ;;  %v11469_v42 = vcombine.high %v2426_v53, %v2430_v39  ;;  %v11468_v48 = vcombine.low %v2426_v53, %v2430_v39 }
 0x546   : > { %7320 = vmatpush1.bf16.msra.mxu1 %v11428_v13  ;;  %7280 = vmatprep.subr.bf16.mxu0 %v11309_v6  ;;  %v2558_v4 = vld [vmem:[%s14469_s23 + $0xcb0] sm:$0xff] }
 0x547   : > { %7321 = vmatprep.subr.bf16.mxu1 %v11437_v14  ;;  %v11597_v32 = vcombine.high %v2554_v49, %v2558_v4  ;;  %v2434_v22 = vld [vmem:[%s14469_s23 + $0x8d0] sm:$0xff]  ;;  %v11596_v59 = vcombine.low %v2554_v49, %v2558_v4 }
 0x548   : > { %v2438_v23 = vld [vmem:[%s14469_s23 + $0x8f0] sm:$0xff] }
 0x549   : > { %7281 = vmatpush1.bf16.msra.mxu0 %v11308_v15  ;;  %v2562_v0 = vld [vmem:[%s14469_s23 + $0xcd0] sm:$0xff]  ;;  %v11477_v31 = vcombine.high %v2434_v22, %v2438_v23  ;;  %v11476_v21 = vcombine.low %v2434_v22, %v2438_v23 }
 0x54a   : > { %7322 = vmatpush1.bf16.msra.mxu1 %v11436_v29  ;;  %7282 = vmatprep.subr.bf16.mxu0 %v11317_v61  ;;  %v2566_v50 = vld [vmem:[%s14469_s23 + $0xcf0] sm:$0xff] }
 0x54b   : > { %7323 = vmatprep.subr.bf16.mxu1 %v11445_v28  ;;  %v11605_v35 = vcombine.high %v2562_v0, %v2566_v50  ;;  %v2442_v13 = vld [vmem:[%s14469_s23 + $0x910] sm:$0xff]  ;;  %v11604_v51 = vcombine.low %v2562_v0, %v2566_v50 }
 0x54c   : > { %v2446_v6 = vld [vmem:[%s14469_s23 + $0x930] sm:$0xff] }
 0x54d   : > { %7283 = vmatpush1.bf16.msra.mxu0 %v11316_v56  ;;  %v2570_v14 = vld [vmem:[%s14469_s23 + $0xd10] sm:$0xff]  ;;  %v11485_v30 = vcombine.high %v2442_v13, %v2446_v6  ;;  %v11484_v52 = vcombine.low %v2442_v13, %v2446_v6 }
 0x54e   : > { %7324 = vmatpush1.bf16.msra.mxu1 %v11444_v12  ;;  %7334 = vmatprep.subr.bf16.mxu0 %v11453_v18  ;;  %v2574_v9 = vld [vmem:[%s14469_s23 + $0xd30] sm:$0xff] }
 0x54f   : > { %7375 = vmatprep.subr.bf16.mxu1 %v11581_v24  ;;  %v11613_v15 = vcombine.high %v2570_v14, %v2574_v9  ;;  %v2450_v29 = vld [vmem:[%s14469_s23 + $0x950] sm:$0xff]  ;;  %v11612_v54 = vcombine.low %v2570_v14, %v2574_v9 }
 0x550   : > { %7285 = vmatmul.mubr.bf16.vlgmr.msra.gmra.mrb[36].mxu0 %v14906_v47  ;;  %v2454_v61 = vld [vmem:[%s14469_s23 + $0x970] sm:$0xff] }
 0x551   : > { %7326 = vmatmul.mubr.bf16.vlgmr.msra.gmra.mrb[36].mxu1 %v14908_v7  ;;  %7335 = vmatpush1.bf16.msra.mxu0 %v11452_v3  ;;  %v2578_v28 = vld [vmem:[%s14469_s23 + $0xd50] sm:$0xff]  ;;  %v11493_v25 = vcombine.high %v2450_v29, %v2454_v61  ;;  %v11492_v40 = vcombine.low %v2450_v29, %v2454_v61 }
 0x552   : > { %7366 = vmatprep.mubr.bf16.mxu0 %v14921_v55  ;;  %7376 = vmatpush1.bf16.msra.mxu1 %v11580_v11  ;;  %v2582_v58 = vld [vmem:[%s14469_s23 + $0xd70] sm:$0xff] }
 0x553   : > { %7407 = vmatprep.mubr.bf16.mxu1 %v14930_v16  ;;  %7336 = vmatprep.subr.bf16.mxu0 %v11461_v17  ;;  %v11621_v56 = vcombine.high %v2578_v28, %v2582_v58  ;;  %v2458_v12 = vld [vmem:[%s14469_s23 + $0x990] sm:$0xff]  ;;  %v11620_v3 = vcombine.low %v2578_v28, %v2582_v58 }
 0x554   : > { %7377 = vmatprep.subr.bf16.mxu1 %v11589_v57  ;;  %v2462_v18 = vld [vmem:[%s14469_s23 + $0x9b0] sm:$0xff] }
 0x555   : > { %7337 = vmatpush1.bf16.msra.mxu0 %v11460_v19  ;;  %v2586_v24 = vld [vmem:[%s14469_s23 + $0xd90] sm:$0xff]  ;;  %v11501_v10 = vcombine.high %v2458_v12, %v2462_v18 }
 0x556   : > { %7378 = vmatpush1.bf16.msra.mxu1 %v11588_v26  ;;  %7338 = vmatprep.subr.bf16.mxu0 %v11469_v42  ;;  %v2590_v20 = vld [vmem:[%s14469_s23 + $0xdb0] sm:$0xff] }
 0x557   : > { %7379 = vmatprep.subr.bf16.mxu1 %v11597_v32  ;;  %v11629_v11 = vcombine.high %v2586_v24, %v2590_v20  ;;  %v2466_v17 = vld [vmem:[%s14469_s23 + $0x9d0] sm:$0xff]  ;;  %v11500_v32 = vcombine.low %v2458_v12, %v2462_v18  ;;  %v11628_v50 = vcombine.low %v2586_v24, %v2590_v20 }
 0x558   : > { %v2470_v53 = vld [vmem:[%s14469_s23 + $0x9f0] sm:$0xff] }
 0x559   : > { %7339 = vmatpush1.bf16.msra.mxu0 %v11468_v48  ;;  %v2594_v49 = vld [vmem:[%s14469_s23 + $0xdd0] sm:$0xff]  ;;  %v11509_v48 = vcombine.high %v2466_v17, %v2470_v53  ;;  %v11508_v9 = vcombine.low %v2466_v17, %v2470_v53 }
 0x55a   : > { %7380 = vmatpush1.bf16.msra.mxu1 %v11596_v59  ;;  %7340 = vmatprep.subr.bf16.mxu0 %v11477_v31  ;;  %v2598_v4 = vld [vmem:[%s14469_s23 + $0xdf0] sm:$0xff] }
 0x55b   : > { %7381 = vmatprep.subr.bf16.mxu1 %v11605_v35  ;;  %v11637_v31 = vcombine.high %v2594_v49, %v2598_v4  ;;  %v2474_v35 = vld [vmem:[%s14469_s23 + $0xa10] sm:$0xff] }
 0x55c   : > { %v2478_v13 = vld [vmem:[%s14469_s23 + $0xa30] sm:$0xff] }
 0x55d   : > { %7341 = vmatpush1.bf16.msra.mxu0 %v11476_v21  ;;  %v2602_v6 = vld [vmem:[%s14469_s23 + $0xe10] sm:$0xff]  ;;  %v11636_v21 = vcombine.low %v2594_v49, %v2598_v4  ;;  %v11516_v58 = vcombine.low %v2474_v35, %v2478_v13 }
 0x55e   : > { %7382 = vmatpush1.bf16.msra.mxu1 %v11604_v51  ;;  %7342 = vmatprep.subr.bf16.mxu0 %v11485_v30  ;;  %v2606_v14 = vld [vmem:[%s14469_s23 + $0xe30] sm:$0xff]  ;;  %v11517_v51 = vcombine.high %v2474_v35, %v2478_v13 }
 0x55f   : > { %7383 = vmatprep.subr.bf16.mxu1 %v11613_v15  ;;  %v11645_v30 = vcombine.high %v2602_v6, %v2606_v14  ;;  %v2482_v15 = vld [vmem:[%s14469_s23 + $0xa50] sm:$0xff] }
 0x560   : > { %v2486_v29 = vld [vmem:[%s14469_s23 + $0xa70] sm:$0xff] }
 0x561   : > { %7343 = vmatpush1.bf16.msra.mxu0 %v11484_v52  ;;  %v2610_v61 = vld [vmem:[%s14469_s23 + $0xe50] sm:$0xff]  ;;  %v11644_v52 = vcombine.low %v2602_v6, %v2606_v14  ;;  %v11524_v20 = vcombine.low %v2482_v15, %v2486_v29 }
 0x562   : > { %7384 = vmatpush1.bf16.msra.mxu1 %v11612_v54  ;;  %7344 = vmatprep.subr.bf16.mxu0 %v11493_v25  ;;  %v2614_v28 = vld [vmem:[%s14469_s23 + $0xe70] sm:$0xff]  ;;  %v11525_v54 = vcombine.high %v2482_v15, %v2486_v29 }
 0x563   : > { %v7040_v27 = vpop.f32.mrb[24].mxu0  ;;  %7385 = vmatprep.subr.bf16.mxu1 %v11621_v56  ;;  %v11653_v25 = vcombine.high %v2610_v61, %v2614_v28  ;;  %v2490_v56 = vld [vmem:[%s14469_s23 + $0xa90] sm:$0xff] }
 0x564   : > { %v7081_v39 = vpop.f32.mrb[24].mxu1  ;;  %v7042_v57 = vpop.f32.mrb[25].mxu0  ;;  %v2494_v12 = vld [vmem:[%s14469_s23 + $0xab0] sm:$0xff] }
 0x565   : > { %v15443_v19 = vadd.f32 %v7081_v39, %v7040_v27  ;;  %v7083_v26 = vpop.f32.mrb[25].mxu1  ;;  %v7044_v42 = vpop.f32.mrb[26].mxu0  ;;  %7345 = vmatpush1.bf16.msra.mxu0 %v11492_v40  ;;  %v2618_v18 = vld [vmem:[%s14469_s23 + $0xe90] sm:$0xff]  ;;  %v11652_v40 = vcombine.low %v2610_v61, %v2614_v28  ;;  %v11532_v39 = vcombine.low %v2490_v56, %v2494_v12 }
 0x566   : > { %v15445_v22 = vadd.f32 %v7083_v26, %v7042_v57  ;;  %v7085_v23 = vpop.f32.mrb[26].mxu1  ;;  %7386 = vmatpush1.bf16.msra.mxu1 %v11620_v3  ;;  %v7045_v0 = vpop.f32.mrb[27].mxu0  ;;  %7346 = vmatprep.subr.bf16.mxu0 %v11501_v10  ;;  %v2622_v24 = vld [vmem:[%s14469_s23 + $0xeb0] sm:$0xff]  ;;  %v11533_v3 = vcombine.high %v2490_v56, %v2494_v12 }
 0x567   : > { %v7086_v59 = vpop.f32.mrb[27].mxu1  ;;  %7387 = vmatprep.subr.bf16.mxu1 %v11629_v11  ;;  %v11661_v10 = vcombine.high %v2618_v18, %v2622_v24  ;;  %v2498_v27 = vld [vmem:[%s14469_s23 + $0xad0] sm:$0xff]  ;;  %v11660_v57 = vcombine.low %v2618_v18, %v2622_v24 }
 0x568   : > { %v2502_v11 = vld [vmem:[%s14469_s23 + $0xaf0] sm:$0xff] }
 0x569   : > { %7347 = vmatpush1.bf16.msra.mxu0 %v11500_v32  ;;  %v2626_v17 = vld [vmem:[%s14469_s23 + $0xed0] sm:$0xff]  ;;  %v11541_v49 = vcombine.high %v2498_v27, %v2502_v11  ;;  %v11540_v0 = vcombine.low %v2498_v27, %v2502_v11 }
 0x56a   : > { %7388 = vmatpush1.bf16.msra.mxu1 %v11628_v50  ;;  %7348 = vmatprep.subr.bf16.mxu0 %v11509_v48  ;;  %v2630_v53 = vld [vmem:[%s14469_s23 + $0xef0] sm:$0xff] }
 0x56b   : > { %7389 = vmatprep.subr.bf16.mxu1 %v11637_v31  ;;  %v11669_v4 = vcombine.high %v2626_v17, %v2630_v53  ;;  %v2506_v26 = vld [vmem:[%s14469_s23 + $0xb10] sm:$0xff]  ;;  %v11668_v50 = vcombine.low %v2626_v17, %v2630_v53 }
 0x56c   : > { %v2510_v42 = vld [vmem:[%s14469_s23 + $0xb30] sm:$0xff] }
 0x56d   : > { %7349 = vmatpush1.bf16.msra.mxu0 %v11508_v9  ;;  %v2634_v32 = vld [vmem:[%s14469_s23 + $0xf10] sm:$0xff]  ;;  %v11549_v48 = vcombine.high %v2506_v26, %v2510_v42  ;;  %v11548_v14 = vcombine.low %v2506_v26, %v2510_v42 }
 0x56e   : > { %7390 = vmatpush1.bf16.msra.mxu1 %v11636_v21  ;;  %7350 = vmatprep.subr.bf16.mxu0 %v11517_v51  ;;  %v2638_v23 = vld [vmem:[%s14469_s23 + $0xf30] sm:$0xff] }
 0x56f   : > { %7391 = vmatprep.subr.bf16.mxu1 %v11645_v30  ;;  %v11677_v59 = vcombine.high %v2634_v32, %v2638_v23  ;;  %v2514_v31 = vld [vmem:[%s14469_s23 + $0xb50] sm:$0xff]  ;;  %v11676_v9 = vcombine.low %v2634_v32, %v2638_v23 }
 0x570   : > { %v2518_v35 = vld [vmem:[%s14469_s23 + $0xb70] sm:$0xff] }
 0x571   : > { %7351 = vmatpush1.bf16.msra.mxu0 %v11516_v58  ;;  %v2642_v13 = vld [vmem:[%s14469_s23 + $0xf50] sm:$0xff]  ;;  %v11557_v21 = vcombine.high %v2514_v31, %v2518_v35  ;;  %v11556_v28 = vcombine.low %v2514_v31, %v2518_v35 }
 0x572   : > { %7392 = vmatpush1.bf16.msra.mxu1 %v11644_v52  ;;  %7352 = vmatprep.subr.bf16.mxu0 %v11525_v54  ;;  %v2646_v6 = vld [vmem:[%s14469_s23 + $0xf70] sm:$0xff] }
 0x573   : > { %7393 = vmatprep.subr.bf16.mxu1 %v11653_v25  ;;  %v11685_v51 = vcombine.high %v2642_v13, %v2646_v6  ;;  %v2522_v30 = vld [vmem:[%s14469_s23 + $0xb90] sm:$0xff]  ;;  %v11684_v58 = vcombine.low %v2642_v13, %v2646_v6 }
 0x574   : > { %v2526_v15 = vld [vmem:[%s14469_s23 + $0xbb0] sm:$0xff] }
 0x575   : > { %7353 = vmatpush1.bf16.msra.mxu0 %v11524_v20  ;;  %v2650_v29 = vld [vmem:[%s14469_s23 + $0xf90] sm:$0xff]  ;;  %v11565_v52 = vcombine.high %v2522_v30, %v2526_v15  ;;  %v11564_v24 = vcombine.low %v2522_v30, %v2526_v15 }
 0x576   : > { %7394 = vmatpush1.bf16.msra.mxu1 %v11652_v40  ;;  %7354 = vmatprep.subr.bf16.mxu0 %v11533_v3  ;;  %v2654_v61 = vld [vmem:[%s14469_s23 + $0xfb0] sm:$0xff] }
 0x577   : > { %7395 = vmatprep.subr.bf16.mxu1 %v11661_v10  ;;  %v11693_v54 = vcombine.high %v2650_v29, %v2654_v61  ;;  %v2530_v25 = vld [vmem:[%s14469_s23 + $0xbd0] sm:$0xff]  ;;  %v11692_v20 = vcombine.low %v2650_v29, %v2654_v61 }
 0x578   : > { %v2534_v56 = vld [vmem:[%s14469_s23 + $0xbf0] sm:$0xff] }
 0x579   : > { %7355 = vmatpush1.bf16.msra.mxu0 %v11532_v39  ;;  %v2658_v12 = vld [vmem:[%s14469_s23 + $0xfd0] sm:$0xff]  ;;  %v11573_v40 = vcombine.high %v2530_v25, %v2534_v56  ;;  %v11572_v53 = vcombine.low %v2530_v25, %v2534_v56 }
 0x57a   : > { %7396 = vmatpush1.bf16.msra.mxu1 %v11660_v57  ;;  %7356 = vmatprep.subr.bf16.mxu0 %v11541_v49  ;;  %v2662_v18 = vld [vmem:[%s14469_s23 + $0xff0] sm:$0xff] }
 0x57b   : > { %7397 = vmatprep.subr.bf16.mxu1 %v11669_v4  ;;  %v11701_v3 = vcombine.high %v2658_v12, %v2662_v18  ;;  %v2666_v10 = vld [vmem:[%s14469_s23 + $0x1010] sm:$0xff]  ;;  %v11700_v39 = vcombine.low %v2658_v12, %v2662_v18 }
 0x57c   : > { %v2670_v27 = vld [vmem:[%s14469_s23 + $0x1030] sm:$0xff] }
 0x57d   : > { %7357 = vmatpush1.bf16.msra.mxu0 %v11540_v0  ;;  %v2794_v11 = vld [vmem:[%s14469_s23 + $0x1410] sm:$0xff]  ;;  %v11709_v57 = vcombine.high %v2666_v10, %v2670_v27  ;;  %v11708_v42 = vcombine.low %v2666_v10, %v2670_v27 }
 0x57e   : > { %7398 = vmatpush1.bf16.msra.mxu1 %v11668_v50  ;;  %7358 = vmatprep.subr.bf16.mxu0 %v11549_v48  ;;  %v2798_v17 = vld [vmem:[%s14469_s23 + $0x1430] sm:$0xff] }
 0x57f   : > { %7399 = vmatprep.subr.bf16.mxu1 %v11677_v59  ;;  %v11837_v49 = vcombine.high %v2794_v11, %v2798_v17  ;;  %v2674_v4 = vld [vmem:[%s14469_s23 + $0x1050] sm:$0xff]  ;;  %v11836_v0 = vcombine.low %v2794_v11, %v2798_v17 }
 0x580   : > { %v2678_v26 = vld [vmem:[%s14469_s23 + $0x1070] sm:$0xff] }
 0x581   : > { %7359 = vmatpush1.bf16.msra.mxu0 %v11548_v14  ;;  %v2802_v32 = vld [vmem:[%s14469_s23 + $0x1450] sm:$0xff]  ;;  %v11717_v50 = vcombine.high %v2674_v4, %v2678_v26  ;;  %v11716_v6 = vcombine.low %v2674_v4, %v2678_v26 }
 0x582   : > { %7400 = vmatpush1.bf16.msra.mxu1 %v11676_v9  ;;  %7360 = vmatprep.subr.bf16.mxu0 %v11557_v21  ;;  %v2806_v23 = vld [vmem:[%s14469_s23 + $0x1470] sm:$0xff] }
 0x583   : > { %7401 = vmatprep.subr.bf16.mxu1 %v11685_v51  ;;  %v2682_v48 = vld [vmem:[%s14469_s23 + $0x1090] sm:$0xff]  ;;  %v11845_v31 = vcombine.high %v2802_v32, %v2806_v23  ;;  %v11844_v14 = vcombine.low %v2802_v32, %v2806_v23 }
 0x584   : > { %v2686_v59 = vld [vmem:[%s14469_s23 + $0x10b0] sm:$0xff] }
 0x585   : > { %7361 = vmatpush1.bf16.msra.mxu0 %v11556_v28  ;;  %v2810_v35 = vld [vmem:[%s14469_s23 + $0x1490] sm:$0xff]  ;;  %v11725_v9 = vcombine.high %v2682_v48, %v2686_v59  ;;  %v11724_v61 = vcombine.low %v2682_v48, %v2686_v59 }
 0x586   : > { %7402 = vmatpush1.bf16.msra.mxu1 %v11684_v58  ;;  %7362 = vmatprep.subr.bf16.mxu0 %v11565_v52  ;;  %v2814_v13 = vld [vmem:[%s14469_s23 + $0x14b0] sm:$0xff] }
 0x587   : > { %7403 = vmatprep.subr.bf16.mxu1 %v11693_v54  ;;  %v11853_v21 = vcombine.high %v2810_v35, %v2814_v13  ;;  %v2690_v51 = vld [vmem:[%s14469_s23 + $0x10d0] sm:$0xff]  ;;  %v11852_v28 = vcombine.low %v2810_v35, %v2814_v13 }
 0x588   : > { %v2694_v30 = vld [vmem:[%s14469_s23 + $0x10f0] sm:$0xff] }
 0x589   : > { %7363 = vmatpush1.bf16.msra.mxu0 %v11564_v24  ;;  %v2818_v15 = vld [vmem:[%s14469_s23 + $0x14d0] sm:$0xff]  ;;  %v11733_v58 = vcombine.high %v2690_v51, %v2694_v30  ;;  %v11732_v18 = vcombine.low %v2690_v51, %v2694_v30 }
 0x58a   : > { %7404 = vmatpush1.bf16.msra.mxu1 %v11692_v20  ;;  %7364 = vmatprep.subr.bf16.mxu0 %v11573_v40  ;;  %v2822_v29 = vld [vmem:[%s14469_s23 + $0x14f0] sm:$0xff] }
 0x58b   : > { %7405 = vmatprep.subr.bf16.mxu1 %v11701_v3  ;;  %v11861_v52 = vcombine.high %v2818_v15, %v2822_v29  ;;  %v2698_v54 = vld [vmem:[%s14469_s23 + $0x1110] sm:$0xff]  ;;  %v11860_v24 = vcombine.low %v2818_v15, %v2822_v29 }
 0x58c   : > { %v2702_v25 = vld [vmem:[%s14469_s23 + $0x1130] sm:$0xff] }
 0x58d   : > { %7365 = vmatpush1.bf16.msra.mxu0 %v11572_v53  ;;  %v2826_v56 = vld [vmem:[%s14469_s23 + $0x1510] sm:$0xff]  ;;  %v11741_v20 = vcombine.high %v2698_v54, %v2702_v25  ;;  %v11740_v17 = vcombine.low %v2698_v54, %v2702_v25 }
 0x58e   : > { %7406 = vmatpush1.bf16.msra.mxu1 %v11700_v39  ;;  %7416 = vmatprep.subr.bf16.mxu0 %v11709_v57  ;;  %v2830_v12 = vld [vmem:[%s14469_s23 + $0x1530] sm:$0xff] }
 0x58f   : > { %7457 = vmatprep.subr.bf16.mxu1 %v11837_v49  ;;  %v11869_v40 = vcombine.high %v2826_v56, %v2830_v12  ;;  %v2706_v3 = vld [vmem:[%s14469_s23 + $0x1150] sm:$0xff]  ;;  %v11868_v53 = vcombine.low %v2826_v56, %v2830_v12 }
 0x590   : > { %7367 = vmatmul.mubr.bf16.vlgmr.msra.gmra.mrb[40].mxu0 %v15049_v8  ;;  %v2710_v10 = vld [vmem:[%s14469_s23 + $0x1170] sm:$0xff] }
 0x591   : > { %7408 = vmatmul.mubr.bf16.vlgmr.msra.gmra.mrb[40].mxu1 %v15051_v5  ;;  %7417 = vmatpush1.bf16.msra.mxu0 %v11708_v42  ;;  %v2834_v27 = vld [vmem:[%s14469_s23 + $0x1550] sm:$0xff]  ;;  %v11749_v39 = vcombine.high %v2706_v3, %v2710_v10  ;;  %v11748_v32 = vcombine.low %v2706_v3, %v2710_v10 }
 0x592   : > { %7448 = vmatprep.mubr.bf16.mxu0 %v15053_v46  ;;  %7458 = vmatpush1.bf16.msra.mxu1 %v11836_v0  ;;  %v2838_v11 = vld [vmem:[%s14469_s23 + $0x1570] sm:$0xff] }
 0x593   : > { %7489 = vmatprep.mubr.bf16.mxu1 %v15059_v45  ;;  %7418 = vmatprep.subr.bf16.mxu0 %v11717_v50  ;;  %v11877_v57 = vcombine.high %v2834_v27, %v2838_v11  ;;  %v2714_v49 = vld [vmem:[%s14469_s23 + $0x1190] sm:$0xff]  ;;  %v11876_v23 = vcombine.low %v2834_v27, %v2838_v11 }
 0x594   : > { %7459 = vmatprep.subr.bf16.mxu1 %v11845_v31  ;;  %v2718_v4 = vld [vmem:[%s14469_s23 + $0x11b0] sm:$0xff] }
 0x595   : > { %7419 = vmatpush1.bf16.msra.mxu0 %v11716_v6  ;;  %v2842_v26 = vld [vmem:[%s14469_s23 + $0x1590] sm:$0xff]  ;;  %v11757_v0 = vcombine.high %v2714_v49, %v2718_v4  ;;  %v11756_v15 = vcombine.low %v2714_v49, %v2718_v4 }
 0x596   : > { %7460 = vmatpush1.bf16.msra.mxu1 %v11844_v14  ;;  %7420 = vmatprep.subr.bf16.mxu0 %v11725_v9  ;;  %v2846_v42 = vld [vmem:[%s14469_s23 + $0x15b0] sm:$0xff] }
 0x597   : > { %7461 = vmatprep.subr.bf16.mxu1 %v11853_v21  ;;  %v11885_v48 = vcombine.high %v2842_v26, %v2846_v42  ;;  %v2722_v59 = vld [vmem:[%s14469_s23 + $0x11d0] sm:$0xff] }
 0x598   : > { %v2726_v31 = vld [vmem:[%s14469_s23 + $0x11f0] sm:$0xff] }
 0x599   : > { %7421 = vmatpush1.bf16.msra.mxu0 %v11724_v61  ;;  %v2850_v14 = vld [vmem:[%s14469_s23 + $0x15d0] sm:$0xff] }
 0x59a   : > { %7462 = vmatpush1.bf16.msra.mxu1 %v11852_v28  ;;  %7422 = vmatprep.subr.bf16.mxu0 %v11733_v58  ;;  %v2854_v9 = vld [vmem:[%s14469_s23 + $0x15f0] sm:$0xff]  ;;  %v11765_v58 = vcombine.high %v2722_v59, %v2726_v31 }
 0x59b   : > { %7463 = vmatprep.subr.bf16.mxu1 %v11861_v52  ;;  %v11893_v54 = vcombine.high %v2850_v14, %v2854_v9  ;;  %v2730_v25 = vld [vmem:[%s14469_s23 + $0x1210] sm:$0xff] }
 0x59c   : > { %v2734_v56 = vld [vmem:[%s14469_s23 + $0x1230] sm:$0xff] }
 0x59d   : > { %7423 = vmatpush1.bf16.msra.mxu0 %v11732_v18  ;;  %v2858_v12 = vld [vmem:[%s14469_s23 + $0x1610] sm:$0xff] }
 0x59e   : > { %7464 = vmatpush1.bf16.msra.mxu1 %v11860_v24  ;;  %7424 = vmatprep.subr.bf16.mxu0 %v11741_v20  ;;  %v2862_v18 = vld [vmem:[%s14469_s23 + $0x1630] sm:$0xff]  ;;  %v11764_v24 = vcombine.low %v2722_v59, %v2726_v31  ;;  %v11892_v20 = vcombine.low %v2850_v14, %v2854_v9 }
 0x59f   : > { %7465 = vmatprep.subr.bf16.mxu1 %v11869_v40  ;;  %v11773_v40 = vcombine.high %v2730_v25, %v2734_v56  ;;  %v11901_v3 = vcombine.high %v2858_v12, %v2862_v18  ;;  %v2738_v10 = vld [vmem:[%s14469_s23 + $0x1250] sm:$0xff] }
 0x5a0   : > { %v2742_v27 = vld [vmem:[%s14469_s23 + $0x1270] sm:$0xff] }
 0x5a1   : > { %7425 = vmatpush1.bf16.msra.mxu0 %v11740_v17  ;;  %v2866_v11 = vld [vmem:[%s14469_s23 + $0x1650] sm:$0xff] }
 0x5a2   : > { %7466 = vmatpush1.bf16.msra.mxu1 %v11868_v53  ;;  %7426 = vmatprep.subr.bf16.mxu0 %v11749_v39  ;;  %v2870_v17 = vld [vmem:[%s14469_s23 + $0x1670] sm:$0xff]  ;;  %v11772_v53 = vcombine.low %v2730_v25, %v2734_v56  ;;  %v11900_v39 = vcombine.low %v2858_v12, %v2862_v18 }
 0x5a3   : > { %v7122_v50 = vpop.f32.mrb[28].mxu0  ;;  %7467 = vmatprep.subr.bf16.mxu1 %v11877_v57  ;;  %v11781_v57 = vcombine.high %v2738_v10, %v2742_v27  ;;  %v11909_v49 = vcombine.high %v2866_v11, %v2870_v17  ;;  %v2746_v4 = vld [vmem:[%s14469_s23 + $0x1290] sm:$0xff] }
 0x5a4   : > { %v7123_v35 = vadd.f32 %v7122_v50, %v15443_v19  ;;  %v7163_v13 = vpop.f32.mrb[28].mxu1  ;;  %v7124_v6 = vpop.f32.mrb[29].mxu0  ;;  %v11884_v19 = vcombine.low %v2842_v26, %v2846_v42  ;;  %v2750_v26 = vld [vmem:[%s14469_s23 + $0x12b0] sm:$0xff] }
 0x5a5   : > { %v7125_v21 = vadd.f32 %v7124_v6, %v15445_v22  ;;  %v7165_v51 = vpop.f32.mrb[29].mxu1  ;;  %v7126_v30 = vpop.f32.mrb[30].mxu0  ;;  %7427 = vmatpush1.bf16.msra.mxu0 %v11748_v32  ;;  %v2874_v42 = vld [vmem:[%s14469_s23 + $0x1690] sm:$0xff]  ;;  %v11789_v50 = vcombine.high %v2746_v4, %v2750_v26  ;;  %v11788_v6 = vcombine.low %v2746_v4, %v2750_v26 }
 0x5a6   : > { %v15517_v29 = vadd.f32 %v7163_v13, %v7123_v35  ;;  %v7167_v61 = vpop.f32.mrb[30].mxu1  ;;  %7468 = vmatpush1.bf16.msra.mxu1 %v11876_v23  ;;  %v7127_v28 = vpop.f32.mrb[31].mxu0  ;;  %7428 = vmatprep.subr.bf16.mxu0 %v11757_v0  ;;  %v2878_v32 = vld [vmem:[%s14469_s23 + $0x16b0] sm:$0xff]  ;;  %v11780_v23 = vcombine.low %v2738_v10, %v2742_v27  ;;  %v11908_v0 = vcombine.low %v2866_v11, %v2870_v17 }
 0x5a7   : > { %v15519_v52 = vadd.f32 %v7165_v51, %v7125_v21  ;;  %v7168_v22 = vpop.f32.mrb[31].mxu1  ;;  %7469 = vmatprep.subr.bf16.mxu1 %v11885_v48  ;;  %v11917_v48 = vcombine.high %v2874_v42, %v2878_v32  ;;  %v2754_v59 = vld [vmem:[%s14469_s23 + $0x12d0] sm:$0xff]  ;;  %v11916_v14 = vcombine.low %v2874_v42, %v2878_v32 }
 0x5a8   : > { %v2758_v31 = vld [vmem:[%s14469_s23 + $0x12f0] sm:$0xff] }
 0x5a9   : > { %7429 = vmatpush1.bf16.msra.mxu0 %v11756_v15  ;;  %v2882_v35 = vld [vmem:[%s14469_s23 + $0x16d0] sm:$0xff]  ;;  %v11797_v9 = vcombine.high %v2754_v59, %v2758_v31  ;;  %v11796_v28 = vcombine.low %v2754_v59, %v2758_v31  ;;  %v2159_v59 = vld [vmem:[%s14469_s23 + $0x38] sm:$0xff] }
 0x5aa   : > { %7470 = vmatpush1.bf16.msra.mxu1 %v11884_v19  ;;  %7430 = vmatprep.subr.bf16.mxu0 %v11765_v58  ;;  %v2886_v13 = vld [vmem:[%s14469_s23 + $0x16f0] sm:$0xff]  ;;  %v2283_v31 = vld [vmem:[%s14469_s23 + $0x418] sm:$0xff] }
 0x5ab   : > { %7471 = vmatprep.subr.bf16.mxu1 %v11893_v54  ;;  %v11925_v21 = vcombine.high %v2882_v35, %v2886_v13  ;;  %v2762_v51 = vld [vmem:[%s14469_s23 + $0x1310] sm:$0xff]  ;;  %v11924_v19 = vcombine.low %v2882_v35, %v2886_v13  ;;  %v2287_v35 = vld [vmem:[%s14469_s23 + $0x438] sm:$0xff] }
 0x5ac   : > { %v2766_v30 = vld [vmem:[%s14469_s23 + $0x1330] sm:$0xff] }
 0x5ad   : > { %7431 = vmatpush1.bf16.msra.mxu0 %v11764_v24  ;;  %v2890_v15 = vld [vmem:[%s14469_s23 + $0x1710] sm:$0xff]  ;;  %v11805_v58 = vcombine.high %v2762_v51, %v2766_v30  ;;  %v11804_v18 = vcombine.low %v2762_v51, %v2766_v30  ;;  %v2167_v51 = vld [vmem:[%s14469_s23 + $0x78] sm:$0xff] }
 0x5ae   : > { %7472 = vmatpush1.bf16.msra.mxu1 %v11892_v20  ;;  %7432 = vmatprep.subr.bf16.mxu0 %v11773_v40  ;;  %v2894_v61 = vld [vmem:[%s14469_s23 + $0x1730] sm:$0xff] }
 0x5af   : > { %7473 = vmatprep.subr.bf16.mxu1 %v11901_v3  ;;  %v11933_v22 = vcombine.high %v2890_v15, %v2894_v61  ;;  %v2770_v54 = vld [vmem:[%s14469_s23 + $0x1350] sm:$0xff]  ;;  %v11932_v24 = vcombine.low %v2890_v15, %v2894_v61  ;;  %v2291_v15 = vld [vmem:[%s14469_s23 + $0x458] sm:$0xff] }
 0x5b0   : > { %v2774_v25 = vld [vmem:[%s14469_s23 + $0x1370] sm:$0xff]  ;;  %v2295_v61 = vld [vmem:[%s14469_s23 + $0x478] sm:$0xff] }
 0x5b1   : > { %7433 = vmatpush1.bf16.msra.mxu0 %v11772_v53  ;;  %v2898_v56 = vld [vmem:[%s14469_s23 + $0x1750] sm:$0xff]  ;;  %v11813_v20 = vcombine.high %v2770_v54, %v2774_v25  ;;  %v11812_v17 = vcombine.low %v2770_v54, %v2774_v25  ;;  %v11335_v54 = vcombine.high %v2291_v15, %v2295_v61  ;;  %v2299_v25 = vld [vmem:[%s14469_s23 + $0x498] sm:$0xff] }
 0x5b2   : > { %7474 = vmatpush1.bf16.msra.mxu1 %v11900_v39  ;;  %7434 = vmatprep.subr.bf16.mxu0 %v11781_v57  ;;  %v2902_v12 = vld [vmem:[%s14469_s23 + $0x1770] sm:$0xff] }
 0x5b3   : > { %7475 = vmatprep.subr.bf16.mxu1 %v11909_v49  ;;  %v11941_v40 = vcombine.high %v2898_v56, %v2902_v12  ;;  %v2778_v3 = vld [vmem:[%s14469_s23 + $0x1390] sm:$0xff]  ;;  %v11940_v53 = vcombine.low %v2898_v56, %v2902_v12  ;;  %v2303_v56 = vld [vmem:[%s14469_s23 + $0x4b8] sm:$0xff] }
 0x5b4   : > { %v2782_v10 = vld [vmem:[%s14469_s23 + $0x13b0] sm:$0xff] }
 0x5b5   : > { %7435 = vmatpush1.bf16.msra.mxu0 %v11780_v23  ;;  %v2906_v27 = vld [vmem:[%s14469_s23 + $0x1790] sm:$0xff]  ;;  %v11821_v39 = vcombine.high %v2778_v3, %v2782_v10  ;;  %v11820_v32 = vcombine.low %v2778_v3, %v2782_v10  ;;  %v2183_v3 = vld [vmem:[%s14469_s23 + $0xf8] sm:$0xff] }
 0x5b6   : > { %7476 = vmatpush1.bf16.msra.mxu1 %v11908_v0  ;;  %7436 = vmatprep.subr.bf16.mxu0 %v11789_v50  ;;  %v2910_v11 = vld [vmem:[%s14469_s23 + $0x17b0] sm:$0xff]  ;;  %v2307_v10 = vld [vmem:[%s14469_s23 + $0x4d8] sm:$0xff] }
 0x5b7   : > { %7477 = vmatprep.subr.bf16.mxu1 %v11917_v48  ;;  %v11949_v57 = vcombine.high %v2906_v27, %v2910_v11  ;;  %v2786_v49 = vld [vmem:[%s14469_s23 + $0x13d0] sm:$0xff]  ;;  %v11948_v23 = vcombine.low %v2906_v27, %v2910_v11  ;;  %v2155_v48 = vld [vmem:[%s14469_s23 + $0x18] sm:$0xff] }
 0x5b8   : > { %v2790_v4 = vld [vmem:[%s14469_s23 + $0x13f0] sm:$0xff]  ;;  %v11198_v30 = vcombine.low %v2155_v48, %v2159_v59  ;;  %v2311_v27 = vld [vmem:[%s14469_s23 + $0x4f8] sm:$0xff] }
 0x5b9   : > { %7437 = vmatpush1.bf16.msra.mxu0 %v11788_v6  ;;  %v2914_v26 = vld [vmem:[%s14469_s23 + $0x17d0] sm:$0xff]  ;;  %v11829_v0 = vcombine.high %v2786_v49, %v2790_v4  ;;  %v11828_v13 = vcombine.low %v2786_v49, %v2790_v4  ;;  %v2319_v49 = vld [vmem:[%s14469_s23 + $0x538] sm:$0xff] }
 0x5ba   : > { %7478 = vmatpush1.bf16.msra.mxu1 %v11916_v14  ;;  %7438 = vmatprep.subr.bf16.mxu0 %v11797_v9  ;;  %v2918_v42 = vld [vmem:[%s14469_s23 + $0x17f0] sm:$0xff]  ;;  %v11199_v14 = vcombine.high %v2155_v48, %v2159_v59  ;;  %v11327_v9 = vcombine.high %v2283_v31, %v2287_v35  ;;  %v2327_v48 = vld [vmem:[%s14469_s23 + $0x578] sm:$0xff] }
 0x5bb   : > { %7479 = vmatprep.subr.bf16.mxu1 %v11925_v21  ;;  %v11957_v50 = vcombine.high %v2914_v26, %v2918_v42  ;;  %v11956_v6 = vcombine.low %v2914_v26, %v2918_v42  ;;  %v2163_v21 = vld [vmem:[%s14469_s23 + $0x58] sm:$0xff]  ;;  %v11350_v26 = vcombine.low %v2307_v10, %v2311_v27 }
 0x5bc   : > { %v11206_v12 = vcombine.low %v2163_v21, %v2167_v51 }
 0x5bd   : > { %7439 = vmatpush1.bf16.msra.mxu0 %v11796_v28  ;;  %v11326_v28 = vcombine.low %v2283_v31, %v2287_v35 }
 0x5be   : > { %7480 = vmatpush1.bf16.msra.mxu1 %v11924_v19  ;;  %7440 = vmatprep.subr.bf16.mxu0 %v11805_v58  ;;  %v11207_v19 = vcombine.high %v2163_v21, %v2167_v51  ;;  %v2171_v58 = vld [vmem:[%s14469_s23 + $0x98] sm:$0xff] }
 0x5bf   : > { %7481 = vmatprep.subr.bf16.mxu1 %v11933_v22  ;;  %v2175_v22 = vld [vmem:[%s14469_s23 + $0xb8] sm:$0xff] }
 0x5c0   : > { %v11214_v11 = vcombine.low %v2171_v58, %v2175_v22  ;;  %v2335_v21 = vld [vmem:[%s14469_s23 + $0x5b8] sm:$0xff] }
 0x5c1   : > { %7441 = vmatpush1.bf16.msra.mxu0 %v11804_v18  ;;  %v11334_v18 = vcombine.low %v2291_v15, %v2295_v61 }
 0x5c2   : > { %7482 = vmatpush1.bf16.msra.mxu1 %v11932_v24  ;;  %7442 = vmatprep.subr.bf16.mxu0 %v11813_v20  ;;  %v11215_v24 = vcombine.high %v2171_v58, %v2175_v22  ;;  %v11343_v20 = vcombine.high %v2299_v25, %v2303_v56  ;;  %v2215_v58 = vld [vmem:[%s14469_s23 + $0x1f8] sm:$0xff] }
 0x5c3   : > { %7483 = vmatprep.subr.bf16.mxu1 %v11941_v40  ;;  %v2179_v40 = vld [vmem:[%s14469_s23 + $0xd8] sm:$0xff] }
 0x5c4   : > { %v11222_v4 = vcombine.low %v2179_v40, %v2183_v3 }
 0x5c5   : > { %7443 = vmatpush1.bf16.msra.mxu0 %v11812_v17  ;;  %v11223_v17 = vcombine.high %v2179_v40, %v2183_v3 }
 0x5c6   : > { %7484 = vmatpush1.bf16.msra.mxu1 %v11940_v53  ;;  %7444 = vmatprep.subr.bf16.mxu0 %v11821_v39  ;;  %v2187_v53 = vld [vmem:[%s14469_s23 + $0x118] sm:$0xff] }
 0x5c7   : > { %7485 = vmatprep.subr.bf16.mxu1 %v11949_v57  ;;  %v2191_v39 = vld [vmem:[%s14469_s23 + $0x138] sm:$0xff] }
 0x5c8   : > { %v2315_v57 = vld [vmem:[%s14469_s23 + $0x518] sm:$0xff]  ;;  %v11231_v42 = vcombine.high %v2187_v53, %v2191_v39  ;;  %v11230_v59 = vcombine.low %v2187_v53, %v2191_v39 }
 0x5c9   : > { %7445 = vmatpush1.bf16.msra.mxu0 %v11820_v32  ;;  %v11359_v32 = vcombine.high %v2315_v57, %v2319_v49  ;;  %v11358_v31 = vcombine.low %v2315_v57, %v2319_v49  ;;  %v2219_v39 = vld [vmem:[%s14469_s23 + $0x218] sm:$0xff] }
 0x5ca   : > { %7486 = vmatpush1.bf16.msra.mxu1 %v11948_v23  ;;  %7446 = vmatprep.subr.bf16.mxu0 %v11829_v0  ;;  %v2195_v23 = vld [vmem:[%s14469_s23 + $0x158] sm:$0xff] }
 0x5cb   : > { %7487 = vmatprep.subr.bf16.mxu1 %v11957_v50  ;;  %v2199_v0 = vld [vmem:[%s14469_s23 + $0x178] sm:$0xff] }
 0x5cc   : > { %v2323_v50 = vld [vmem:[%s14469_s23 + $0x558] sm:$0xff]  ;;  %v11239_v35 = vcombine.high %v2195_v23, %v2199_v0  ;;  %v11238_v51 = vcombine.low %v2195_v23, %v2199_v0 }
 0x5cd   : > { %7447 = vmatpush1.bf16.msra.mxu0 %v11828_v13  ;;  %v11367_v13 = vcombine.high %v2323_v50, %v2327_v48  ;;  %v2223_v57 = vld [vmem:[%s14469_s23 + $0x238] sm:$0xff] }
 0x5ce   : > { %7488 = vmatpush1.bf16.msra.mxu1 %v11956_v6  ;;  %7498 = vmatprep.subr.bf16.mxu0 %v11199_v14  ;;  %v2203_v6 = vld [vmem:[%s14469_s23 + $0x198] sm:$0xff]  ;;  %v11263_v0 = vcombine.high %v2219_v39, %v2223_v57 }
 0x5cf   : > { %7539 = vmatprep.subr.bf16.mxu1 %v11327_v9  ;;  %v2207_v14 = vld [vmem:[%s14469_s23 + $0x1b8] sm:$0xff] }
 0x5d0   : > { %7449 = vmatmul.mubr.bf16.vlgmr.msra.gmra.mrb[44].mxu0 %v15127_v36  ;;  %v2331_v9 = vld [vmem:[%s14469_s23 + $0x598] sm:$0xff]  ;;  %v11247_v15 = vcombine.high %v2203_v6, %v2207_v14  ;;  %v11246_v3 = vcombine.low %v2203_v6, %v2207_v14 }
 0x5d1   : > { %7490 = vmatmul.mubr.bf16.vlgmr.msra.gmra.mrb[44].mxu1 %v15129_v44  ;;  %7499 = vmatpush1.bf16.msra.mxu0 %v11198_v30  ;;  %v11366_v30 = vcombine.low %v2323_v50, %v2327_v48  ;;  %v2227_v48 = vld [vmem:[%s14469_s23 + $0x258] sm:$0xff] }
 0x5d2   : > { %7530 = vmatprep.mubr.bf16.mxu0 %v14902_v41  ;;  %7540 = vmatpush1.bf16.msra.mxu1 %v11326_v28  ;;  %v11342_v41 = vcombine.low %v2299_v25, %v2303_v56  ;;  %v11375_v28 = vcombine.high %v2331_v9, %v2335_v21  ;;  %v2339_v56 = vld [vmem:[%s14469_s23 + $0x5d8] sm:$0xff] }
 0x5d3   : > { %7571 = vmatprep.mubr.bf16.mxu1 %v14904_v43  ;;  %7500 = vmatprep.subr.bf16.mxu0 %v11207_v19  ;;  %v11351_v43 = vcombine.high %v2307_v10, %v2311_v27  ;;  %v2211_v19 = vld [vmem:[%s14469_s23 + $0x1d8] sm:$0xff]  ;;  %v2135_v27 = vld [vmem:[#allocation2 + $0x18] sm:$0xff] }
 0x5d4   : > { %7541 = vmatprep.subr.bf16.mxu1 %v11335_v54 }
 0x5d5   : > { %7501 = vmatpush1.bf16.msra.mxu0 %v11206_v12  ;;  %v2343_v12 = vld [vmem:[%s14469_s23 + $0x5f8] sm:$0xff] }
 0x5d6   : > { %7542 = vmatpush1.bf16.msra.mxu1 %v11334_v18  ;;  %7502 = vmatprep.subr.bf16.mxu0 %v11215_v24  ;;  %v2134_v18 = vld [vmem:[#allocation2 + $0x10] sm:$0xff]  ;;  %v11382_v23 = vcombine.low %v2339_v56, %v2343_v12 }
 0x5d7   : > { %7543 = vmatprep.subr.bf16.mxu1 %v11343_v20 }
 0x5d9   : > { %7503 = vmatpush1.bf16.msra.mxu0 %v11214_v11 }
 0x5da   : > { %7544 = vmatpush1.bf16.msra.mxu1 %v11342_v41  ;;  %7504 = vmatprep.subr.bf16.mxu0 %v11223_v17  ;;  %v11374_v41 = vcombine.low %v2331_v9, %v2335_v21  ;;  %v11255_v17 = vcombine.high %v2211_v19, %v2215_v58  ;;  %v2235_v21 = vld [vmem:[%s14469_s23 + $0x298] sm:$0xff] }
 0x5db   : > { %7545 = vmatprep.subr.bf16.mxu1 %v11351_v43 }
 0x5dd   : > { %7505 = vmatpush1.bf16.msra.mxu0 %v11222_v4  ;;  %v2347_v4 = vld [vmem:[%s14469_s23 + $0x618] sm:$0xff] }
 0x5de   : > { %7546 = vmatpush1.bf16.msra.mxu1 %v11350_v26  ;;  %7506 = vmatprep.subr.bf16.mxu0 %v11231_v42  ;;  %v2351_v26 = vld [vmem:[%s14469_s23 + $0x638] sm:$0xff] }
 0x5df   : > { %7547 = vmatprep.subr.bf16.mxu1 %v11359_v32  ;;  %v11254_v32 = vcombine.low %v2211_v19, %v2215_v58  ;;  %v11391_v50 = vcombine.high %v2347_v4, %v2351_v26  ;;  %v11390_v6 = vcombine.low %v2347_v4, %v2351_v26 }
 0x5e1   : > { %7507 = vmatpush1.bf16.msra.mxu0 %v11230_v59  ;;  %v2231_v59 = vld [vmem:[%s14469_s23 + $0x278] sm:$0xff] }
 0x5e2   : > { %7548 = vmatpush1.bf16.msra.mxu1 %v11358_v31  ;;  %7508 = vmatprep.subr.bf16.mxu0 %v11239_v35  ;;  %v2355_v31 = vld [vmem:[%s14469_s23 + $0x658] sm:$0xff]  ;;  %v11271_v14 = vcombine.high %v2227_v48, %v2231_v59 }
 0x5e3   : > { %v7204_v61 = vpop.f32.mrb[32].mxu0  ;;  %7549 = vmatprep.subr.bf16.mxu1 %v11367_v13  ;;  %v2359_v35 = vld [vmem:[%s14469_s23 + $0x678] sm:$0xff]  ;;  %v11262_v13 = vcombine.low %v2219_v39, %v2223_v57 }
 0x5e4   : > { %v7205_v22 = vadd.f32 %v7204_v61, %v15517_v29  ;;  %v7245_v54 = vpop.f32.mrb[32].mxu1  ;;  %v7206_v25 = vpop.f32.mrb[33].mxu0  ;;  %v11399_v9 = vcombine.high %v2355_v31, %v2359_v35  ;;  %v11270_v61 = vcombine.low %v2227_v48, %v2231_v59  ;;  %v2391_v39 = vld [vmem:[%s14469_s23 + $0x778] sm:$0xff] }
 0x5e5   : > { %v7207_v24 = vadd.f32 %v7206_v25, %v15519_v52  ;;  %v7247_v20 = vpop.f32.mrb[33].mxu1  ;;  %v7208_v40 = vpop.f32.mrb[34].mxu0  ;;  %7509 = vmatpush1.bf16.msra.mxu0 %v11238_v51  ;;  %v11383_v52 = vcombine.high %v2339_v56, %v2343_v12  ;;  %v2239_v51 = vld [vmem:[%s14469_s23 + $0x2b8] sm:$0xff] }
 0x5e6   : > { %v7246_v10 = vadd.f32 %v7245_v54, %v7205_v22  ;;  %v7249_v11 = vpop.f32.mrb[34].mxu1  ;;  %7550 = vmatpush1.bf16.msra.mxu1 %v11366_v30  ;;  %v7209_v29 = vpop.f32.mrb[35].mxu0  ;;  %7510 = vmatprep.subr.bf16.mxu0 %v11247_v15  ;;  %v2363_v30 = vld [vmem:[%s14469_s23 + $0x698] sm:$0xff]  ;;  %v11279_v19 = vcombine.high %v2235_v21, %v2239_v51  ;;  %v11278_v12 = vcombine.low %v2235_v21, %v2239_v51 }
 0x5e7   : > { %v7248_v43 = vadd.f32 %v7247_v20, %v7207_v24  ;;  %v7250_v53 = vpop.f32.mrb[35].mxu1  ;;  %7551 = vmatprep.subr.bf16.mxu1 %v11375_v28  ;;  %v2367_v15 = vld [vmem:[%s14469_s23 + $0x6b8] sm:$0xff]  ;;  %v11398_v28 = vcombine.low %v2355_v31, %v2359_v35 }
 0x5e8   : > { %v7746_v49 = vadd.f32 %v7246_v10, %v2134_v18  ;;  %v11407_v58 = vcombine.high %v2363_v30, %v2367_v15  ;;  %v2243_v22 = vld [vmem:[%s14469_s23 + $0x2d8] sm:$0xff]  ;;  %v11406_v18 = vcombine.low %v2363_v30, %v2367_v15 }
 0x5e9   : > { %v7747_v42 = vadd.f32 %v7248_v43, %v2135_v27  ;;  %7511 = vmatpush1.bf16.msra.mxu0 %v11246_v3  ;;  %v2247_v54 = vld [vmem:[%s14469_s23 + $0x2f8] sm:$0xff] }
 0x5ea   : > { %7754 = vst [vmem:[#allocation2 + $0x10] sm:$0xff] %v7746_v49  ;;  %7552 = vmatpush1.bf16.msra.mxu1 %v11374_v41  ;;  %7512 = vmatprep.subr.bf16.mxu0 %v11255_v17  ;;  %v2371_v25 = vld [vmem:[%s14469_s23 + $0x6d8] sm:$0xff]  ;;  %v11287_v24 = vcombine.high %v2243_v22, %v2247_v54  ;;  %v11286_v11 = vcombine.low %v2243_v22, %v2247_v54 }
 0x5eb   : > { %7755 = vst [vmem:[#allocation2 + $0x18] sm:$0xff] %v7747_v42  ;;  %7553 = vmatprep.subr.bf16.mxu1 %v11383_v52  ;;  %v2375_v56 = vld [vmem:[%s14469_s23 + $0x6f8] sm:$0xff] }
 0x5ec   : > { %v11415_v20 = vcombine.high %v2371_v25, %v2375_v56  ;;  %v2251_v40 = vld [vmem:[%s14469_s23 + $0x318] sm:$0xff]  ;;  %v11414_v29 = vcombine.low %v2371_v25, %v2375_v56 }
 0x5ed   : > { %7513 = vmatpush1.bf16.msra.mxu0 %v11254_v32  ;;  %v2255_v3 = vld [vmem:[%s14469_s23 + $0x338] sm:$0xff] }
 0x5ee   : > { %7554 = vmatpush1.bf16.msra.mxu1 %v11382_v23  ;;  %7514 = vmatprep.subr.bf16.mxu0 %v11263_v0  ;;  %v2379_v10 = vld [vmem:[%s14469_s23 + $0x718] sm:$0xff]  ;;  %v11295_v41 = vcombine.high %v2251_v40, %v2255_v3  ;;  %v11294_v57 = vcombine.low %v2251_v40, %v2255_v3 }
 0x5ef   : > { %7555 = vmatprep.subr.bf16.mxu1 %v11391_v50  ;;  %v2383_v27 = vld [vmem:[%s14469_s23 + $0x738] sm:$0xff] }
 0x5f0   : > { %v11423_v17 = vcombine.high %v2379_v10, %v2383_v27  ;;  %v2259_v43 = vld [vmem:[%s14469_s23 + $0x358] sm:$0xff]  ;;  %v11422_v49 = vcombine.low %v2379_v10, %v2383_v27 }
 0x5f1   : > { %7515 = vmatpush1.bf16.msra.mxu0 %v11262_v13  ;;  %v2263_v53 = vld [vmem:[%s14469_s23 + $0x378] sm:$0xff] }
 0x5f2   : > { %7556 = vmatpush1.bf16.msra.mxu1 %v11390_v6  ;;  %7516 = vmatprep.subr.bf16.mxu0 %v11271_v14  ;;  %v2387_v52 = vld [vmem:[%s14469_s23 + $0x758] sm:$0xff]  ;;  %v11303_v4 = vcombine.high %v2259_v43, %v2263_v53  ;;  %v11302_v50 = vcombine.low %v2259_v43, %v2263_v53 }
 0x5f3   : > { %7557 = vmatprep.subr.bf16.mxu1 %v11399_v9  ;;  %v11431_v26 = vcombine.high %v2387_v52, %v2391_v39  ;;  %v2267_v42 = vld [vmem:[%s14469_s23 + $0x398] sm:$0xff]  ;;  %v11430_v48 = vcombine.low %v2387_v52, %v2391_v39 }
 0x5f4   : > { %v2271_v32 = vld [vmem:[%s14469_s23 + $0x3b8] sm:$0xff] }
 0x5f5   : > { %7517 = vmatpush1.bf16.msra.mxu0 %v11270_v61  ;;  %v2395_v23 = vld [vmem:[%s14469_s23 + $0x798] sm:$0xff]  ;;  %v11311_v59 = vcombine.high %v2267_v42, %v2271_v32  ;;  %v11310_v9 = vcombine.low %v2267_v42, %v2271_v32 }
 0x5f6   : > { %7558 = vmatpush1.bf16.msra.mxu1 %v11398_v28  ;;  %7518 = vmatprep.subr.bf16.mxu0 %v11279_v19  ;;  %v2399_v0 = vld [vmem:[%s14469_s23 + $0x7b8] sm:$0xff] }
 0x5f7   : > { %7559 = vmatprep.subr.bf16.mxu1 %v11407_v58  ;;  %v11439_v31 = vcombine.high %v2395_v23, %v2399_v0  ;;  %v2275_v35 = vld [vmem:[%s14469_s23 + $0x3d8] sm:$0xff]  ;;  %v11438_v21 = vcombine.low %v2395_v23, %v2399_v0 }
 0x5f8   : > { %v2279_v13 = vld [vmem:[%s14469_s23 + $0x3f8] sm:$0xff] }
 0x5f9   : > { %7519 = vmatpush1.bf16.msra.mxu0 %v11278_v12  ;;  %v2403_v6 = vld [vmem:[%s14469_s23 + $0x7d8] sm:$0xff]  ;;  %v11319_v51 = vcombine.high %v2275_v35, %v2279_v13  ;;  %v11318_v58 = vcombine.low %v2275_v35, %v2279_v13 }
 0x5fa   : > { %7560 = vmatpush1.bf16.msra.mxu1 %v11406_v18  ;;  %7520 = vmatprep.subr.bf16.mxu0 %v11287_v24  ;;  %v2407_v14 = vld [vmem:[%s14469_s23 + $0x7f8] sm:$0xff] }
 0x5fb   : > { %7561 = vmatprep.subr.bf16.mxu1 %v11415_v20  ;;  %v11447_v30 = vcombine.high %v2403_v6, %v2407_v14  ;;  %v2411_v15 = vld [vmem:[%s14469_s23 + $0x818] sm:$0xff]  ;;  %v11446_v22 = vcombine.low %v2403_v6, %v2407_v14 }
 0x5fc   : > { %v2415_v61 = vld [vmem:[%s14469_s23 + $0x838] sm:$0xff] }
 0x5fd   : > { %7521 = vmatpush1.bf16.msra.mxu0 %v11286_v11  ;;  %v2539_v28 = vld [vmem:[%s14469_s23 + $0xc18] sm:$0xff]  ;;  %v11455_v54 = vcombine.high %v2411_v15, %v2415_v61  ;;  %v11454_v18 = vcombine.low %v2411_v15, %v2415_v61 }
 0x5fe   : > { %7562 = vmatpush1.bf16.msra.mxu1 %v11414_v29  ;;  %7522 = vmatprep.subr.bf16.mxu0 %v11295_v41  ;;  %v2543_v19 = vld [vmem:[%s14469_s23 + $0xc38] sm:$0xff] }
 0x5ff   : > { %7563 = vmatprep.subr.bf16.mxu1 %v11423_v17  ;;  %v11583_v25 = vcombine.high %v2539_v28, %v2543_v19  ;;  %v2419_v56 = vld [vmem:[%s14469_s23 + $0x858] sm:$0xff]  ;;  %v11582_v40 = vcombine.low %v2539_v28, %v2543_v19 }
 0x600   : > { %v2423_v12 = vld [vmem:[%s14469_s23 + $0x878] sm:$0xff] }
 0x601   : > { %7523 = vmatpush1.bf16.msra.mxu0 %v11294_v57  ;;  %v2547_v24 = vld [vmem:[%s14469_s23 + $0xc58] sm:$0xff]  ;;  %v11463_v3 = vcombine.high %v2419_v56, %v2423_v12  ;;  %v11462_v17 = vcombine.low %v2419_v56, %v2423_v12 }
 0x602   : > { %7564 = vmatpush1.bf16.msra.mxu1 %v11422_v49  ;;  %7524 = vmatprep.subr.bf16.mxu0 %v11303_v4  ;;  %v2551_v20 = vld [vmem:[%s14469_s23 + $0xc78] sm:$0xff] }
 0x603   : > { %7565 = vmatprep.subr.bf16.mxu1 %v11431_v26  ;;  %v2427_v10 = vld [vmem:[%s14469_s23 + $0x898] sm:$0xff]  ;;  %v11591_v11 = vcombine.high %v2547_v24, %v2551_v20  ;;  %v11590_v43 = vcombine.low %v2547_v24, %v2551_v20 }
 0x604   : > { %v2431_v27 = vld [vmem:[%s14469_s23 + $0x8b8] sm:$0xff] }
 0x605   : > { %7525 = vmatpush1.bf16.msra.mxu0 %v11302_v50  ;;  %v2555_v29 = vld [vmem:[%s14469_s23 + $0xc98] sm:$0xff]  ;;  %v11471_v53 = vcombine.high %v2427_v10, %v2431_v27  ;;  %v11470_v49 = vcombine.low %v2427_v10, %v2431_v27 }
 0x606   : > { %7566 = vmatpush1.bf16.msra.mxu1 %v11430_v48  ;;  %7526 = vmatprep.subr.bf16.mxu0 %v11311_v59  ;;  %v2559_v41 = vld [vmem:[%s14469_s23 + $0xcb8] sm:$0xff] }
 0x607   : > { %7567 = vmatprep.subr.bf16.mxu1 %v11439_v31  ;;  %v2435_v52 = vld [vmem:[%s14469_s23 + $0x8d8] sm:$0xff] }
 0x608   : > { %v2439_v39 = vld [vmem:[%s14469_s23 + $0x8f8] sm:$0xff] }
 0x609   : > { %7527 = vmatpush1.bf16.msra.mxu0 %v11310_v9  ;;  %v2563_v57 = vld [vmem:[%s14469_s23 + $0xcd8] sm:$0xff]  ;;  %v11479_v4 = vcombine.high %v2435_v52, %v2439_v39  ;;  %v11478_v0 = vcombine.low %v2435_v52, %v2439_v39 }
 0x60a   : > { %7568 = vmatpush1.bf16.msra.mxu1 %v11438_v21  ;;  %7528 = vmatprep.subr.bf16.mxu0 %v11319_v51  ;;  %v2443_v26 = vld [vmem:[%s14469_s23 + $0x918] sm:$0xff] }
 0x60b   : > { %7569 = vmatprep.subr.bf16.mxu1 %v11447_v30  ;;  %v2447_v42 = vld [vmem:[%s14469_s23 + $0x938] sm:$0xff] }
 0x60c   : > { %v2571_v32 = vld [vmem:[%s14469_s23 + $0xd18] sm:$0xff]  ;;  %v11487_v48 = vcombine.high %v2443_v26, %v2447_v42  ;;  %v11486_v14 = vcombine.low %v2443_v26, %v2447_v42 }
 0x60d   : > { %7529 = vmatpush1.bf16.msra.mxu0 %v11318_v58  ;;  %v2575_v23 = vld [vmem:[%s14469_s23 + $0xd38] sm:$0xff] }
 0x60e   : > { %7570 = vmatpush1.bf16.msra.mxu1 %v11446_v22  ;;  %7580 = vmatprep.subr.bf16.mxu0 %v11455_v54  ;;  %v11615_v59 = vcombine.high %v2571_v32, %v2575_v23  ;;  %v2451_v31 = vld [vmem:[%s14469_s23 + $0x958] sm:$0xff]  ;;  %v11614_v9 = vcombine.low %v2571_v32, %v2575_v23 }
 0x60f   : > { %7621 = vmatprep.subr.bf16.mxu1 %v11583_v25  ;;  %v2455_v35 = vld [vmem:[%s14469_s23 + $0x978] sm:$0xff] }
 0x610   : > { %7531 = vmatmul.mubr.bf16.vlgmr.msra.gmra.mrb[48].mxu0 %v14906_v47  ;;  %v11599_v47 = vcombine.high %v2555_v29, %v2559_v41  ;;  %v2579_v13 = vld [vmem:[%s14469_s23 + $0xd58] sm:$0xff]  ;;  %v11495_v21 = vcombine.high %v2451_v31, %v2455_v35  ;;  %v11494_v19 = vcombine.low %v2451_v31, %v2455_v35 }
 0x611   : > { %7572 = vmatmul.mubr.bf16.vlgmr.msra.gmra.mrb[48].mxu1 %v14908_v7  ;;  %7581 = vmatpush1.bf16.msra.mxu0 %v11454_v18  ;;  %v2567_v7 = vld [vmem:[%s14469_s23 + $0xcf8] sm:$0xff] }
 0x612   : > { %7612 = vmatprep.mubr.bf16.mxu0 %v14921_v55  ;;  %7622 = vmatpush1.bf16.msra.mxu1 %v11582_v40  ;;  %v11598_v55 = vcombine.low %v2555_v29, %v2559_v41  ;;  %v11606_v50 = vcombine.low %v2563_v57, %v2567_v7  ;;  %v2583_v6 = vld [vmem:[%s14469_s23 + $0xd78] sm:$0xff] }
 0x613   : > { %7653 = vmatprep.mubr.bf16.mxu1 %v14930_v16  ;;  %7582 = vmatprep.subr.bf16.mxu0 %v11463_v3  ;;  %v11607_v16 = vcombine.high %v2563_v57, %v2567_v7  ;;  %v11623_v51 = vcombine.high %v2579_v13, %v2583_v6  ;;  %v2459_v30 = vld [vmem:[%s14469_s23 + $0x998] sm:$0xff]  ;;  %v11622_v58 = vcombine.low %v2579_v13, %v2583_v6 }
 0x614   : > { %7623 = vmatprep.subr.bf16.mxu1 %v11591_v11  ;;  %v2463_v15 = vld [vmem:[%s14469_s23 + $0x9b8] sm:$0xff] }
 0x615   : > { %7583 = vmatpush1.bf16.msra.mxu0 %v11462_v17  ;;  %v2587_v61 = vld [vmem:[%s14469_s23 + $0xd98] sm:$0xff]  ;;  %v11503_v22 = vcombine.high %v2459_v30, %v2463_v15  ;;  %v11502_v11 = vcombine.low %v2459_v30, %v2463_v15 }
 0x616   : > { %7624 = vmatpush1.bf16.msra.mxu1 %v11590_v43  ;;  %7584 = vmatprep.subr.bf16.mxu0 %v11471_v53  ;;  %v2591_v28 = vld [vmem:[%s14469_s23 + $0xdb8] sm:$0xff] }
 0x617   : > { %7625 = vmatprep.subr.bf16.mxu1 %v11599_v47  ;;  %v11631_v25 = vcombine.high %v2587_v61, %v2591_v28  ;;  %v2467_v56 = vld [vmem:[%s14469_s23 + $0x9d8] sm:$0xff]  ;;  %v11630_v43 = vcombine.low %v2587_v61, %v2591_v28 }
 0x618   : > { %v2471_v12 = vld [vmem:[%s14469_s23 + $0x9f8] sm:$0xff] }
 0x619   : > { %7585 = vmatpush1.bf16.msra.mxu0 %v11470_v49  ;;  %v2595_v20 = vld [vmem:[%s14469_s23 + $0xdd8] sm:$0xff]  ;;  %v11511_v53 = vcombine.high %v2467_v56, %v2471_v12 }
 0x61a   : > { %7626 = vmatpush1.bf16.msra.mxu1 %v11598_v55  ;;  %7586 = vmatprep.subr.bf16.mxu0 %v11479_v4  ;;  %v2599_v40 = vld [vmem:[%s14469_s23 + $0xdf8] sm:$0xff]  ;;  %v11510_v55 = vcombine.low %v2467_v56, %v2471_v12 }
 0x61b   : > { %7627 = vmatprep.subr.bf16.mxu1 %v11607_v16  ;;  %v11639_v52 = vcombine.high %v2595_v20, %v2599_v40  ;;  %v2475_v39 = vld [vmem:[%s14469_s23 + $0xa18] sm:$0xff]  ;;  %v11638_v4 = vcombine.low %v2595_v20, %v2599_v40 }
 0x61c   : > { %v2479_v57 = vld [vmem:[%s14469_s23 + $0xa38] sm:$0xff] }
 0x61d   : > { %7587 = vmatpush1.bf16.msra.mxu0 %v11478_v0  ;;  %v2603_v7 = vld [vmem:[%s14469_s23 + $0xe18] sm:$0xff]  ;;  %v11519_v16 = vcombine.high %v2475_v39, %v2479_v57 }
 0x61e   : > { %7628 = vmatpush1.bf16.msra.mxu1 %v11606_v50  ;;  %7588 = vmatprep.subr.bf16.mxu0 %v11487_v48  ;;  %v2607_v49 = vld [vmem:[%s14469_s23 + $0xe38] sm:$0xff]  ;;  %v11518_v50 = vcombine.low %v2475_v39, %v2479_v57 }
 0x61f   : > { %7629 = vmatprep.subr.bf16.mxu1 %v11615_v59  ;;  %v11647_v26 = vcombine.high %v2603_v7, %v2607_v49  ;;  %v2483_v42 = vld [vmem:[%s14469_s23 + $0xa58] sm:$0xff]  ;;  %v11646_v48 = vcombine.low %v2603_v7, %v2607_v49 }
 0x620   : > { %v2487_v32 = vld [vmem:[%s14469_s23 + $0xa78] sm:$0xff] }
 0x621   : > { %7589 = vmatpush1.bf16.msra.mxu0 %v11486_v14  ;;  %v2611_v23 = vld [vmem:[%s14469_s23 + $0xe58] sm:$0xff]  ;;  %v11527_v59 = vcombine.high %v2483_v42, %v2487_v32 }
 0x622   : > { %7630 = vmatpush1.bf16.msra.mxu1 %v11614_v9  ;;  %7590 = vmatprep.subr.bf16.mxu0 %v11495_v21  ;;  %v2615_v0 = vld [vmem:[%s14469_s23 + $0xe78] sm:$0xff]  ;;  %v11526_v9 = vcombine.low %v2483_v42, %v2487_v32 }
 0x623   : > { %v7286_v54 = vpop.f32.mrb[36].mxu0  ;;  %7631 = vmatprep.subr.bf16.mxu1 %v11623_v51  ;;  %v11655_v31 = vcombine.high %v2611_v23, %v2615_v0  ;;  %v2491_v35 = vld [vmem:[%s14469_s23 + $0xa98] sm:$0xff]  ;;  %v11654_v21 = vcombine.low %v2611_v23, %v2615_v0 }
 0x624   : > { %v7327_v18 = vpop.f32.mrb[36].mxu1  ;;  %v7288_v24 = vpop.f32.mrb[37].mxu0  ;;  %v2495_v13 = vld [vmem:[%s14469_s23 + $0xab8] sm:$0xff] }
 0x625   : > { %v15659_v3 = vadd.f32 %v7327_v18, %v7286_v54  ;;  %v7329_v10 = vpop.f32.mrb[37].mxu1  ;;  %v7290_v27 = vpop.f32.mrb[38].mxu0  ;;  %7591 = vmatpush1.bf16.msra.mxu0 %v11494_v19  ;;  %v2619_v6 = vld [vmem:[%s14469_s23 + $0xe98] sm:$0xff]  ;;  %v11535_v51 = vcombine.high %v2491_v35, %v2495_v13 }
 0x626   : > { %v15661_v29 = vadd.f32 %v7329_v10, %v7288_v24  ;;  %v7331_v41 = vpop.f32.mrb[38].mxu1  ;;  %7632 = vmatpush1.bf16.msra.mxu1 %v11622_v58  ;;  %v7291_v17 = vpop.f32.mrb[39].mxu0  ;;  %7592 = vmatprep.subr.bf16.mxu0 %v11503_v22  ;;  %v2623_v14 = vld [vmem:[%s14469_s23 + $0xeb8] sm:$0xff]  ;;  %v11534_v58 = vcombine.low %v2491_v35, %v2495_v13 }
 0x627   : > { %v7332_v47 = vpop.f32.mrb[39].mxu1  ;;  %7633 = vmatprep.subr.bf16.mxu1 %v11631_v25  ;;  %v11663_v30 = vcombine.high %v2619_v6, %v2623_v14  ;;  %v2499_v15 = vld [vmem:[%s14469_s23 + $0xad8] sm:$0xff]  ;;  %v11662_v22 = vcombine.low %v2619_v6, %v2623_v14 }
 0x628   : > { %v2503_v61 = vld [vmem:[%s14469_s23 + $0xaf8] sm:$0xff] }
 0x629   : > { %7593 = vmatpush1.bf16.msra.mxu0 %v11502_v11  ;;  %v2627_v28 = vld [vmem:[%s14469_s23 + $0xed8] sm:$0xff]  ;;  %v11543_v54 = vcombine.high %v2499_v15, %v2503_v61  ;;  %v11542_v20 = vcombine.low %v2499_v15, %v2503_v61 }
 0x62a   : > { %7634 = vmatpush1.bf16.msra.mxu1 %v11630_v43  ;;  %7594 = vmatprep.subr.bf16.mxu0 %v11511_v53  ;;  %v2631_v19 = vld [vmem:[%s14469_s23 + $0xef8] sm:$0xff] }
 0x62b   : > { %7635 = vmatprep.subr.bf16.mxu1 %v11639_v52  ;;  %v11671_v25 = vcombine.high %v2627_v28, %v2631_v19  ;;  %v2507_v56 = vld [vmem:[%s14469_s23 + $0xb18] sm:$0xff]  ;;  %v11670_v40 = vcombine.low %v2627_v28, %v2631_v19 }
 0x62c   : > { %v2511_v12 = vld [vmem:[%s14469_s23 + $0xb38] sm:$0xff] }
 0x62d   : > { %7595 = vmatpush1.bf16.msra.mxu0 %v11510_v55  ;;  %v2635_v18 = vld [vmem:[%s14469_s23 + $0xf18] sm:$0xff]  ;;  %v11551_v10 = vcombine.high %v2507_v56, %v2511_v12  ;;  %v11550_v53 = vcombine.low %v2507_v56, %v2511_v12 }
 0x62e   : > { %7636 = vmatpush1.bf16.msra.mxu1 %v11638_v4  ;;  %7596 = vmatprep.subr.bf16.mxu0 %v11519_v16  ;;  %v2639_v24 = vld [vmem:[%s14469_s23 + $0xf38] sm:$0xff] }
 0x62f   : > { %7637 = vmatprep.subr.bf16.mxu1 %v11647_v26  ;;  %v11679_v27 = vcombine.high %v2635_v18, %v2639_v24  ;;  %v2515_v11 = vld [vmem:[%s14469_s23 + $0xb58] sm:$0xff]  ;;  %v11678_v47 = vcombine.low %v2635_v18, %v2639_v24 }
 0x630   : > { %v2519_v41 = vld [vmem:[%s14469_s23 + $0xb78] sm:$0xff] }
 0x631   : > { %7597 = vmatpush1.bf16.msra.mxu0 %v11518_v50  ;;  %v2643_v17 = vld [vmem:[%s14469_s23 + $0xf58] sm:$0xff]  ;;  %v11559_v52 = vcombine.high %v2515_v11, %v2519_v41  ;;  %v11558_v4 = vcombine.low %v2515_v11, %v2519_v41 }
 0x632   : > { %7638 = vmatpush1.bf16.msra.mxu1 %v11646_v48  ;;  %7598 = vmatprep.subr.bf16.mxu0 %v11527_v59  ;;  %v2647_v43 = vld [vmem:[%s14469_s23 + $0xf78] sm:$0xff] }
 0x633   : > { %7639 = vmatprep.subr.bf16.mxu1 %v11655_v31  ;;  %v11687_v39 = vcombine.high %v2643_v17, %v2647_v43  ;;  %v2523_v57 = vld [vmem:[%s14469_s23 + $0xb98] sm:$0xff]  ;;  %v11686_v16 = vcombine.low %v2643_v17, %v2647_v43 }
 0x634   : > { %v2527_v7 = vld [vmem:[%s14469_s23 + $0xbb8] sm:$0xff] }
 0x635   : > { %7599 = vmatpush1.bf16.msra.mxu0 %v11526_v9  ;;  %v2651_v49 = vld [vmem:[%s14469_s23 + $0xf98] sm:$0xff]  ;;  %v11567_v26 = vcombine.high %v2523_v57, %v2527_v7  ;;  %v11566_v48 = vcombine.low %v2523_v57, %v2527_v7 }
 0x636   : > { %7640 = vmatpush1.bf16.msra.mxu1 %v11654_v21  ;;  %7600 = vmatprep.subr.bf16.mxu0 %v11535_v51  ;;  %v2655_v55 = vld [vmem:[%s14469_s23 + $0xfb8] sm:$0xff] }
 0x637   : > { %7641 = vmatprep.subr.bf16.mxu1 %v11663_v30  ;;  %v11695_v42 = vcombine.high %v2651_v49, %v2655_v55  ;;  %v2531_v32 = vld [vmem:[%s14469_s23 + $0xbd8] sm:$0xff]  ;;  %v11694_v59 = vcombine.low %v2651_v49, %v2655_v55 }
 0x638   : > { %v2535_v23 = vld [vmem:[%s14469_s23 + $0xbf8] sm:$0xff] }
 0x639   : > { %7601 = vmatpush1.bf16.msra.mxu0 %v11534_v58  ;;  %v2659_v0 = vld [vmem:[%s14469_s23 + $0xfd8] sm:$0xff]  ;;  %v11575_v31 = vcombine.high %v2531_v32, %v2535_v23  ;;  %v11574_v21 = vcombine.low %v2531_v32, %v2535_v23 }
 0x63a   : > { %7642 = vmatpush1.bf16.msra.mxu1 %v11662_v22  ;;  %7602 = vmatprep.subr.bf16.mxu0 %v11543_v54  ;;  %v2663_v50 = vld [vmem:[%s14469_s23 + $0xff8] sm:$0xff] }
 0x63b   : > { %7643 = vmatprep.subr.bf16.mxu1 %v11671_v25  ;;  %v11703_v35 = vcombine.high %v2659_v0, %v2663_v50  ;;  %v2667_v13 = vld [vmem:[%s14469_s23 + $0x1018] sm:$0xff]  ;;  %v11702_v51 = vcombine.low %v2659_v0, %v2663_v50 }
 0x63c   : > { %v2671_v6 = vld [vmem:[%s14469_s23 + $0x1038] sm:$0xff] }
 0x63d   : > { %7603 = vmatpush1.bf16.msra.mxu0 %v11542_v20  ;;  %v2795_v14 = vld [vmem:[%s14469_s23 + $0x1418] sm:$0xff]  ;;  %v11711_v30 = vcombine.high %v2667_v13, %v2671_v6  ;;  %v11710_v19 = vcombine.low %v2667_v13, %v2671_v6 }
 0x63e   : > { %7644 = vmatpush1.bf16.msra.mxu1 %v11670_v40  ;;  %7604 = vmatprep.subr.bf16.mxu0 %v11551_v10  ;;  %v2799_v9 = vld [vmem:[%s14469_s23 + $0x1438] sm:$0xff] }
 0x63f   : > { %7645 = vmatprep.subr.bf16.mxu1 %v11679_v27  ;;  %v11839_v15 = vcombine.high %v2795_v14, %v2799_v9  ;;  %v2675_v61 = vld [vmem:[%s14469_s23 + $0x1058] sm:$0xff]  ;;  %v11838_v54 = vcombine.low %v2795_v14, %v2799_v9 }
 0x640   : > { %v2679_v28 = vld [vmem:[%s14469_s23 + $0x1078] sm:$0xff] }
 0x641   : > { %7605 = vmatpush1.bf16.msra.mxu0 %v11550_v53  ;;  %v2803_v58 = vld [vmem:[%s14469_s23 + $0x1458] sm:$0xff]  ;;  %v11719_v25 = vcombine.high %v2675_v61, %v2679_v28  ;;  %v11718_v40 = vcombine.low %v2675_v61, %v2679_v28 }
 0x642   : > { %7646 = vmatpush1.bf16.msra.mxu1 %v11678_v47  ;;  %7606 = vmatprep.subr.bf16.mxu0 %v11559_v52  ;;  %v2807_v22 = vld [vmem:[%s14469_s23 + $0x1478] sm:$0xff] }
 0x643   : > { %7647 = vmatprep.subr.bf16.mxu1 %v11687_v39  ;;  %v2683_v56 = vld [vmem:[%s14469_s23 + $0x1098] sm:$0xff]  ;;  %v11847_v18 = vcombine.high %v2803_v58, %v2807_v22  ;;  %v11846_v10 = vcombine.low %v2803_v58, %v2807_v22 }
 0x644   : > { %v2687_v12 = vld [vmem:[%s14469_s23 + $0x10b8] sm:$0xff] }
 0x645   : > { %7607 = vmatpush1.bf16.msra.mxu0 %v11558_v4  ;;  %v2811_v24 = vld [vmem:[%s14469_s23 + $0x1498] sm:$0xff]  ;;  %v11727_v27 = vcombine.high %v2683_v56, %v2687_v12  ;;  %v11726_v43 = vcombine.low %v2683_v56, %v2687_v12 }
 0x646   : > { %7648 = vmatpush1.bf16.msra.mxu1 %v11686_v16  ;;  %7608 = vmatprep.subr.bf16.mxu0 %v11567_v26  ;;  %v2815_v20 = vld [vmem:[%s14469_s23 + $0x14b8] sm:$0xff] }
 0x647   : > { %7649 = vmatprep.subr.bf16.mxu1 %v11695_v42  ;;  %v2691_v11 = vld [vmem:[%s14469_s23 + $0x10d8] sm:$0xff] }
 0x648   : > { %v2695_v41 = vld [vmem:[%s14469_s23 + $0x10f8] sm:$0xff] }
 0x649   : > { %7609 = vmatpush1.bf16.msra.mxu0 %v11566_v48  ;;  %v2819_v17 = vld [vmem:[%s14469_s23 + $0x14d8] sm:$0xff]  ;;  %v11735_v53 = vcombine.high %v2691_v11, %v2695_v41  ;;  %v11734_v7 = vcombine.low %v2691_v11, %v2695_v41 }
 0x64a   : > { %7650 = vmatpush1.bf16.msra.mxu1 %v11694_v59  ;;  %7610 = vmatprep.subr.bf16.mxu0 %v11575_v31  ;;  %v2699_v47 = vld [vmem:[%s14469_s23 + $0x1118] sm:$0xff] }
 0x64b   : > { %7651 = vmatprep.subr.bf16.mxu1 %v11703_v35  ;;  %v2703_v52 = vld [vmem:[%s14469_s23 + $0x1138] sm:$0xff] }
 0x64c   : > { %v2827_v39 = vld [vmem:[%s14469_s23 + $0x1518] sm:$0xff]  ;;  %v11743_v55 = vcombine.high %v2699_v47, %v2703_v52  ;;  %v11742_v23 = vcombine.low %v2699_v47, %v2703_v52 }
 0x64d   : > { %7611 = vmatpush1.bf16.msra.mxu0 %v11574_v21  ;;  %v2831_v57 = vld [vmem:[%s14469_s23 + $0x1538] sm:$0xff] }
 0x64e   : > { %7652 = vmatpush1.bf16.msra.mxu1 %v11702_v51  ;;  %7662 = vmatprep.subr.bf16.mxu0 %v11711_v30  ;;  %v11871_v4 = vcombine.high %v2827_v39, %v2831_v57  ;;  %v2707_v16 = vld [vmem:[%s14469_s23 + $0x1158] sm:$0xff]  ;;  %v11870_v0 = vcombine.low %v2827_v39, %v2831_v57 }
 0x64f   : > { %7703 = vmatprep.subr.bf16.mxu1 %v11839_v15  ;;  %v2711_v26 = vld [vmem:[%s14469_s23 + $0x1178] sm:$0xff] }
 0x650   : > { %7613 = vmatmul.mubr.bf16.vlgmr.msra.gmra.mrb[52].mxu0 %v15049_v8  ;;  %v11855_v8 = vcombine.high %v2811_v24, %v2815_v20  ;;  %v2835_v42 = vld [vmem:[%s14469_s23 + $0x1558] sm:$0xff]  ;;  %v11751_v50 = vcombine.high %v2707_v16, %v2711_v26  ;;  %v11750_v6 = vcombine.low %v2707_v16, %v2711_v26 }
 0x651   : > { %7654 = vmatmul.mubr.bf16.vlgmr.msra.gmra.mrb[52].mxu1 %v15051_v5  ;;  %7663 = vmatpush1.bf16.msra.mxu0 %v11710_v19  ;;  %v2823_v5 = vld [vmem:[%s14469_s23 + $0x14f8] sm:$0xff] }
 0x652   : > { %7694 = vmatprep.mubr.bf16.mxu0 %v15053_v46  ;;  %7704 = vmatpush1.bf16.msra.mxu1 %v11838_v54  ;;  %v11854_v46 = vcombine.low %v2811_v24, %v2815_v20  ;;  %v11862_v49 = vcombine.low %v2819_v17, %v2823_v5  ;;  %v2839_v32 = vld [vmem:[%s14469_s23 + $0x1578] sm:$0xff] }
 0x653   : > { %7735 = vmatprep.mubr.bf16.mxu1 %v15059_v45  ;;  %7664 = vmatprep.subr.bf16.mxu0 %v11719_v25  ;;  %v11863_v45 = vcombine.high %v2819_v17, %v2823_v5  ;;  %v11879_v48 = vcombine.high %v2835_v42, %v2839_v32  ;;  %v2715_v59 = vld [vmem:[%s14469_s23 + $0x1198] sm:$0xff]  ;;  %v11878_v14 = vcombine.low %v2835_v42, %v2839_v32 }
 0x654   : > { %7705 = vmatprep.subr.bf16.mxu1 %v11847_v18  ;;  %v2719_v31 = vld [vmem:[%s14469_s23 + $0x11b8] sm:$0xff] }
 0x655   : > { %7665 = vmatpush1.bf16.msra.mxu0 %v11718_v40  ;;  %v2843_v35 = vld [vmem:[%s14469_s23 + $0x1598] sm:$0xff]  ;;  %v11759_v9 = vcombine.high %v2715_v59, %v2719_v31  ;;  %v11758_v12 = vcombine.low %v2715_v59, %v2719_v31 }
 0x656   : > { %7706 = vmatpush1.bf16.msra.mxu1 %v11846_v10  ;;  %7666 = vmatprep.subr.bf16.mxu0 %v11727_v27  ;;  %v2847_v13 = vld [vmem:[%s14469_s23 + $0x15b8] sm:$0xff] }
 0x657   : > { %7707 = vmatprep.subr.bf16.mxu1 %v11855_v8  ;;  %v11887_v51 = vcombine.high %v2843_v35, %v2847_v13  ;;  %v2723_v30 = vld [vmem:[%s14469_s23 + $0x11d8] sm:$0xff] }
 0x658   : > { %v2727_v15 = vld [vmem:[%s14469_s23 + $0x11f8] sm:$0xff] }
 0x659   : > { %7667 = vmatpush1.bf16.msra.mxu0 %v11726_v43  ;;  %v2851_v58 = vld [vmem:[%s14469_s23 + $0x15d8] sm:$0xff]  ;;  %v11767_v40 = vcombine.high %v2723_v30, %v2727_v15  ;;  %v11766_v5 = vcombine.low %v2723_v30, %v2727_v15 }
 0x65a   : > { %7708 = vmatpush1.bf16.msra.mxu1 %v11854_v46  ;;  %7668 = vmatprep.subr.bf16.mxu0 %v11735_v53  ;;  %v2855_v22 = vld [vmem:[%s14469_s23 + $0x15f8] sm:$0xff] }
 0x65b   : > { %7709 = vmatprep.subr.bf16.mxu1 %v11863_v45  ;;  %v11895_v27 = vcombine.high %v2851_v58, %v2855_v22  ;;  %v2731_v8 = vld [vmem:[%s14469_s23 + $0x1218] sm:$0xff]  ;;  %v11894_v43 = vcombine.low %v2851_v58, %v2855_v22 }
 0x65c   : > { %v2735_v11 = vld [vmem:[%s14469_s23 + $0x1238] sm:$0xff] }
 0x65d   : > { %7669 = vmatpush1.bf16.msra.mxu0 %v11734_v7  ;;  %v2859_v41 = vld [vmem:[%s14469_s23 + $0x1618] sm:$0xff]  ;;  %v11775_v46 = vcombine.high %v2731_v8, %v2735_v11  ;;  %v11774_v57 = vcombine.low %v2731_v8, %v2735_v11 }
 0x65e   : > { %7710 = vmatpush1.bf16.msra.mxu1 %v11862_v49  ;;  %7670 = vmatprep.subr.bf16.mxu0 %v11743_v55  ;;  %v2863_v17 = vld [vmem:[%s14469_s23 + $0x1638] sm:$0xff] }
 0x65f   : > { %7711 = vmatprep.subr.bf16.mxu1 %v11871_v4  ;;  %v11903_v53 = vcombine.high %v2859_v41, %v2863_v17  ;;  %v2739_v45 = vld [vmem:[%s14469_s23 + $0x1258] sm:$0xff]  ;;  %v11902_v7 = vcombine.low %v2859_v41, %v2863_v17 }
 0x660   : > { %v2743_v47 = vld [vmem:[%s14469_s23 + $0x1278] sm:$0xff] }
 0x661   : > { %7671 = vmatpush1.bf16.msra.mxu0 %v11742_v23  ;;  %v2867_v52 = vld [vmem:[%s14469_s23 + $0x1658] sm:$0xff]  ;;  %v11783_v49 = vcombine.high %v2739_v45, %v2743_v47  ;;  %v11782_v32 = vcombine.low %v2739_v45, %v2743_v47 }
 0x662   : > { %7712 = vmatpush1.bf16.msra.mxu1 %v11870_v0  ;;  %7672 = vmatprep.subr.bf16.mxu0 %v11751_v50  ;;  %v2871_v39 = vld [vmem:[%s14469_s23 + $0x1678] sm:$0xff] }
 0x663   : > { %v7368_v21 = vpop.f32.mrb[40].mxu0  ;;  %7713 = vmatprep.subr.bf16.mxu1 %v11879_v48  ;;  %v11911_v55 = vcombine.high %v2867_v52, %v2871_v39  ;;  %v2747_v4 = vld [vmem:[%s14469_s23 + $0x1298] sm:$0xff]  ;;  %v11910_v23 = vcombine.low %v2867_v52, %v2871_v39 }
 0x664   : > { %v7369_v61 = vadd.f32 %v7368_v21, %v15659_v3  ;;  %v7409_v28 = vpop.f32.mrb[40].mxu1  ;;  %v7370_v19 = vpop.f32.mrb[41].mxu0  ;;  %v11886_v3 = vcombine.low %v2843_v35, %v2847_v13  ;;  %v2751_v16 = vld [vmem:[%s14469_s23 + $0x12b8] sm:$0xff] }
 0x665   : > { %v7371_v54 = vadd.f32 %v7370_v19, %v15661_v29  ;;  %v7411_v25 = vpop.f32.mrb[41].mxu1  ;;  %v7372_v56 = vpop.f32.mrb[42].mxu0  ;;  %7673 = vmatpush1.bf16.msra.mxu0 %v11750_v6  ;;  %v2875_v26 = vld [vmem:[%s14469_s23 + $0x1698] sm:$0xff]  ;;  %v11791_v0 = vcombine.high %v2747_v4, %v2751_v16  ;;  %v11790_v13 = vcombine.low %v2747_v4, %v2751_v16 }
 0x666   : > { %v15733_v18 = vadd.f32 %v7409_v28, %v7369_v61  ;;  %v7413_v24 = vpop.f32.mrb[42].mxu1  ;;  %7714 = vmatpush1.bf16.msra.mxu1 %v11878_v14  ;;  %v7373_v20 = vpop.f32.mrb[43].mxu0  ;;  %7674 = vmatprep.subr.bf16.mxu0 %v11759_v9  ;;  %v2879_v42 = vld [vmem:[%s14469_s23 + $0x16b8] sm:$0xff] }
 0x667   : > { %v15735_v10 = vadd.f32 %v7411_v25, %v7371_v54  ;;  %v7414_v29 = vpop.f32.mrb[43].mxu1  ;;  %7715 = vmatprep.subr.bf16.mxu1 %v11887_v51  ;;  %v11919_v50 = vcombine.high %v2875_v26, %v2879_v42  ;;  %v2755_v48 = vld [vmem:[%s14469_s23 + $0x12d8] sm:$0xff]  ;;  %v11918_v6 = vcombine.low %v2875_v26, %v2879_v42  ;;  %v2136_v42 = vld [vmem:[#allocation2 + $0x20] sm:$0xff] }
 0x668   : > { %v2759_v59 = vld [vmem:[%s14469_s23 + $0x12f8] sm:$0xff] }
 0x669   : > { %7675 = vmatpush1.bf16.msra.mxu0 %v11758_v12  ;;  %v2883_v31 = vld [vmem:[%s14469_s23 + $0x16d8] sm:$0xff]  ;;  %v11799_v14 = vcombine.high %v2755_v48, %v2759_v59  ;;  %v11798_v61 = vcombine.low %v2755_v48, %v2759_v59 }
 0x66a   : > { %7716 = vmatpush1.bf16.msra.mxu1 %v11886_v3  ;;  %7676 = vmatprep.subr.bf16.mxu0 %v11767_v40  ;;  %v2887_v35 = vld [vmem:[%s14469_s23 + $0x16f8] sm:$0xff] }
 0x66b   : > { %7717 = vmatprep.subr.bf16.mxu1 %v11895_v27  ;;  %v11927_v9 = vcombine.high %v2883_v31, %v2887_v35  ;;  %v2763_v21 = vld [vmem:[%s14469_s23 + $0x1318] sm:$0xff]  ;;  %v11926_v28 = vcombine.low %v2883_v31, %v2887_v35 }
 0x66c   : > { %v2767_v51 = vld [vmem:[%s14469_s23 + $0x1338] sm:$0xff] }
 0x66d   : > { %7677 = vmatpush1.bf16.msra.mxu0 %v11766_v5  ;;  %v2891_v30 = vld [vmem:[%s14469_s23 + $0x1718] sm:$0xff]  ;;  %v11807_v19 = vcombine.high %v2763_v21, %v2767_v51  ;;  %v11806_v12 = vcombine.low %v2763_v21, %v2767_v51 }
 0x66e   : > { %7718 = vmatpush1.bf16.msra.mxu1 %v11894_v43  ;;  %7678 = vmatprep.subr.bf16.mxu0 %v11775_v46  ;;  %v2895_v15 = vld [vmem:[%s14469_s23 + $0x1738] sm:$0xff] }
 0x66f   : > { %7719 = vmatprep.subr.bf16.mxu1 %v11903_v53  ;;  %v11935_v58 = vcombine.high %v2891_v30, %v2895_v15  ;;  %v2771_v22 = vld [vmem:[%s14469_s23 + $0x1358] sm:$0xff]  ;;  %v11934_v24 = vcombine.low %v2891_v30, %v2895_v15 }
 0x670   : > { %v2775_v54 = vld [vmem:[%s14469_s23 + $0x1378] sm:$0xff] }
 0x671   : > { %7679 = vmatpush1.bf16.msra.mxu0 %v11774_v57  ;;  %v2899_v25 = vld [vmem:[%s14469_s23 + $0x1758] sm:$0xff]  ;;  %v11815_v20 = vcombine.high %v2771_v22, %v2775_v54  ;;  %v11814_v11 = vcombine.low %v2771_v22, %v2775_v54 }
 0x672   : > { %7720 = vmatpush1.bf16.msra.mxu1 %v11902_v7  ;;  %7680 = vmatprep.subr.bf16.mxu0 %v11783_v49  ;;  %v2903_v56 = vld [vmem:[%s14469_s23 + $0x1778] sm:$0xff] }
 0x673   : > { %7721 = vmatprep.subr.bf16.mxu1 %v11911_v55  ;;  %v11943_v3 = vcombine.high %v2899_v25, %v2903_v56  ;;  %v2779_v40 = vld [vmem:[%s14469_s23 + $0x1398] sm:$0xff]  ;;  %v11942_v41 = vcombine.low %v2899_v25, %v2903_v56 }
 0x674   : > { %v2783_v29 = vld [vmem:[%s14469_s23 + $0x13b8] sm:$0xff] }
 0x675   : > { %7681 = vmatpush1.bf16.msra.mxu0 %v11782_v32  ;;  %v2907_v27 = vld [vmem:[%s14469_s23 + $0x1798] sm:$0xff]  ;;  %v11823_v17 = vcombine.high %v2779_v40, %v2783_v29  ;;  %v11822_v47 = vcombine.low %v2779_v40, %v2783_v29 }
 0x676   : > { %7722 = vmatpush1.bf16.msra.mxu1 %v11910_v23  ;;  %7682 = vmatprep.subr.bf16.mxu0 %v11791_v0  ;;  %v2911_v8 = vld [vmem:[%s14469_s23 + $0x17b8] sm:$0xff] }
 0x677   : > { %7723 = vmatprep.subr.bf16.mxu1 %v11919_v50  ;;  %v11951_v5 = vcombine.high %v2907_v27, %v2911_v8  ;;  %v2787_v43 = vld [vmem:[%s14469_s23 + $0x13d8] sm:$0xff]  ;;  %v11950_v52 = vcombine.low %v2907_v27, %v2911_v8 }
 0x678   : > { %v2791_v46 = vld [vmem:[%s14469_s23 + $0x13f8] sm:$0xff] }
 0x679   : > { %7683 = vmatpush1.bf16.msra.mxu0 %v11790_v13  ;;  %v2915_v53 = vld [vmem:[%s14469_s23 + $0x17d8] sm:$0xff]  ;;  %v11831_v39 = vcombine.high %v2787_v43, %v2791_v46  ;;  %v11830_v7 = vcombine.low %v2787_v43, %v2791_v46 }
 0x67a   : > { %7724 = vmatpush1.bf16.msra.mxu1 %v11918_v6  ;;  %7684 = vmatprep.subr.bf16.mxu0 %v11799_v14  ;;  %v2919_v45 = vld [vmem:[%s14469_s23 + $0x17f8] sm:$0xff] }
 0x67b   : > { %7725 = vmatprep.subr.bf16.mxu1 %v11927_v9  ;;  %v11959_v57 = vcombine.high %v2915_v53, %v2919_v45  ;;  %v11958_v49 = vcombine.low %v2915_v53, %v2919_v45  ;;  %v2137_v48 = vld [vmem:[#allocation2 + $0x28] sm:$0xff]  ;;  %v2139_v53 = vld [vmem:[#allocation2 + $0x38] sm:$0xff] }
 0x67d   : > { %7685 = vmatpush1.bf16.msra.mxu0 %v11798_v61 }
 0x67e   : > { %7726 = vmatpush1.bf16.msra.mxu1 %v11926_v28  ;;  %7686 = vmatprep.subr.bf16.mxu0 %v11807_v19 }
 0x67f   : > { %7727 = vmatprep.subr.bf16.mxu1 %v11935_v58 }
 0x681   : > { %7687 = vmatpush1.bf16.msra.mxu0 %v11806_v12 }
 0x682   : > { %7728 = vmatpush1.bf16.msra.mxu1 %v11934_v24  ;;  %7688 = vmatprep.subr.bf16.mxu0 %v11815_v20 }
 0x683   : > { %7729 = vmatprep.subr.bf16.mxu1 %v11943_v3 }
 0x685   : > { %7689 = vmatpush1.bf16.msra.mxu0 %v11814_v11 }
 0x686   : > { %7730 = vmatpush1.bf16.msra.mxu1 %v11942_v41  ;;  %7690 = vmatprep.subr.bf16.mxu0 %v11823_v17  ;;  %v2138_v41 = vld [vmem:[#allocation2 + $0x30] sm:$0xff] }
 0x687   : > { %7731 = vmatprep.subr.bf16.mxu1 %v11951_v5 }
 0x689   : > { %7691 = vmatpush1.bf16.msra.mxu0 %v11822_v47 }
 0x68a   : > { %7732 = vmatpush1.bf16.msra.mxu1 %v11950_v52  ;;  %7692 = vmatprep.subr.bf16.mxu0 %v11831_v39 }
 0x68b   : > { %7733 = vmatprep.subr.bf16.mxu1 %v11959_v57 }
 0x68d   : > { %7693 = vmatpush1.bf16.msra.mxu0 %v11830_v7 }
 0x68e   : > { %7734 = vmatpush1.bf16.msra.mxu1 %v11958_v49  ;;  %v12696_v49 = vld [vmem:[#allocation18 + $0x4] ss:$16 sps:$4 sm:$0xff] (!%p11960_p10)  }
 0x68f   : > { %9766 = vmatprep.subr.bf16.mxu0 (!%p11960_p10), %v12696_v49  ;;  %v7772_v49 = vld [vmem:[#allocation14] sm:$0xff] (!%p11960_p10) }
 0x690   : > { %7695 = vmatmul.mubr.bf16.vlgmr.msra.gmra.mrb[56].mxu0 %v15127_v36 }
 0x691   : > { %7736 = vmatmul.mubr.bf16.vlgmr.msra.gmra.mrb[56].mxu1 %v15129_v44 }
 0x6a3   : > { %v7450_v55 = vpop.f32.mrb[44].mxu0 }
 0x6a4   : > { %v7451_v4 = vadd.f32 %v7450_v55, %v15733_v18  ;;  %v7491_v16 = vpop.f32.mrb[44].mxu1  ;;  %v7452_v26 = vpop.f32.mrb[45].mxu0  ;;  %v12698_v55 = vld [vmem:[#allocation18 + $0xc] ss:$16 sps:$4 sm:$0xff] (!%p11960_p10)  }
 0x6a5   : > { %v7453_v32 = vadd.f32 %v7452_v26, %v15735_v10  ;;  %v7493_v23 = vpop.f32.mrb[45].mxu1  ;;  %v7454_v0 = vpop.f32.mrb[46].mxu0  ;;  %9930 = vmatprep.subr.bf16.mxu1 (!%p11960_p10), %v12698_v55  ;;  %v12702_v26 = vld [vmem:[#allocation18 + $0x24] ss:$16 sps:$4 sm:$0xff] (!%p11960_p10)   ;;  %v12772_v55 = vld [vmem:[#allocation18 + $0x180] ss:$16 sps:$4 sm:$0xff] (!%p11960_p10)  }
 0x6a6   : > { %v7492_v50 = vadd.f32 %v7491_v16, %v7451_v4  ;;  %v7495_v59 = vpop.f32.mrb[46].mxu1  ;;  %v7455_v31 = vpop.f32.mrb[47].mxu0  ;;  %v12700_v4 = vld [vmem:[#allocation18] ss:$16 sps:$4 sm:$0xff] (!%p11960_p10)   ;;  %v12701_v16 = vld [vmem:[#allocation18 + $0x8] ss:$16 sps:$4 sm:$0xff] (!%p11960_p10)  }
 0x6a7   : > { %v7494_v35 = vadd.f32 %v7493_v23, %v7453_v32  ;;  %v7496_v13 = vpop.f32.mrb[47].mxu1  ;;  %9767 = vmatpush1.bf16.msra.mxu0 (!%p11960_p10), %v12700_v4  ;;  %9931 = vmatpush1.bf16.msra.mxu1 (!%p11960_p10), %v12701_v16  ;;  %v12706_v32 = vld [vmem:[#allocation18 + $0x20] ss:$16 sps:$4 sm:$0xff] (!%p11960_p10)   ;;  %v12707_v23 = vld [vmem:[#allocation18 + $0x28] ss:$16 sps:$4 sm:$0xff] (!%p11960_p10)   ;;  %v7777_v16 = vrot.slane (!%p11960_p10), %v7772_v49, %v14661_v62 }
 0x6a8   : > { %v7748_v6 = vadd.f32 %v7492_v50, %v2136_v42  ;;  %v12704_v42 = vld [vmem:[#allocation18 + $0x2c] ss:$16 sps:$4 sm:$0xff] (!%p11960_p10)   ;;  %9768 = vmatprep.subr.bf16.mxu0 (!%p11960_p10), %v12702_v26  ;;  %v12708_v0 = vld [vmem:[#allocation18 + $0x44] ss:$16 sps:$4 sm:$0xff] (!%p11960_p10)   ;;  %v12713_v59 = vld [vmem:[#allocation18 + $0x48] ss:$16 sps:$4 sm:$0xff] (!%p11960_p10)   ;;  %v7781_v26 = vrot.slane (!%p11960_p10), %v7772_v49, %v14671_v1 }
 0x6a9   : > { %v7749_v36 = vadd.f32 %v7494_v35, %v2137_v48  ;;  %9932 = vmatprep.subr.bf16.mxu1 (!%p11960_p10), %v12704_v42  ;;  %v12710_v50 = vld [vmem:[#allocation18 + $0x4c] ss:$16 sps:$4 sm:$0xff] (!%p11960_p10)   ;;  %v12712_v48 = vld [vmem:[#allocation18 + $0x40] ss:$16 sps:$4 sm:$0xff] (!%p11960_p10)   ;;  %v12714_v31 = vld [vmem:[#allocation18 + $0x64] ss:$16 sps:$4 sm:$0xff] (!%p11960_p10)   ;;  %v7785_v42 = vrot.slane (!%p11960_p10), %v7772_v49, %v14664_v63 }
 0x6aa   : > { %7756 = vst [vmem:[#allocation2 + $0x20] sm:$0xff] %v7748_v6  ;;  %v12716_v35 = vld [vmem:[#allocation18 + $0x6c] ss:$16 sps:$4 sm:$0xff] (!%p11960_p10)   ;;  %v12718_v13 = vld [vmem:[#allocation18 + $0x60] ss:$16 sps:$4 sm:$0xff] (!%p11960_p10)  }
 0x6ab   : > { %7757 = vst [vmem:[#allocation2 + $0x28] sm:$0xff] %v7749_v36  ;;  %9769 = vmatpush1.bf16.msra.mxu0 (!%p11960_p10), %v12706_v32  ;;  %9933 = vmatpush1.bf16.msra.mxu1 (!%p11960_p10), %v12707_v23  ;;  %v12719_v6 = vld [vmem:[#allocation18 + $0x68] ss:$16 sps:$4 sm:$0xff] (!%p11960_p10)   ;;  %v12720_v36 = vld [vmem:[#allocation18 + $0x84] ss:$16 sps:$4 sm:$0xff] (!%p11960_p10)   ;;  %v7789_v32 = vrot.slane (!%p11960_p10), %v7772_v49, %v14674_v2 }
 0x6ac   : > { %9770 = vmatprep.subr.bf16.mxu0 (!%p11960_p10), %v12708_v0  ;;  %9934 = vmatprep.subr.bf16.mxu1 (!%p11960_p10), %v12710_v50  ;;  %v7793_v50 = vrot.slane (!%p11960_p10), %v7772_v49, %v14701_v33 }
 0x6af   : > { %9771 = vmatpush1.bf16.msra.mxu0 (!%p11960_p10), %v12712_v48  ;;  %9935 = vmatpush1.bf16.msra.mxu1 (!%p11960_p10), %v12713_v59  ;;  %v7797_v48 = vrot.slane (!%p11960_p10), %v7772_v49, %v14707_v37  ;;  %v7801_v59 = vrot.slane (!%p11960_p10), %v7772_v49, %v14704_v34 }
 0x6b0   : > { %9772 = vmatprep.subr.bf16.mxu0 (!%p11960_p10), %v12714_v31  ;;  %9936 = vmatprep.subr.bf16.mxu1 (!%p11960_p10), %v12716_v35  ;;  %v7805_v31 = vrot.slane (!%p11960_p10), %v7772_v49, %v14710_v38  ;;  %v12773_v35 = vld [vmem:[#allocation18 + $0x188] ss:$16 sps:$4 sm:$0xff] (!%p11960_p10)  }
 0x6b2   : > { %v7769_v4 = vld [vmem:[#allocation2 + $0x28] sm:$0xff] (!%p11960_p10) }
 0x6b3   : > { %9773 = vmatpush1.bf16.msra.mxu0 (!%p11960_p10), %v12718_v13  ;;  %9937 = vmatpush1.bf16.msra.mxu1 (!%p11960_p10), %v12719_v6  ;;  %v12774_v13 = vld [vmem:[#allocation18 + $0x1a4] ss:$16 sps:$4 sm:$0xff] (!%p11960_p10)  }
 0x6b4   : > { %9774 = vmatprep.subr.bf16.mxu0 (!%p11960_p10), %v12720_v36 }
 0x6e3   : > { %v7532_v44 = vpop.f32.mrb[48].mxu0 }
 0x6e4   : > { %v7573_v14 = vpop.f32.mrb[48].mxu1  ;;  %v7534_v18 = vpop.f32.mrb[49].mxu0 }
 0x6e5   : > { %v7574_v9 = vadd.f32 %v7573_v14, %v7532_v44  ;;  %v7575_v21 = vpop.f32.mrb[49].mxu1  ;;  %v7536_v51 = vpop.f32.mrb[50].mxu0  ;;  %v12722_v44 = vld [vmem:[#allocation18 + $0x8c] ss:$16 sps:$4 sm:$0xff] (!%p11960_p10)   ;;  %v12724_v14 = vld [vmem:[#allocation18 + $0x80] ss:$16 sps:$4 sm:$0xff] (!%p11960_p10)  }
 0x6e6   : > { %v7576_v30 = vadd.f32 %v7575_v21, %v7534_v18  ;;  %v7577_v10 = vpop.f32.mrb[50].mxu1  ;;  %v7537_v15 = vpop.f32.mrb[51].mxu0  ;;  %v12725_v18 = vld [vmem:[#allocation18 + $0x88] ss:$16 sps:$4 sm:$0xff] (!%p11960_p10)   ;;  %9938 = vmatprep.subr.bf16.mxu1 (!%p11960_p10), %v12722_v44  ;;  %v12728_v21 = vld [vmem:[#allocation18 + $0xac] ss:$16 sps:$4 sm:$0xff] (!%p11960_p10)   ;;  %9775 = vmatpush1.bf16.msra.mxu0 (!%p11960_p10), %v12724_v14 }
 0x6e7   : > { %v7578_v61 = vpop.f32.mrb[51].mxu1  ;;  %v12730_v51 = vld [vmem:[#allocation18 + $0xa0] ss:$16 sps:$4 sm:$0xff] (!%p11960_p10)   ;;  %9939 = vmatpush1.bf16.msra.mxu1 (!%p11960_p10), %v12725_v18  ;;  %v12732_v10 = vld [vmem:[#allocation18 + $0xc4] ss:$16 sps:$4 sm:$0xff] (!%p11960_p10)  }
 0x6e8   : > { %9940 = vmatprep.subr.bf16.mxu1 (!%p11960_p10), %v12728_v21  ;;  %v12734_v15 = vld [vmem:[#allocation18 + $0xcc] ss:$16 sps:$4 sm:$0xff] (!%p11960_p10)   ;;  %v12736_v61 = vld [vmem:[#allocation18 + $0xc0] ss:$16 sps:$4 sm:$0xff] (!%p11960_p10)   ;;  %v15792_v21 = vadd.f32 (!%p11960_p10), %v7797_v48, %v7769_v4 }
 0x6e9   : > { %v12776_v14 = vld [vmem:[#allocation18 + $0x1ac] ss:$16 sps:$4 sm:$0xff] (!%p11960_p10)   ;;  %v12790_v48 = vld [vmem:[#allocation18 + $0x1e0] ss:$16 sps:$4 sm:$0xff] (!%p11960_p10)  }
 0x723   : > { %v7614_v28 = vpop.f32.mrb[52].mxu0 }
 0x724   : > { %v7615_v19 = vadd.f32 %v7614_v28, %v7574_v9  ;;  %v7655_v58 = vpop.f32.mrb[52].mxu1  ;;  %v7616_v22 = vpop.f32.mrb[53].mxu0  ;;  %v12726_v9 = vld [vmem:[#allocation18 + $0xa4] ss:$16 sps:$4 sm:$0xff] (!%p11960_p10)   ;;  %v12737_v28 = vld [vmem:[#allocation18 + $0xc8] ss:$16 sps:$4 sm:$0xff] (!%p11960_p10)  }
 0x725   : > { %v7617_v54 = vadd.f32 %v7616_v22, %v7576_v30  ;;  %v7657_v25 = vpop.f32.mrb[53].mxu1  ;;  %v7618_v56 = vpop.f32.mrb[54].mxu0  ;;  %v12731_v30 = vld [vmem:[#allocation18 + $0xa8] ss:$16 sps:$4 sm:$0xff] (!%p11960_p10)   ;;  %9776 = vmatprep.subr.bf16.mxu0 (!%p11960_p10), %v12726_v9  ;;  %v12742_v22 = vld [vmem:[#allocation18 + $0xe0] ss:$16 sps:$4 sm:$0xff] (!%p11960_p10)  }
 0x726   : > { %v7656_v12 = vadd.f32 %v7655_v58, %v7615_v19  ;;  %v7659_v24 = vpop.f32.mrb[54].mxu1  ;;  %v7619_v20 = vpop.f32.mrb[55].mxu0  ;;  %9777 = vmatpush1.bf16.msra.mxu0 (!%p11960_p10), %v12730_v51  ;;  %9941 = vmatpush1.bf16.msra.mxu1 (!%p11960_p10), %v12731_v30  ;;  %v12738_v19 = vld [vmem:[#allocation18 + $0xe4] ss:$16 sps:$4 sm:$0xff] (!%p11960_p10)   ;;  %v12740_v58 = vld [vmem:[#allocation18 + $0xec] ss:$16 sps:$4 sm:$0xff] (!%p11960_p10)  }
 0x727   : > { %v7658_v3 = vadd.f32 %v7657_v25, %v7617_v54  ;;  %v7660_v40 = vpop.f32.mrb[55].mxu1  ;;  %9778 = vmatprep.subr.bf16.mxu0 (!%p11960_p10), %v12732_v10  ;;  %9942 = vmatprep.subr.bf16.mxu1 (!%p11960_p10), %v12734_v15  ;;  %v12743_v54 = vld [vmem:[#allocation18 + $0xe8] ss:$16 sps:$4 sm:$0xff] (!%p11960_p10)   ;;  %v12744_v25 = vld [vmem:[#allocation18 + $0x104] ss:$16 sps:$4 sm:$0xff] (!%p11960_p10)  }
 0x728   : > { %v12746_v56 = vld [vmem:[#allocation18 + $0x10c] ss:$16 sps:$4 sm:$0xff] (!%p11960_p10)   ;;  %v12749_v24 = vld [vmem:[#allocation18 + $0x108] ss:$16 sps:$4 sm:$0xff] (!%p11960_p10)   ;;  %v12750_v20 = vld [vmem:[#allocation18 + $0x124] ss:$16 sps:$4 sm:$0xff] (!%p11960_p10)  }
 0x729   : > { %v12754_v40 = vld [vmem:[#allocation18 + $0x120] ss:$16 sps:$4 sm:$0xff] (!%p11960_p10)  }
 0x72a   : > { %9779 = vmatpush1.bf16.msra.mxu0 (!%p11960_p10), %v12736_v61  ;;  %9943 = vmatpush1.bf16.msra.mxu1 (!%p11960_p10), %v12737_v28  ;;  %v12778_v61 = vld [vmem:[#allocation18 + $0x1a0] ss:$16 sps:$4 sm:$0xff] (!%p11960_p10)  }
 0x72b   : > { %9780 = vmatprep.subr.bf16.mxu0 (!%p11960_p10), %v12738_v19  ;;  %9944 = vmatprep.subr.bf16.mxu1 (!%p11960_p10), %v12740_v58 }
 0x72e   : > { %9781 = vmatpush1.bf16.msra.mxu0 (!%p11960_p10), %v12742_v22  ;;  %9945 = vmatpush1.bf16.msra.mxu1 (!%p11960_p10), %v12743_v54  ;;  %v7854_v22 = vrot.slane (!%p11960_p10), %v15792_v21, 4  ;;  %v12779_v54 = vld [vmem:[#allocation18 + $0x1a8] ss:$16 sps:$4 sm:$0xff] (!%p11960_p10)  }
 0x72f   : > { %9782 = vmatprep.subr.bf16.mxu0 (!%p11960_p10), %v12744_v25  ;;  %9946 = vmatprep.subr.bf16.mxu1 (!%p11960_p10), %v12746_v56 }
 0x732   : > { %9947 = vmatpush1.bf16.msra.mxu1 (!%p11960_p10), %v12749_v24 }
 0x763   : > { %v7696_v29 = vpop.f32.mrb[56].mxu0 }
 0x764   : > { %v7697_v27 = vadd.f32 %v7696_v29, %v7656_v12  ;;  %v7737_v8 = vpop.f32.mrb[56].mxu1  ;;  %v7698_v11 = vpop.f32.mrb[57].mxu0  ;;  %v12748_v12 = vld [vmem:[#allocation18 + $0x100] ss:$16 sps:$4 sm:$0xff] (!%p11960_p10)   ;;  %v12755_v29 = vld [vmem:[#allocation18 + $0x128] ss:$16 sps:$4 sm:$0xff] (!%p11960_p10)  }
 0x765   : > { %v7699_v17 = vadd.f32 %v7698_v11, %v7658_v3  ;;  %v7739_v5 = vpop.f32.mrb[57].mxu1  ;;  %v7700_v43 = vpop.f32.mrb[58].mxu0  ;;  %7763 = sbr.rel (%p11960_p10) target bundleno = 3298 (0xce2), region = 180  ;;  %v12752_v3 = vld [vmem:[#allocation18 + $0x12c] ss:$16 sps:$4 sm:$0xff] (!%p11960_p10)   ;;  %9783 = vmatpush1.bf16.msra.mxu0 (!%p11960_p10), %v12748_v12 }
 0x766   : > { %v7738_v46 = vadd.f32 %v7737_v8, %v7697_v27  ;;  %v7741_v45 = vpop.f32.mrb[58].mxu1  ;;  %v7701_v47 = vpop.f32.mrb[59].mxu0  ;;  %v12756_v27 = vld [vmem:[#allocation18 + $0x144] ss:$16 sps:$4 sm:$0xff] (!%p11960_p10)   ;;  %9784 = vmatprep.subr.bf16.mxu0 (!%p11960_p10), %v12750_v20  ;;  %9948 = vmatprep.subr.bf16.mxu1 (!%p11960_p10), %v12752_v3  ;;  %v12758_v8 = vld [vmem:[#allocation18 + $0x14c] ss:$16 sps:$4 sm:$0xff] (!%p11960_p10)  }
 0x767   : > { %v7740_v52 = vadd.f32 %v7739_v5, %v7699_v17  ;;  %v7742_v39 = vpop.f32.mrb[59].mxu1  ;;  %v12760_v11 = vld [vmem:[#allocation18 + $0x140] ss:$16 sps:$4 sm:$0xff] (!%p11960_p10)   ;;  %9949 = vmatpush1.bf16.msra.mxu1 (!%p11960_p10), %v12755_v29  ;;  %v12762_v17 = vld [vmem:[#allocation18 + $0x164] ss:$16 sps:$4 sm:$0xff] (!%p11960_p10)   ;;  %v7764_v47 = vld [vmem:[#allocation2] sm:$0xff] (!%p11960_p10) }
 0x768   : > { %v7750_v57 = vadd.f32 %v7738_v46, %v2138_v41  ;;  %v12761_v41 = vld [vmem:[#allocation18 + $0x148] ss:$16 sps:$4 sm:$0xff] (!%p11960_p10)   ;;  %9950 = vmatprep.subr.bf16.mxu1 (!%p11960_p10), %v12758_v8  ;;  %v12764_v5 = vld [vmem:[#allocation18 + $0x16c] ss:$16 sps:$4 sm:$0xff] (!%p11960_p10)   ;;  %v12766_v43 = vld [vmem:[#allocation18 + $0x160] ss:$16 sps:$4 sm:$0xff] (!%p11960_p10)   ;;  %v15782_v6 = vadd.f32 (!%p11960_p10), %v7777_v16, %v7764_v47 }
 0x769   : > { %v7751_v7 = vadd.f32 %v7740_v52, %v2139_v53  ;;  %9785 = vmatpush1.bf16.msra.mxu0 (!%p11960_p10), %v12754_v40  ;;  %v12767_v46 = vld [vmem:[#allocation18 + $0x168] ss:$16 sps:$4 sm:$0xff] (!%p11960_p10)   ;;  %v12768_v53 = vld [vmem:[#allocation18 + $0x184] ss:$16 sps:$4 sm:$0xff] (!%p11960_p10)   ;;  %v12770_v45 = vld [vmem:[#allocation18 + $0x18c] ss:$16 sps:$4 sm:$0xff] (!%p11960_p10)  }
 0x76a   : > { %7758 = vst [vmem:[#allocation2 + $0x30] sm:$0xff] %v7750_v57  ;;  %9786 = vmatprep.subr.bf16.mxu0 (!%p11960_p10), %v12756_v27  ;;  %v7765_v52 = vld [vmem:[#allocation2 + $0x8] sm:$0xff] (!%p11960_p10)  ;;  %v7766_v39 = vld [vmem:[#allocation2 + $0x10] sm:$0xff] (!%p11960_p10)  ;;  %v7767_v57 = vld [vmem:[#allocation2 + $0x18] sm:$0xff] (!%p11960_p10)  ;;  %v7824_v10 = vrot.slane (!%p11960_p10), %v15782_v6, 4 }
 0x76b   : > { %7759 = vst [vmem:[#allocation2 + $0x38] sm:$0xff] %v7751_v7  ;;  %9951 = vmatpush1.bf16.msra.mxu1 (!%p11960_p10), %v12761_v41  ;;  %v7768_v7 = vld [vmem:[#allocation2 + $0x20] sm:$0xff] (!%p11960_p10)  ;;  %v15784_v36 = vadd.f32 (!%p11960_p10), %v7781_v26, %v7765_v52  ;;  %v15786_v44 = vadd.f32 (!%p11960_p10), %v7785_v42, %v7766_v39  ;;  %v15788_v18 = vadd.f32 (!%p11960_p10), %v7789_v32, %v7767_v57  ;;  %v12780_v20 = vld [vmem:[#allocation18 + $0x1c4] ss:$16 sps:$4 sm:$0xff] (!%p11960_p10)  }
 0x76c   : > { %9952 = vmatprep.subr.bf16.mxu1 %v12764_v5  ;;  %v15790_v9 = vadd.f32 %v7793_v50, %v7768_v7  ;;  %v7825_v25 = vadd.f32 %v7824_v10, %v15782_v6  ;;  %v12782_v3 = vld [vmem:[#allocation18 + $0x1cc] ss:$16 sps:$4 sm:$0xff]   ;;  %v7855_v41 = vadd.f32 %v7854_v22, %v15792_v21  ;;  %v12784_v5 = vld [vmem:[#allocation18 + $0x1c0] ss:$16 sps:$4 sm:$0xff]   ;;  %v12785_v47 = vld [vmem:[#allocation18 + $0x1c8] ss:$16 sps:$4 sm:$0xff]  }
 0x76d   : > { %9787 = vmatpush1.bf16.msra.mxu0 %v12760_v11  ;;  %v7830_v15 = vrot.slane %v15784_v36, 4  ;;  %v7836_v28 = vrot.slane %v15786_v44, 4  ;;  %v7842_v19 = vrot.slane %v15788_v18, 4  ;;  %v12786_v52 = vld [vmem:[#allocation18 + $0x1e4] ss:$16 sps:$4 sm:$0xff]  }
 0x76e   : > { %9788 = vmatprep.subr.bf16.mxu0 %v12762_v17  ;;  %v7848_v58 = vrot.slane %v15790_v9, 4  ;;  %v7826_v8 = vrot.slane %v7825_v25, 2  ;;  %v7856_v7 = vrot.slane %v7855_v41, 2 }
 0x76f   : > { %9953 = vmatpush1.bf16.msra.mxu1 %v12767_v46  ;;  %v7831_v56 = vadd.f32 %v7830_v15, %v15784_v36  ;;  %v7837_v40 = vadd.f32 %v7836_v28, %v15786_v44  ;;  %v7843_v29 = vadd.f32 %v7842_v19, %v15788_v18 }
 0x770   : > { %9954 = vmatprep.subr.bf16.mxu1 %v12770_v45  ;;  %v7849_v27 = vadd.f32 %v7848_v58, %v15790_v9  ;;  %v7827_v39 = vadd.f32 %v7826_v8, %v7825_v25  ;;  %v12794_v25 = vld [vmem:[#allocation18 + $0x204] ss:$16 sps:$4 sm:$0xff]  }
 0x771   : > { %v7770_v23 = vld [vmem:[#allocation2 + $0x30] sm:$0xff]  ;;  %9789 = vmatpush1.bf16.msra.mxu0 %v12766_v43  ;;  %v7832_v11 = vrot.slane %v7831_v56, 2  ;;  %v7838_v43 = vrot.slane %v7837_v40, 2  ;;  %v7844_v46 = vrot.slane %v7843_v29, 2 }
 0x772   : > { %v7771_v0 = vld [vmem:[#allocation2 + $0x38] sm:$0xff]  ;;  %9790 = vmatprep.subr.bf16.mxu0 %v12768_v53  ;;  %v15794_v51 = vadd.f32 %v7801_v59, %v7770_v23  ;;  %v7850_v53 = vrot.slane %v7849_v27, 2  ;;  %v7828_v32 = vrot.slane %v7827_v39, 1 }
 0x773   : > { %v15796_v30 = vadd.f32 %v7805_v31, %v7771_v0  ;;  %9955 = vmatpush1.bf16.msra.mxu1 %v12773_v35  ;;  %v7833_v57 = vadd.f32 %v7832_v11, %v7831_v56  ;;  %v7839_v4 = vadd.f32 %v7838_v43, %v7837_v40  ;;  %v7845_v16 = vadd.f32 %v7844_v46, %v7843_v29  ;;  %v12797_v56 = vld [vmem:[#allocation18 + $0x20c] ss:$16 sps:$4 sm:$0xff]  }
 0x774   : > { %v7860_v12 = vrot.slane %v15794_v51, 4  ;;  %9956 = vmatprep.subr.bf16.mxu1 %v12776_v14  ;;  %v7851_v26 = vadd.f32 %v7850_v53, %v7849_v27  ;;  %v7857_v0 = vadd.f32 %v7856_v7, %v7855_v41  ;;  %v12791_v14 = vld [vmem:[#allocation18 + $0x1e8] ss:$16 sps:$4 sm:$0xff]   ;;  %v7829_v10 = vadd.f32 %v7828_v32, %v7827_v39 }
 0x775   : > { %9791 = vmatpush1.bf16.msra.mxu0 %v12772_v55  ;;  %v7866_v24 = vrot.slane %v15796_v30, 4  ;;  %v12788_v55 = vld [vmem:[#allocation18 + $0x1ec] ss:$16 sps:$4 sm:$0xff]   ;;  %v7834_v23 = vrot.slane %v7833_v57, 1  ;;  %v7840_v59 = vrot.slane %v7839_v4, 1  ;;  %v7846_v31 = vrot.slane %v7845_v16, 1 }
 0x776   : > { %9792 = vmatprep.subr.bf16.mxu0 %v12774_v13  ;;  %v7861_v17 = vadd.f32 %v7860_v12, %v15794_v51  ;;  %v7852_v35 = vrot.slane %v7851_v26, 1 }
 0x777   : > { %v7867_v45 = vadd.f32 %v7866_v24, %v15796_v30  ;;  %9957 = vmatpush1.bf16.msra.mxu1 %v12779_v54  ;;  %v7835_v15 = vadd.f32 %v7834_v23, %v7833_v57  ;;  %v7841_v19 = vadd.f32 %v7840_v59, %v7839_v4  ;;  %v7847_v58 = vadd.f32 %v7846_v31, %v7845_v16 }
 0x778   : > { %v7862_v49 = vrot.slane %v7861_v17, 2  ;;  %9958 = vmatprep.subr.bf16.mxu1 %v12782_v3  ;;  %v7853_v22 = vadd.f32 %v7852_v35, %v7851_v26 }
 0x779   : > { %9793 = vmatpush1.bf16.msra.mxu0 %v12778_v61  ;;  %v7868_v42 = vrot.slane %v7867_v45, 2  ;;  %v7858_v61 = vrot.slane %v7857_v0, 1  ;;  %v15816_v3 = vmul.f32 0.125, %v7835_v15  ;;  %v15818_v29 = vmul.f32 0.125, %v7841_v19 }
 0x77a   : > { %9794 = vmatprep.subr.bf16.mxu0 %v12780_v20  ;;  %v7863_v50 = vadd.f32 %v7862_v49, %v7861_v17  ;;  %v15814_v20 = vmul.f32 0.125, %v7829_v10  ;;  %v15820_v27 = vmul.f32 0.125, %v7847_v58  ;;  %v15822_v8 = vmul.f32 0.125, %v7853_v22 }
 0x77b   : > { %v7869_v13 = vadd.f32 %v7868_v42, %v7867_v45  ;;  %9959 = vmatpush1.bf16.msra.mxu1 %v12785_v47  ;;  %v7859_v12 = vadd.f32 %v7858_v61, %v7857_v0  ;;  %v7882_v46 = vsub.f32 %v15786_v44, %v15818_v29 }
 0x77c   : > { %v7864_v28 = vrot.slane %v7863_v50, 1  ;;  %9960 = vmatprep.subr.bf16.mxu1 %v12788_v55  ;;  %v7880_v17 = vsub.f32 %v15782_v6, %v15814_v20  ;;  %v7883_v53 = vsub.f32 %v15788_v18, %v15820_v27  ;;  %v7884_v45 = vsub.f32 %v15790_v9, %v15822_v8 }
 0x77d   : > { %9795 = vmatpush1.bf16.msra.mxu0 %v12784_v5  ;;  %v7870_v54 = vrot.slane %v7869_v13, 1  ;;  %v15824_v11 = vmul.f32 0.125, %v7859_v12  ;;  %v7881_v5 = vsub.f32 %v15784_v36, %v15816_v3  ;;  %v7890_v49 = vmul.f32 %v7882_v46, %v7882_v46 }
 0x77e   : > { %9796 = vmatprep.subr.bf16.mxu0 %v12786_v52  ;;  %v7865_v24 = vadd.f32 %v7864_v28, %v7863_v50  ;;  %v7888_v39 = vmul.f32 %v7880_v17, %v7880_v17  ;;  %v7891_v55 = vmul.f32 %v7883_v53, %v7883_v53  ;;  %v7892_v4 = vmul.f32 %v7884_v45, %v7884_v45 }
 0x77f   : > { %v7871_v40 = vadd.f32 %v7870_v54, %v7869_v13  ;;  %9961 = vmatpush1.bf16.msra.mxu1 %v12791_v14  ;;  %v7885_v47 = vsub.f32 %v15792_v21, %v15824_v11  ;;  %v7889_v57 = vmul.f32 %v7881_v5, %v7881_v5  ;;  %v7908_v0 = vrot.slane %v7890_v49, 4 }
 0x780   : > { %v15826_v41 = vmul.f32 0.125, %v7865_v24  ;;  %9971 = vmatprep.subr.bf16.mxu1 %v12797_v56  ;;  %v7896_v42 = vrot.slane %v7888_v39, 4  ;;  %v7914_v50 = vrot.slane %v7891_v55, 4 }
 0x781   : > { %9797 = vmatpush1.bf16.msra.mxu0 %v12790_v48  ;;  %v15832_v43 = vmul.f32 0.125, %v7871_v40  ;;  %v7893_v16 = vmul.f32 %v7885_v47, %v7885_v47  ;;  %v7902_v32 = vrot.slane %v7889_v57, 4  ;;  %v7920_v48 = vrot.slane %v7892_v4, 4 }
 0x782   : > { %9807 = vmatprep.subr.bf16.mxu0 %v12794_v25  ;;  %v7886_v52 = vsub.f32 %v15794_v51, %v15826_v41  ;;  %v7897_v59 = vadd.f32 %v7896_v42, %v7888_v39  ;;  %v7909_v14 = vadd.f32 %v7908_v0, %v7890_v49  ;;  %v7915_v10 = vadd.f32 %v7914_v50, %v7891_v55 }
 0x783   : > { %v7887_v7 = vsub.f32 %v15796_v30, %v15832_v43  ;;  %v7903_v31 = vadd.f32 %v7902_v32, %v7889_v57  ;;  %v7926_v35 = vrot.slane %v7893_v16, 4  ;;  %v7921_v15 = vadd.f32 %v7920_v48, %v7892_v4 }
 0x784   : > { %v7894_v26 = vmul.f32 %v7886_v52, %v7886_v52  ;;  %v7898_v28 = vrot.slane %v7897_v59, 2  ;;  %v7910_v54 = vrot.slane %v7909_v14, 2  ;;  %v7916_v25 = vrot.slane %v7915_v10, 2 }
 0x785   : > { %v7895_v23 = vmul.f32 %v7887_v7, %v7887_v7  ;;  %v7904_v19 = vrot.slane %v7903_v31, 2  ;;  %v7927_v58 = vadd.f32 %v7926_v35, %v7893_v16  ;;  %v7922_v56 = vrot.slane %v7921_v15, 2 }
 0x786   : > { %v7932_v13 = vrot.slane %v7894_v26, 4  ;;  %v7899_v24 = vadd.f32 %v7898_v28, %v7897_v59  ;;  %v7911_v46 = vadd.f32 %v7910_v54, %v7909_v14  ;;  %v7917_v53 = vadd.f32 %v7916_v25, %v7915_v10 }
 0x787   : > { %v7938_v61 = vrot.slane %v7895_v23, 4  ;;  %v7905_v40 = vadd.f32 %v7904_v19, %v7903_v31  ;;  %v7928_v17 = vrot.slane %v7927_v58, 2  ;;  %v7923_v45 = vadd.f32 %v7922_v56, %v7921_v15 }
 0x788   : > { %v7933_v22 = vadd.f32 %v7932_v13, %v7894_v26  ;;  %v7900_v52 = vrot.slane %v7899_v24, 1  ;;  %v7912_v49 = vrot.slane %v7911_v46, 1  ;;  %v7918_v55 = vrot.slane %v7917_v53, 1 }
 0x789   : > { %v7939_v12 = vadd.f32 %v7938_v61, %v7895_v23  ;;  %v7906_v39 = vrot.slane %v7905_v40, 1  ;;  %v7929_v57 = vadd.f32 %v7928_v17, %v7927_v58  ;;  %v7924_v4 = vrot.slane %v7923_v45, 1 }
 0x78a   : > { %v7934_v5 = vrot.slane %v7933_v22, 2  ;;  %v7901_v26 = vadd.f32 %v7900_v52, %v7899_v24  ;;  %v7913_v0 = vadd.f32 %v7912_v49, %v7911_v46  ;;  %v7919_v50 = vadd.f32 %v7918_v55, %v7917_v53 }
 0x78b   : > { %v7940_v47 = vrot.slane %v7939_v12, 2  ;;  %v7907_v42 = vadd.f32 %v7906_v39, %v7905_v40  ;;  %v7930_v32 = vrot.slane %v7929_v57, 1  ;;  %v7925_v48 = vadd.f32 %v7924_v4, %v7923_v45 }
 0x78c   : > { %v7935_v7 = vadd.f32 %v7934_v5, %v7933_v22  ;;  %v7944_v13 = vmul.f32 0.125, %v7901_v26  ;;  %v7946_v15 = vmul.f32 0.125, %v7913_v0  ;;  %v7947_v61 = vmul.f32 0.125, %v7919_v50 }
 0x78d   : > { %v7941_v16 = vadd.f32 %v7940_v47, %v7939_v12  ;;  %v7931_v31 = vadd.f32 %v7930_v32, %v7929_v57  ;;  %v7945_v14 = vmul.f32 0.125, %v7907_v42  ;;  %v7948_v28 = vmul.f32 0.125, %v7925_v48 }
 0x78e   : > { %v7936_v23 = vrot.slane %v7935_v7, 1  ;;  %v7952_v22 = vadd.f32 1e-05, %v7944_v13  ;;  %v7954_v56 = vadd.f32 1e-05, %v7946_v15 }
 0x78f   : > { %v7942_v59 = vrot.slane %v7941_v16, 1  ;;  %v7949_v19 = vmul.f32 0.125, %v7931_v31  ;;  %v7953_v54 = vadd.f32 1e-05, %v7945_v14  ;;  %v7955_v12 = vadd.f32 1e-05, %v7947_v61 }
 0x790   : > { %v7937_v35 = vadd.f32 %v7936_v23, %v7935_v7  ;;  %v7956_v24 = vadd.f32 1e-05, %v7948_v28  ;;  %13120 = vrsqrt.f32 %v7952_v22  ;;  %v7822_v31 = vld [vmem:[#allocation15] sm:$0xff] }
 0x791   : > { %v7943_v10 = vadd.f32 %v7942_v59, %v7941_v16  ;;  %v7957_v40 = vadd.f32 1e-05, %v7949_v19  ;;  %13122 = vrsqrt.f32 %v7953_v54 }
 0x792   : > { %v7950_v58 = vmul.f32 0.125, %v7937_v35  ;;  %13124 = vrsqrt.f32 %v7954_v56 }
 0x793   : > { %v7951_v25 = vmul.f32 0.125, %v7943_v10  ;;  %13126 = vrsqrt.f32 %v7955_v12 }
 0x794   : > { %v7958_v17 = vadd.f32 1e-05, %v7950_v58  ;;  %13128 = vrsqrt.f32 %v7956_v24 }
 0x795   : > { %v7959_v5 = vadd.f32 1e-05, %v7951_v25  ;;  %13130 = vrsqrt.f32 %v7957_v40 }
 0x796   : > { %13132 = vrsqrt.f32 %v7958_v17 }
 0x797   : > { %13134 = vrsqrt.f32 %v7959_v5 }
 0x79a   : > { %v13121_v46 = vpop.eup %13120 }
 0x79b   : > { %v13123_v53 = vpop.eup %13122 }
 0x79c   : > { %v13125_v45 = vpop.eup %13124  ;;  %v7976_v47 = vcombine.low %v13121_v46, %v13123_v53 }
 0x79d   : > { %v13127_v52 = vpop.eup %13126 }
 0x79e   : > { %v13129_v39 = vpop.eup %13128  ;;  %v7977_v57 = vcombine.low %v13125_v45, %v13127_v52  ;;  %v7986_v7 = vrot.slane %v7976_v47, %v14818_v60 }
 0x79f   : > { %v13131_v49 = vpop.eup %13130 }
 0x7a0   : > { %v13133_v55 = vpop.eup %13132  ;;  %v7978_v4 = vcombine.low %v13129_v39, %v13131_v49  ;;  %v7993_v16 = vrot.slane %v7977_v57, %v14818_v60  ;;  %v7823_v39 = vld [vmem:[#allocation17] sm:$0xff] }
 0x7a1   : > { %v13135_v26 = vpop.eup %13134 }
 0x7a2   : > { %v7979_v42 = vcombine.low %v13133_v55, %v13135_v26  ;;  %v8000_v32 = vrot.slane %v7978_v4, %v14818_v60  ;;  %v8008_v23 = vcombine.low %v7986_v7, %v7993_v16 }
 0x7a4   : > { %v8007_v0 = vrot.slane %v7979_v42, %v14818_v60  ;;  %v8016_v48 = vrot.slane %v8008_v23, %v14818_v60 }
 0x7a6   : > { %v8009_v50 = vcombine.low %v8000_v32, %v8007_v0 }
 0x7a8   : > { %v8023_v59 = vrot.slane %v8009_v50, %v14818_v60 }
 0x7aa   : > { %v8024_v35 = vcombine.low %v8016_v48, %v8023_v59  ;;  %v12792_v59 = vld [vmem:[#allocation18 + $0x200] ss:$16 sps:$4 sm:$0xff]  }
 0x7ac   : > { %v8026_v13 = vmul.f32 %v8024_v35, %v7822_v31  ;;  %v12803_v35 = vld [vmem:[#allocation18 + $0x22c] ss:$16 sps:$4 sm:$0xff]  }
 0x7ae   : > { %v8031_v14 = vrot.slane %v8026_v13, %v14661_v62  ;;  %v8035_v10 = vrot.slane %v8026_v13, %v14671_v1  ;;  %v15855_v15 = vrot.slane %v8026_v13, %v14664_v63  ;;  %v8043_v61 = vrot.slane %v8026_v13, %v14674_v2 }
 0x7af   : > { %v15859_v28 = vrot.slane %v8026_v13, %v14701_v33  ;;  %v15862_v19 = vrot.slane %v8026_v13, %v14707_v37  ;;  %v15865_v58 = vrot.slane %v8026_v13, %v14704_v34  ;;  %v15868_v22 = vrot.slane %v8026_v13, %v14710_v38 }
 0x7b0   : > { %v8068_v54 = vmul.f32 %v8031_v14, %v15814_v20  ;;  %v8069_v25 = vmul.f32 %v8035_v10, %v15816_v3  ;;  %v8070_v56 = vmul.f32 %v15855_v15, %v15818_v29  ;;  %v8071_v12 = vmul.f32 %v8043_v61, %v15820_v27 }
 0x7b1   : > { %v8072_v24 = vmul.f32 %v15859_v28, %v15822_v8  ;;  %v8073_v40 = vmul.f32 %v15862_v19, %v15824_v11  ;;  %v8074_v17 = vmul.f32 %v15865_v58, %v15826_v41  ;;  %v8075_v5 = vmul.f32 %v15868_v22, %v15832_v43 }
 0x7b2   : > { %v8084_v20 = vcombine.low %v8068_v54, %v8069_v25  ;;  %v8085_v46 = vcombine.low %v8070_v56, %v8071_v12  ;;  %v8136_v7 = vmul.f32 %v8035_v10, %v15784_v36  ;;  %v8135_v49 = vmul.f32 %v8031_v14, %v15782_v6  ;;  %v12795_v6 = vld [vmem:[#allocation18 + $0x208] ss:$16 sps:$4 sm:$0xff]   ;;  %v12798_v14 = vld [vmem:[#allocation18 + $0x220] ss:$16 sps:$4 sm:$0xff]   ;;  %v12809_v54 = vld [vmem:[#allocation18 + $0x24c] ss:$16 sps:$4 sm:$0xff]  }
 0x7b3   : > { %v8086_v3 = vcombine.low %v8072_v24, %v8073_v40  ;;  %v8087_v53 = vcombine.low %v8074_v17, %v8075_v5  ;;  %v8138_v55 = vmul.f32 %v8043_v61, %v15788_v18  ;;  %v12800_v18 = vld [vmem:[#allocation18 + $0x224] ss:$16 sps:$4 sm:$0xff]   ;;  %v12801_v10 = vld [vmem:[#allocation18 + $0x228] ss:$16 sps:$4 sm:$0xff]   ;;  %v12804_v25 = vld [vmem:[#allocation18 + $0x240] ss:$16 sps:$4 sm:$0xff]  }
 0x7b4   : > { %v8094_v29 = vrot.slane %v8084_v20, %v14818_v60  ;;  %v8101_v27 = vrot.slane %v8085_v46, %v14818_v60  ;;  %v12806_v61 = vld [vmem:[#allocation18 + $0x244] ss:$16 sps:$4 sm:$0xff]   ;;  %v12807_v56 = vld [vmem:[#allocation18 + $0x248] ss:$16 sps:$4 sm:$0xff]   ;;  %v12815_v24 = vld [vmem:[#allocation18 + $0x26c] ss:$16 sps:$4 sm:$0xff]  }
 0x7b5   : > { %v8108_v45 = vrot.slane %v8086_v3, %v14818_v60  ;;  %v8115_v8 = vrot.slane %v8087_v53, %v14818_v60  ;;  %v12812_v12 = vld [vmem:[#allocation18 + $0x264] ss:$16 sps:$4 sm:$0xff]   ;;  %v12810_v40 = vld [vmem:[#allocation18 + $0x260] ss:$16 sps:$4 sm:$0xff]   ;;  %v12813_v17 = vld [vmem:[#allocation18 + $0x268] ss:$16 sps:$4 sm:$0xff]  }
 0x7b6   : > { %v8116_v47 = vcombine.low %v8094_v29, %v8101_v27  ;;  %v12818_v5 = vld [vmem:[#allocation18 + $0x284] ss:$16 sps:$4 sm:$0xff]   ;;  %v12821_v20 = vld [vmem:[#allocation18 + $0x28c] ss:$16 sps:$4 sm:$0xff]   ;;  %v12816_v46 = vld [vmem:[#allocation18 + $0x280] ss:$16 sps:$4 sm:$0xff]  }
 0x7b7   : > { %v8117_v11 = vcombine.low %v8108_v45, %v8115_v8  ;;  %v12819_v3 = vld [vmem:[#allocation18 + $0x288] ss:$16 sps:$4 sm:$0xff]   ;;  %v12824_v53 = vld [vmem:[#allocation18 + $0x2a4] ss:$16 sps:$4 sm:$0xff]   ;;  %v12827_v29 = vld [vmem:[#allocation18 + $0x2ac] ss:$16 sps:$4 sm:$0xff]  }
 0x7b8   : > { %v8124_v52 = vrot.slane %v8116_v47, %v14818_v60  ;;  %v12822_v27 = vld [vmem:[#allocation18 + $0x2a0] ss:$16 sps:$4 sm:$0xff]   ;;  %v12825_v45 = vld [vmem:[#allocation18 + $0x2a8] ss:$16 sps:$4 sm:$0xff]   ;;  %v12830_v8 = vld [vmem:[#allocation18 + $0x2c4] ss:$16 sps:$4 sm:$0xff]  }
 0x7b9   : > { %v8131_v41 = vrot.slane %v8117_v11, %v14818_v60  ;;  %v12833_v47 = vld [vmem:[#allocation18 + $0x2cc] ss:$16 sps:$4 sm:$0xff]   ;;  %v12828_v11 = vld [vmem:[#allocation18 + $0x2c0] ss:$16 sps:$4 sm:$0xff]  }
 0x7bb   : > { %v8132_v43 = vcombine.low %v8124_v52, %v8131_v41  ;;  %v12831_v52 = vld [vmem:[#allocation18 + $0x2c8] ss:$16 sps:$4 sm:$0xff]   ;;  %v12836_v41 = vld [vmem:[#allocation18 + $0x2e4] ss:$16 sps:$4 sm:$0xff]  }
 0x7bd   : > { %v15889_v57 = vsub.f32 %v7823_v39, %v8132_v43  ;;  %v12839_v39 = vld [vmem:[#allocation18 + $0x2ec] ss:$16 sps:$4 sm:$0xff]   ;;  %v12834_v43 = vld [vmem:[#allocation18 + $0x2e0] ss:$16 sps:$4 sm:$0xff]  }
 0x7bf   : > { %v8151_v4 = vrot.slane %v15889_v57, %v14671_v1  ;;  %v8147_v16 = vrot.slane %v15889_v57, %v14661_v62  ;;  %v8159_v26 = vrot.slane %v15889_v57, %v14674_v2 }
 0x7c1   : > { %v8185_v42 = vadd.f32 %v8151_v4, %v8136_v7  ;;  %v8184_v32 = vadd.f32 %v8147_v16, %v8135_v49  ;;  %v8187_v23 = vadd.f32 %v8159_v26, %v8138_v55  ;;  %v12837_v7 = vld [vmem:[#allocation18 + $0x2e8] ss:$16 sps:$4 sm:$0xff]   ;;  %v12842_v49 = vld [vmem:[#allocation18 + $0x304] ss:$16 sps:$4 sm:$0xff]   ;;  %v12845_v55 = vld [vmem:[#allocation18 + $0x30c] ss:$16 sps:$4 sm:$0xff]  }
 0x7c2   : > { %v12840_v4 = vld [vmem:[#allocation18 + $0x300] ss:$16 sps:$4 sm:$0xff]   ;;  %v12843_v16 = vld [vmem:[#allocation18 + $0x308] ss:$16 sps:$4 sm:$0xff]   ;;  %v12848_v26 = vld [vmem:[#allocation18 + $0x324] ss:$16 sps:$4 sm:$0xff]  }
 0x7c3   : > { %v8193_v0 = vmax.f32 %v8185_v42, 0.0  ;;  %v8192_v50 = vmax.f32 %v8184_v32, 0.0  ;;  %v8195_v48 = vmax.f32 %v8187_v23, 0.0  ;;  %v12851_v42 = vld [vmem:[#allocation18 + $0x32c] ss:$16 sps:$4 sm:$0xff]  }
 0x7c4   : > { %v12846_v32 = vld [vmem:[#allocation18 + $0x320] ss:$16 sps:$4 sm:$0xff]   ;;  %v12849_v23 = vld [vmem:[#allocation18 + $0x328] ss:$16 sps:$4 sm:$0xff]  }
 0x7c5   : > { %v8201_v36 = vpack.c.bf16 %v8193_v0, %v8193_v0  ;;  %v8200_v31 = vpack.c.bf16 %v8192_v50, %v8192_v50  ;;  %v8203_v13 = vpack.c.bf16 %v8195_v48, %v8195_v48  ;;  %v12854_v0 = vld [vmem:[#allocation18 + $0x344] ss:$16 sps:$4 sm:$0xff]   ;;  %v12857_v50 = vld [vmem:[#allocation18 + $0x34c] ss:$16 sps:$4 sm:$0xff]   ;;  %v12852_v48 = vld [vmem:[#allocation18 + $0x340] ss:$16 sps:$4 sm:$0xff]  }
 0x7c7   : > { %9798 = vmatprep.mubr.bf16.mxu0 %v8201_v36  ;;  %9962 = vmatprep.mubr.bf16.mxu1 %v8201_v36  ;;  %v12855_v36 = vld [vmem:[#allocation18 + $0x348] ss:$16 sps:$4 sm:$0xff]  }
 0x7c8   : > { %9799 = vmatmul.mubr.bf16.vlgmr.msra.gmra.mrb[0].mxu0 %v8200_v31  ;;  %9963 = vmatmul.mubr.bf16.vlgmr.msra.gmra.mrb[0].mxu1 %v8200_v31  ;;  %v12858_v31 = vld [vmem:[#allocation18 + $0x360] ss:$16 sps:$4 sm:$0xff]  }
 0x7c9   : > { %9808 = vmatpush1.bf16.msra.mxu0 %v12792_v59  ;;  %9972 = vmatpush1.bf16.msra.mxu1 %v12795_v6  ;;  %v12860_v59 = vld [vmem:[#allocation18 + $0x364] ss:$16 sps:$4 sm:$0xff]   ;;  %v12863_v6 = vld [vmem:[#allocation18 + $0x36c] ss:$16 sps:$4 sm:$0xff]  }
 0x7ca   : > { %9809 = vmatprep.subr.bf16.mxu0 %v12800_v18  ;;  %9973 = vmatprep.subr.bf16.mxu1 %v12803_v35  ;;  %v12861_v18 = vld [vmem:[#allocation18 + $0x368] ss:$16 sps:$4 sm:$0xff]   ;;  %v12866_v35 = vld [vmem:[#allocation18 + $0x384] ss:$16 sps:$4 sm:$0xff]  }
 0x7cb   : > { %9839 = vmatprep.mubr.bf16.mxu0 %v8203_v13  ;;  %10003 = vmatprep.mubr.bf16.mxu1 %v8203_v13  ;;  %v12869_v13 = vld [vmem:[#allocation18 + $0x38c] ss:$16 sps:$4 sm:$0xff]  }
 0x7cd   : > { %9810 = vmatpush1.bf16.msra.mxu0 %v12798_v14  ;;  %9974 = vmatpush1.bf16.msra.mxu1 %v12801_v10  ;;  %v12864_v14 = vld [vmem:[#allocation18 + $0x380] ss:$16 sps:$4 sm:$0xff]   ;;  %v12867_v10 = vld [vmem:[#allocation18 + $0x388] ss:$16 sps:$4 sm:$0xff]  }
 0x7ce   : > { %9811 = vmatprep.subr.bf16.mxu0 %v12806_v61  ;;  %9975 = vmatprep.subr.bf16.mxu1 %v12809_v54  ;;  %v12872_v61 = vld [vmem:[#allocation18 + $0x3a4] ss:$16 sps:$4 sm:$0xff]   ;;  %v12875_v54 = vld [vmem:[#allocation18 + $0x3ac] ss:$16 sps:$4 sm:$0xff]  }
 0x7d1   : > { %9812 = vmatpush1.bf16.msra.mxu0 %v12804_v25  ;;  %9976 = vmatpush1.bf16.msra.mxu1 %v12807_v56  ;;  %v8137_v25 = vmul.f32 %v15855_v15, %v15786_v44  ;;  %v8155_v56 = vrot.slane %v15889_v57, %v14664_v63  ;;  %v12879_v44 = vld [vmem:[#allocation18 + $0x3c8] ss:$16 sps:$4 sm:$0xff]   ;;  %v12884_v15 = vld [vmem:[#allocation18 + $0x3e4] ss:$16 sps:$4 sm:$0xff]  }
 0x7d2   : > { %9813 = vmatprep.subr.bf16.mxu0 %v12812_v12  ;;  %9977 = vmatprep.subr.bf16.mxu1 %v12815_v24  ;;  %v12870_v12 = vld [vmem:[#allocation18 + $0x3a0] ss:$16 sps:$4 sm:$0xff]   ;;  %v12873_v24 = vld [vmem:[#allocation18 + $0x3a8] ss:$16 sps:$4 sm:$0xff]  }
 0x7d5   : > { %9814 = vmatpush1.bf16.msra.mxu0 %v12810_v40  ;;  %9978 = vmatpush1.bf16.msra.mxu1 %v12813_v17  ;;  %v12878_v40 = vld [vmem:[#allocation18 + $0x3c4] ss:$16 sps:$4 sm:$0xff]   ;;  %v12881_v17 = vld [vmem:[#allocation18 + $0x3cc] ss:$16 sps:$4 sm:$0xff]  }
 0x7d6   : > { %9815 = vmatprep.subr.bf16.mxu0 %v12818_v5  ;;  %9979 = vmatprep.subr.bf16.mxu1 %v12821_v20  ;;  %v8186_v5 = vadd.f32 %v8155_v56, %v8137_v25  ;;  %v12876_v20 = vld [vmem:[#allocation18 + $0x3c0] ss:$16 sps:$4 sm:$0xff]   ;;  %v12935_v25 = vld [vmem:[#allocation18 + $0x4ec] ss:$16 sps:$4 sm:$0xff]  }
 0x7d7   : > { %v12930_v56 = vld [vmem:[#allocation18 + $0x4e0] ss:$16 sps:$4 sm:$0xff]  }
 0x7d9   : > { %9816 = vmatpush1.bf16.msra.mxu0 %v12816_v46  ;;  %9980 = vmatpush1.bf16.msra.mxu1 %v12819_v3  ;;  %v8140_v46 = vmul.f32 %v15862_v19, %v15792_v21  ;;  %v8167_v3 = vrot.slane %v15889_v57, %v14707_v37  ;;  %v12893_v21 = vld [vmem:[#allocation18 + $0x40c] ss:$16 sps:$4 sm:$0xff]   ;;  %v12888_v19 = vld [vmem:[#allocation18 + $0x400] ss:$16 sps:$4 sm:$0xff]  }
 0x7da   : > { %9817 = vmatprep.subr.bf16.mxu0 %v12824_v53  ;;  %9981 = vmatprep.subr.bf16.mxu1 %v12827_v29  ;;  %v12887_v53 = vld [vmem:[#allocation18 + $0x3ec] ss:$16 sps:$4 sm:$0xff]   ;;  %v8194_v29 = vmax.f32 %v8186_v5, 0.0  ;;  %v12939_v5 = vld [vmem:[#allocation18 + $0x508] ss:$16 sps:$4 sm:$0xff]  }
 0x7dd   : > { %9818 = vmatpush1.bf16.msra.mxu0 %v12822_v27  ;;  %9982 = vmatpush1.bf16.msra.mxu1 %v12825_v45  ;;  %v8189_v27 = vadd.f32 %v8167_v3, %v8140_v46  ;;  %v12882_v45 = vld [vmem:[#allocation18 + $0x3e0] ss:$16 sps:$4 sm:$0xff]   ;;  %v12947_v46 = vld [vmem:[#allocation18 + $0x52c] ss:$16 sps:$4 sm:$0xff]  }
 0x7de   : > { %9819 = vmatprep.subr.bf16.mxu0 %v12830_v8  ;;  %9983 = vmatprep.subr.bf16.mxu1 %v12833_v47  ;;  %v12885_v8 = vld [vmem:[#allocation18 + $0x3e8] ss:$16 sps:$4 sm:$0xff]   ;;  %v12890_v47 = vld [vmem:[#allocation18 + $0x404] ss:$16 sps:$4 sm:$0xff]   ;;  %v12942_v3 = vld [vmem:[#allocation18 + $0x520] ss:$16 sps:$4 sm:$0xff]  }
 0x7df   : > { %v8197_v37 = vmax.f32 %v8189_v27, 0.0  ;;  %v12951_v27 = vld [vmem:[#allocation18 + $0x548] ss:$16 sps:$4 sm:$0xff]  }
 0x7e1   : > { %9820 = vmatpush1.bf16.msra.mxu0 %v12828_v11  ;;  %9984 = vmatpush1.bf16.msra.mxu1 %v12831_v52  ;;  %v12891_v11 = vld [vmem:[#allocation18 + $0x408] ss:$16 sps:$4 sm:$0xff]   ;;  %v8202_v52 = vpack.c.bf16 %v8194_v29, %v8194_v29  ;;  %v12948_v29 = vld [vmem:[#allocation18 + $0x540] ss:$16 sps:$4 sm:$0xff]  }
 0x7e2   : > { %9821 = vmatprep.subr.bf16.mxu0 %v12836_v41  ;;  %9985 = vmatprep.subr.bf16.mxu1 %v12839_v39  ;;  %v12896_v41 = vld [vmem:[#allocation18 + $0x424] ss:$16 sps:$4 sm:$0xff]   ;;  %v12899_v39 = vld [vmem:[#allocation18 + $0x42c] ss:$16 sps:$4 sm:$0xff]  }
 0x7e5   : > { %9822 = vmatpush1.bf16.msra.mxu0 %v12834_v43  ;;  %9986 = vmatpush1.bf16.msra.mxu1 %v12837_v7  ;;  %v12894_v43 = vld [vmem:[#allocation18 + $0x420] ss:$16 sps:$4 sm:$0xff]   ;;  %v12897_v7 = vld [vmem:[#allocation18 + $0x428] ss:$16 sps:$4 sm:$0xff]  }
 0x7e6   : > { %9823 = vmatprep.subr.bf16.mxu0 %v12842_v49  ;;  %9987 = vmatprep.subr.bf16.mxu1 %v12845_v55  ;;  %v8205_v49 = vpack.c.bf16 %v8197_v37, %v8197_v37  ;;  %v12902_v55 = vld [vmem:[#allocation18 + $0x444] ss:$16 sps:$4 sm:$0xff]   ;;  %v12960_v37 = vld [vmem:[#allocation18 + $0x580] ss:$16 sps:$4 sm:$0xff]  }
 0x7e9   : > { %9824 = vmatpush1.bf16.msra.mxu0 %v12840_v4  ;;  %9988 = vmatpush1.bf16.msra.mxu1 %v12843_v16  ;;  %v12905_v4 = vld [vmem:[#allocation18 + $0x44c] ss:$16 sps:$4 sm:$0xff]   ;;  %v12900_v16 = vld [vmem:[#allocation18 + $0x440] ss:$16 sps:$4 sm:$0xff]  }
 0x7ea   : > { %9825 = vmatprep.subr.bf16.mxu0 %v12848_v26  ;;  %9989 = vmatprep.subr.bf16.mxu1 %v12851_v42  ;;  %v12903_v26 = vld [vmem:[#allocation18 + $0x448] ss:$16 sps:$4 sm:$0xff]   ;;  %v12908_v42 = vld [vmem:[#allocation18 + $0x464] ss:$16 sps:$4 sm:$0xff]  }
 0x7ed   : > { %9826 = vmatpush1.bf16.msra.mxu0 %v12846_v32  ;;  %9990 = vmatpush1.bf16.msra.mxu1 %v12849_v23  ;;  %v12911_v32 = vld [vmem:[#allocation18 + $0x46c] ss:$16 sps:$4 sm:$0xff]   ;;  %v12906_v23 = vld [vmem:[#allocation18 + $0x460] ss:$16 sps:$4 sm:$0xff]  }
 0x7ee   : > { %9827 = vmatprep.subr.bf16.mxu0 %v12854_v0  ;;  %9991 = vmatprep.subr.bf16.mxu1 %v12857_v50  ;;  %v12909_v0 = vld [vmem:[#allocation18 + $0x468] ss:$16 sps:$4 sm:$0xff]   ;;  %v12914_v50 = vld [vmem:[#allocation18 + $0x484] ss:$16 sps:$4 sm:$0xff]  }
 0x7f1   : > { %9828 = vmatpush1.bf16.msra.mxu0 %v12852_v48  ;;  %9992 = vmatpush1.bf16.msra.mxu1 %v12855_v36  ;;  %v12917_v48 = vld [vmem:[#allocation18 + $0x48c] ss:$16 sps:$4 sm:$0xff]   ;;  %v12912_v36 = vld [vmem:[#allocation18 + $0x480] ss:$16 sps:$4 sm:$0xff]  }
 0x7f2   : > { %9829 = vmatprep.subr.bf16.mxu0 %v12860_v59  ;;  %9993 = vmatprep.subr.bf16.mxu1 %v12863_v6  ;;  %v12915_v59 = vld [vmem:[#allocation18 + $0x488] ss:$16 sps:$4 sm:$0xff]   ;;  %v12920_v6 = vld [vmem:[#allocation18 + $0x4a4] ss:$16 sps:$4 sm:$0xff]  }
 0x7f5   : > { %9830 = vmatpush1.bf16.msra.mxu0 %v12858_v31  ;;  %9994 = vmatpush1.bf16.msra.mxu1 %v12861_v18  ;;  %v12923_v31 = vld [vmem:[#allocation18 + $0x4ac] ss:$16 sps:$4 sm:$0xff]   ;;  %v12918_v18 = vld [vmem:[#allocation18 + $0x4a0] ss:$16 sps:$4 sm:$0xff]  }
 0x7f6   : > { %9831 = vmatprep.subr.bf16.mxu0 %v12866_v35  ;;  %9995 = vmatprep.subr.bf16.mxu1 %v12869_v13  ;;  %v12921_v35 = vld [vmem:[#allocation18 + $0x4a8] ss:$16 sps:$4 sm:$0xff]   ;;  %v12926_v13 = vld [vmem:[#allocation18 + $0x4c4] ss:$16 sps:$4 sm:$0xff]  }
 0x7f9   : > { %9832 = vmatpush1.bf16.msra.mxu0 %v12864_v14  ;;  %9996 = vmatpush1.bf16.msra.mxu1 %v12867_v10  ;;  %v12929_v14 = vld [vmem:[#allocation18 + $0x4cc] ss:$16 sps:$4 sm:$0xff]   ;;  %v12924_v10 = vld [vmem:[#allocation18 + $0x4c0] ss:$16 sps:$4 sm:$0xff]  }
 0x7fa   : > { %9833 = vmatprep.subr.bf16.mxu0 %v12872_v61  ;;  %9997 = vmatprep.subr.bf16.mxu1 %v12875_v54  ;;  %v12927_v61 = vld [vmem:[#allocation18 + $0x4c8] ss:$16 sps:$4 sm:$0xff]   ;;  %v12932_v54 = vld [vmem:[#allocation18 + $0x4e4] ss:$16 sps:$4 sm:$0xff]  }
 0x7fd   : > { %9834 = vmatpush1.bf16.msra.mxu0 %v12870_v12  ;;  %9998 = vmatpush1.bf16.msra.mxu1 %v12873_v24  ;;  %v12933_v12 = vld [vmem:[#allocation18 + $0x4e8] ss:$16 sps:$4 sm:$0xff]   ;;  %v12938_v24 = vld [vmem:[#allocation18 + $0x504] ss:$16 sps:$4 sm:$0xff]  }
 0x7fe   : > { %9835 = vmatprep.subr.bf16.mxu0 %v12878_v40  ;;  %9999 = vmatprep.subr.bf16.mxu1 %v12881_v17  ;;  %v12941_v40 = vld [vmem:[#allocation18 + $0x50c] ss:$16 sps:$4 sm:$0xff]   ;;  %v12936_v17 = vld [vmem:[#allocation18 + $0x500] ss:$16 sps:$4 sm:$0xff]  }
 0x801   : > { %9836 = vmatpush1.bf16.msra.mxu0 %v12876_v20  ;;  %10000 = vmatpush1.bf16.msra.mxu1 %v12879_v44  ;;  %v12944_v20 = vld [vmem:[#allocation18 + $0x524] ss:$16 sps:$4 sm:$0xff]   ;;  %v12945_v44 = vld [vmem:[#allocation18 + $0x528] ss:$16 sps:$4 sm:$0xff]  }
 0x802   : > { %9837 = vmatprep.subr.bf16.mxu0 %v12884_v15  ;;  %10001 = vmatprep.subr.bf16.mxu1 %v12887_v53  ;;  %v12950_v15 = vld [vmem:[#allocation18 + $0x544] ss:$16 sps:$4 sm:$0xff]   ;;  %v12953_v53 = vld [vmem:[#allocation18 + $0x54c] ss:$16 sps:$4 sm:$0xff]  }
 0x805   : > { %9838 = vmatpush1.bf16.msra.mxu0 %v12882_v45  ;;  %10002 = vmatpush1.bf16.msra.mxu1 %v12885_v8  ;;  %v12956_v45 = vld [vmem:[#allocation18 + $0x564] ss:$16 sps:$4 sm:$0xff]   ;;  %v12959_v8 = vld [vmem:[#allocation18 + $0x56c] ss:$16 sps:$4 sm:$0xff]  }
 0x806   : > { %9848 = vmatprep.subr.bf16.mxu0 %v12890_v47  ;;  %10012 = vmatprep.subr.bf16.mxu1 %v12893_v21  ;;  %v12954_v47 = vld [vmem:[#allocation18 + $0x560] ss:$16 sps:$4 sm:$0xff]   ;;  %v12957_v21 = vld [vmem:[#allocation18 + $0x568] ss:$16 sps:$4 sm:$0xff]  }
 0x808   : > { %9840 = vmatmul.mubr.bf16.vlgmr.msra.gmra.mrb[0].mxu0 %v8202_v52  ;;  %10004 = vmatmul.mubr.bf16.vlgmr.msra.gmra.mrb[0].mxu1 %v8202_v52  ;;  %v12963_v52 = vld [vmem:[#allocation18 + $0x588] ss:$16 sps:$4 sm:$0xff]  }
 0x809   : > { %9849 = vmatpush1.bf16.msra.mxu0 %v12888_v19  ;;  %10013 = vmatpush1.bf16.msra.mxu1 %v12891_v11  ;;  %v12962_v19 = vld [vmem:[#allocation18 + $0x584] ss:$16 sps:$4 sm:$0xff]   ;;  %v12965_v11 = vld [vmem:[#allocation18 + $0x58c] ss:$16 sps:$4 sm:$0xff]  }
 0x80a   : > { %9850 = vmatprep.subr.bf16.mxu0 %v12896_v41  ;;  %10014 = vmatprep.subr.bf16.mxu1 %v12899_v39  ;;  %v12968_v41 = vld [vmem:[#allocation18 + $0x5a4] ss:$16 sps:$4 sm:$0xff]   ;;  %v12971_v39 = vld [vmem:[#allocation18 + $0x5ac] ss:$16 sps:$4 sm:$0xff]  }
 0x80b   : > { %9880 = vmatprep.mubr.bf16.mxu0 %v8205_v49  ;;  %10044 = vmatprep.mubr.bf16.mxu1 %v8205_v49  ;;  %v12966_v49 = vld [vmem:[#allocation18 + $0x5a0] ss:$16 sps:$4 sm:$0xff]  }
 0x80d   : > { %9851 = vmatpush1.bf16.msra.mxu0 %v12894_v43  ;;  %10015 = vmatpush1.bf16.msra.mxu1 %v12897_v7  ;;  %v8139_v43 = vmul.f32 %v15859_v28, %v15790_v9  ;;  %v8163_v7 = vrot.slane %v15889_v57, %v14701_v33  ;;  %v12972_v9 = vld [vmem:[#allocation18 + $0x5c0] ss:$16 sps:$4 sm:$0xff]   ;;  %v12975_v28 = vld [vmem:[#allocation18 + $0x5c8] ss:$16 sps:$4 sm:$0xff]   ;;  %v12980_v33 = vld [vmem:[#allocation18 + $0x5e4] ss:$16 sps:$4 sm:$0xff]  }
 0x80e   : > { %9852 = vmatprep.subr.bf16.mxu0 %v12902_v55  ;;  %10016 = vmatprep.subr.bf16.mxu1 %v12905_v4  ;;  %v12969_v55 = vld [vmem:[#allocation18 + $0x5a8] ss:$16 sps:$4 sm:$0xff]   ;;  %v12974_v4 = vld [vmem:[#allocation18 + $0x5c4] ss:$16 sps:$4 sm:$0xff]  }
 0x811   : > { %9853 = vmatpush1.bf16.msra.mxu0 %v12900_v16  ;;  %10017 = vmatpush1.bf16.msra.mxu1 %v12903_v26  ;;  %v12977_v16 = vld [vmem:[#allocation18 + $0x5cc] ss:$16 sps:$4 sm:$0xff]   ;;  %v8142_v26 = vmul.f32 %v15868_v22, %v15796_v30  ;;  %v12986_v30 = vld [vmem:[#allocation18 + $0x604] ss:$16 sps:$4 sm:$0xff]  }
 0x812   : > { %9854 = vmatprep.subr.bf16.mxu0 %v12908_v42  ;;  %10018 = vmatprep.subr.bf16.mxu1 %v12911_v32  ;;  %v8175_v42 = vrot.slane %v15889_v57, %v14710_v38  ;;  %v8188_v32 = vadd.f32 %v8163_v7, %v8139_v43  ;;  %v12989_v22 = vld [vmem:[#allocation18 + $0x60c] ss:$16 sps:$4 sm:$0xff]   ;;  %v13035_v43 = vld [vmem:[#allocation18 + $0x708] ss:$16 sps:$4 sm:$0xff]   ;;  %v13040_v7 = vld [vmem:[#allocation18 + $0x724] ss:$16 sps:$4 sm:$0xff]  }
 0x815   : > { %9855 = vmatpush1.bf16.msra.mxu0 %v12906_v23  ;;  %10019 = vmatpush1.bf16.msra.mxu1 %v12909_v0  ;;  %v12983_v23 = vld [vmem:[#allocation18 + $0x5ec] ss:$16 sps:$4 sm:$0xff]   ;;  %v8191_v0 = vadd.f32 %v8175_v42, %v8142_v26  ;;  %v13044_v42 = vld [vmem:[#allocation18 + $0x740] ss:$16 sps:$4 sm:$0xff]  }
 0x816   : > { %9856 = vmatprep.subr.bf16.mxu0 %v12914_v50  ;;  %10020 = vmatprep.subr.bf16.mxu1 %v12917_v48  ;;  %v8196_v50 = vmax.f32 %v8188_v32, 0.0  ;;  %v12978_v48 = vld [vmem:[#allocation18 + $0x5e0] ss:$16 sps:$4 sm:$0xff]   ;;  %v13049_v26 = vld [vmem:[#allocation18 + $0x74c] ss:$16 sps:$4 sm:$0xff]  }
 0x817   : > { %v8199_v38 = vmax.f32 %v8191_v0, 0.0  ;;  %v13047_v32 = vld [vmem:[#allocation18 + $0x748] ss:$16 sps:$4 sm:$0xff]   ;;  %v13058_v0 = vld [vmem:[#allocation18 + $0x784] ss:$16 sps:$4 sm:$0xff]  }
 0x819   : > { %9857 = vmatpush1.bf16.msra.mxu0 %v12912_v36  ;;  %10021 = vmatpush1.bf16.msra.mxu1 %v12915_v59  ;;  %v12981_v36 = vld [vmem:[#allocation18 + $0x5e8] ss:$16 sps:$4 sm:$0xff]   ;;  %v8204_v59 = vpack.c.bf16 %v8196_v50, %v8196_v50  ;;  %v13061_v50 = vld [vmem:[#allocation18 + $0x78c] ss:$16 sps:$4 sm:$0xff]  }
 0x81a   : > { %9858 = vmatprep.subr.bf16.mxu0 %v12920_v6  ;;  %10022 = vmatprep.subr.bf16.mxu1 %v12923_v31  ;;  %v12984_v6 = vld [vmem:[#allocation18 + $0x600] ss:$16 sps:$4 sm:$0xff]   ;;  %v12987_v31 = vld [vmem:[#allocation18 + $0x608] ss:$16 sps:$4 sm:$0xff]  }
 0x81d   : > { %9859 = vmatpush1.bf16.msra.mxu0 %v12918_v18  ;;  %10023 = vmatpush1.bf16.msra.mxu1 %v12921_v35  ;;  %v12992_v18 = vld [vmem:[#allocation18 + $0x624] ss:$16 sps:$4 sm:$0xff]   ;;  %v12995_v35 = vld [vmem:[#allocation18 + $0x62c] ss:$16 sps:$4 sm:$0xff]  }
 0x81e   : > { %9860 = vmatprep.subr.bf16.mxu0 %v12926_v13  ;;  %10024 = vmatprep.subr.bf16.mxu1 %v12929_v14  ;;  %v8207_v13 = vpack.c.bf16 %v8199_v38, %v8199_v38  ;;  %v12990_v14 = vld [vmem:[#allocation18 + $0x620] ss:$16 sps:$4 sm:$0xff]   ;;  %v8141_v38 = vmul.f32 %v15865_v58, %v15794_v51  ;;  %v13079_v51 = vld [vmem:[#allocation18 + $0x7ec] ss:$16 sps:$4 sm:$0xff]  }
 0x821   : > { %9861 = vmatpush1.bf16.msra.mxu0 %v12924_v10  ;;  %10025 = vmatpush1.bf16.msra.mxu1 %v12927_v61  ;;  %v12993_v10 = vld [vmem:[#allocation18 + $0x628] ss:$16 sps:$4 sm:$0xff]   ;;  %v12998_v61 = vld [vmem:[#allocation18 + $0x644] ss:$16 sps:$4 sm:$0xff]  }
 0x822   : > { %9862 = vmatprep.subr.bf16.mxu0 %v12932_v54  ;;  %10026 = vmatprep.subr.bf16.mxu1 %v12935_v25  ;;  %v13001_v54 = vld [vmem:[#allocation18 + $0x64c] ss:$16 sps:$4 sm:$0xff]   ;;  %v12996_v25 = vld [vmem:[#allocation18 + $0x640] ss:$16 sps:$4 sm:$0xff]  }
 0x825   : > { %9863 = vmatpush1.bf16.msra.mxu0 %v12930_v56  ;;  %10027 = vmatpush1.bf16.msra.mxu1 %v12933_v12  ;;  %v12999_v56 = vld [vmem:[#allocation18 + $0x648] ss:$16 sps:$4 sm:$0xff]   ;;  %v13004_v12 = vld [vmem:[#allocation18 + $0x664] ss:$16 sps:$4 sm:$0xff]  }
 0x826   : > { %9864 = vmatprep.subr.bf16.mxu0 %v12938_v24  ;;  %10028 = vmatprep.subr.bf16.mxu1 %v12941_v40  ;;  %v13007_v24 = vld [vmem:[#allocation18 + $0x66c] ss:$16 sps:$4 sm:$0xff]   ;;  %v13002_v40 = vld [vmem:[#allocation18 + $0x660] ss:$16 sps:$4 sm:$0xff]  }
 0x829   : > { %9865 = vmatpush1.bf16.msra.mxu0 %v12936_v17  ;;  %10029 = vmatpush1.bf16.msra.mxu1 %v12939_v5  ;;  %v13005_v17 = vld [vmem:[#allocation18 + $0x668] ss:$16 sps:$4 sm:$0xff]   ;;  %v13010_v5 = vld [vmem:[#allocation18 + $0x684] ss:$16 sps:$4 sm:$0xff]  }
 0x82a   : > { %9866 = vmatprep.subr.bf16.mxu0 %v12944_v20  ;;  %10030 = vmatprep.subr.bf16.mxu1 %v12947_v46  ;;  %v13013_v20 = vld [vmem:[#allocation18 + $0x68c] ss:$16 sps:$4 sm:$0xff]   ;;  %v13008_v46 = vld [vmem:[#allocation18 + $0x680] ss:$16 sps:$4 sm:$0xff]  }
 0x82d   : > { %9867 = vmatpush1.bf16.msra.mxu0 %v12942_v3  ;;  %10031 = vmatpush1.bf16.msra.mxu1 %v12945_v44  ;;  %v13011_v3 = vld [vmem:[#allocation18 + $0x688] ss:$16 sps:$4 sm:$0xff]   ;;  %v13016_v44 = vld [vmem:[#allocation18 + $0x6a4] ss:$16 sps:$4 sm:$0xff]  }
 0x82e   : > { %9868 = vmatprep.subr.bf16.mxu0 %v12950_v15  ;;  %10032 = vmatprep.subr.bf16.mxu1 %v12953_v53  ;;  %v13019_v15 = vld [vmem:[#allocation18 + $0x6ac] ss:$16 sps:$4 sm:$0xff]   ;;  %v13014_v53 = vld [vmem:[#allocation18 + $0x6a0] ss:$16 sps:$4 sm:$0xff]  }
 0x831   : > { %9869 = vmatpush1.bf16.msra.mxu0 %v12948_v29  ;;  %10033 = vmatpush1.bf16.msra.mxu1 %v12951_v27  ;;  %v13017_v29 = vld [vmem:[#allocation18 + $0x6a8] ss:$16 sps:$4 sm:$0xff]   ;;  %v13022_v27 = vld [vmem:[#allocation18 + $0x6c4] ss:$16 sps:$4 sm:$0xff]  }
 0x832   : > { %9870 = vmatprep.subr.bf16.mxu0 %v12956_v45  ;;  %10034 = vmatprep.subr.bf16.mxu1 %v12959_v8  ;;  %v13025_v45 = vld [vmem:[#allocation18 + $0x6cc] ss:$16 sps:$4 sm:$0xff]   ;;  %v13020_v8 = vld [vmem:[#allocation18 + $0x6c0] ss:$16 sps:$4 sm:$0xff]  }
 0x835   : > { %9871 = vmatpush1.bf16.msra.mxu0 %v12954_v47  ;;  %10035 = vmatpush1.bf16.msra.mxu1 %v12957_v21  ;;  %v13023_v47 = vld [vmem:[#allocation18 + $0x6c8] ss:$16 sps:$4 sm:$0xff]   ;;  %v13028_v21 = vld [vmem:[#allocation18 + $0x6e4] ss:$16 sps:$4 sm:$0xff]  }
 0x836   : > { %9872 = vmatprep.subr.bf16.mxu0 %v12962_v19  ;;  %10036 = vmatprep.subr.bf16.mxu1 %v12965_v11  ;;  %v13031_v19 = vld [vmem:[#allocation18 + $0x6ec] ss:$16 sps:$4 sm:$0xff]   ;;  %v13026_v11 = vld [vmem:[#allocation18 + $0x6e0] ss:$16 sps:$4 sm:$0xff]  }
 0x839   : > { %9873 = vmatpush1.bf16.msra.mxu0 %v12960_v37  ;;  %10037 = vmatpush1.bf16.msra.mxu1 %v12963_v52  ;;  %v13029_v37 = vld [vmem:[#allocation18 + $0x6e8] ss:$16 sps:$4 sm:$0xff]   ;;  %v13034_v52 = vld [vmem:[#allocation18 + $0x704] ss:$16 sps:$4 sm:$0xff]  }
 0x83a   : > { %9874 = vmatprep.subr.bf16.mxu0 %v12968_v41  ;;  %10038 = vmatprep.subr.bf16.mxu1 %v12971_v39  ;;  %v13037_v41 = vld [vmem:[#allocation18 + $0x70c] ss:$16 sps:$4 sm:$0xff]   ;;  %v13032_v39 = vld [vmem:[#allocation18 + $0x700] ss:$16 sps:$4 sm:$0xff]  }
 0x83d   : > { %9875 = vmatpush1.bf16.msra.mxu0 %v12966_v49  ;;  %10039 = vmatpush1.bf16.msra.mxu1 %v12969_v55  ;;  %v13043_v49 = vld [vmem:[#allocation18 + $0x72c] ss:$16 sps:$4 sm:$0xff]   ;;  %v13038_v55 = vld [vmem:[#allocation18 + $0x720] ss:$16 sps:$4 sm:$0xff]  }
 0x83e   : > { %9876 = vmatprep.subr.bf16.mxu0 %v12974_v4  ;;  %10040 = vmatprep.subr.bf16.mxu1 %v12977_v16  ;;  %v13041_v4 = vld [vmem:[#allocation18 + $0x728] ss:$16 sps:$4 sm:$0xff]   ;;  %v13046_v16 = vld [vmem:[#allocation18 + $0x744] ss:$16 sps:$4 sm:$0xff]  }
 0x841   : > { %9877 = vmatpush1.bf16.msra.mxu0 %v12972_v9  ;;  %10041 = vmatpush1.bf16.msra.mxu1 %v12975_v28  ;;  %v13052_v9 = vld [vmem:[#allocation18 + $0x764] ss:$16 sps:$4 sm:$0xff]   ;;  %v13055_v28 = vld [vmem:[#allocation18 + $0x76c] ss:$16 sps:$4 sm:$0xff]  }
 0x842   : > { %9878 = vmatprep.subr.bf16.mxu0 %v12980_v33  ;;  %10042 = vmatprep.subr.bf16.mxu1 %v12983_v23  ;;  %v13050_v33 = vld [vmem:[#allocation18 + $0x760] ss:$16 sps:$4 sm:$0xff]   ;;  %v13053_v23 = vld [vmem:[#allocation18 + $0x768] ss:$16 sps:$4 sm:$0xff]  }
 0x845   : > { %9879 = vmatpush1.bf16.msra.mxu0 %v12978_v48  ;;  %10043 = vmatpush1.bf16.msra.mxu1 %v12981_v36  ;;  %v13056_v48 = vld [vmem:[#allocation18 + $0x780] ss:$16 sps:$4 sm:$0xff]   ;;  %v13059_v36 = vld [vmem:[#allocation18 + $0x788] ss:$16 sps:$4 sm:$0xff]  }
 0x846   : > { %9889 = vmatprep.subr.bf16.mxu0 %v12986_v30  ;;  %10053 = vmatprep.subr.bf16.mxu1 %v12989_v22  ;;  %v13064_v30 = vld [vmem:[#allocation18 + $0x7a4] ss:$16 sps:$4 sm:$0xff]   ;;  %v13067_v22 = vld [vmem:[#allocation18 + $0x7ac] ss:$16 sps:$4 sm:$0xff]  }
 0x848   : > { %9881 = vmatmul.mubr.bf16.vlgmr.msra.gmra.mrb[0].mxu0 %v8204_v59  ;;  %10045 = vmatmul.mubr.bf16.vlgmr.msra.gmra.mrb[0].mxu1 %v8204_v59  ;;  %v8171_v59 = vrot.slane %v15889_v57, %v14704_v34  ;;  %v13074_v34 = vld [vmem:[#allocation18 + $0x7e0] ss:$16 sps:$4 sm:$0xff]   ;;  %v13077_v57 = vld [vmem:[#allocation18 + $0x7e8] ss:$16 sps:$4 sm:$0xff]  }
 0x849   : > { %9890 = vmatpush1.bf16.msra.mxu0 %v12984_v6  ;;  %10054 = vmatpush1.bf16.msra.mxu1 %v12987_v31  ;;  %v13062_v6 = vld [vmem:[#allocation18 + $0x7a0] ss:$16 sps:$4 sm:$0xff]   ;;  %v13065_v31 = vld [vmem:[#allocation18 + $0x7a8] ss:$16 sps:$4 sm:$0xff]  }
 0x84a   : > { %9891 = vmatprep.subr.bf16.mxu0 %v12992_v18  ;;  %10055 = vmatprep.subr.bf16.mxu1 %v12995_v35  ;;  %v13070_v18 = vld [vmem:[#allocation18 + $0x7c4] ss:$16 sps:$4 sm:$0xff]   ;;  %v13073_v35 = vld [vmem:[#allocation18 + $0x7cc] ss:$16 sps:$4 sm:$0xff]  }
 0x84b   : > { %9921 = vmatprep.mubr.bf16.mxu0 %v8207_v13  ;;  %10085 = vmatprep.mubr.bf16.mxu1 %v8207_v13  ;;  %v8190_v13 = vadd.f32 %v8171_v59, %v8141_v38 }
 0x84d   : > { %9892 = vmatpush1.bf16.msra.mxu0 %v12990_v14  ;;  %10056 = vmatpush1.bf16.msra.mxu1 %v12993_v10  ;;  %v13068_v14 = vld [vmem:[#allocation18 + $0x7c0] ss:$16 sps:$4 sm:$0xff]   ;;  %v13071_v10 = vld [vmem:[#allocation18 + $0x7c8] ss:$16 sps:$4 sm:$0xff]   ;;  %v8198_v58 = vmax.f32 %v8190_v13, 0.0 }
 0x84e   : > { %9893 = vmatprep.subr.bf16.mxu0 %v12998_v61  ;;  %10057 = vmatprep.subr.bf16.mxu1 %v13001_v54  ;;  %v13076_v61 = vld [vmem:[#allocation18 + $0x7e4] ss:$16 sps:$4 sm:$0xff]  }
 0x84f   : > { %v8206_v54 = vpack.c.bf16 %v8198_v58, %v8198_v58 }
 0x851   : > { %9894 = vmatpush1.bf16.msra.mxu0 %v12996_v25  ;;  %10058 = vmatpush1.bf16.msra.mxu1 %v12999_v56  ;;  %v13080_v25 = vld [vmem:[#allocation24 + $0x40] sm:$0xff]  }
 0x852   : > { %9895 = vmatprep.subr.bf16.mxu0 %v13004_v12  ;;  %10059 = vmatprep.subr.bf16.mxu1 %v13007_v24  ;;  %v13081_v56 = vld [vmem:[#allocation24 + $0xc0] sm:$0xff]  }
 0x853   : > { %v13082_v12 = vld [vmem:[#allocation24] sm:$0xff]  }
 0x854   : > { %v13083_v24 = vld [vmem:[#allocation24 + $0x80] sm:$0xff]  }
 0x855   : > { %9896 = vmatpush1.bf16.msra.mxu0 %v13002_v40  ;;  %10060 = vmatpush1.bf16.msra.mxu1 %v13005_v17  ;;  %v13084_v40 = vld [vmem:[#allocation24 + $0x48] sm:$0xff]  }
 0x856   : > { %9897 = vmatprep.subr.bf16.mxu0 %v13010_v5  ;;  %10061 = vmatprep.subr.bf16.mxu1 %v13013_v20  ;;  %v13085_v17 = vld [vmem:[#allocation24 + $0xc8] sm:$0xff]  }
 0x857   : > { %v13086_v5 = vld [vmem:[#allocation24 + $0x8] sm:$0xff]  }
 0x858   : > { %v13087_v20 = vld [vmem:[#allocation24 + $0x88] sm:$0xff]  }
 0x859   : > { %9898 = vmatpush1.bf16.msra.mxu0 %v13008_v46  ;;  %10062 = vmatpush1.bf16.msra.mxu1 %v13011_v3  ;;  %v13088_v46 = vld [vmem:[#allocation24 + $0x50] sm:$0xff]  }
 0x85a   : > { %9899 = vmatprep.subr.bf16.mxu0 %v13016_v44  ;;  %10063 = vmatprep.subr.bf16.mxu1 %v13019_v15  ;;  %v13089_v3 = vld [vmem:[#allocation24 + $0xd0] sm:$0xff]  }
 0x85b   : > { %v13090_v44 = vld [vmem:[#allocation24 + $0x10] sm:$0xff]  }
 0x85c   : > { %v13091_v15 = vld [vmem:[#allocation24 + $0x90] sm:$0xff]  }
 0x85d   : > { %9900 = vmatpush1.bf16.msra.mxu0 %v13014_v53  ;;  %10064 = vmatpush1.bf16.msra.mxu1 %v13017_v29  ;;  %v13092_v53 = vld [vmem:[#allocation24 + $0x58] sm:$0xff]  }
 0x85e   : > { %9901 = vmatprep.subr.bf16.mxu0 %v13022_v27  ;;  %10065 = vmatprep.subr.bf16.mxu1 %v13025_v45  ;;  %v13093_v29 = vld [vmem:[#allocation24 + $0xd8] sm:$0xff]  }
 0x85f   : > { %v13094_v27 = vld [vmem:[#allocation24 + $0x18] sm:$0xff]  }
 0x860   : > { %v13095_v45 = vld [vmem:[#allocation24 + $0x98] sm:$0xff]  }
 0x861   : > { %9902 = vmatpush1.bf16.msra.mxu0 %v13020_v8  ;;  %10066 = vmatpush1.bf16.msra.mxu1 %v13023_v47  ;;  %v13096_v8 = vld [vmem:[#allocation24 + $0x60] sm:$0xff]  }
 0x862   : > { %9903 = vmatprep.subr.bf16.mxu0 %v13028_v21  ;;  %10067 = vmatprep.subr.bf16.mxu1 %v13031_v19  ;;  %v13097_v47 = vld [vmem:[#allocation24 + $0xe0] sm:$0xff]  }
 0x863   : > { %v13098_v21 = vld [vmem:[#allocation24 + $0x20] sm:$0xff]  }
 0x864   : > { %v13099_v19 = vld [vmem:[#allocation24 + $0xa0] sm:$0xff]  }
 0x865   : > { %9904 = vmatpush1.bf16.msra.mxu0 %v13026_v11  ;;  %10068 = vmatpush1.bf16.msra.mxu1 %v13029_v37  ;;  %v13100_v11 = vld [vmem:[#allocation24 + $0x68] sm:$0xff]  }
 0x866   : > { %9905 = vmatprep.subr.bf16.mxu0 %v13034_v52  ;;  %10069 = vmatprep.subr.bf16.mxu1 %v13037_v41  ;;  %v13101_v37 = vld [vmem:[#allocation24 + $0xe8] sm:$0xff]  }
 0x867   : > { %v13102_v52 = vld [vmem:[#allocation24 + $0x28] sm:$0xff]  }
 0x868   : > { %v13103_v41 = vld [vmem:[#allocation24 + $0xa8] sm:$0xff]  }
 0x869   : > { %9906 = vmatpush1.bf16.msra.mxu0 %v13032_v39  ;;  %10070 = vmatpush1.bf16.msra.mxu1 %v13035_v43  ;;  %v13104_v39 = vld [vmem:[#allocation24 + $0x70] sm:$0xff]  }
 0x86a   : > { %9907 = vmatprep.subr.bf16.mxu0 %v13040_v7  ;;  %10071 = vmatprep.subr.bf16.mxu1 %v13043_v49  ;;  %v13105_v43 = vld [vmem:[#allocation24 + $0xf0] sm:$0xff]  }
 0x86b   : > { %v13106_v7 = vld [vmem:[#allocation24 + $0x30] sm:$0xff]  }
 0x86c   : > { %v13107_v49 = vld [vmem:[#allocation24 + $0xb0] sm:$0xff]  }
 0x86d   : > { %9908 = vmatpush1.bf16.msra.mxu0 %v13038_v55  ;;  %10072 = vmatpush1.bf16.msra.mxu1 %v13041_v4  ;;  %v13108_v55 = vld [vmem:[#allocation24 + $0x78] sm:$0xff]  }
 0x86e   : > { %9909 = vmatprep.subr.bf16.mxu0 %v13046_v16  ;;  %10073 = vmatprep.subr.bf16.mxu1 %v13049_v26  ;;  %v13109_v4 = vld [vmem:[#allocation24 + $0xf8] sm:$0xff]  }
 0x86f   : > { %v13110_v16 = vld [vmem:[#allocation24 + $0x38] sm:$0xff]  }
 0x870   : > { %v13111_v26 = vld [vmem:[#allocation24 + $0xb8] sm:$0xff]  }
 0x871   : > { %9910 = vmatpush1.bf16.msra.mxu0 %v13044_v42  ;;  %10074 = vmatpush1.bf16.msra.mxu1 %v13047_v32  ;;  %v8464_v42 = vld [vmem:[#allocation20] sm:$0xf] }
 0x872   : > { %9911 = vmatprep.subr.bf16.mxu0 %v13052_v9  ;;  %10075 = vmatprep.subr.bf16.mxu1 %v13055_v28  ;;  %v8469_v32 = vrot.slane %v8464_v42, %v14661_v62  ;;  %v8477_v9 = vrot.slane %v8464_v42, %v14664_v63  ;;  %v8473_v28 = vrot.slane %v8464_v42, %v14671_v1 }
 0x875   : > { %9912 = vmatpush1.bf16.msra.mxu0 %v13050_v33  ;;  %10076 = vmatpush1.bf16.msra.mxu1 %v13053_v23  ;;  %v8481_v33 = vrot.slane %v8464_v42, %v14674_v2 }
 0x876   : > { %9913 = vmatprep.subr.bf16.mxu0 %v13058_v0  ;;  %10077 = vmatprep.subr.bf16.mxu1 %v13061_v50 }
 0x879   : > { %9914 = vmatpush1.bf16.msra.mxu0 %v13056_v48  ;;  %10078 = vmatpush1.bf16.msra.mxu1 %v13059_v36 }
 0x87a   : > { %9915 = vmatprep.subr.bf16.mxu0 %v13064_v30  ;;  %10079 = vmatprep.subr.bf16.mxu1 %v13067_v22 }
 0x87d   : > { %9916 = vmatpush1.bf16.msra.mxu0 %v13062_v6  ;;  %10080 = vmatpush1.bf16.msra.mxu1 %v13065_v31 }
 0x87e   : > { %9917 = vmatprep.subr.bf16.mxu0 %v13070_v18  ;;  %10081 = vmatprep.subr.bf16.mxu1 %v13073_v35 }
 0x881   : > { %9918 = vmatpush1.bf16.msra.mxu0 %v13068_v14  ;;  %10082 = vmatpush1.bf16.msra.mxu1 %v13071_v10 }
 0x882   : > { %9919 = vmatprep.subr.bf16.mxu0 %v13076_v61  ;;  %10083 = vmatprep.subr.bf16.mxu1 %v13079_v51 }
 0x885   : > { %9920 = vmatpush1.bf16.msra.mxu0 %v13074_v34  ;;  %10084 = vmatpush1.bf16.msra.mxu1 %v13077_v57 }
 0x886   : > { %12270 = vmatprep.subr.bf16.mxu0 %v13080_v25  ;;  %12292 = vmatprep.subr.bf16.mxu1 %v13081_v56 }
 0x888   : > { %9922 = vmatmul.mubr.bf16.vlgmr.msra.gmra.mrb[0].mxu0 %v8206_v54  ;;  %10086 = vmatmul.mubr.bf16.vlgmr.msra.gmra.mrb[0].mxu1 %v8206_v54 }
 0x889   : > { %12271 = vmatpush3.bf16.msra.mxu0 %v13082_v12  ;;  %12293 = vmatpush3.bf16.msra.mxu1 %v13083_v24 }
 0x88a   : > { %12272 = vmatprep.subr.bf16.mxu0 %v13084_v40  ;;  %12294 = vmatprep.subr.bf16.mxu1 %v13085_v17 }
 0x88d   : > { %12273 = vmatpush3.bf16.msra.mxu0 %v13086_v5  ;;  %12295 = vmatpush3.bf16.msra.mxu1 %v13087_v20 }
 0x88e   : > { %12274 = vmatprep.subr.bf16.mxu0 %v13088_v46  ;;  %12296 = vmatprep.subr.bf16.mxu1 %v13089_v3 }
 0x891   : > { %12275 = vmatpush3.bf16.msra.mxu0 %v13090_v44  ;;  %12297 = vmatpush3.bf16.msra.mxu1 %v13091_v15 }
 0x892   : > { %12276 = vmatprep.subr.bf16.mxu0 %v13092_v53  ;;  %12298 = vmatprep.subr.bf16.mxu1 %v13093_v29 }
 0x895   : > { %12277 = vmatpush3.bf16.msra.mxu0 %v13094_v27  ;;  %12299 = vmatpush3.bf16.msra.mxu1 %v13095_v45 }
 0x896   : > { %12278 = vmatprep.subr.bf16.mxu0 %v13096_v8  ;;  %12300 = vmatprep.subr.bf16.mxu1 %v13097_v47 }
 0x899   : > { %12279 = vmatpush3.bf16.msra.mxu0 %v13098_v21  ;;  %12301 = vmatpush3.bf16.msra.mxu1 %v13099_v19 }
 0x89a   : > { %12280 = vmatprep.subr.bf16.mxu0 %v13100_v11  ;;  %12302 = vmatprep.subr.bf16.mxu1 %v13101_v37 }
 0x89d   : > { %12281 = vmatpush3.bf16.msra.mxu0 %v13102_v52  ;;  %12303 = vmatpush3.bf16.msra.mxu1 %v13103_v41 }
 0x89e   : > { %12282 = vmatprep.subr.bf16.mxu0 %v13104_v39  ;;  %12304 = vmatprep.subr.bf16.mxu1 %v13105_v43 }
 0x8a1   : > { %12283 = vmatpush3.bf16.msra.mxu0 %v13106_v7  ;;  %12305 = vmatpush3.bf16.msra.mxu1 %v13107_v49 }
 0x8a2   : > { %12284 = vmatprep.subr.bf16.mxu0 %v13108_v55  ;;  %12306 = vmatprep.subr.bf16.mxu1 %v13109_v4 }
 0x8a5   : > { %12285 = vmatpush3.bf16.msra.mxu0 %v13110_v16  ;;  %12307 = vmatpush3.bf16.msra.mxu1 %v13111_v26 }
 0x95b   : > { %v9923_v23 = vpop.f32.mrb[0].mxu0  ;;  %v10087_v0 = vpop.f32.mrb[0].mxu1 }
 0x95c   : > { %v15924_v50 = vadd.f32 %v9923_v23, %v8469_v32  ;;  %v15926_v48 = vadd.f32 %v10087_v0, %v8477_v9  ;;  %v9925_v36 = vpop.f32.mrb[1].mxu0  ;;  %v10089_v30 = vpop.f32.mrb[1].mxu1 }
 0x95d   : > { %v15928_v22 = vadd.f32 %v9925_v36, %v8473_v28  ;;  %v15930_v38 = vadd.f32 %v10089_v30, %v8481_v33  ;;  %v9927_v59 = vpop.f32.mrb[2].mxu0  ;;  %v10091_v6 = vpop.f32.mrb[2].mxu1 }
 0x95e   : > { %v10096_v31 = vrot.slane %v15924_v50, 4  ;;  %v10108_v18 = vrot.slane %v15926_v48, 4  ;;  %v9928_v35 = vpop.f32.mrb[3].mxu0  ;;  %v10092_v13 = vpop.f32.mrb[3].mxu1 }
 0x95f   : > { %v10102_v14 = vrot.slane %v15928_v22, 4  ;;  %v10114_v10 = vrot.slane %v15930_v38, 4 }
 0x960   : > { %v10097_v61 = vadd.f32 %v15924_v50, %v10096_v31  ;;  %v10109_v51 = vadd.f32 %v15926_v48, %v10108_v18 }
 0x961   : > { %v10103_v58 = vadd.f32 %v15928_v22, %v10102_v14  ;;  %v10115_v34 = vadd.f32 %v15930_v38, %v10114_v10 }
 0x962   : > { %v10098_v57 = vrot.slane %v10097_v61, 2  ;;  %v10110_v54 = vrot.slane %v10109_v51, 2 }
 0x963   : > { %v10104_v25 = vrot.slane %v10103_v58, 2  ;;  %v10116_v56 = vrot.slane %v10115_v34, 2 }
 0x964   : > { %v10099_v12 = vadd.f32 %v10098_v57, %v10097_v61  ;;  %v10111_v24 = vadd.f32 %v10110_v54, %v10109_v51 }
 0x965   : > { %v10105_v40 = vadd.f32 %v10104_v25, %v10103_v58  ;;  %v10117_v17 = vadd.f32 %v10116_v56, %v10115_v34 }
 0x966   : > { %v10100_v5 = vrot.slane %v10099_v12, 1  ;;  %v10112_v20 = vrot.slane %v10111_v24, 1 }
 0x967   : > { %v10106_v46 = vrot.slane %v10105_v40, 1  ;;  %v10118_v3 = vrot.slane %v10117_v17, 1 }
 0x968   : > { %v10101_v44 = vadd.f32 %v10100_v5, %v10099_v12  ;;  %v10113_v15 = vadd.f32 %v10112_v20, %v10111_v24 }
 0x969   : > { %v10107_v53 = vadd.f32 %v10106_v46, %v10105_v40  ;;  %v10119_v29 = vadd.f32 %v10118_v3, %v10117_v17 }
 0x96a   : > { %v15940_v27 = vmul.f32 0.125, %v10101_v44  ;;  %v15942_v45 = vmul.f32 0.125, %v10113_v15 }
 0x96b   : > { %v15944_v8 = vmul.f32 0.125, %v10107_v53  ;;  %v10123_v47 = vmul.f32 0.125, %v10119_v29  ;;  %v10094_v53 = vld [vmem:[#allocation21] sm:$0xf] }
 0x96c   : > { %v10124_v21 = vsub.f32 %v15924_v50, %v15940_v27  ;;  %v10126_v19 = vsub.f32 %v15926_v48, %v15942_v45 }
 0x96d   : > { %v10125_v11 = vsub.f32 %v15928_v22, %v15944_v8  ;;  %v10127_v37 = vsub.f32 %v15930_v38, %v10123_v47 }
 0x96e   : > { %v10128_v52 = vmul.f32 %v10124_v21, %v10124_v21  ;;  %v10130_v41 = vmul.f32 %v10126_v19, %v10126_v19 }
 0x96f   : > { %v10129_v39 = vmul.f32 %v10125_v11, %v10125_v11  ;;  %v10131_v43 = vmul.f32 %v10127_v37, %v10127_v37 }
 0x970   : > { %v10132_v7 = vrot.slane %v10128_v52, 4  ;;  %v10144_v49 = vrot.slane %v10130_v41, 4 }
 0x971   : > { %v10138_v55 = vrot.slane %v10129_v39, 4  ;;  %v10150_v4 = vrot.slane %v10131_v43, 4 }
 0x972   : > { %v10133_v16 = vadd.f32 %v10132_v7, %v10128_v52  ;;  %v10145_v26 = vadd.f32 %v10144_v49, %v10130_v41 }
 0x973   : > { %v10139_v42 = vadd.f32 %v10138_v55, %v10129_v39  ;;  %v10151_v32 = vadd.f32 %v10150_v4, %v10131_v43 }
 0x974   : > { %v10134_v9 = vrot.slane %v10133_v16, 2  ;;  %v10146_v28 = vrot.slane %v10145_v26, 2 }
 0x975   : > { %v10140_v33 = vrot.slane %v10139_v42, 2  ;;  %v10152_v23 = vrot.slane %v10151_v32, 2 }
 0x976   : > { %v10135_v0 = vadd.f32 %v10134_v9, %v10133_v16  ;;  %v10147_v36 = vadd.f32 %v10146_v28, %v10145_v26 }
 0x977   : > { %v10141_v30 = vadd.f32 %v10140_v33, %v10139_v42  ;;  %v10153_v59 = vadd.f32 %v10152_v23, %v10151_v32 }
 0x978   : > { %v10136_v6 = vrot.slane %v10135_v0, 1  ;;  %v10148_v31 = vrot.slane %v10147_v36, 1 }
 0x979   : > { %v10142_v18 = vrot.slane %v10141_v30, 1  ;;  %v10154_v35 = vrot.slane %v10153_v59, 1 }
 0x97a   : > { %v10137_v13 = vadd.f32 %v10136_v6, %v10135_v0  ;;  %v10149_v14 = vadd.f32 %v10148_v31, %v10147_v36 }
 0x97b   : > { %v10143_v10 = vadd.f32 %v10142_v18, %v10141_v30  ;;  %v10155_v61 = vadd.f32 %v10154_v35, %v10153_v59 }
 0x97c   : > { %v10156_v51 = vmul.f32 0.125, %v10137_v13  ;;  %v10158_v58 = vmul.f32 0.125, %v10149_v14  ;;  %v13114_v13 = vld [vmem:[#allocation30 + $0x10] sm:$0xff]   ;;  %v13115_v14 = vld [vmem:[#allocation30 + $0x18] sm:$0xff]  }
 0x97d   : > { %v10157_v34 = vmul.f32 0.125, %v10143_v10  ;;  %v10159_v57 = vmul.f32 0.125, %v10155_v61  ;;  %v13116_v10 = vld [vmem:[#allocation30 + $0x20] sm:$0xff]   ;;  %v13117_v61 = vld [vmem:[#allocation30 + $0x28] sm:$0xff]  }
 0x97e   : > { %v10160_v54 = vadd.f32 1e-05, %v10156_v51  ;;  %v10162_v25 = vadd.f32 1e-05, %v10158_v58  ;;  %v13118_v51 = vld [vmem:[#allocation30 + $0x30] sm:$0xff]   ;;  %v13119_v58 = vld [vmem:[#allocation30 + $0x38] sm:$0xff]  }
 0x97f   : > { %v10161_v56 = vadd.f32 1e-05, %v10157_v34  ;;  %v10163_v12 = vadd.f32 1e-05, %v10159_v57 }
 0x980   : > { %13136 = vrsqrt.f32 %v10160_v54  ;;  %v12217_v54 = vld [vmem:[#allocation26] ss:$0 sm:$0xff] }
 0x981   : > { %13138 = vrsqrt.f32 %v10162_v25 }
 0x982   : > { %13140 = vrsqrt.f32 %v10161_v56 }
 0x983   : > { %13142 = vrsqrt.f32 %v10163_v12 }
 0x98a   : > { %v13137_v24 = vpop.eup %13136 }
 0x98b   : > { %v13139_v40 = vpop.eup %13138 }
 0x98c   : > { %v13141_v17 = vpop.eup %13140 }
 0x98d   : > { %v13143_v5 = vpop.eup %13142  ;;  %v10172_v20 = vcombine.low %v13137_v24, %v13141_v17 }
 0x98e   : > { %v10173_v46 = vcombine.low %v13139_v40, %v13143_v5 }
 0x98f   : > { %v10180_v3 = vrot.slane %v10172_v20, %v14818_v60 }
 0x990   : > { %v10187_v44 = vrot.slane %v10173_v46, %v14818_v60 }
 0x992   : > { %v10188_v15 = vcombine.low %v10180_v3, %v10187_v44 }
 0x994   : > { %v10195_v29 = vrot.slane %v10188_v15, %v14818_v60 }
 0x996   : > { %v10197_v21 = vmul.f32 %v10195_v29, %v10094_v53 }
 0x998   : > { %v10210_v19 = vrot.slane %v10197_v21, %v14664_v63  ;;  %v10214_v11 = vrot.slane %v10197_v21, %v14674_v2  ;;  %v10202_v37 = vrot.slane %v10197_v21, %v14661_v62  ;;  %v10206_v52 = vrot.slane %v10197_v21, %v14671_v1 }
 0x99a   : > { %v10221_v41 = vmul.f32 %v10210_v19, %v15942_v45  ;;  %v10222_v39 = vmul.f32 %v10214_v11, %v10123_v47  ;;  %v10219_v43 = vmul.f32 %v10202_v37, %v15940_v27  ;;  %v10220_v7 = vmul.f32 %v10206_v52, %v15944_v8  ;;  %v10095_v47 = vld [vmem:[#allocation23] sm:$0xf] }
 0x99b   : > { %v10254_v49 = vmul.f32 %v15928_v22, %v10206_v52  ;;  %v10256_v55 = vmul.f32 %v15930_v38, %v10214_v11  ;;  %v10253_v4 = vmul.f32 %v15924_v50, %v10202_v37  ;;  %v10255_v16 = vmul.f32 %v15926_v48, %v10210_v19 }
 0x99c   : > { %v10228_v26 = vcombine.low %v10221_v41, %v10222_v39  ;;  %v10227_v42 = vcombine.low %v10219_v43, %v10220_v7 }
 0x99e   : > { %v10242_v32 = vrot.slane %v10228_v26, %v14818_v60  ;;  %v10235_v9 = vrot.slane %v10227_v42, %v14818_v60  ;;  %v10633_v26 = vld [vmem:[#allocation27] sm:$0x1] }
 0x9a0   : > { %v10243_v45 = vcombine.low %v10235_v9, %v10242_v32  ;;  %v10634_v9 = vld [vmem:[#allocation29] sm:$0x1] }
 0x9a2   : > { %v10250_v27 = vrot.slane %v10243_v45, %v14818_v60 }
 0x9a4   : > { %v10252_v28 = vsub.f32 %v10095_v47, %v10250_v27 }
 0x9a6   : > { %v10265_v8 = vrot.slane %v10252_v28, %v14671_v1  ;;  %v10273_v22 = vrot.slane %v10252_v28, %v14674_v2  ;;  %v10261_v38 = vrot.slane %v10252_v28, %v14661_v62  ;;  %v10269_v50 = vrot.slane %v10252_v28, %v14664_v63  ;;  %v13112_v1 = vld [vmem:[#allocation30] sm:$0xff]   ;;  %v13113_v63 = vld [vmem:[#allocation30 + $0x8] sm:$0xff]  }
 0x9a7   : > { %v13829_v2 = vmov 0.0  }
 0x9a8   : > { %v10279_v48 = vadd.f32 %v10265_v8, %v10254_v49  ;;  %v10281_v33 = vadd.f32 %v10273_v22, %v10256_v55  ;;  %v10278_v23 = vadd.f32 %v10261_v38, %v10253_v4  ;;  %v10280_v0 = vadd.f32 %v10269_v50, %v10255_v16  ;;  %12323 = vmatprep.subr.bf16.mxu0 %v13829_v2 }
 0x9aa   : > { %v10283_v36 = vmax.f32 %v10279_v48, 0.0  ;;  %v10285_v30 = vmax.f32 %v10281_v33, 0.0  ;;  %v10282_v59 = vmax.f32 %v10278_v23, 0.0  ;;  %v10284_v6 = vmax.f32 %v10280_v0, 0.0  ;;  %v12250_v23 = vld [vmem:[#allocation32] ss:$0 sm:$0xff] }
 0x9ab   : > { %v16156_v48 = vlaneseq }
 0x9ac   : > { %v10287_v31 = vpack.c.bf16 %v10283_v36, %v10283_v36  ;;  %v10289_v18 = vpack.c.bf16 %v10285_v30, %v10285_v30  ;;  %v10286_v60 = vpack.c.bf16 %v10282_v59, %v10282_v59  ;;  %v10288_v35 = vpack.c.bf16 %v10284_v6, %v10284_v6 }
 0x9ad   : > { %v10784_v33 = vand.u32 127, %v16156_v48 }
 0x9ae   : > { %10585 = vmatprep.mubr.bf16.mxu0 %v10287_v31  ;;  %10625 = vmatprep.mubr.bf16.mxu1 %v10289_v18 }
 0x9af   : > { %10586 = vmatmul.mubr.bf16.vlgmr.msra.gmra.mrb[4].mxu0 %v10286_v60  ;;  %10626 = vmatmul.mubr.bf16.vlgmr.msra.gmra.mrb[4].mxu1 %v10288_v35  ;;  %vm10786_vm2 = vcmp.ge.s32.totalorder %v10784_v33, 2  ;;  %vm10787_vm3 = vcmp.lt.s32.totalorder %v10784_v33, 10  ;;  %vm10785_vm5 = vcmp.lt.s32.totalorder %v10784_v33, 2  ;;  %vm10789_vm6 = vcmp.ge.s32.totalorder %v10784_v33, 10 }
 0x9b0   : > { %12324 = vmatpush3.bf16.msra.mxu0 %v13112_v1  ;;  %12339 = vmatprep.mubr.msk.bf16.mxu0 %vm13830_vm1, %v13829_v2  ;;  %vm15977_vm4 = vmand %vm10786_vm2, %vm10787_vm3  ;;  %vm10790_vm7 = vcmp.lt.s32.totalorder %v10784_v33, 12 }
 0x9b1   : > { %12325 = vmatprep.subr.bf16.mxu0 %v13829_v2  ;;  %vm10791_vm8 = vmand %vm10789_vm6, %vm10790_vm7 }
 0x9b4   : > { %12326 = vmatpush3.bf16.msra.mxu0 %v13113_v63 }
 0x9b5   : > { %12327 = vmatprep.subr.bf16.mxu0 %v13829_v2 }
 0x9b8   : > { %12328 = vmatpush3.bf16.msra.mxu0 %v13114_v13 }
 0x9b9   : > { %12329 = vmatprep.subr.bf16.mxu0 %v13829_v2 }
 0x9bc   : > { %12330 = vmatpush3.bf16.msra.mxu0 %v13115_v14 }
 0x9bd   : > { %12331 = vmatprep.subr.bf16.mxu0 %v13829_v2 }
 0x9c0   : > { %12332 = vmatpush3.bf16.msra.mxu0 %v13116_v10 }
 0x9c1   : > { %12333 = vmatprep.subr.bf16.mxu0 %v13829_v2 }
 0x9c4   : > { %12334 = vmatpush3.bf16.msra.mxu0 %v13117_v61 }
 0x9c5   : > { %12335 = vmatprep.subr.bf16.mxu0 %v13829_v2 }
 0x9c8   : > { %12336 = vmatpush3.bf16.msra.mxu0 %v13118_v51 }
 0x9c9   : > { %12337 = vmatprep.subr.bf16.mxu0 %v13829_v2 }
 0x9cc   : > { %12338 = vmatpush3.bf16.msra.mxu0 %v13119_v58 }
 0xa82   : > { %v12286_v34 = vpop.f32.mrb[4].mxu0  ;;  %v12308_v57 = vpop.f32.mrb[4].mxu1 }
 0xa83   : > { %v12287_v25 = vpop.f32.mrb[5].mxu0  ;;  %v12309_v56 = vpop.f32.mrb[5].mxu1 }
 0xa84   : > { %v12288_v12 = vadd.f32 %v12287_v25, %v12286_v34  ;;  %v12310_v24 = vadd.f32 %v12309_v56, %v12308_v57  ;;  %v12289_v40 = vpop.f32.mrb[6].mxu0  ;;  %v12311_v17 = vpop.f32.mrb[6].mxu1 }
 0xa85   : > { %v12290_v5 = vpop.f32.mrb[7].mxu0  ;;  %v12312_v20 = vpop.f32.mrb[7].mxu1 }
 0xa86   : > { %v10588_v46 = vadd.f32 %v12288_v12, %v12217_v54 }
 0xa88   : > { %v10628_v3 = vadd.f32 %v12310_v24, %v10588_v46 }
 0xa8a   : > { %v10635_v44 = vrot.slane %v10628_v3, 4 }
 0xa8c   : > { %v10636_v15 = vadd.f32 %v10635_v44, %v10628_v3 }
 0xa8e   : > { %v10637_v53 = vrot.slane %v10636_v15, 2 }
 0xa90   : > { %v10638_v29 = vadd.f32 %v10637_v53, %v10636_v15 }
 0xa92   : > { %v10639_v21 = vrot.slane %v10638_v29, 1 }
 0xa94   : > { %v10640_v19 = vadd.f32 %v10639_v21, %v10638_v29 }
 0xa96   : > { %v10641_v11 = vmul.f32 0.125, %v10640_v19 }
 0xa98   : > { %v10642_v37 = vsub.f32 %v10628_v3, %v10641_v11 }
 0xa9a   : > { %v10643_v52 = vmul.f32 %v10642_v37, %v10642_v37 }
 0xa9c   : > { %v10644_v41 = vrot.slane %v10643_v52, 4 }
 0xa9e   : > { %v10645_v39 = vadd.f32 %v10644_v41, %v10643_v52 }
 0xaa0   : > { %v10646_v43 = vrot.slane %v10645_v39, 2 }
 0xaa2   : > { %v10647_v7 = vadd.f32 %v10646_v43, %v10645_v39 }
 0xaa4   : > { %v10648_v49 = vrot.slane %v10647_v7, 1 }
 0xaa6   : > { %v10649_v55 = vadd.f32 %v10648_v49, %v10647_v7 }
 0xaa8   : > { %v10650_v4 = vmul.f32 0.125, %v10649_v55 }
 0xaaa   : > { %v10651_v16 = vadd.f32 1e-05, %v10650_v4 }
 0xaac   : > { %13144 = vrsqrt.f32 %v10651_v16 }
 0xab6   : > { %v13145_v42 = vpop.eup %13144 }
 0xab7   : > { %v10653_v32 = vmul.f32 %v13145_v42, %v10633_v26 }
 0xab9   : > { %v10654_v45 = vmul.f32 %v10653_v32, %v10641_v11  ;;  %v10660_v47 = vrot.slane %v10653_v32, %v14661_v62 }
 0xabb   : > { %v10655_v27 = vsub.f32 %v10634_v9, %v10654_v45  ;;  %v10662_v28 = vmul.f32 %v10660_v47, %v10628_v3 }
 0xabd   : > { %v10667_v8 = vrot.slane %v10655_v27, %v14661_v62 }
 0xabf   : > { %v10669_v22 = vadd.f32 %v10667_v8, %v10662_v28 }
 0xac1   : > { %v10670_v38 = vmax.f32 %v10669_v22, 0.0 }
 0xac3   : > { %v10671_v50 = vpack.c.bf16 %v10670_v38, %v10670_v38 }
 0xac5   : > { %12340 = vmatmul.mubr.bf16.vlgmr.msra.gmra.mrb[8].mxu0 %v10671_v50 }
 0xb98   : > { %v10777_v0 = vpop.f32.mrb[8].mxu0 }
 0xb99   : > { %v10778_v30 = vadd.f32 %v12250_v23, %v10777_v0  ;;  %v12341_v59 = vpop.f32.mrb[9].mxu0 }
 0xb9a   : > { %v10780_v62 = vpop.f32.mrb[10].mxu0 }
 0xb9b   : > { %v12342_v6 = vpop.f32.mrb[11].mxu0  ;;  %v10795_v31 = vsel %vm15977_vm4, %v10778_v30, -1e+30  ;;  %v10792_v18 = vsel %vm10785_vm5, %v10778_v30, -1e+30 }
 0xb9c   : > { %10796 = vmax.xlane.f32.xlu0 %v10795_v31  ;;  %10793 = vmax.xlane.f32.xlu1 %v10792_v18  ;;  %v10798_v60 = vsel %vm10791_vm8, %v10778_v30, -1e+30 }
 0xba0   : > { %10799 = vmax.xlane.f32.xlu0 %v10798_v60 }
 0xc29   : > { %v10797_v35 = vpop.xlane.xlu0 %10796  ;;  %v10794_v2 = vpop.xlane.xlu1 %10793 }
 0xc2d   : > { %v10800_v1 = vpop.xlane.xlu0 %10799 }
 0xc2e   : > { %v10801_v63 = vsel %vm15977_vm4, %v10797_v35, %v10800_v1 }
 0xc2f   : > { %v10802_v13 = vsel %vm10785_vm5, %v10794_v2, %v10801_v63 }
 0xc30   : > { %v10803_v14 = vsub.f32 %v10778_v30, %v10802_v13 }
 0xc32   : > { %v10804_v10 = vmul.f32 1.442695, %v10803_v14 }
 0xc34   : > { %13146 = vpow2.f32 %v10804_v10 }
 0xc3e   : > { %v13147_v61 = vpop.eup %13146 }
 0xc3f   : > { %v10806_v51 = vsel %vm10790_vm7, %v13147_v61, 0.0 }
 0xc40   : > { %v10813_v58 = vsel %vm10791_vm8, %v10806_v51, 0.0  ;;  %v10810_v34 = vsel %vm15977_vm4, %v10806_v51, 0.0  ;;  %v10807_v57 = vsel %vm10785_vm5, %v10806_v51, 0.0 }
 0xc41   : > { %10814 = vadd.xlane.f32.xlu0 %v10813_v58  ;;  %10811 = vadd.xlane.f32.xlu1 %v10810_v34 }
 0xc45   : > { %10808 = vadd.xlane.f32.xlu1 %v10807_v57 }
 0xcce   : > { %v10812_v54 = vpop.xlane.xlu1 %10811  ;;  %v10815_v25 = vpop.xlane.xlu0 %10814 }
 0xccf   : > { %v10816_v56 = vsel %vm15977_vm4, %v10812_v54, %v10815_v25 }
 0xcd2   : > { %v10809_v12 = vpop.xlane.xlu1 %10808 }
 0xcd3   : > { %v10817_v24 = vsel %vm10785_vm5, %v10809_v12, %v10816_v56 }
 0xcd4   : > { %13148 = vrcp.f32 %v10817_v24 }
 0xcde   : > { %v13149_v40 = vpop.eup %13148 }
 0xcdf   : > { %v10819_v17 = vmul.f32 %v13149_v40, %v10806_v51 }
 0xce1   : > { %10820 = vst [vmem:[#allocation33] sm:$0xff] %v10819_v17 }
 0xce2 PF: > { %p12537_p2 = scmp.eq.s32.totalorder %s13953_s2, 1  ;;  %s13831_s16 = smov [#allocation33]  }
 0xce3   : > { %s10828_s18 = sshll.u32 %s13831_s16, 4  ;;  %s10829_s18 = int_to_ptr.vmem [resolvable:$true] %s10828_s18 }
 0xce4   : > { %s13692_s15 = scalar_lea.vmem %s10829_s18, 128  ;;  %p13699_p11 = scmp.lt.s32.totalorder %s10829_s18, %s10829_s18 }
 0xce5   : > { %p13693_p12 = scmp.ne.s32.totalorder %s10829_s18, %s13692_s15  ;;  %p13700_p5 = scmp.lt.s32.totalorder %s13692_s15, %s13692_s15 }
 0xce7   : > { %p13694_p0 = pnand %p13693_p12, %p12537_p2  ;;  %p13701_p8 = por %p13700_p5, %p13699_p11 }
 0xce9   : > { %p13695_p3 = pneg %p13694_p0 }
 0xceb   : > { %p13702_p7 = pnand %p13701_p8, %p13695_p3 }
 0xced   : > { %13705 = shalt.err (!%p13702_p7)
}
 0xcee   : > { %s16159_s9 = sld [smem:[#allocation67_spill]] }
 0xcf4   : > { %s13706_s25 = scalar_lea.hbm %s16159_s9, 128 }
 0xcf5   : > { %p13707_p13 = scmp.ne.s32.totalorder %s16159_s9, %s13706_s25  ;;  %p13712_p4 = scmp.lt.u32.totalorder %s13706_s25, %s16159_s9 }
 0xcf7   : > { %p13708_p6 = pnand %p13707_p13, %p12537_p2 }
 0xcf9   : > { %p13709_p1 = pneg %p13708_p6 }
 0xcfb   : > { %p13714_p9 = pnand %p13712_p4, %p13709_p1 }
 0xcfd   : > { %13717 = shalt.err (!%p13714_p9)
}
 0xcfe   : > { %12446 = dma.vmem_to_hbm [thread:$0]  (%p12537_p2), %s10829_s18, 128, %s16159_s9, [#allocation5]  }
 0xcff   : > { %13779 = dma.done.wait (%p12537_p2), [#allocation5], 128  }
 0xd00   : > { %13781 = vsyncadd (%p12537_p2), [#allocation5], 4294967168 }
 0xd01 PF: > { %s16160_s17 = sld [smem:[#allocation47_spill]]  ;;  %p43_p10 = scmp.ge.s32.totalorder %s14124_s28, 4  }
 0xd02   : > { %s16161_s0 = smov %s13788_s30  ;;  %s16162_s30 = smov %s13792_s20 }
 0xd03   : > { %s16164_s21 = smov %s14124_s28  ;;  %45 = sbr.rel (!%p43_p10) target bundleno = 35 (0x23), region = 246 }
 0xd07   : > { %s16163_s20 = smov %s16160_s17 }
 0xd0a   :  { %10841 = vsyncpa [#allocation4], 1 }
 0xd0b   :  { %10843 = vsyncpa [#allocation4 + $0x1], 1 }
 0xd0c   :  { %10844 = vsyncpa [#allocation7], 1 }
 0xd0d   :  { %10846 = vsyncpa [#allocation7 + $0x1], 1 }
 0xd0e   :  { %10847 = vsyncpa [#allocation10], 1 }
 0xd0f   :  { %10849 = vsyncpa [#allocation10 + $0x1], 1 }
 0xd10   :  { %10850 = vsyncpa [#allocation13], 1 }
 0xd11   :  { %10852 = vsyncpa [#allocation13 + $0x1], 1 }
 0xd12   :  { %10853 = vsyncpa [#allocation16], 1 }
 0xd13   :  { %10854 = vsyncpa [#allocation19], 1 }
 0xd14   :  { %10855 = vsyncpa [#allocation22], 1 }
 0xd15   :  { %10856 = vsyncpa [#allocation25], 1 }
 0xd16   :  { %10857 = vsyncpa [#allocation28], 1 }
 0xd17   :  { %10858 = vsyncpa [#allocation31], 1 }
 0xd18   :  { %10859 = vsyncpa [#allocation5], 1 }
 0xd19   :  { %10861 = vsyncpa [#allocation5 + $0x1], 1 }

</bundles_post_ra>
